<compile_context>
chip_gen: v5e
topology: v5e:2x2
jax: 0.10.0
libtpu: 0.0.40
codegen_flags: <defaults>
</compile_context>

<pallas_src>
import functools

import jax
import jax.numpy as jnp
from jax.experimental import pallas as pl
from jax.experimental.pallas import tpu as pltpu


# ----------------------------------------------------------------------------
# Kernel 1: tiled matmul + bias (+ optional ReLU), bf16 operands, f32 accum.
# Used for the conv-as-matmul encoder and the hoisted layer-0 input projection.
# ----------------------------------------------------------------------------
def _matmul_bias_kernel(x_ref, w_ref, b_ref, o_ref, acc_ref, *, relu):
    k = pl.program_id(2)

    @pl.when(k == 0)
    def _():
        acc_ref[...] = jnp.zeros_like(acc_ref)

    acc_ref[...] += jnp.dot(x_ref[...], w_ref[...],
                            preferred_element_type=jnp.float32)

    @pl.when(k == pl.num_programs(2) - 1)
    def _():
        r = acc_ref[...] + b_ref[...]
        if relu:
            r = jnp.maximum(r, 0.0)
        o_ref[...] = r.astype(o_ref.dtype)


def matmul_bias(x, w, b, *, relu=False, out_dtype=jnp.float32):
    """out = act(x @ w + b). x:(M,K), w:(K,N), b:(1,N). bf16 MXU, f32 accum."""
    M, K = x.shape
    Kw, N = w.shape
    assert K == Kw

    # Tile selection (cdiv + zero-pad everywhere; no divisibility asserts).
    tk = min(2048, K)
    Kp = pl.cdiv(K, tk) * tk
    tn = min(256, N)                       # N>=256 -> >=2 parallel blocks (v7x)
    Np = pl.cdiv(N, tn) * tn
    if M >= 512:
        tm = 512
    elif M >= 256:
        tm = 256
    elif M >= 128:
        tm = 128
    else:
        tm = max(16, ((M + 15) // 16) * 16)   # bf16 native (16,128) packing
    Mp = pl.cdiv(M, tm) * tm

    x = x.astype(jnp.bfloat16)
    w = w.astype(jnp.bfloat16)
    b = b.astype(jnp.float32).reshape(1, N)
    if (Mp, Kp) != (M, K):
        x = jnp.pad(x, ((0, Mp - M), (0, Kp - K)))
    if (Kp, Np) != (K, N):
        w = jnp.pad(w, ((0, Kp - K), (0, Np - N)))
    if Np != N:
        b = jnp.pad(b, ((0, 0), (0, Np - N)))

    out = pl.pallas_call(
        functools.partial(_matmul_bias_kernel, relu=relu),
        out_shape=jax.ShapeDtypeStruct((Mp, Np), out_dtype),
        grid=(Mp // tm, Np // tn, Kp // tk),
        in_specs=[
            pl.BlockSpec((tm, tk), lambda i, j, k: (i, k)),
            pl.BlockSpec((tk, tn), lambda i, j, k: (k, j)),
            pl.BlockSpec((1, tn), lambda i, j, k: (0, j)),
        ],
        out_specs=pl.BlockSpec((tm, tn), lambda i, j, k: (i, j)),
        scratch_shapes=[pltpu.VMEM((tm, tn), jnp.float32)],
        compiler_params=pltpu.CompilerParams(
            dimension_semantics=("parallel", "parallel", "arbitrary"),
            vmem_limit_bytes=32 * 1024 * 1024),
    )(x, w, b)
    if (Mp, Np) != (M, N):
        out = out[:M, :N]
    return out


# ----------------------------------------------------------------------------
# Kernel 2: LSTM recurrence with precomputed input gates (PyTorch order i,f,g,o)
# plus a fused per-timestep output projection:
#   * intermediate layers: proj = W_ih of the NEXT layer, bias = next layer's
#     b_ih + b_hh -> the kernel directly emits the next layer's gate
#     pre-activations (bf16), no separate matmul / HBM round trip of h.
#   * last layer: proj = linear_out weight (padded to 128 lanes), bias = out_b,
#     output in f32.
# Grid iterates over blocks of timesteps; h/c state lives in VMEM scratch.
# Gate pre-activations for padded hidden units are exactly 0 (zero-padded
# weights/bias), so padded h/c stay 0 and the real 32 units match an H=32 LSTM.
# ----------------------------------------------------------------------------
def _lstm_cell(g, h, c, whh):
    hp = whh.shape[0]
    gates = g + jnp.dot(h.astype(whh.dtype), whh,
                        preferred_element_type=jnp.float32)
    i = jax.nn.sigmoid(gates[:, 0 * hp:1 * hp])
    f = jax.nn.sigmoid(gates[:, 1 * hp:2 * hp])
    gg = jnp.tanh(gates[:, 2 * hp:3 * hp])
    o = jax.nn.sigmoid(gates[:, 3 * hp:4 * hp])
    c_new = f * c + i * gg
    h_new = o * jnp.tanh(c_new)
    return h_new, c_new


def _lstm_proj_kernel(g_ref, whh_ref, wproj_ref, bproj_ref, out_ref,
                      h_scr, c_scr, *, unroll):
    @pl.when(pl.program_id(0) == 0)
    def _():
        h_scr[...] = jnp.zeros_like(h_scr)
        c_scr[...] = jnp.zeros_like(c_scr)

    whh = whh_ref[...]
    wproj = wproj_ref[...]
    bproj = bproj_ref[...]

    def body(t, carry):
        h, c = carry
        h, c = _lstm_cell(g_ref[t].astype(jnp.float32), h, c, whh)
        proj = jnp.dot(h.astype(wproj.dtype), wproj,
                       preferred_element_type=jnp.float32) + bproj
        out_ref[t] = proj.astype(out_ref.dtype)
        return h, c

    h, c = jax.lax.fori_loop(0, g_ref.shape[0], body,
                             (h_scr[...], c_scr[...]), unroll=unroll)
    h_scr[...] = h
    c_scr[...] = c


def _pick_time_block(seq):
    for cand in (32, 16, 8, 4, 2, 1):
        if seq % cand == 0:
            return cand
    return 1


def lstm_proj_layer(gates_tbg, w_hh, w_proj, b_proj, *, out_dtype):
    """gates_tbg: (seq, bs, 4*Hp) precomputed x@W_ih + b for THIS layer.

    Returns (seq, bs, Nproj): per-timestep h @ w_proj + b_proj (next layer's
    gates, or the padded output-head predictions for the last layer).
    """
    seq, bs, g4 = gates_tbg.shape
    hp = w_hh.shape[0]
    n_out = w_proj.shape[1]
    t_blk = _pick_time_block(seq)
    unroll = True if t_blk <= 8 else 8     # partial unroll for long blocks
    return pl.pallas_call(
        functools.partial(_lstm_proj_kernel, unroll=unroll),
        out_shape=jax.ShapeDtypeStruct((seq, bs, n_out), out_dtype),
        grid=(seq // t_blk,),
        in_specs=[
            pl.BlockSpec((t_blk, bs, g4), lambda i: (i, 0, 0)),
            pl.BlockSpec((hp, g4), lambda i: (0, 0)),
            pl.BlockSpec((hp, n_out), lambda i: (0, 0)),
            pl.BlockSpec((1, n_out), lambda i: (0, 0)),
        ],
        out_specs=pl.BlockSpec((t_blk, bs, n_out), lambda i: (i, 0, 0)),
        scratch_shapes=[pltpu.VMEM((bs, hp), jnp.float32),
                        pltpu.VMEM((bs, hp), jnp.float32)],
        compiler_params=pltpu.CompilerParams(
            dimension_semantics=("arbitrary",)),
    )(gates_tbg, w_hh.astype(jnp.bfloat16),
      w_proj.astype(jnp.bfloat16), b_proj.astype(jnp.float32))


# ----------------------------------------------------------------------------
# Glue: im2col (layout only, bf16), parameter construction, full forward
# ----------------------------------------------------------------------------
def im2col(x_nhwc, kh, kw, stride, pad, k_pad):
    N, H, W, C = x_nhwc.shape
    xp = jnp.pad(x_nhwc, ((0, 0), (pad, pad), (pad, pad), (0, 0)))
    OH = (H + 2 * pad - kh) // stride + 1
    OW = (W + 2 * pad - kw) // stride + 1
    cols = []
    for i in range(kh):
        for j in range(kw):
            cols.append(xp[:, i:i + stride * OH:stride, j:j + stride * OW:stride, :])
    patches = jnp.stack(cols, axis=3).reshape(N * OH * OW, kh * kw * C)
    patches = jnp.pad(patches, ((0, 0), (0, k_pad - kh * kw * C)))  # lane-align K
    return patches, OH, OW


def _pad_gate_matrix(w, in_pad, h, h_pad):
    """(in_real, 4h) PyTorch gate order i,f,g,o -> (in_pad, 4*h_pad), zeros elsewhere."""
    in_real = w.shape[0]
    out = jnp.zeros((in_pad, 4 * h_pad), w.dtype)
    for g in range(4):
        out = out.at[:in_real, g * h_pad:g * h_pad + h].set(w[:, g * h:(g + 1) * h])
    return out


def _pad_gate_vec(b, h, h_pad):
    out = jnp.zeros((4 * h_pad,), b.dtype)
    for g in range(4):
        out = out.at[g * h_pad:g * h_pad + h].set(b[g * h:(g + 1) * h])
    return out.reshape(1, 4 * h_pad)


def init_params(key, *, c_in, c_out, h_img, w_img, hidden, num_layers,
                h_pad=128, out_pad=128, kh=3, kw=3, k_pad=128):
    oh, ow = h_img // 2, w_img // 2
    # Features are flattened pixel-major (oh, ow, c); for real pretrained
    # weights, W_ih rows would be permuted once on host from PyTorch's
    # channel-major (c, oh, ow) order to match.  Synthetic weights: generated
    # directly in this order.
    feat = c_out * oh * ow
    keys = jax.random.split(key, 4 + 4 * num_layers)
    p = {}

    k_real = kh * kw * c_in
    conv_w = 0.1 * jax.random.normal(keys[0], (k_real, c_out), jnp.float32)
    p["conv_w"] = jnp.zeros((k_pad, c_out), jnp.bfloat16).at[:k_real].set(
        conv_w.astype(jnp.bfloat16))
    p["conv_b"] = 0.1 * jax.random.normal(keys[1], (1, c_out), jnp.float32)

    p["lstm"] = []
    for l in range(num_layers):
        in_real = feat if l == 0 else hidden
        in_pad = feat if l == 0 else h_pad
        k0, k1, k2, k3 = keys[4 + 4 * l:8 + 4 * l]
        w_ih = 0.05 * jax.random.normal(k0, (in_real, 4 * hidden), jnp.float32)
        w_hh = 0.05 * jax.random.normal(k1, (hidden, 4 * hidden), jnp.float32)
        b_ih = 0.05 * jax.random.normal(k2, (4 * hidden,), jnp.float32)
        b_hh = 0.05 * jax.random.normal(k3, (4 * hidden,), jnp.float32)
        w_ih_p = _pad_gate_matrix(w_ih, in_pad, hidden, h_pad).astype(jnp.bfloat16)
        w_hh_p = _pad_gate_matrix(w_hh, h_pad, hidden, h_pad).astype(jnp.bfloat16)
        b_p = _pad_gate_vec(b_ih + b_hh, hidden, h_pad)          # f32, (1, 4*Hp)
        p["lstm"].append((w_ih_p, w_hh_p, b_p))

    out_w = 0.1 * jax.random.normal(keys[2], (hidden, 2), jnp.float32)
    out_b = 0.1 * jax.random.normal(keys[3], (1, 2), jnp.float32)
    p["out_w"] = jnp.zeros((h_pad, out_pad), jnp.bfloat16).at[:hidden, :2].set(
        out_w.astype(jnp.bfloat16))
    p["out_b"] = jnp.zeros((1, out_pad), jnp.float32).at[:, :2].set(out_b)
    return p


@functools.partial(jax.jit, static_argnames=("return_type",))
def cnn_lstm_forward(params, imgs, labels, return_type="preds"):
    # imgs: (bs, seq, c, h, w)  -- NCHW per frame, like the PyTorch module.
    bs, seq, c, h, w = imgs.shape

    # Single transpose: time-major frame order + NHWC, cast to bf16 once.
    # Everything downstream stays in this order (no transposes of the big
    # feature tensor, no separate f32->bf16 pass over the patches).
    x = jnp.transpose(imgs, (1, 0, 3, 4, 2)).reshape(seq * bs, h, w, c)
    x = x.astype(jnp.bfloat16)

    # Encoder: Conv2d(k=3, s=2, p=1) + ReLU via lane-dense im2col matmul.
    patches, OH, OW = im2col(x, 3, 3, 2, 1, params["conv_w"].shape[0])
    conv = matmul_bias(patches, params["conv_w"], params["conv_b"],
                       relu=True, out_dtype=jnp.bfloat16)      # (N*OH*OW, Cout)
    c_out = params["conv_w"].shape[1]
    feat = conv.reshape(seq * bs, OH * OW * c_out)             # pixel-major, free reshape

    # Stacked LSTM:
    #  * layer 0's x @ W_ih + b is one big hoisted matmul (bf16 gates out),
    #  * every layer's recurrence kernel fuses the NEXT layer's W_ih projection
    #    (or the output head for the last layer) into its per-step epilogue,
    #    so hidden states never round-trip through HBM.
    # TODO(synk): inter-layer dropout only applies in training mode; eval forward omits it.
    h_pad = params["lstm"][0][1].shape[0]
    n_layers = len(params["lstm"])

    w_ih0, _, b0 = params["lstm"][0]
    gates = matmul_bias(feat, w_ih0, b0, relu=False,
                        out_dtype=jnp.bfloat16)                # (seq*bs, 4*Hp)
    gates = gates.reshape(seq, bs, 4 * h_pad)                  # time-major, free

    preds_pad = None
    for l in range(n_layers):
        _, w_hh, _ = params["lstm"][l]
        if l < n_layers - 1:
            w_ih_next, _, b_next = params["lstm"][l + 1]
            gates = lstm_proj_layer(gates, w_hh, w_ih_next, b_next,
                                    out_dtype=jnp.bfloat16)    # next layer's gates
        else:
            preds_pad = lstm_proj_layer(gates, w_hh, params["out_w"],
                                        params["out_b"], out_dtype=jnp.float32)

    preds = jnp.transpose(preds_pad[:, :, :2], (1, 0, 2))      # (bs, seq, 2), tiny

    if return_type == "loss":
        # glue: tiny scalar reduction (MSE) in plain JAX
        return jnp.mean((preds - labels) ** 2)
    return preds


if __name__ == "__main__":
    bs, seq, c, h, w = 2, 8, 4, 16, 16
    c_out, hidden, num_layers = 128, 32, 2   # 128*8*8 = 8192-dim embedding (stand-in for 62720)

    key = jax.random.PRNGKey(0)
    k_img, k_lab, k_par = jax.random.split(key, 3)
    imgs = jax.random.normal(k_img, (bs, seq, c, h, w), jnp.float32)
    labels = jax.random.normal(k_lab, (bs, seq, 2), jnp.float32)
    params = init_params(k_par, c_in=c, c_out=c_out, h_img=h, w_img=w,
                         hidden=hidden, num_layers=num_layers)

    preds = cnn_lstm_forward(params, imgs, labels, return_type="preds")
    loss = cnn_lstm_forward(params, imgs, labels, return_type="loss")
    jax.block_until_ready((preds, loss))
    assert preds.shape == (bs, seq, 2) and loss.shape == ()
    print("KERNEL_OK")
</pallas_src>

<mosaic_0001>
module attributes {stable_mosaic.version = 11 : i64} {
  func.func @_matmul_bias_kernel(%arg0: i32, %arg1: i32, %arg2: i32, %arg3: memref<512x128xbf16, #tpu.memory_space<vmem>>, %arg4: memref<128x128xbf16, #tpu.memory_space<vmem>>, %arg5: memref<1x128xf32, #tpu.memory_space<vmem>>, %arg6: memref<512x128xbf16, #tpu.memory_space<vmem>>, %arg7: memref<512x128xf32, #tpu.memory_space<vmem>>) attributes {dimension_semantics = [#tpu.dimension_semantics<parallel>, #tpu.dimension_semantics<parallel>, #tpu.dimension_semantics<arbitrary>], iteration_bounds = array<i64: 2, 1, 1>, scalar_prefetch = 0 : i64, scratch_operands = 1 : i64, tpu.core_type = #tpu.core_type<tc>, window_params = [{transform_indices = @transform_0, window_bounds = array<i64: 512, 128>}, {transform_indices = @transform_1, window_bounds = array<i64: 128, 128>}, {transform_indices = @transform_2, window_bounds = array<i64: 1, 128>}, {transform_indices = @transform_3, window_bounds = array<i64: 512, 128>}]} {
    %c0_i32 = arith.constant 0 : i32
    %0 = arith.cmpi eq, %arg2, %c0_i32 : i32
    %1 = arith.extui %0 : i1 to i32
    %c0_i32_0 = arith.constant 0 : i32
    %2 = arith.cmpi ne, %1, %c0_i32_0 : i32
    scf.if %2 {
      %cst_10 = arith.constant 0.000000e+00 : f32
      %12 = vector.broadcast %cst_10 : f32 to vector<512x128xf32>
      %c0_11 = arith.constant 0 : index
      %c0_12 = arith.constant 0 : index
      %13 = vector.load %arg7[%c0_11, %c0_12] : memref<512x128xf32, #tpu.memory_space<vmem>>, vector<512x128xf32>
      tpu.vector_store %arg7[%c0_11, %c0_12], %12 {strides = array<i32>} : memref<512x128xf32, #tpu.memory_space<vmem>>, vector<512x128xf32>,
    } else {
    }
    %c0 = arith.constant 0 : index
    %c0_1 = arith.constant 0 : index
    %3 = vector.load %arg7[%c0, %c0_1] : memref<512x128xf32, #tpu.memory_space<vmem>>, vector<512x128xf32>
    %c0_2 = arith.constant 0 : index
    %c0_3 = arith.constant 0 : index
    %4 = vector.load %arg3[%c0_2, %c0_3] : memref<512x128xbf16, #tpu.memory_space<vmem>>, vector<512x128xbf16>
    %c0_4 = arith.constant 0 : index
    %c0_5 = arith.constant 0 : index
    %5 = vector.load %arg4[%c0_4, %c0_5] : memref<128x128xbf16, #tpu.memory_space<vmem>>, vector<128x128xbf16>
    %cst = arith.constant dense<0.000000e+00> : vector<512x128xf32>
    %6 = tpu.matmul %4, %5, %cst {dimension_numbers = #tpu.dot_dimension_numbers<[1], [0], [0], [1], [0, 0, 1, 1], [], []>} : vector<512x128xbf16>, vector<128x128xbf16>, vector<512x128xf32> -> vector<512x128xf32>
    %7 = arith.addf %3, %6 : vector<512x128xf32>
    %c0_6 = arith.constant 0 : index
    %c0_7 = arith.constant 0 : index
    %8 = vector.load %arg7[%c0_6, %c0_7] : memref<512x128xf32, #tpu.memory_space<vmem>>, vector<512x128xf32>
    tpu.vector_store %arg7[%c0_6, %c0_7], %7 {strides = array<i32>} : memref<512x128xf32, #tpu.memory_space<vmem>>, vector<512x128xf32>,
    %c0_i32_8 = arith.constant 0 : i32
    %9 = arith.cmpi eq, %arg2, %c0_i32_8 : i32
    %10 = arith.extui %9 : i1 to i32
    %c0_i32_9 = arith.constant 0 : i32
    %11 = arith.cmpi ne, %10, %c0_i32_9 : i32
    scf.if %11 {
      %c0_10 = arith.constant 0 : index
      %c0_11 = arith.constant 0 : index
      %12 = vector.load %arg7[%c0_10, %c0_11] : memref<512x128xf32, #tpu.memory_space<vmem>>, vector<512x128xf32>
      %c0_12 = arith.constant 0 : index
      %c0_13 = arith.constant 0 : index
      %13 = vector.load %arg5[%c0_12, %c0_13] : memref<1x128xf32, #tpu.memory_space<vmem>>, vector<1x128xf32>
      %14 = vector.broadcast %13 : vector<1x128xf32> to vector<512x128xf32>
      %15 = arith.addf %12, %14 : vector<512x128xf32>
      %cst_14 = arith.constant 0.000000e+00 : f32
      %16 = vector.broadcast %cst_14 : f32 to vector<512x128xf32>
      %17 = arith.maximumf %15, %16 : vector<512x128xf32>
      %18 = arith.truncf %17 : vector<512x128xf32> to vector<512x128xbf16>
      %c0_15 = arith.constant 0 : index
      %c0_16 = arith.constant 0 : index
      %19 = vector.load %arg6[%c0_15, %c0_16] : memref<512x128xbf16, #tpu.memory_space<vmem>>, vector<512x128xbf16>
      tpu.vector_store %arg6[%c0_15, %c0_16], %18 {strides = array<i32>} : memref<512x128xbf16, #tpu.memory_space<vmem>>, vector<512x128xbf16>,
    } else {
    }
    return
  }
  func.func @transform_0(%arg0: i32, %arg1: i32, %arg2: i32) -> (i32, i32) {
    %c0_i32 = arith.constant 0 : i32
    return %arg0, %arg2 : i32, i32
  }
  func.func @transform_1(%arg0: i32, %arg1: i32, %arg2: i32) -> (i32, i32) {
    %c0_i32 = arith.constant 0 : i32
    return %arg2, %arg1 : i32, i32
  }
  func.func @transform_2(%arg0: i32, %arg1: i32, %arg2: i32) -> (i32, i32) {
    %c0_i32 = arith.constant 0 : i32
    %c0_i32_0 = arith.constant 0 : i32
    return %c0_i32, %arg1 : i32, i32
  }
  func.func @transform_3(%arg0: i32, %arg1: i32, %arg2: i32) -> (i32, i32) {
    %c0_i32 = arith.constant 0 : i32
    return %arg0, %arg1 : i32, i32
  }
}

module attributes {stable_mosaic.version = 11 : i64} {
  func.func @_matmul_bias_kernel(%arg0: i32, %arg1: i32, %arg2: i32, %arg3: memref<16x2048xbf16, #tpu.memory_space<vmem>>, %arg4: memref<2048x256xbf16, #tpu.memory_space<vmem>>, %arg5: memref<1x256xf32, #tpu.memory_space<vmem>>, %arg6: memref<16x256xbf16, #tpu.memory_space<vmem>>, %arg7: memref<16x256xf32, #tpu.memory_space<vmem>>) attributes {dimension_semantics = [#tpu.dimension_semantics<parallel>, #tpu.dimension_semantics<parallel>, #tpu.dimension_semantics<arbitrary>], iteration_bounds = array<i64: 1, 2, 4>, scalar_prefetch = 0 : i64, scratch_operands = 1 : i64, tpu.core_type = #tpu.core_type<tc>, window_params = [{transform_indices = @transform_0, window_bounds = array<i64: 16, 2048>}, {transform_indices = @transform_1, window_bounds = array<i64: 2048, 256>}, {transform_indices = @transform_2, window_bounds = array<i64: 1, 256>}, {transform_indices = @transform_3, window_bounds = array<i64: 16, 256>}]} {
    %c0_i32 = arith.constant 0 : i32
    %0 = arith.cmpi eq, %arg2, %c0_i32 : i32
    %1 = arith.extui %0 : i1 to i32
    %c0_i32_0 = arith.constant 0 : i32
    %2 = arith.cmpi ne, %1, %c0_i32_0 : i32
    scf.if %2 {
      %cst_9 = arith.constant 0.000000e+00 : f32
      %12 = vector.broadcast %cst_9 : f32 to vector<16x256xf32>
      %c0_10 = arith.constant 0 : index
      %c0_11 = arith.constant 0 : index
      %13 = vector.load %arg7[%c0_10, %c0_11] : memref<16x256xf32, #tpu.memory_space<vmem>>, vector<16x256xf32>
      tpu.vector_store %arg7[%c0_10, %c0_11], %12 {strides = array<i32>} : memref<16x256xf32, #tpu.memory_space<vmem>>, vector<16x256xf32>,
    } else {
    }
    %c0 = arith.constant 0 : index
    %c0_1 = arith.constant 0 : index
    %3 = vector.load %arg7[%c0, %c0_1] : memref<16x256xf32, #tpu.memory_space<vmem>>, vector<16x256xf32>
    %c0_2 = arith.constant 0 : index
    %c0_3 = arith.constant 0 : index
    %4 = vector.load %arg3[%c0_2, %c0_3] : memref<16x2048xbf16, #tpu.memory_space<vmem>>, vector<16x2048xbf16>
    %c0_4 = arith.constant 0 : index
    %c0_5 = arith.constant 0 : index
    %5 = vector.load %arg4[%c0_4, %c0_5] : memref<2048x256xbf16, #tpu.memory_space<vmem>>, vector<2048x256xbf16>
    %cst = arith.constant dense<0.000000e+00> : vector<16x256xf32>
    %6 = tpu.matmul %4, %5, %cst {dimension_numbers = #tpu.dot_dimension_numbers<[1], [0], [0], [1], [0, 0, 1, 1], [], []>} : vector<16x2048xbf16>, vector<2048x256xbf16>, vector<16x256xf32> -> vector<16x256xf32>
    %7 = arith.addf %3, %6 : vector<16x256xf32>
    %c0_6 = arith.constant 0 : index
    %c0_7 = arith.constant 0 : index
    %8 = vector.load %arg7[%c0_6, %c0_7] : memref<16x256xf32, #tpu.memory_space<vmem>>, vector<16x256xf32>
    tpu.vector_store %arg7[%c0_6, %c0_7], %7 {strides = array<i32>} : memref<16x256xf32, #tpu.memory_space<vmem>>, vector<16x256xf32>,
    %c3_i32 = arith.constant 3 : i32
    %9 = arith.cmpi eq, %arg2, %c3_i32 : i32
    %10 = arith.extui %9 : i1 to i32
    %c0_i32_8 = arith.constant 0 : i32
    %11 = arith.cmpi ne, %10, %c0_i32_8 : i32
    scf.if %11 {
      %c0_9 = arith.constant 0 : index
      %c0_10 = arith.constant 0 : index
      %12 = vector.load %arg7[%c0_9, %c0_10] : memref<16x256xf32, #tpu.memory_space<vmem>>, vector<16x256xf32>
      %c0_11 = arith.constant 0 : index
      %c0_12 = arith.constant 0 : index
      %13 = vector.load %arg5[%c0_11, %c0_12] : memref<1x256xf32, #tpu.memory_space<vmem>>, vector<1x256xf32>
      %14 = vector.broadcast %13 : vector<1x256xf32> to vector<16x256xf32>
      %15 = arith.addf %12, %14 : vector<16x256xf32>
      %16 = arith.truncf %15 : vector<16x256xf32> to vector<16x256xbf16>
      %c0_13 = arith.constant 0 : index
      %c0_14 = arith.constant 0 : index
      %17 = vector.load %arg6[%c0_13, %c0_14] : memref<16x256xbf16, #tpu.memory_space<vmem>>, vector<16x256xbf16>
      tpu.vector_store %arg6[%c0_13, %c0_14], %16 {strides = array<i32>} : memref<16x256xbf16, #tpu.memory_space<vmem>>, vector<16x256xbf16>,
    } else {
    }
    return
  }
  func.func @transform_0(%arg0: i32, %arg1: i32, %arg2: i32) -> (i32, i32) {
    %c0_i32 = arith.constant 0 : i32
    return %arg0, %arg2 : i32, i32
  }
  func.func @transform_1(%arg0: i32, %arg1: i32, %arg2: i32) -> (i32, i32) {
    %c0_i32 = arith.constant 0 : i32
    return %arg2, %arg1 : i32, i32
  }
  func.func @transform_2(%arg0: i32, %arg1: i32, %arg2: i32) -> (i32, i32) {
    %c0_i32 = arith.constant 0 : i32
    %c0_i32_0 = arith.constant 0 : i32
    return %c0_i32, %arg1 : i32, i32
  }
  func.func @transform_3(%arg0: i32, %arg1: i32, %arg2: i32) -> (i32, i32) {
    %c0_i32 = arith.constant 0 : i32
    return %arg0, %arg1 : i32, i32
  }
}

module attributes {stable_mosaic.version = 11 : i64} {
  func.func @_lstm_proj_kernel(%arg0: i32, %arg1: memref<8x2x512xbf16, #tpu.memory_space<vmem>>, %arg2: memref<128x512xbf16, #tpu.memory_space<vmem>>, %arg3: memref<128x512xbf16, #tpu.memory_space<vmem>>, %arg4: memref<1x512xf32, #tpu.memory_space<vmem>>, %arg5: memref<8x2x512xbf16, #tpu.memory_space<vmem>>, %arg6: memref<2x128xf32, #tpu.memory_space<vmem>>, %arg7: memref<2x128xf32, #tpu.memory_space<vmem>>) attributes {dimension_semantics = [#tpu.dimension_semantics<arbitrary>], iteration_bounds = array<i64: 1>, scalar_prefetch = 0 : i64, scratch_operands = 2 : i64, tpu.core_type = #tpu.core_type<tc>, window_params = [{transform_indices = @transform_0, window_bounds = array<i64: 8, 2, 512>}, {pipeline_mode = #tpu.pipeline_mode<synchronous>, transform_indices = @transform_1, window_bounds = array<i64: 128, 512>}, {pipeline_mode = #tpu.pipeline_mode<synchronous>, transform_indices = @transform_2, window_bounds = array<i64: 128, 512>}, {pipeline_mode = #tpu.pipeline_mode<synchronous>, transform_indices = @transform_3, window_bounds = array<i64: 1, 512>}, {transform_indices = @transform_4, window_bounds = array<i64: 8, 2, 512>}]} {
    %c0_i32 = arith.constant 0 : i32
    %0 = arith.cmpi eq, %arg0, %c0_i32 : i32
    %1 = arith.extui %0 : i1 to i32
    %c0_i32_0 = arith.constant 0 : i32
    %2 = arith.cmpi ne, %1, %c0_i32_0 : i32
    scf.if %2 {
      %cst_86 = arith.constant 0.000000e+00 : f32
      %338 = vector.broadcast %cst_86 : f32 to vector<2x128xf32>
      %c0_87 = arith.constant 0 : index
      %c0_88 = arith.constant 0 : index
      %339 = vector.load %arg6[%c0_87, %c0_88] : memref<2x128xf32, #tpu.memory_space<vmem>>, vector<2x128xf32>
      tpu.vector_store %arg6[%c0_87, %c0_88], %338 {strides = array<i32>} : memref<2x128xf32, #tpu.memory_space<vmem>>, vector<2x128xf32>,
      %cst_89 = arith.constant 0.000000e+00 : f32
      %340 = vector.broadcast %cst_89 : f32 to vector<2x128xf32>
      %c0_90 = arith.constant 0 : index
      %c0_91 = arith.constant 0 : index
      %341 = vector.load %arg7[%c0_90, %c0_91] : memref<2x128xf32, #tpu.memory_space<vmem>>, vector<2x128xf32>
      tpu.vector_store %arg7[%c0_90, %c0_91], %340 {strides = array<i32>} : memref<2x128xf32, #tpu.memory_space<vmem>>, vector<2x128xf32>,
    } else {
    }
    %c0 = arith.constant 0 : index
    %c0_1 = arith.constant 0 : index
    %3 = vector.load %arg2[%c0, %c0_1] : memref<128x512xbf16, #tpu.memory_space<vmem>>, vector<128x512xbf16>
    %c0_2 = arith.constant 0 : index
    %c0_3 = arith.constant 0 : index
    %4 = vector.load %arg3[%c0_2, %c0_3] : memref<128x512xbf16, #tpu.memory_space<vmem>>, vector<128x512xbf16>
    %c0_4 = arith.constant 0 : index
    %c0_5 = arith.constant 0 : index
    %5 = vector.load %arg4[%c0_4, %c0_5] : memref<1x512xf32, #tpu.memory_space<vmem>>, vector<1x512xf32>
    %c0_6 = arith.constant 0 : index
    %c0_7 = arith.constant 0 : index
    %6 = vector.load %arg6[%c0_6, %c0_7] : memref<2x128xf32, #tpu.memory_space<vmem>>, vector<2x128xf32>
    %c0_8 = arith.constant 0 : index
    %c0_9 = arith.constant 0 : index
    %7 = vector.load %arg7[%c0_8, %c0_9] : memref<2x128xf32, #tpu.memory_space<vmem>>, vector<2x128xf32>
    %c0_i32_10 = arith.constant 0 : i32
    %8 = arith.index_cast %c0_i32_10 : i32 to index
    %c0_11 = arith.constant 0 : index
    %c0_12 = arith.constant 0 : index
    %9 = vector.load %arg1[%8, %c0_11, %c0_12] : memref<8x2x512xbf16, #tpu.memory_space<vmem>>, vector<1x2x512xbf16>
    %10 = vector.shape_cast %9 : vector<1x2x512xbf16> to vector<2x512xbf16>
    %11 = arith.extf %10 : vector<2x512xbf16> to vector<2x512xf32>
    %12 = arith.truncf %6 : vector<2x128xf32> to vector<2x128xbf16>
    %cst = arith.constant dense<0.000000e+00> : vector<2x512xf32>
    %13 = tpu.matmul %12, %3, %cst {dimension_numbers = #tpu.dot_dimension_numbers<[1], [0], [0], [1], [0, 0, 1, 1], [], []>} : vector<2x128xbf16>, vector<128x512xbf16>, vector<2x512xf32> -> vector<2x512xf32>
    %14 = arith.addf %11, %13 : vector<2x512xf32>
    %15 = vector.extract_strided_slice %14 {offsets = [0, 0], sizes = [2, 128], strides = [1, 1]} : vector<2x512xf32> to vector<2x128xf32>
    %16 = arith.negf %15 : vector<2x128xf32>
    %17 = math.exp %16 : vector<2x128xf32>
    %cst_13 = arith.constant 1.000000e+00 : f32
    %18 = vector.broadcast %cst_13 : f32 to vector<2x128xf32>
    %19 = arith.addf %18, %17 : vector<2x128xf32>
    %20 = arith.divf %18, %19 : vector<2x128xf32>
    %21 = vector.extract_strided_slice %14 {offsets = [0, 128], sizes = [2, 128], strides = [1, 1]} : vector<2x512xf32> to vector<2x128xf32>
    %22 = arith.negf %21 : vector<2x128xf32>
    %23 = math.exp %22 : vector<2x128xf32>
    %cst_14 = arith.constant 1.000000e+00 : f32
    %24 = vector.broadcast %cst_14 : f32 to vector<2x128xf32>
    %25 = arith.addf %24, %23 : vector<2x128xf32>
    %26 = arith.divf %24, %25 : vector<2x128xf32>
    %27 = vector.extract_strided_slice %14 {offsets = [0, 256], sizes = [2, 128], strides = [1, 1]} : vector<2x512xf32> to vector<2x128xf32>
    %28 = math.tanh %27 : vector<2x128xf32>
    %29 = vector.extract_strided_slice %14 {offsets = [0, 384], sizes = [2, 128], strides = [1, 1]} : vector<2x512xf32> to vector<2x128xf32>
    %30 = arith.negf %29 : vector<2x128xf32>
    %31 = math.exp %30 : vector<2x128xf32>
    %cst_15 = arith.constant 1.000000e+00 : f32
    %32 = vector.broadcast %cst_15 : f32 to vector<2x128xf32>
    %33 = arith.addf %32, %31 : vector<2x128xf32>
    %34 = arith.divf %32, %33 : vector<2x128xf32>
    %35 = arith.mulf %26, %7 : vector<2x128xf32>
    %36 = arith.mulf %20, %28 : vector<2x128xf32>
    %37 = arith.addf %35, %36 : vector<2x128xf32>
    %38 = math.tanh %37 : vector<2x128xf32>
    %39 = arith.mulf %34, %38 : vector<2x128xf32>
    %40 = arith.truncf %39 : vector<2x128xf32> to vector<2x128xbf16>
    %cst_16 = arith.constant dense<0.000000e+00> : vector<2x512xf32>
    %41 = tpu.matmul %40, %4, %cst_16 {dimension_numbers = #tpu.dot_dimension_numbers<[1], [0], [0], [1], [0, 0, 1, 1], [], []>} : vector<2x128xbf16>, vector<128x512xbf16>, vector<2x512xf32> -> vector<2x512xf32>
    %42 = vector.broadcast %5 : vector<1x512xf32> to vector<2x512xf32>
    %43 = arith.addf %41, %42 : vector<2x512xf32>
    %44 = arith.truncf %43 : vector<2x512xf32> to vector<2x512xbf16>
    %45 = arith.index_cast %c0_i32_10 : i32 to index
    %c0_17 = arith.constant 0 : index
    %c0_18 = arith.constant 0 : index
    %46 = vector.load %arg5[%45, %c0_17, %c0_18] : memref<8x2x512xbf16, #tpu.memory_space<vmem>>, vector<1x2x512xbf16>
    %47 = vector.shape_cast %46 : vector<1x2x512xbf16> to vector<2x512xbf16>
    %48 = vector.shape_cast %44 : vector<2x512xbf16> to vector<1x2x512xbf16>
    tpu.vector_store %arg5[%45, %c0_17, %c0_18], %48 {strides = array<i32>} : memref<8x2x512xbf16, #tpu.memory_space<vmem>>, vector<1x2x512xbf16>,
    %c1_i32 = arith.constant 1 : i32
    %49 = arith.index_cast %c1_i32 : i32 to index
    %c0_19 = arith.constant 0 : index
    %c0_20 = arith.constant 0 : index
    %50 = vector.load %arg1[%49, %c0_19, %c0_20] : memref<8x2x512xbf16, #tpu.memory_space<vmem>>, vector<1x2x512xbf16>
    %51 = vector.shape_cast %50 : vector<1x2x512xbf16> to vector<2x512xbf16>
    %52 = arith.extf %51 : vector<2x512xbf16> to vector<2x512xf32>
    %53 = arith.truncf %39 : vector<2x128xf32> to vector<2x128xbf16>
    %cst_21 = arith.constant dense<0.000000e+00> : vector<2x512xf32>
    %54 = tpu.matmul %53, %3, %cst_21 {dimension_numbers = #tpu.dot_dimension_numbers<[1], [0], [0], [1], [0, 0, 1, 1], [], []>} : vector<2x128xbf16>, vector<128x512xbf16>, vector<2x512xf32> -> vector<2x512xf32>
    %55 = arith.addf %52, %54 : vector<2x512xf32>
    %56 = vector.extract_strided_slice %55 {offsets = [0, 0], sizes = [2, 128], strides = [1, 1]} : vector<2x512xf32> to vector<2x128xf32>
    %57 = arith.negf %56 : vector<2x128xf32>
    %58 = math.exp %57 : vector<2x128xf32>
    %cst_22 = arith.constant 1.000000e+00 : f32
    %59 = vector.broadcast %cst_22 : f32 to vector<2x128xf32>
    %60 = arith.addf %59, %58 : vector<2x128xf32>
    %61 = arith.divf %59, %60 : vector<2x128xf32>
    %62 = vector.extract_strided_slice %55 {offsets = [0, 128], sizes = [2, 128], strides = [1, 1]} : vector<2x512xf32> to vector<2x128xf32>
    %63 = arith.negf %62 : vector<2x128xf32>
    %64 = math.exp %63 : vector<2x128xf32>
    %cst_23 = arith.constant 1.000000e+00 : f32
    %65 = vector.broadcast %cst_23 : f32 to vector<2x128xf32>
    %66 = arith.addf %65, %64 : vector<2x128xf32>
    %67 = arith.divf %65, %66 : vector<2x128xf32>
    %68 = vector.extract_strided_slice %55 {offsets = [0, 256], sizes = [2, 128], strides = [1, 1]} : vector<2x512xf32> to vector<2x128xf32>
    %69 = math.tanh %68 : vector<2x128xf32>
    %70 = vector.extract_strided_slice %55 {offsets = [0, 384], sizes = [2, 128], strides = [1, 1]} : vector<2x512xf32> to vector<2x128xf32>
    %71 = arith.negf %70 : vector<2x128xf32>
    %72 = math.exp %71 : vector<2x128xf32>
    %cst_24 = arith.constant 1.000000e+00 : f32
    %73 = vector.broadcast %cst_24 : f32 to vector<2x128xf32>
    %74 = arith.addf %73, %72 : vector<2x128xf32>
    %75 = arith.divf %73, %74 : vector<2x128xf32>
    %76 = arith.mulf %67, %37 : vector<2x128xf32>
    %77 = arith.mulf %61, %69 : vector<2x128xf32>
    %78 = arith.addf %76, %77 : vector<2x128xf32>
    %79 = math.tanh %78 : vector<2x128xf32>
    %80 = arith.mulf %75, %79 : vector<2x128xf32>
    %81 = arith.truncf %80 : vector<2x128xf32> to vector<2x128xbf16>
    %cst_25 = arith.constant dense<0.000000e+00> : vector<2x512xf32>
    %82 = tpu.matmul %81, %4, %cst_25 {dimension_numbers = #tpu.dot_dimension_numbers<[1], [0], [0], [1], [0, 0, 1, 1], [], []>} : vector<2x128xbf16>, vector<128x512xbf16>, vector<2x512xf32> -> vector<2x512xf32>
    %83 = vector.broadcast %5 : vector<1x512xf32> to vector<2x512xf32>
    %84 = arith.addf %82, %83 : vector<2x512xf32>
    %85 = arith.truncf %84 : vector<2x512xf32> to vector<2x512xbf16>
    %86 = arith.index_cast %c1_i32 : i32 to index
    %c0_26 = arith.constant 0 : index
    %c0_27 = arith.constant 0 : index
    %87 = vector.load %arg5[%86, %c0_26, %c0_27] : memref<8x2x512xbf16, #tpu.memory_space<vmem>>, vector<1x2x512xbf16>
    %88 = vector.shape_cast %87 : vector<1x2x512xbf16> to vector<2x512xbf16>
    %89 = vector.shape_cast %85 : vector<2x512xbf16> to vector<1x2x512xbf16>
    tpu.vector_store %arg5[%86, %c0_26, %c0_27], %89 {strides = array<i32>} : memref<8x2x512xbf16, #tpu.memory_space<vmem>>, vector<1x2x512xbf16>,
    %c2_i32 = arith.constant 2 : i32
    %90 = arith.index_cast %c2_i32 : i32 to index
    %c0_28 = arith.constant 0 : index
    %c0_29 = arith.constant 0 : index
    %91 = vector.load %arg1[%90, %c0_28, %c0_29] : memref<8x2x512xbf16, #tpu.memory_space<vmem>>, vector<1x2x512xbf16>
    %92 = vector.shape_cast %91 : vector<1x2x512xbf16> to vector<2x512xbf16>
    %93 = arith.extf %92 : vector<2x512xbf16> to vector<2x512xf32>
    %94 = arith.truncf %80 : vector<2x128xf32> to vector<2x128xbf16>
    %cst_30 = arith.constant dense<0.000000e+00> : vector<2x512xf32>
    %95 = tpu.matmul %94, %3, %cst_30 {dimension_numbers = #tpu.dot_dimension_numbers<[1], [0], [0], [1], [0, 0, 1, 1], [], []>} : vector<2x128xbf16>, vector<128x512xbf16>, vector<2x512xf32> -> vector<2x512xf32>
    %96 = arith.addf %93, %95 : vector<2x512xf32>
    %97 = vector.extract_strided_slice %96 {offsets = [0, 0], sizes = [2, 128], strides = [1, 1]} : vector<2x512xf32> to vector<2x128xf32>
    %98 = arith.negf %97 : vector<2x128xf32>
    %99 = math.exp %98 : vector<2x128xf32>
    %cst_31 = arith.constant 1.000000e+00 : f32
    %100 = vector.broadcast %cst_31 : f32 to vector<2x128xf32>
    %101 = arith.addf %100, %99 : vector<2x128xf32>
    %102 = arith.divf %100, %101 : vector<2x128xf32>
    %103 = vector.extract_strided_slice %96 {offsets = [0, 128], sizes = [2, 128], strides = [1, 1]} : vector<2x512xf32> to vector<2x128xf32>
    %104 = arith.negf %103 : vector<2x128xf32>
    %105 = math.exp %104 : vector<2x128xf32>
    %cst_32 = arith.constant 1.000000e+00 : f32
    %106 = vector.broadcast %cst_32 : f32 to vector<2x128xf32>
    %107 = arith.addf %106, %105 : vector<2x128xf32>
    %108 = arith.divf %106, %107 : vector<2x128xf32>
    %109 = vector.extract_strided_slice %96 {offsets = [0, 256], sizes = [2, 128], strides = [1, 1]} : vector<2x512xf32> to vector<2x128xf32>
    %110 = math.tanh %109 : vector<2x128xf32>
    %111 = vector.extract_strided_slice %96 {offsets = [0, 384], sizes = [2, 128], strides = [1, 1]} : vector<2x512xf32> to vector<2x128xf32>
    %112 = arith.negf %111 : vector<2x128xf32>
    %113 = math.exp %112 : vector<2x128xf32>
    %cst_33 = arith.constant 1.000000e+00 : f32
    %114 = vector.broadcast %cst_33 : f32 to vector<2x128xf32>
    %115 = arith.addf %114, %113 : vector<2x128xf32>
    %116 = arith.divf %114, %115 : vector<2x128xf32>
    %117 = arith.mulf %108, %78 : vector<2x128xf32>
    %118 = arith.mulf %102, %110 : vector<2x128xf32>
    %119 = arith.addf %117, %118 : vector<2x128xf32>
    %120 = math.tanh %119 : vector<2x128xf32>
    %121 = arith.mulf %116, %120 : vector<2x128xf32>
    %122 = arith.truncf %121 : vector<2x128xf32> to vector<2x128xbf16>
    %cst_34 = arith.constant dense<0.000000e+00> : vector<2x512xf32>
    %123 = tpu.matmul %122, %4, %cst_34 {dimension_numbers = #tpu.dot_dimension_numbers<[1], [0], [0], [1], [0, 0, 1, 1], [], []>} : vector<2x128xbf16>, vector<128x512xbf16>, vector<2x512xf32> -> vector<2x512xf32>
    %124 = vector.broadcast %5 : vector<1x512xf32> to vector<2x512xf32>
    %125 = arith.addf %123, %124 : vector<2x512xf32>
    %126 = arith.truncf %125 : vector<2x512xf32> to vector<2x512xbf16>
    %127 = arith.index_cast %c2_i32 : i32 to index
    %c0_35 = arith.constant 0 : index
    %c0_36 = arith.constant 0 : index
    %128 = vector.load %arg5[%127, %c0_35, %c0_36] : memref<8x2x512xbf16, #tpu.memory_space<vmem>>, vector<1x2x512xbf16>
    %129 = vector.shape_cast %128 : vector<1x2x512xbf16> to vector<2x512xbf16>
    %130 = vector.shape_cast %126 : vector<2x512xbf16> to vector<1x2x512xbf16>
    tpu.vector_store %arg5[%127, %c0_35, %c0_36], %130 {strides = array<i32>} : memref<8x2x512xbf16, #tpu.memory_space<vmem>>, vector<1x2x512xbf16>,
    %c3_i32 = arith.constant 3 : i32
    %131 = arith.index_cast %c3_i32 : i32 to index
    %c0_37 = arith.constant 0 : index
    %c0_38 = arith.constant 0 : index
    %132 = vector.load %arg1[%131, %c0_37, %c0_38] : memref<8x2x512xbf16, #tpu.memory_space<vmem>>, vector<1x2x512xbf16>
    %133 = vector.shape_cast %132 : vector<1x2x512xbf16> to vector<2x512xbf16>
    %134 = arith.extf %133 : vector<2x512xbf16> to vector<2x512xf32>
    %135 = arith.truncf %121 : vector<2x128xf32> to vector<2x128xbf16>
    %cst_39 = arith.constant dense<0.000000e+00> : vector<2x512xf32>
    %136 = tpu.matmul %135, %3, %cst_39 {dimension_numbers = #tpu.dot_dimension_numbers<[1], [0], [0], [1], [0, 0, 1, 1], [], []>} : vector<2x128xbf16>, vector<128x512xbf16>, vector<2x512xf32> -> vector<2x512xf32>
    %137 = arith.addf %134, %136 : vector<2x512xf32>
    %138 = vector.extract_strided_slice %137 {offsets = [0, 0], sizes = [2, 128], strides = [1, 1]} : vector<2x512xf32> to vector<2x128xf32>
    %139 = arith.negf %138 : vector<2x128xf32>
    %140 = math.exp %139 : vector<2x128xf32>
    %cst_40 = arith.constant 1.000000e+00 : f32
    %141 = vector.broadcast %cst_40 : f32 to vector<2x128xf32>
    %142 = arith.addf %141, %140 : vector<2x128xf32>
    %143 = arith.divf %141, %142 : vector<2x128xf32>
    %144 = vector.extract_strided_slice %137 {offsets = [0, 128], sizes = [2, 128], strides = [1, 1]} : vector<2x512xf32> to vector<2x128xf32>
    %145 = arith.negf %144 : vector<2x128xf32>
    %146 = math.exp %145 : vector<2x128xf32>
    %cst_41 = arith.constant 1.000000e+00 : f32
    %147 = vector.broadcast %cst_41 : f32 to vector<2x128xf32>
    %148 = arith.addf %147, %146 : vector<2x128xf32>
    %149 = arith.divf %147, %148 : vector<2x128xf32>
    %150 = vector.extract_strided_slice %137 {offsets = [0, 256], sizes = [2, 128], strides = [1, 1]} : vector<2x512xf32> to vector<2x128xf32>
    %151 = math.tanh %150 : vector<2x128xf32>
    %152 = vector.extract_strided_slice %137 {offsets = [0, 384], sizes = [2, 128], strides = [1, 1]} : vector<2x512xf32> to vector<2x128xf32>
    %153 = arith.negf %152 : vector<2x128xf32>
    %154 = math.exp %153 : vector<2x128xf32>
    %cst_42 = arith.constant 1.000000e+00 : f32
    %155 = vector.broadcast %cst_42 : f32 to vector<2x128xf32>
    %156 = arith.addf %155, %154 : vector<2x128xf32>
    %157 = arith.divf %155, %156 : vector<2x128xf32>
    %158 = arith.mulf %149, %119 : vector<2x128xf32>
    %159 = arith.mulf %143, %151 : vector<2x128xf32>
    %160 = arith.addf %158, %159 : vector<2x128xf32>
    %161 = math.tanh %160 : vector<2x128xf32>
    %162 = arith.mulf %157, %161 : vector<2x128xf32>
    %163 = arith.truncf %162 : vector<2x128xf32> to vector<2x128xbf16>
    %cst_43 = arith.constant dense<0.000000e+00> : vector<2x512xf32>
    %164 = tpu.matmul %163, %4, %cst_43 {dimension_numbers = #tpu.dot_dimension_numbers<[1], [0], [0], [1], [0, 0, 1, 1], [], []>} : vector<2x128xbf16>, vector<128x512xbf16>, vector<2x512xf32> -> vector<2x512xf32>
    %165 = vector.broadcast %5 : vector<1x512xf32> to vector<2x512xf32>
    %166 = arith.addf %164, %165 : vector<2x512xf32>
    %167 = arith.truncf %166 : vector<2x512xf32> to vector<2x512xbf16>
    %168 = arith.index_cast %c3_i32 : i32 to index
    %c0_44 = arith.constant 0 : index
    %c0_45 = arith.constant 0 : index
    %169 = vector.load %arg5[%168, %c0_44, %c0_45] : memref<8x2x512xbf16, #tpu.memory_space<vmem>>, vector<1x2x512xbf16>
    %170 = vector.shape_cast %169 : vector<1x2x512xbf16> to vector<2x512xbf16>
    %171 = vector.shape_cast %167 : vector<2x512xbf16> to vector<1x2x512xbf16>
    tpu.vector_store %arg5[%168, %c0_44, %c0_45], %171 {strides = array<i32>} : memref<8x2x512xbf16, #tpu.memory_space<vmem>>, vector<1x2x512xbf16>,
    %c4_i32 = arith.constant 4 : i32
    %172 = arith.index_cast %c4_i32 : i32 to index
    %c0_46 = arith.constant 0 : index
    %c0_47 = arith.constant 0 : index
    %173 = vector.load %arg1[%172, %c0_46, %c0_47] : memref<8x2x512xbf16, #tpu.memory_space<vmem>>, vector<1x2x512xbf16>
    %174 = vector.shape_cast %173 : vector<1x2x512xbf16> to vector<2x512xbf16>
    %175 = arith.extf %174 : vector<2x512xbf16> to vector<2x512xf32>
    %176 = arith.truncf %162 : vector<2x128xf32> to vector<2x128xbf16>
    %cst_48 = arith.constant dense<0.000000e+00> : vector<2x512xf32>
    %177 = tpu.matmul %176, %3, %cst_48 {dimension_numbers = #tpu.dot_dimension_numbers<[1], [0], [0], [1], [0, 0, 1, 1], [], []>} : vector<2x128xbf16>, vector<128x512xbf16>, vector<2x512xf32> -> vector<2x512xf32>
    %178 = arith.addf %175, %177 : vector<2x512xf32>
    %179 = vector.extract_strided_slice %178 {offsets = [0, 0], sizes = [2, 128], strides = [1, 1]} : vector<2x512xf32> to vector<2x128xf32>
    %180 = arith.negf %179 : vector<2x128xf32>
    %181 = math.exp %180 : vector<2x128xf32>
    %cst_49 = arith.constant 1.000000e+00 : f32
    %182 = vector.broadcast %cst_49 : f32 to vector<2x128xf32>
    %183 = arith.addf %182, %181 : vector<2x128xf32>
    %184 = arith.divf %182, %183 : vector<2x128xf32>
    %185 = vector.extract_strided_slice %178 {offsets = [0, 128], sizes = [2, 128], strides = [1, 1]} : vector<2x512xf32> to vector<2x128xf32>
    %186 = arith.negf %185 : vector<2x128xf32>
    %187 = math.exp %186 : vector<2x128xf32>
    %cst_50 = arith.constant 1.000000e+00 : f32
    %188 = vector.broadcast %cst_50 : f32 to vector<2x128xf32>
    %189 = arith.addf %188, %187 : vector<2x128xf32>
    %190 = arith.divf %188, %189 : vector<2x128xf32>
    %191 = vector.extract_strided_slice %178 {offsets = [0, 256], sizes = [2, 128], strides = [1, 1]} : vector<2x512xf32> to vector<2x128xf32>
    %192 = math.tanh %191 : vector<2x128xf32>
    %193 = vector.extract_strided_slice %178 {offsets = [0, 384], sizes = [2, 128], strides = [1, 1]} : vector<2x512xf32> to vector<2x128xf32>
    %194 = arith.negf %193 : vector<2x128xf32>
    %195 = math.exp %194 : vector<2x128xf32>
    %cst_51 = arith.constant 1.000000e+00 : f32
    %196 = vector.broadcast %cst_51 : f32 to vector<2x128xf32>
    %197 = arith.addf %196, %195 : vector<2x128xf32>
    %198 = arith.divf %196, %197 : vector<2x128xf32>
    %199 = arith.mulf %190, %160 : vector<2x128xf32>
    %200 = arith.mulf %184, %192 : vector<2x128xf32>
    %201 = arith.addf %199, %200 : vector<2x128xf32>
    %202 = math.tanh %201 : vector<2x128xf32>
    %203 = arith.mulf %198, %202 : vector<2x128xf32>
    %204 = arith.truncf %203 : vector<2x128xf32> to vector<2x128xbf16>
    %cst_52 = arith.constant dense<0.000000e+00> : vector<2x512xf32>
    %205 = tpu.matmul %204, %4, %cst_52 {dimension_numbers = #tpu.dot_dimension_numbers<[1], [0], [0], [1], [0, 0, 1, 1], [], []>} : vector<2x128xbf16>, vector<128x512xbf16>, vector<2x512xf32> -> vector<2x512xf32>
    %206 = vector.broadcast %5 : vector<1x512xf32> to vector<2x512xf32>
    %207 = arith.addf %205, %206 : vector<2x512xf32>
    %208 = arith.truncf %207 : vector<2x512xf32> to vector<2x512xbf16>
    %209 = arith.index_cast %c4_i32 : i32 to index
    %c0_53 = arith.constant 0 : index
    %c0_54 = arith.constant 0 : index
    %210 = vector.load %arg5[%209, %c0_53, %c0_54] : memref<8x2x512xbf16, #tpu.memory_space<vmem>>, vector<1x2x512xbf16>
    %211 = vector.shape_cast %210 : vector<1x2x512xbf16> to vector<2x512xbf16>
    %212 = vector.shape_cast %208 : vector<2x512xbf16> to vector<1x2x512xbf16>
    tpu.vector_store %arg5[%209, %c0_53, %c0_54], %212 {strides = array<i32>} : memref<8x2x512xbf16, #tpu.memory_space<vmem>>, vector<1x2x512xbf16>,
    %c5_i32 = arith.constant 5 : i32
    %213 = arith.index_cast %c5_i32 : i32 to index
    %c0_55 = arith.constant 0 : index
    %c0_56 = arith.constant 0 : index
    %214 = vector.load %arg1[%213, %c0_55, %c0_56] : memref<8x2x512xbf16, #tpu.memory_space<vmem>>, vector<1x2x512xbf16>
    %215 = vector.shape_cast %214 : vector<1x2x512xbf16> to vector<2x512xbf16>
    %216 = arith.extf %215 : vector<2x512xbf16> to vector<2x512xf32>
    %217 = arith.truncf %203 : vector<2x128xf32> to vector<2x128xbf16>
    %cst_57 = arith.constant dense<0.000000e+00> : vector<2x512xf32>
    %218 = tpu.matmul %217, %3, %cst_57 {dimension_numbers = #tpu.dot_dimension_numbers<[1], [0], [0], [1], [0, 0, 1, 1], [], []>} : vector<2x128xbf16>, vector<128x512xbf16>, vector<2x512xf32> -> vector<2x512xf32>
    %219 = arith.addf %216, %218 : vector<2x512xf32>
    %220 = vector.extract_strided_slice %219 {offsets = [0, 0], sizes = [2, 128], strides = [1, 1]} : vector<2x512xf32> to vector<2x128xf32>
    %221 = arith.negf %220 : vector<2x128xf32>
    %222 = math.exp %221 : vector<2x128xf32>
    %cst_58 = arith.constant 1.000000e+00 : f32
    %223 = vector.broadcast %cst_58 : f32 to vector<2x128xf32>
    %224 = arith.addf %223, %222 : vector<2x128xf32>
    %225 = arith.divf %223, %224 : vector<2x128xf32>
    %226 = vector.extract_strided_slice %219 {offsets = [0, 128], sizes = [2, 128], strides = [1, 1]} : vector<2x512xf32> to vector<2x128xf32>
    %227 = arith.negf %226 : vector<2x128xf32>
    %228 = math.exp %227 : vector<2x128xf32>
    %cst_59 = arith.constant 1.000000e+00 : f32
    %229 = vector.broadcast %cst_59 : f32 to vector<2x128xf32>
    %230 = arith.addf %229, %228 : vector<2x128xf32>
    %231 = arith.divf %229, %230 : vector<2x128xf32>
    %232 = vector.extract_strided_slice %219 {offsets = [0, 256], sizes = [2, 128], strides = [1, 1]} : vector<2x512xf32> to vector<2x128xf32>
    %233 = math.tanh %232 : vector<2x128xf32>
    %234 = vector.extract_strided_slice %219 {offsets = [0, 384], sizes = [2, 128], strides = [1, 1]} : vector<2x512xf32> to vector<2x128xf32>
    %235 = arith.negf %234 : vector<2x128xf32>
    %236 = math.exp %235 : vector<2x128xf32>
    %cst_60 = arith.constant 1.000000e+00 : f32
    %237 = vector.broadcast %cst_60 : f32 to vector<2x128xf32>
    %238 = arith.addf %237, %236 : vector<2x128xf32>
    %239 = arith.divf %237, %238 : vector<2x128xf32>
    %240 = arith.mulf %231, %201 : vector<2x128xf32>
    %241 = arith.mulf %225, %233 : vector<2x128xf32>
    %242 = arith.addf %240, %241 : vector<2x128xf32>
    %243 = math.tanh %242 : vector<2x128xf32>
    %244 = arith.mulf %239, %243 : vector<2x128xf32>
    %245 = arith.truncf %244 : vector<2x128xf32> to vector<2x128xbf16>
    %cst_61 = arith.constant dense<0.000000e+00> : vector<2x512xf32>
    %246 = tpu.matmul %245, %4, %cst_61 {dimension_numbers = #tpu.dot_dimension_numbers<[1], [0], [0], [1], [0, 0, 1, 1], [], []>} : vector<2x128xbf16>, vector<128x512xbf16>, vector<2x512xf32> -> vector<2x512xf32>
    %247 = vector.broadcast %5 : vector<1x512xf32> to vector<2x512xf32>
    %248 = arith.addf %246, %247 : vector<2x512xf32>
    %249 = arith.truncf %248 : vector<2x512xf32> to vector<2x512xbf16>
    %250 = arith.index_cast %c5_i32 : i32 to index
    %c0_62 = arith.constant 0 : index
    %c0_63 = arith.constant 0 : index
    %251 = vector.load %arg5[%250, %c0_62, %c0_63] : memref<8x2x512xbf16, #tpu.memory_space<vmem>>, vector<1x2x512xbf16>
    %252 = vector.shape_cast %251 : vector<1x2x512xbf16> to vector<2x512xbf16>
    %253 = vector.shape_cast %249 : vector<2x512xbf16> to vector<1x2x512xbf16>
    tpu.vector_store %arg5[%250, %c0_62, %c0_63], %253 {strides = array<i32>} : memref<8x2x512xbf16, #tpu.memory_space<vmem>>, vector<1x2x512xbf16>,
    %c6_i32 = arith.constant 6 : i32
    %254 = arith.index_cast %c6_i32 : i32 to index
    %c0_64 = arith.constant 0 : index
    %c0_65 = arith.constant 0 : index
    %255 = vector.load %arg1[%254, %c0_64, %c0_65] : memref<8x2x512xbf16, #tpu.memory_space<vmem>>, vector<1x2x512xbf16>
    %256 = vector.shape_cast %255 : vector<1x2x512xbf16> to vector<2x512xbf16>
    %257 = arith.extf %256 : vector<2x512xbf16> to vector<2x512xf32>
    %258 = arith.truncf %244 : vector<2x128xf32> to vector<2x128xbf16>
    %cst_66 = arith.constant dense<0.000000e+00> : vector<2x512xf32>
    %259 = tpu.matmul %258, %3, %cst_66 {dimension_numbers = #tpu.dot_dimension_numbers<[1], [0], [0], [1], [0, 0, 1, 1], [], []>} : vector<2x128xbf16>, vector<128x512xbf16>, vector<2x512xf32> -> vector<2x512xf32>
    %260 = arith.addf %257, %259 : vector<2x512xf32>
    %261 = vector.extract_strided_slice %260 {offsets = [0, 0], sizes = [2, 128], strides = [1, 1]} : vector<2x512xf32> to vector<2x128xf32>
    %262 = arith.negf %261 : vector<2x128xf32>
    %263 = math.exp %262 : vector<2x128xf32>
    %cst_67 = arith.constant 1.000000e+00 : f32
    %264 = vector.broadcast %cst_67 : f32 to vector<2x128xf32>
    %265 = arith.addf %264, %263 : vector<2x128xf32>
    %266 = arith.divf %264, %265 : vector<2x128xf32>
    %267 = vector.extract_strided_slice %260 {offsets = [0, 128], sizes = [2, 128], strides = [1, 1]} : vector<2x512xf32> to vector<2x128xf32>
    %268 = arith.negf %267 : vector<2x128xf32>
    %269 = math.exp %268 : vector<2x128xf32>
    %cst_68 = arith.constant 1.000000e+00 : f32
    %270 = vector.broadcast %cst_68 : f32 to vector<2x128xf32>
    %271 = arith.addf %270, %269 : vector<2x128xf32>
    %272 = arith.divf %270, %271 : vector<2x128xf32>
    %273 = vector.extract_strided_slice %260 {offsets = [0, 256], sizes = [2, 128], strides = [1, 1]} : vector<2x512xf32> to vector<2x128xf32>
    %274 = math.tanh %273 : vector<2x128xf32>
    %275 = vector.extract_strided_slice %260 {offsets = [0, 384], sizes = [2, 128], strides = [1, 1]} : vector<2x512xf32> to vector<2x128xf32>
    %276 = arith.negf %275 : vector<2x128xf32>
    %277 = math.exp %276 : vector<2x128xf32>
    %cst_69 = arith.constant 1.000000e+00 : f32
    %278 = vector.broadcast %cst_69 : f32 to vector<2x128xf32>
    %279 = arith.addf %278, %277 : vector<2x128xf32>
    %280 = arith.divf %278, %279 : vector<2x128xf32>
    %281 = arith.mulf %272, %242 : vector<2x128xf32>
    %282 = arith.mulf %266, %274 : vector<2x128xf32>
    %283 = arith.addf %281, %282 : vector<2x128xf32>
    %284 = math.tanh %283 : vector<2x128xf32>
    %285 = arith.mulf %280, %284 : vector<2x128xf32>
    %286 = arith.truncf %285 : vector<2x128xf32> to vector<2x128xbf16>
    %cst_70 = arith.constant dense<0.000000e+00> : vector<2x512xf32>
    %287 = tpu.matmul %286, %4, %cst_70 {dimension_numbers = #tpu.dot_dimension_numbers<[1], [0], [0], [1], [0, 0, 1, 1], [], []>} : vector<2x128xbf16>, vector<128x512xbf16>, vector<2x512xf32> -> vector<2x512xf32>
    %288 = vector.broadcast %5 : vector<1x512xf32> to vector<2x512xf32>
    %289 = arith.addf %287, %288 : vector<2x512xf32>
    %290 = arith.truncf %289 : vector<2x512xf32> to vector<2x512xbf16>
    %291 = arith.index_cast %c6_i32 : i32 to index
    %c0_71 = arith.constant 0 : index
    %c0_72 = arith.constant 0 : index
    %292 = vector.load %arg5[%291, %c0_71, %c0_72] : memref<8x2x512xbf16, #tpu.memory_space<vmem>>, vector<1x2x512xbf16>
    %293 = vector.shape_cast %292 : vector<1x2x512xbf16> to vector<2x512xbf16>
    %294 = vector.shape_cast %290 : vector<2x512xbf16> to vector<1x2x512xbf16>
    tpu.vector_store %arg5[%291, %c0_71, %c0_72], %294 {strides = array<i32>} : memref<8x2x512xbf16, #tpu.memory_space<vmem>>, vector<1x2x512xbf16>,
    %c7_i32 = arith.constant 7 : i32
    %295 = arith.index_cast %c7_i32 : i32 to index
    %c0_73 = arith.constant 0 : index
    %c0_74 = arith.constant 0 : index
    %296 = vector.load %arg1[%295, %c0_73, %c0_74] : memref<8x2x512xbf16, #tpu.memory_space<vmem>>, vector<1x2x512xbf16>
    %297 = vector.shape_cast %296 : vector<1x2x512xbf16> to vector<2x512xbf16>
    %298 = arith.extf %297 : vector<2x512xbf16> to vector<2x512xf32>
    %299 = arith.truncf %285 : vector<2x128xf32> to vector<2x128xbf16>
    %cst_75 = arith.constant dense<0.000000e+00> : vector<2x512xf32>
    %300 = tpu.matmul %299, %3, %cst_75 {dimension_numbers = #tpu.dot_dimension_numbers<[1], [0], [0], [1], [0, 0, 1, 1], [], []>} : vector<2x128xbf16>, vector<128x512xbf16>, vector<2x512xf32> -> vector<2x512xf32>
    %301 = arith.addf %298, %300 : vector<2x512xf32>
    %302 = vector.extract_strided_slice %301 {offsets = [0, 0], sizes = [2, 128], strides = [1, 1]} : vector<2x512xf32> to vector<2x128xf32>
    %303 = arith.negf %302 : vector<2x128xf32>
    %304 = math.exp %303 : vector<2x128xf32>
    %cst_76 = arith.constant 1.000000e+00 : f32
    %305 = vector.broadcast %cst_76 : f32 to vector<2x128xf32>
    %306 = arith.addf %305, %304 : vector<2x128xf32>
    %307 = arith.divf %305, %306 : vector<2x128xf32>
    %308 = vector.extract_strided_slice %301 {offsets = [0, 128], sizes = [2, 128], strides = [1, 1]} : vector<2x512xf32> to vector<2x128xf32>
    %309 = arith.negf %308 : vector<2x128xf32>
    %310 = math.exp %309 : vector<2x128xf32>
    %cst_77 = arith.constant 1.000000e+00 : f32
    %311 = vector.broadcast %cst_77 : f32 to vector<2x128xf32>
    %312 = arith.addf %311, %310 : vector<2x128xf32>
    %313 = arith.divf %311, %312 : vector<2x128xf32>
    %314 = vector.extract_strided_slice %301 {offsets = [0, 256], sizes = [2, 128], strides = [1, 1]} : vector<2x512xf32> to vector<2x128xf32>
    %315 = math.tanh %314 : vector<2x128xf32>
    %316 = vector.extract_strided_slice %301 {offsets = [0, 384], sizes = [2, 128], strides = [1, 1]} : vector<2x512xf32> to vector<2x128xf32>
    %317 = arith.negf %316 : vector<2x128xf32>
    %318 = math.exp %317 : vector<2x128xf32>
    %cst_78 = arith.constant 1.000000e+00 : f32
    %319 = vector.broadcast %cst_78 : f32 to vector<2x128xf32>
    %320 = arith.addf %319, %318 : vector<2x128xf32>
    %321 = arith.divf %319, %320 : vector<2x128xf32>
    %322 = arith.mulf %313, %283 : vector<2x128xf32>
    %323 = arith.mulf %307, %315 : vector<2x128xf32>
    %324 = arith.addf %322, %323 : vector<2x128xf32>
    %325 = math.tanh %324 : vector<2x128xf32>
    %326 = arith.mulf %321, %325 : vector<2x128xf32>
    %327 = arith.truncf %326 : vector<2x128xf32> to vector<2x128xbf16>
    %cst_79 = arith.constant dense<0.000000e+00> : vector<2x512xf32>
    %328 = tpu.matmul %327, %4, %cst_79 {dimension_numbers = #tpu.dot_dimension_numbers<[1], [0], [0], [1], [0, 0, 1, 1], [], []>} : vector<2x128xbf16>, vector<128x512xbf16>, vector<2x512xf32> -> vector<2x512xf32>
    %329 = vector.broadcast %5 : vector<1x512xf32> to vector<2x512xf32>
    %330 = arith.addf %328, %329 : vector<2x512xf32>
    %331 = arith.truncf %330 : vector<2x512xf32> to vector<2x512xbf16>
    %332 = arith.index_cast %c7_i32 : i32 to index
    %c0_80 = arith.constant 0 : index
    %c0_81 = arith.constant 0 : index
    %333 = vector.load %arg5[%332, %c0_80, %c0_81] : memref<8x2x512xbf16, #tpu.memory_space<vmem>>, vector<1x2x512xbf16>
    %334 = vector.shape_cast %333 : vector<1x2x512xbf16> to vector<2x512xbf16>
    %335 = vector.shape_cast %331 : vector<2x512xbf16> to vector<1x2x512xbf16>
    tpu.vector_store %arg5[%332, %c0_80, %c0_81], %335 {strides = array<i32>} : memref<8x2x512xbf16, #tpu.memory_space<vmem>>, vector<1x2x512xbf16>,
    %c8_i32 = arith.constant 8 : i32
    %c0_82 = arith.constant 0 : index
    %c0_83 = arith.constant 0 : index
    %336 = vector.load %arg6[%c0_82, %c0_83] : memref<2x128xf32, #tpu.memory_space<vmem>>, vector<2x128xf32>
    tpu.vector_store %arg6[%c0_82, %c0_83], %326 {strides = array<i32>} : memref<2x128xf32, #tpu.memory_space<vmem>>, vector<2x128xf32>,
    %c0_84 = arith.constant 0 : index
    %c0_85 = arith.constant 0 : index
    %337 = vector.load %arg7[%c0_84, %c0_85] : memref<2x128xf32, #tpu.memory_space<vmem>>, vector<2x128xf32>
    tpu.vector_store %arg7[%c0_84, %c0_85], %324 {strides = array<i32>} : memref<2x128xf32, #tpu.memory_space<vmem>>, vector<2x128xf32>,
    return
  }
  func.func @transform_0(%arg0: i32) -> (i32, i32, i32) {
    %c0_i32 = arith.constant 0 : i32
    %c0_i32_0 = arith.constant 0 : i32
    %c0_i32_1 = arith.constant 0 : i32
    return %arg0, %c0_i32, %c0_i32_0 : i32, i32, i32
  }
  func.func @transform_1(%arg0: i32) -> (i32, i32) {
    %c0_i32 = arith.constant 0 : i32
    %c0_i32_0 = arith.constant 0 : i32
    %c0_i32_1 = arith.constant 0 : i32
    return %c0_i32, %c0_i32_0 : i32, i32
  }
  func.func @transform_2(%arg0: i32) -> (i32, i32) {
    %c0_i32 = arith.constant 0 : i32
    %c0_i32_0 = arith.constant 0 : i32
    %c0_i32_1 = arith.constant 0 : i32
    return %c0_i32, %c0_i32_0 : i32, i32
  }
  func.func @transform_3(%arg0: i32) -> (i32, i32) {
    %c0_i32 = arith.constant 0 : i32
    %c0_i32_0 = arith.constant 0 : i32
    %c0_i32_1 = arith.constant 0 : i32
    return %c0_i32, %c0_i32_0 : i32, i32
  }
  func.func @transform_4(%arg0: i32) -> (i32, i32, i32) {
    %c0_i32 = arith.constant 0 : i32
    %c0_i32_0 = arith.constant 0 : i32
    %c0_i32_1 = arith.constant 0 : i32
    return %arg0, %c0_i32, %c0_i32_0 : i32, i32, i32
  }
}

module attributes {stable_mosaic.version = 11 : i64} {
  func.func @_lstm_proj_kernel(%arg0: i32, %arg1: memref<8x2x512xbf16, #tpu.memory_space<vmem>>, %arg2: memref<128x512xbf16, #tpu.memory_space<vmem>>, %arg3: memref<128x128xbf16, #tpu.memory_space<vmem>>, %arg4: memref<1x128xf32, #tpu.memory_space<vmem>>, %arg5: memref<8x2x128xf32, #tpu.memory_space<vmem>>, %arg6: memref<2x128xf32, #tpu.memory_space<vmem>>, %arg7: memref<2x128xf32, #tpu.memory_space<vmem>>) attributes {dimension_semantics = [#tpu.dimension_semantics<arbitrary>], iteration_bounds = array<i64: 1>, scalar_prefetch = 0 : i64, scratch_operands = 2 : i64, tpu.core_type = #tpu.core_type<tc>, window_params = [{transform_indices = @transform_0, window_bounds = array<i64: 8, 2, 512>}, {pipeline_mode = #tpu.pipeline_mode<synchronous>, transform_indices = @transform_1, window_bounds = array<i64: 128, 512>}, {pipeline_mode = #tpu.pipeline_mode<synchronous>, transform_indices = @transform_2, window_bounds = array<i64: 128, 128>}, {pipeline_mode = #tpu.pipeline_mode<synchronous>, transform_indices = @transform_3, window_bounds = array<i64: 1, 128>}, {transform_indices = @transform_4, window_bounds = array<i64: 8, 2, 128>}]} {
    %c0_i32 = arith.constant 0 : i32
    %0 = arith.cmpi eq, %arg0, %c0_i32 : i32
    %1 = arith.extui %0 : i1 to i32
    %c0_i32_0 = arith.constant 0 : i32
    %2 = arith.cmpi ne, %1, %c0_i32_0 : i32
    scf.if %2 {
      %cst_86 = arith.constant 0.000000e+00 : f32
      %330 = vector.broadcast %cst_86 : f32 to vector<2x128xf32>
      %c0_87 = arith.constant 0 : index
      %c0_88 = arith.constant 0 : index
      %331 = vector.load %arg6[%c0_87, %c0_88] : memref<2x128xf32, #tpu.memory_space<vmem>>, vector<2x128xf32>
      tpu.vector_store %arg6[%c0_87, %c0_88], %330 {strides = array<i32>} : memref<2x128xf32, #tpu.memory_space<vmem>>, vector<2x128xf32>,
      %cst_89 = arith.constant 0.000000e+00 : f32
      %332 = vector.broadcast %cst_89 : f32 to vector<2x128xf32>
      %c0_90 = arith.constant 0 : index
      %c0_91 = arith.constant 0 : index
      %333 = vector.load %arg7[%c0_90, %c0_91] : memref<2x128xf32, #tpu.memory_space<vmem>>, vector<2x128xf32>
      tpu.vector_store %arg7[%c0_90, %c0_91], %332 {strides = array<i32>} : memref<2x128xf32, #tpu.memory_space<vmem>>, vector<2x128xf32>,
    } else {
    }
    %c0 = arith.constant 0 : index
    %c0_1 = arith.constant 0 : index
    %3 = vector.load %arg2[%c0, %c0_1] : memref<128x512xbf16, #tpu.memory_space<vmem>>, vector<128x512xbf16>
    %c0_2 = arith.constant 0 : index
    %c0_3 = arith.constant 0 : index
    %4 = vector.load %arg3[%c0_2, %c0_3] : memref<128x128xbf16, #tpu.memory_space<vmem>>, vector<128x128xbf16>
    %c0_4 = arith.constant 0 : index
    %c0_5 = arith.constant 0 : index
    %5 = vector.load %arg4[%c0_4, %c0_5] : memref<1x128xf32, #tpu.memory_space<vmem>>, vector<1x128xf32>
    %c0_6 = arith.constant 0 : index
    %c0_7 = arith.constant 0 : index
    %6 = vector.load %arg6[%c0_6, %c0_7] : memref<2x128xf32, #tpu.memory_space<vmem>>, vector<2x128xf32>
    %c0_8 = arith.constant 0 : index
    %c0_9 = arith.constant 0 : index
    %7 = vector.load %arg7[%c0_8, %c0_9] : memref<2x128xf32, #tpu.memory_space<vmem>>, vector<2x128xf32>
    %c0_i32_10 = arith.constant 0 : i32
    %8 = arith.index_cast %c0_i32_10 : i32 to index
    %c0_11 = arith.constant 0 : index
    %c0_12 = arith.constant 0 : index
    %9 = vector.load %arg1[%8, %c0_11, %c0_12] : memref<8x2x512xbf16, #tpu.memory_space<vmem>>, vector<1x2x512xbf16>
    %10 = vector.shape_cast %9 : vector<1x2x512xbf16> to vector<2x512xbf16>
    %11 = arith.extf %10 : vector<2x512xbf16> to vector<2x512xf32>
    %12 = arith.truncf %6 : vector<2x128xf32> to vector<2x128xbf16>
    %cst = arith.constant dense<0.000000e+00> : vector<2x512xf32>
    %13 = tpu.matmul %12, %3, %cst {dimension_numbers = #tpu.dot_dimension_numbers<[1], [0], [0], [1], [0, 0, 1, 1], [], []>} : vector<2x128xbf16>, vector<128x512xbf16>, vector<2x512xf32> -> vector<2x512xf32>
    %14 = arith.addf %11, %13 : vector<2x512xf32>
    %15 = vector.extract_strided_slice %14 {offsets = [0, 0], sizes = [2, 128], strides = [1, 1]} : vector<2x512xf32> to vector<2x128xf32>
    %16 = arith.negf %15 : vector<2x128xf32>
    %17 = math.exp %16 : vector<2x128xf32>
    %cst_13 = arith.constant 1.000000e+00 : f32
    %18 = vector.broadcast %cst_13 : f32 to vector<2x128xf32>
    %19 = arith.addf %18, %17 : vector<2x128xf32>
    %20 = arith.divf %18, %19 : vector<2x128xf32>
    %21 = vector.extract_strided_slice %14 {offsets = [0, 128], sizes = [2, 128], strides = [1, 1]} : vector<2x512xf32> to vector<2x128xf32>
    %22 = arith.negf %21 : vector<2x128xf32>
    %23 = math.exp %22 : vector<2x128xf32>
    %cst_14 = arith.constant 1.000000e+00 : f32
    %24 = vector.broadcast %cst_14 : f32 to vector<2x128xf32>
    %25 = arith.addf %24, %23 : vector<2x128xf32>
    %26 = arith.divf %24, %25 : vector<2x128xf32>
    %27 = vector.extract_strided_slice %14 {offsets = [0, 256], sizes = [2, 128], strides = [1, 1]} : vector<2x512xf32> to vector<2x128xf32>
    %28 = math.tanh %27 : vector<2x128xf32>
    %29 = vector.extract_strided_slice %14 {offsets = [0, 384], sizes = [2, 128], strides = [1, 1]} : vector<2x512xf32> to vector<2x128xf32>
    %30 = arith.negf %29 : vector<2x128xf32>
    %31 = math.exp %30 : vector<2x128xf32>
    %cst_15 = arith.constant 1.000000e+00 : f32
    %32 = vector.broadcast %cst_15 : f32 to vector<2x128xf32>
    %33 = arith.addf %32, %31 : vector<2x128xf32>
    %34 = arith.divf %32, %33 : vector<2x128xf32>
    %35 = arith.mulf %26, %7 : vector<2x128xf32>
    %36 = arith.mulf %20, %28 : vector<2x128xf32>
    %37 = arith.addf %35, %36 : vector<2x128xf32>
    %38 = math.tanh %37 : vector<2x128xf32>
    %39 = arith.mulf %34, %38 : vector<2x128xf32>
    %40 = arith.truncf %39 : vector<2x128xf32> to vector<2x128xbf16>
    %cst_16 = arith.constant dense<0.000000e+00> : vector<2x128xf32>
    %41 = tpu.matmul %40, %4, %cst_16 {dimension_numbers = #tpu.dot_dimension_numbers<[1], [0], [0], [1], [0, 0, 1, 1], [], []>} : vector<2x128xbf16>, vector<128x128xbf16>, vector<2x128xf32> -> vector<2x128xf32>
    %42 = vector.broadcast %5 : vector<1x128xf32> to vector<2x128xf32>
    %43 = arith.addf %41, %42 : vector<2x128xf32>
    %44 = arith.index_cast %c0_i32_10 : i32 to index
    %c0_17 = arith.constant 0 : index
    %c0_18 = arith.constant 0 : index
    %45 = vector.load %arg5[%44, %c0_17, %c0_18] : memref<8x2x128xf32, #tpu.memory_space<vmem>>, vector<1x2x128xf32>
    %46 = vector.shape_cast %45 : vector<1x2x128xf32> to vector<2x128xf32>
    %47 = vector.shape_cast %43 : vector<2x128xf32> to vector<1x2x128xf32>
    tpu.vector_store %arg5[%44, %c0_17, %c0_18], %47 {strides = array<i32>} : memref<8x2x128xf32, #tpu.memory_space<vmem>>, vector<1x2x128xf32>,
    %c1_i32 = arith.constant 1 : i32
    %48 = arith.index_cast %c1_i32 : i32 to index
    %c0_19 = arith.constant 0 : index
    %c0_20 = arith.constant 0 : index
    %49 = vector.load %arg1[%48, %c0_19, %c0_20] : memref<8x2x512xbf16, #tpu.memory_space<vmem>>, vector<1x2x512xbf16>
    %50 = vector.shape_cast %49 : vector<1x2x512xbf16> to vector<2x512xbf16>
    %51 = arith.extf %50 : vector<2x512xbf16> to vector<2x512xf32>
    %52 = arith.truncf %39 : vector<2x128xf32> to vector<2x128xbf16>
    %cst_21 = arith.constant dense<0.000000e+00> : vector<2x512xf32>
    %53 = tpu.matmul %52, %3, %cst_21 {dimension_numbers = #tpu.dot_dimension_numbers<[1], [0], [0], [1], [0, 0, 1, 1], [], []>} : vector<2x128xbf16>, vector<128x512xbf16>, vector<2x512xf32> -> vector<2x512xf32>
    %54 = arith.addf %51, %53 : vector<2x512xf32>
    %55 = vector.extract_strided_slice %54 {offsets = [0, 0], sizes = [2, 128], strides = [1, 1]} : vector<2x512xf32> to vector<2x128xf32>
    %56 = arith.negf %55 : vector<2x128xf32>
    %57 = math.exp %56 : vector<2x128xf32>
    %cst_22 = arith.constant 1.000000e+00 : f32
    %58 = vector.broadcast %cst_22 : f32 to vector<2x128xf32>
    %59 = arith.addf %58, %57 : vector<2x128xf32>
    %60 = arith.divf %58, %59 : vector<2x128xf32>
    %61 = vector.extract_strided_slice %54 {offsets = [0, 128], sizes = [2, 128], strides = [1, 1]} : vector<2x512xf32> to vector<2x128xf32>
    %62 = arith.negf %61 : vector<2x128xf32>
    %63 = math.exp %62 : vector<2x128xf32>
    %cst_23 = arith.constant 1.000000e+00 : f32
    %64 = vector.broadcast %cst_23 : f32 to vector<2x128xf32>
    %65 = arith.addf %64, %63 : vector<2x128xf32>
    %66 = arith.divf %64, %65 : vector<2x128xf32>
    %67 = vector.extract_strided_slice %54 {offsets = [0, 256], sizes = [2, 128], strides = [1, 1]} : vector<2x512xf32> to vector<2x128xf32>
    %68 = math.tanh %67 : vector<2x128xf32>
    %69 = vector.extract_strided_slice %54 {offsets = [0, 384], sizes = [2, 128], strides = [1, 1]} : vector<2x512xf32> to vector<2x128xf32>
    %70 = arith.negf %69 : vector<2x128xf32>
    %71 = math.exp %70 : vector<2x128xf32>
    %cst_24 = arith.constant 1.000000e+00 : f32
    %72 = vector.broadcast %cst_24 : f32 to vector<2x128xf32>
    %73 = arith.addf %72, %71 : vector<2x128xf32>
    %74 = arith.divf %72, %73 : vector<2x128xf32>
    %75 = arith.mulf %66, %37 : vector<2x128xf32>
    %76 = arith.mulf %60, %68 : vector<2x128xf32>
    %77 = arith.addf %75, %76 : vector<2x128xf32>
    %78 = math.tanh %77 : vector<2x128xf32>
    %79 = arith.mulf %74, %78 : vector<2x128xf32>
    %80 = arith.truncf %79 : vector<2x128xf32> to vector<2x128xbf16>
    %cst_25 = arith.constant dense<0.000000e+00> : vector<2x128xf32>
    %81 = tpu.matmul %80, %4, %cst_25 {dimension_numbers = #tpu.dot_dimension_numbers<[1], [0], [0], [1], [0, 0, 1, 1], [], []>} : vector<2x128xbf16>, vector<128x128xbf16>, vector<2x128xf32> -> vector<2x128xf32>
    %82 = vector.broadcast %5 : vector<1x128xf32> to vector<2x128xf32>
    %83 = arith.addf %81, %82 : vector<2x128xf32>
    %84 = arith.index_cast %c1_i32 : i32 to index
    %c0_26 = arith.constant 0 : index
    %c0_27 = arith.constant 0 : index
    %85 = vector.load %arg5[%84, %c0_26, %c0_27] : memref<8x2x128xf32, #tpu.memory_space<vmem>>, vector<1x2x128xf32>
    %86 = vector.shape_cast %85 : vector<1x2x128xf32> to vector<2x128xf32>
    %87 = vector.shape_cast %83 : vector<2x128xf32> to vector<1x2x128xf32>
    tpu.vector_store %arg5[%84, %c0_26, %c0_27], %87 {strides = array<i32>} : memref<8x2x128xf32, #tpu.memory_space<vmem>>, vector<1x2x128xf32>,
    %c2_i32 = arith.constant 2 : i32
    %88 = arith.index_cast %c2_i32 : i32 to index
    %c0_28 = arith.constant 0 : index
    %c0_29 = arith.constant 0 : index
    %89 = vector.load %arg1[%88, %c0_28, %c0_29] : memref<8x2x512xbf16, #tpu.memory_space<vmem>>, vector<1x2x512xbf16>
    %90 = vector.shape_cast %89 : vector<1x2x512xbf16> to vector<2x512xbf16>
    %91 = arith.extf %90 : vector<2x512xbf16> to vector<2x512xf32>
    %92 = arith.truncf %79 : vector<2x128xf32> to vector<2x128xbf16>
    %cst_30 = arith.constant dense<0.000000e+00> : vector<2x512xf32>
    %93 = tpu.matmul %92, %3, %cst_30 {dimension_numbers = #tpu.dot_dimension_numbers<[1], [0], [0], [1], [0, 0, 1, 1], [], []>} : vector<2x128xbf16>, vector<128x512xbf16>, vector<2x512xf32> -> vector<2x512xf32>
    %94 = arith.addf %91, %93 : vector<2x512xf32>
    %95 = vector.extract_strided_slice %94 {offsets = [0, 0], sizes = [2, 128], strides = [1, 1]} : vector<2x512xf32> to vector<2x128xf32>
    %96 = arith.negf %95 : vector<2x128xf32>
    %97 = math.exp %96 : vector<2x128xf32>
    %cst_31 = arith.constant 1.000000e+00 : f32
    %98 = vector.broadcast %cst_31 : f32 to vector<2x128xf32>
    %99 = arith.addf %98, %97 : vector<2x128xf32>
    %100 = arith.divf %98, %99 : vector<2x128xf32>
    %101 = vector.extract_strided_slice %94 {offsets = [0, 128], sizes = [2, 128], strides = [1, 1]} : vector<2x512xf32> to vector<2x128xf32>
    %102 = arith.negf %101 : vector<2x128xf32>
    %103 = math.exp %102 : vector<2x128xf32>
    %cst_32 = arith.constant 1.000000e+00 : f32
    %104 = vector.broadcast %cst_32 : f32 to vector<2x128xf32>
    %105 = arith.addf %104, %103 : vector<2x128xf32>
    %106 = arith.divf %104, %105 : vector<2x128xf32>
    %107 = vector.extract_strided_slice %94 {offsets = [0, 256], sizes = [2, 128], strides = [1, 1]} : vector<2x512xf32> to vector<2x128xf32>
    %108 = math.tanh %107 : vector<2x128xf32>
    %109 = vector.extract_strided_slice %94 {offsets = [0, 384], sizes = [2, 128], strides = [1, 1]} : vector<2x512xf32> to vector<2x128xf32>
    %110 = arith.negf %109 : vector<2x128xf32>
    %111 = math.exp %110 : vector<2x128xf32>
    %cst_33 = arith.constant 1.000000e+00 : f32
    %112 = vector.broadcast %cst_33 : f32 to vector<2x128xf32>
    %113 = arith.addf %112, %111 : vector<2x128xf32>
    %114 = arith.divf %112, %113 : vector<2x128xf32>
    %115 = arith.mulf %106, %77 : vector<2x128xf32>
    %116 = arith.mulf %100, %108 : vector<2x128xf32>
    %117 = arith.addf %115, %116 : vector<2x128xf32>
    %118 = math.tanh %117 : vector<2x128xf32>
    %119 = arith.mulf %114, %118 : vector<2x128xf32>
    %120 = arith.truncf %119 : vector<2x128xf32> to vector<2x128xbf16>
    %cst_34 = arith.constant dense<0.000000e+00> : vector<2x128xf32>
    %121 = tpu.matmul %120, %4, %cst_34 {dimension_numbers = #tpu.dot_dimension_numbers<[1], [0], [0], [1], [0, 0, 1, 1], [], []>} : vector<2x128xbf16>, vector<128x128xbf16>, vector<2x128xf32> -> vector<2x128xf32>
    %122 = vector.broadcast %5 : vector<1x128xf32> to vector<2x128xf32>
    %123 = arith.addf %121, %122 : vector<2x128xf32>
    %124 = arith.index_cast %c2_i32 : i32 to index
    %c0_35 = arith.constant 0 : index
    %c0_36 = arith.constant 0 : index
    %125 = vector.load %arg5[%124, %c0_35, %c0_36] : memref<8x2x128xf32, #tpu.memory_space<vmem>>, vector<1x2x128xf32>
    %126 = vector.shape_cast %125 : vector<1x2x128xf32> to vector<2x128xf32>
    %127 = vector.shape_cast %123 : vector<2x128xf32> to vector<1x2x128xf32>
    tpu.vector_store %arg5[%124, %c0_35, %c0_36], %127 {strides = array<i32>} : memref<8x2x128xf32, #tpu.memory_space<vmem>>, vector<1x2x128xf32>,
    %c3_i32 = arith.constant 3 : i32
    %128 = arith.index_cast %c3_i32 : i32 to index
    %c0_37 = arith.constant 0 : index
    %c0_38 = arith.constant 0 : index
    %129 = vector.load %arg1[%128, %c0_37, %c0_38] : memref<8x2x512xbf16, #tpu.memory_space<vmem>>, vector<1x2x512xbf16>
    %130 = vector.shape_cast %129 : vector<1x2x512xbf16> to vector<2x512xbf16>
    %131 = arith.extf %130 : vector<2x512xbf16> to vector<2x512xf32>
    %132 = arith.truncf %119 : vector<2x128xf32> to vector<2x128xbf16>
    %cst_39 = arith.constant dense<0.000000e+00> : vector<2x512xf32>
    %133 = tpu.matmul %132, %3, %cst_39 {dimension_numbers = #tpu.dot_dimension_numbers<[1], [0], [0], [1], [0, 0, 1, 1], [], []>} : vector<2x128xbf16>, vector<128x512xbf16>, vector<2x512xf32> -> vector<2x512xf32>
    %134 = arith.addf %131, %133 : vector<2x512xf32>
    %135 = vector.extract_strided_slice %134 {offsets = [0, 0], sizes = [2, 128], strides = [1, 1]} : vector<2x512xf32> to vector<2x128xf32>
    %136 = arith.negf %135 : vector<2x128xf32>
    %137 = math.exp %136 : vector<2x128xf32>
    %cst_40 = arith.constant 1.000000e+00 : f32
    %138 = vector.broadcast %cst_40 : f32 to vector<2x128xf32>
    %139 = arith.addf %138, %137 : vector<2x128xf32>
    %140 = arith.divf %138, %139 : vector<2x128xf32>
    %141 = vector.extract_strided_slice %134 {offsets = [0, 128], sizes = [2, 128], strides = [1, 1]} : vector<2x512xf32> to vector<2x128xf32>
    %142 = arith.negf %141 : vector<2x128xf32>
    %143 = math.exp %142 : vector<2x128xf32>
    %cst_41 = arith.constant 1.000000e+00 : f32
    %144 = vector.broadcast %cst_41 : f32 to vector<2x128xf32>
    %145 = arith.addf %144, %143 : vector<2x128xf32>
    %146 = arith.divf %144, %145 : vector<2x128xf32>
    %147 = vector.extract_strided_slice %134 {offsets = [0, 256], sizes = [2, 128], strides = [1, 1]} : vector<2x512xf32> to vector<2x128xf32>
    %148 = math.tanh %147 : vector<2x128xf32>
    %149 = vector.extract_strided_slice %134 {offsets = [0, 384], sizes = [2, 128], strides = [1, 1]} : vector<2x512xf32> to vector<2x128xf32>
    %150 = arith.negf %149 : vector<2x128xf32>
    %151 = math.exp %150 : vector<2x128xf32>
    %cst_42 = arith.constant 1.000000e+00 : f32
    %152 = vector.broadcast %cst_42 : f32 to vector<2x128xf32>
    %153 = arith.addf %152, %151 : vector<2x128xf32>
    %154 = arith.divf %152, %153 : vector<2x128xf32>
    %155 = arith.mulf %146, %117 : vector<2x128xf32>
    %156 = arith.mulf %140, %148 : vector<2x128xf32>
    %157 = arith.addf %155, %156 : vector<2x128xf32>
    %158 = math.tanh %157 : vector<2x128xf32>
    %159 = arith.mulf %154, %158 : vector<2x128xf32>
    %160 = arith.truncf %159 : vector<2x128xf32> to vector<2x128xbf16>
    %cst_43 = arith.constant dense<0.000000e+00> : vector<2x128xf32>
    %161 = tpu.matmul %160, %4, %cst_43 {dimension_numbers = #tpu.dot_dimension_numbers<[1], [0], [0], [1], [0, 0, 1, 1], [], []>} : vector<2x128xbf16>, vector<128x128xbf16>, vector<2x128xf32> -> vector<2x128xf32>
    %162 = vector.broadcast %5 : vector<1x128xf32> to vector<2x128xf32>
    %163 = arith.addf %161, %162 : vector<2x128xf32>
    %164 = arith.index_cast %c3_i32 : i32 to index
    %c0_44 = arith.constant 0 : index
    %c0_45 = arith.constant 0 : index
    %165 = vector.load %arg5[%164, %c0_44, %c0_45] : memref<8x2x128xf32, #tpu.memory_space<vmem>>, vector<1x2x128xf32>
    %166 = vector.shape_cast %165 : vector<1x2x128xf32> to vector<2x128xf32>
    %167 = vector.shape_cast %163 : vector<2x128xf32> to vector<1x2x128xf32>
    tpu.vector_store %arg5[%164, %c0_44, %c0_45], %167 {strides = array<i32>} : memref<8x2x128xf32, #tpu.memory_space<vmem>>, vector<1x2x128xf32>,
    %c4_i32 = arith.constant 4 : i32
    %168 = arith.index_cast %c4_i32 : i32 to index
    %c0_46 = arith.constant 0 : index
    %c0_47 = arith.constant 0 : index
    %169 = vector.load %arg1[%168, %c0_46, %c0_47] : memref<8x2x512xbf16, #tpu.memory_space<vmem>>, vector<1x2x512xbf16>
    %170 = vector.shape_cast %169 : vector<1x2x512xbf16> to vector<2x512xbf16>
    %171 = arith.extf %170 : vector<2x512xbf16> to vector<2x512xf32>
    %172 = arith.truncf %159 : vector<2x128xf32> to vector<2x128xbf16>
    %cst_48 = arith.constant dense<0.000000e+00> : vector<2x512xf32>
    %173 = tpu.matmul %172, %3, %cst_48 {dimension_numbers = #tpu.dot_dimension_numbers<[1], [0], [0], [1], [0, 0, 1, 1], [], []>} : vector<2x128xbf16>, vector<128x512xbf16>, vector<2x512xf32> -> vector<2x512xf32>
    %174 = arith.addf %171, %173 : vector<2x512xf32>
    %175 = vector.extract_strided_slice %174 {offsets = [0, 0], sizes = [2, 128], strides = [1, 1]} : vector<2x512xf32> to vector<2x128xf32>
    %176 = arith.negf %175 : vector<2x128xf32>
    %177 = math.exp %176 : vector<2x128xf32>
    %cst_49 = arith.constant 1.000000e+00 : f32
    %178 = vector.broadcast %cst_49 : f32 to vector<2x128xf32>
    %179 = arith.addf %178, %177 : vector<2x128xf32>
    %180 = arith.divf %178, %179 : vector<2x128xf32>
    %181 = vector.extract_strided_slice %174 {offsets = [0, 128], sizes = [2, 128], strides = [1, 1]} : vector<2x512xf32> to vector<2x128xf32>
    %182 = arith.negf %181 : vector<2x128xf32>
    %183 = math.exp %182 : vector<2x128xf32>
    %cst_50 = arith.constant 1.000000e+00 : f32
    %184 = vector.broadcast %cst_50 : f32 to vector<2x128xf32>
    %185 = arith.addf %184, %183 : vector<2x128xf32>
    %186 = arith.divf %184, %185 : vector<2x128xf32>
    %187 = vector.extract_strided_slice %174 {offsets = [0, 256], sizes = [2, 128], strides = [1, 1]} : vector<2x512xf32> to vector<2x128xf32>
    %188 = math.tanh %187 : vector<2x128xf32>
    %189 = vector.extract_strided_slice %174 {offsets = [0, 384], sizes = [2, 128], strides = [1, 1]} : vector<2x512xf32> to vector<2x128xf32>
    %190 = arith.negf %189 : vector<2x128xf32>
    %191 = math.exp %190 : vector<2x128xf32>
    %cst_51 = arith.constant 1.000000e+00 : f32
    %192 = vector.broadcast %cst_51 : f32 to vector<2x128xf32>
    %193 = arith.addf %192, %191 : vector<2x128xf32>
    %194 = arith.divf %192, %193 : vector<2x128xf32>
    %195 = arith.mulf %186, %157 : vector<2x128xf32>
    %196 = arith.mulf %180, %188 : vector<2x128xf32>
    %197 = arith.addf %195, %196 : vector<2x128xf32>
    %198 = math.tanh %197 : vector<2x128xf32>
    %199 = arith.mulf %194, %198 : vector<2x128xf32>
    %200 = arith.truncf %199 : vector<2x128xf32> to vector<2x128xbf16>
    %cst_52 = arith.constant dense<0.000000e+00> : vector<2x128xf32>
    %201 = tpu.matmul %200, %4, %cst_52 {dimension_numbers = #tpu.dot_dimension_numbers<[1], [0], [0], [1], [0, 0, 1, 1], [], []>} : vector<2x128xbf16>, vector<128x128xbf16>, vector<2x128xf32> -> vector<2x128xf32>
    %202 = vector.broadcast %5 : vector<1x128xf32> to vector<2x128xf32>
    %203 = arith.addf %201, %202 : vector<2x128xf32>
    %204 = arith.index_cast %c4_i32 : i32 to index
    %c0_53 = arith.constant 0 : index
    %c0_54 = arith.constant 0 : index
    %205 = vector.load %arg5[%204, %c0_53, %c0_54] : memref<8x2x128xf32, #tpu.memory_space<vmem>>, vector<1x2x128xf32>
    %206 = vector.shape_cast %205 : vector<1x2x128xf32> to vector<2x128xf32>
    %207 = vector.shape_cast %203 : vector<2x128xf32> to vector<1x2x128xf32>
    tpu.vector_store %arg5[%204, %c0_53, %c0_54], %207 {strides = array<i32>} : memref<8x2x128xf32, #tpu.memory_space<vmem>>, vector<1x2x128xf32>,
    %c5_i32 = arith.constant 5 : i32
    %208 = arith.index_cast %c5_i32 : i32 to index
    %c0_55 = arith.constant 0 : index
    %c0_56 = arith.constant 0 : index
    %209 = vector.load %arg1[%208, %c0_55, %c0_56] : memref<8x2x512xbf16, #tpu.memory_space<vmem>>, vector<1x2x512xbf16>
    %210 = vector.shape_cast %209 : vector<1x2x512xbf16> to vector<2x512xbf16>
    %211 = arith.extf %210 : vector<2x512xbf16> to vector<2x512xf32>
    %212 = arith.truncf %199 : vector<2x128xf32> to vector<2x128xbf16>
    %cst_57 = arith.constant dense<0.000000e+00> : vector<2x512xf32>
    %213 = tpu.matmul %212, %3, %cst_57 {dimension_numbers = #tpu.dot_dimension_numbers<[1], [0], [0], [1], [0, 0, 1, 1], [], []>} : vector<2x128xbf16>, vector<128x512xbf16>, vector<2x512xf32> -> vector<2x512xf32>
    %214 = arith.addf %211, %213 : vector<2x512xf32>
    %215 = vector.extract_strided_slice %214 {offsets = [0, 0], sizes = [2, 128], strides = [1, 1]} : vector<2x512xf32> to vector<2x128xf32>
    %216 = arith.negf %215 : vector<2x128xf32>
    %217 = math.exp %216 : vector<2x128xf32>
    %cst_58 = arith.constant 1.000000e+00 : f32
    %218 = vector.broadcast %cst_58 : f32 to vector<2x128xf32>
    %219 = arith.addf %218, %217 : vector<2x128xf32>
    %220 = arith.divf %218, %219 : vector<2x128xf32>
    %221 = vector.extract_strided_slice %214 {offsets = [0, 128], sizes = [2, 128], strides = [1, 1]} : vector<2x512xf32> to vector<2x128xf32>
    %222 = arith.negf %221 : vector<2x128xf32>
    %223 = math.exp %222 : vector<2x128xf32>
    %cst_59 = arith.constant 1.000000e+00 : f32
    %224 = vector.broadcast %cst_59 : f32 to vector<2x128xf32>
    %225 = arith.addf %224, %223 : vector<2x128xf32>
    %226 = arith.divf %224, %225 : vector<2x128xf32>
    %227 = vector.extract_strided_slice %214 {offsets = [0, 256], sizes = [2, 128], strides = [1, 1]} : vector<2x512xf32> to vector<2x128xf32>
    %228 = math.tanh %227 : vector<2x128xf32>
    %229 = vector.extract_strided_slice %214 {offsets = [0, 384], sizes = [2, 128], strides = [1, 1]} : vector<2x512xf32> to vector<2x128xf32>
    %230 = arith.negf %229 : vector<2x128xf32>
    %231 = math.exp %230 : vector<2x128xf32>
    %cst_60 = arith.constant 1.000000e+00 : f32
    %232 = vector.broadcast %cst_60 : f32 to vector<2x128xf32>
    %233 = arith.addf %232, %231 : vector<2x128xf32>
    %234 = arith.divf %232, %233 : vector<2x128xf32>
    %235 = arith.mulf %226, %197 : vector<2x128xf32>
    %236 = arith.mulf %220, %228 : vector<2x128xf32>
    %237 = arith.addf %235, %236 : vector<2x128xf32>
    %238 = math.tanh %237 : vector<2x128xf32>
    %239 = arith.mulf %234, %238 : vector<2x128xf32>
    %240 = arith.truncf %239 : vector<2x128xf32> to vector<2x128xbf16>
    %cst_61 = arith.constant dense<0.000000e+00> : vector<2x128xf32>
    %241 = tpu.matmul %240, %4, %cst_61 {dimension_numbers = #tpu.dot_dimension_numbers<[1], [0], [0], [1], [0, 0, 1, 1], [], []>} : vector<2x128xbf16>, vector<128x128xbf16>, vector<2x128xf32> -> vector<2x128xf32>
    %242 = vector.broadcast %5 : vector<1x128xf32> to vector<2x128xf32>
    %243 = arith.addf %241, %242 : vector<2x128xf32>
    %244 = arith.index_cast %c5_i32 : i32 to index
    %c0_62 = arith.constant 0 : index
    %c0_63 = arith.constant 0 : index
    %245 = vector.load %arg5[%244, %c0_62, %c0_63] : memref<8x2x128xf32, #tpu.memory_space<vmem>>, vector<1x2x128xf32>
    %246 = vector.shape_cast %245 : vector<1x2x128xf32> to vector<2x128xf32>
    %247 = vector.shape_cast %243 : vector<2x128xf32> to vector<1x2x128xf32>
    tpu.vector_store %arg5[%244, %c0_62, %c0_63], %247 {strides = array<i32>} : memref<8x2x128xf32, #tpu.memory_space<vmem>>, vector<1x2x128xf32>,
    %c6_i32 = arith.constant 6 : i32
    %248 = arith.index_cast %c6_i32 : i32 to index
    %c0_64 = arith.constant 0 : index
    %c0_65 = arith.constant 0 : index
    %249 = vector.load %arg1[%248, %c0_64, %c0_65] : memref<8x2x512xbf16, #tpu.memory_space<vmem>>, vector<1x2x512xbf16>
    %250 = vector.shape_cast %249 : vector<1x2x512xbf16> to vector<2x512xbf16>
    %251 = arith.extf %250 : vector<2x512xbf16> to vector<2x512xf32>
    %252 = arith.truncf %239 : vector<2x128xf32> to vector<2x128xbf16>
    %cst_66 = arith.constant dense<0.000000e+00> : vector<2x512xf32>
    %253 = tpu.matmul %252, %3, %cst_66 {dimension_numbers = #tpu.dot_dimension_numbers<[1], [0], [0], [1], [0, 0, 1, 1], [], []>} : vector<2x128xbf16>, vector<128x512xbf16>, vector<2x512xf32> -> vector<2x512xf32>
    %254 = arith.addf %251, %253 : vector<2x512xf32>
    %255 = vector.extract_strided_slice %254 {offsets = [0, 0], sizes = [2, 128], strides = [1, 1]} : vector<2x512xf32> to vector<2x128xf32>
    %256 = arith.negf %255 : vector<2x128xf32>
    %257 = math.exp %256 : vector<2x128xf32>
    %cst_67 = arith.constant 1.000000e+00 : f32
    %258 = vector.broadcast %cst_67 : f32 to vector<2x128xf32>
    %259 = arith.addf %258, %257 : vector<2x128xf32>
    %260 = arith.divf %258, %259 : vector<2x128xf32>
    %261 = vector.extract_strided_slice %254 {offsets = [0, 128], sizes = [2, 128], strides = [1, 1]} : vector<2x512xf32> to vector<2x128xf32>
    %262 = arith.negf %261 : vector<2x128xf32>
    %263 = math.exp %262 : vector<2x128xf32>
    %cst_68 = arith.constant 1.000000e+00 : f32
    %264 = vector.broadcast %cst_68 : f32 to vector<2x128xf32>
    %265 = arith.addf %264, %263 : vector<2x128xf32>
    %266 = arith.divf %264, %265 : vector<2x128xf32>
    %267 = vector.extract_strided_slice %254 {offsets = [0, 256], sizes = [2, 128], strides = [1, 1]} : vector<2x512xf32> to vector<2x128xf32>
    %268 = math.tanh %267 : vector<2x128xf32>
    %269 = vector.extract_strided_slice %254 {offsets = [0, 384], sizes = [2, 128], strides = [1, 1]} : vector<2x512xf32> to vector<2x128xf32>
    %270 = arith.negf %269 : vector<2x128xf32>
    %271 = math.exp %270 : vector<2x128xf32>
    %cst_69 = arith.constant 1.000000e+00 : f32
    %272 = vector.broadcast %cst_69 : f32 to vector<2x128xf32>
    %273 = arith.addf %272, %271 : vector<2x128xf32>
    %274 = arith.divf %272, %273 : vector<2x128xf32>
    %275 = arith.mulf %266, %237 : vector<2x128xf32>
    %276 = arith.mulf %260, %268 : vector<2x128xf32>
    %277 = arith.addf %275, %276 : vector<2x128xf32>
    %278 = math.tanh %277 : vector<2x128xf32>
    %279 = arith.mulf %274, %278 : vector<2x128xf32>
    %280 = arith.truncf %279 : vector<2x128xf32> to vector<2x128xbf16>
    %cst_70 = arith.constant dense<0.000000e+00> : vector<2x128xf32>
    %281 = tpu.matmul %280, %4, %cst_70 {dimension_numbers = #tpu.dot_dimension_numbers<[1], [0], [0], [1], [0, 0, 1, 1], [], []>} : vector<2x128xbf16>, vector<128x128xbf16>, vector<2x128xf32> -> vector<2x128xf32>
    %282 = vector.broadcast %5 : vector<1x128xf32> to vector<2x128xf32>
    %283 = arith.addf %281, %282 : vector<2x128xf32>
    %284 = arith.index_cast %c6_i32 : i32 to index
    %c0_71 = arith.constant 0 : index
    %c0_72 = arith.constant 0 : index
    %285 = vector.load %arg5[%284, %c0_71, %c0_72] : memref<8x2x128xf32, #tpu.memory_space<vmem>>, vector<1x2x128xf32>
    %286 = vector.shape_cast %285 : vector<1x2x128xf32> to vector<2x128xf32>
    %287 = vector.shape_cast %283 : vector<2x128xf32> to vector<1x2x128xf32>
    tpu.vector_store %arg5[%284, %c0_71, %c0_72], %287 {strides = array<i32>} : memref<8x2x128xf32, #tpu.memory_space<vmem>>, vector<1x2x128xf32>,
    %c7_i32 = arith.constant 7 : i32
    %288 = arith.index_cast %c7_i32 : i32 to index
    %c0_73 = arith.constant 0 : index
    %c0_74 = arith.constant 0 : index
    %289 = vector.load %arg1[%288, %c0_73, %c0_74] : memref<8x2x512xbf16, #tpu.memory_space<vmem>>, vector<1x2x512xbf16>
    %290 = vector.shape_cast %289 : vector<1x2x512xbf16> to vector<2x512xbf16>
    %291 = arith.extf %290 : vector<2x512xbf16> to vector<2x512xf32>
    %292 = arith.truncf %279 : vector<2x128xf32> to vector<2x128xbf16>
    %cst_75 = arith.constant dense<0.000000e+00> : vector<2x512xf32>
    %293 = tpu.matmul %292, %3, %cst_75 {dimension_numbers = #tpu.dot_dimension_numbers<[1], [0], [0], [1], [0, 0, 1, 1], [], []>} : vector<2x128xbf16>, vector<128x512xbf16>, vector<2x512xf32> -> vector<2x512xf32>
    %294 = arith.addf %291, %293 : vector<2x512xf32>
    %295 = vector.extract_strided_slice %294 {offsets = [0, 0], sizes = [2, 128], strides = [1, 1]} : vector<2x512xf32> to vector<2x128xf32>
    %296 = arith.negf %295 : vector<2x128xf32>
    %297 = math.exp %296 : vector<2x128xf32>
    %cst_76 = arith.constant 1.000000e+00 : f32
    %298 = vector.broadcast %cst_76 : f32 to vector<2x128xf32>
    %299 = arith.addf %298, %297 : vector<2x128xf32>
    %300 = arith.divf %298, %299 : vector<2x128xf32>
    %301 = vector.extract_strided_slice %294 {offsets = [0, 128], sizes = [2, 128], strides = [1, 1]} : vector<2x512xf32> to vector<2x128xf32>
    %302 = arith.negf %301 : vector<2x128xf32>
    %303 = math.exp %302 : vector<2x128xf32>
    %cst_77 = arith.constant 1.000000e+00 : f32
    %304 = vector.broadcast %cst_77 : f32 to vector<2x128xf32>
    %305 = arith.addf %304, %303 : vector<2x128xf32>
    %306 = arith.divf %304, %305 : vector<2x128xf32>
    %307 = vector.extract_strided_slice %294 {offsets = [0, 256], sizes = [2, 128], strides = [1, 1]} : vector<2x512xf32> to vector<2x128xf32>
    %308 = math.tanh %307 : vector<2x128xf32>
    %309 = vector.extract_strided_slice %294 {offsets = [0, 384], sizes = [2, 128], strides = [1, 1]} : vector<2x512xf32> to vector<2x128xf32>
    %310 = arith.negf %309 : vector<2x128xf32>
    %311 = math.exp %310 : vector<2x128xf32>
    %cst_78 = arith.constant 1.000000e+00 : f32
    %312 = vector.broadcast %cst_78 : f32 to vector<2x128xf32>
    %313 = arith.addf %312, %311 : vector<2x128xf32>
    %314 = arith.divf %312, %313 : vector<2x128xf32>
    %315 = arith.mulf %306, %277 : vector<2x128xf32>
    %316 = arith.mulf %300, %308 : vector<2x128xf32>
    %317 = arith.addf %315, %316 : vector<2x128xf32>
    %318 = math.tanh %317 : vector<2x128xf32>
    %319 = arith.mulf %314, %318 : vector<2x128xf32>
    %320 = arith.truncf %319 : vector<2x128xf32> to vector<2x128xbf16>
    %cst_79 = arith.constant dense<0.000000e+00> : vector<2x128xf32>
    %321 = tpu.matmul %320, %4, %cst_79 {dimension_numbers = #tpu.dot_dimension_numbers<[1], [0], [0], [1], [0, 0, 1, 1], [], []>} : vector<2x128xbf16>, vector<128x128xbf16>, vector<2x128xf32> -> vector<2x128xf32>
    %322 = vector.broadcast %5 : vector<1x128xf32> to vector<2x128xf32>
    %323 = arith.addf %321, %322 : vector<2x128xf32>
    %324 = arith.index_cast %c7_i32 : i32 to index
    %c0_80 = arith.constant 0 : index
    %c0_81 = arith.constant 0 : index
    %325 = vector.load %arg5[%324, %c0_80, %c0_81] : memref<8x2x128xf32, #tpu.memory_space<vmem>>, vector<1x2x128xf32>
    %326 = vector.shape_cast %325 : vector<1x2x128xf32> to vector<2x128xf32>
    %327 = vector.shape_cast %323 : vector<2x128xf32> to vector<1x2x128xf32>
    tpu.vector_store %arg5[%324, %c0_80, %c0_81], %327 {strides = array<i32>} : memref<8x2x128xf32, #tpu.memory_space<vmem>>, vector<1x2x128xf32>,
    %c8_i32 = arith.constant 8 : i32
    %c0_82 = arith.constant 0 : index
    %c0_83 = arith.constant 0 : index
    %328 = vector.load %arg6[%c0_82, %c0_83] : memref<2x128xf32, #tpu.memory_space<vmem>>, vector<2x128xf32>
    tpu.vector_store %arg6[%c0_82, %c0_83], %319 {strides = array<i32>} : memref<2x128xf32, #tpu.memory_space<vmem>>, vector<2x128xf32>,
    %c0_84 = arith.constant 0 : index
    %c0_85 = arith.constant 0 : index
    %329 = vector.load %arg7[%c0_84, %c0_85] : memref<2x128xf32, #tpu.memory_space<vmem>>, vector<2x128xf32>
    tpu.vector_store %arg7[%c0_84, %c0_85], %317 {strides = array<i32>} : memref<2x128xf32, #tpu.memory_space<vmem>>, vector<2x128xf32>,
    return
  }
  func.func @transform_0(%arg0: i32) -> (i32, i32, i32) {
    %c0_i32 = arith.constant 0 : i32
    %c0_i32_0 = arith.constant 0 : i32
    %c0_i32_1 = arith.constant 0 : i32
    return %arg0, %c0_i32, %c0_i32_0 : i32, i32, i32
  }
  func.func @transform_1(%arg0: i32) -> (i32, i32) {
    %c0_i32 = arith.constant 0 : i32
    %c0_i32_0 = arith.constant 0 : i32
    %c0_i32_1 = arith.constant 0 : i32
    return %c0_i32, %c0_i32_0 : i32, i32
  }
  func.func @transform_2(%arg0: i32) -> (i32, i32) {
    %c0_i32 = arith.constant 0 : i32
    %c0_i32_0 = arith.constant 0 : i32
    %c0_i32_1 = arith.constant 0 : i32
    return %c0_i32, %c0_i32_0 : i32, i32
  }
  func.func @transform_3(%arg0: i32) -> (i32, i32) {
    %c0_i32 = arith.constant 0 : i32
    %c0_i32_0 = arith.constant 0 : i32
    %c0_i32_1 = arith.constant 0 : i32
    return %c0_i32, %c0_i32_0 : i32, i32
  }
  func.func @transform_4(%arg0: i32) -> (i32, i32, i32) {
    %c0_i32 = arith.constant 0 : i32
    %c0_i32_0 = arith.constant 0 : i32
    %c0_i32_1 = arith.constant 0 : i32
    return %arg0, %c0_i32, %c0_i32_0 : i32, i32, i32
  }
}

</mosaic_0001>

<bundles_post_ra>
// kernel: cnn_lstm_forward.4
= control target key start
LH: loop header
LB: loop body
LE: loop exit
PB: predicated region body
PF: predicated region fallthrough
CT: control target
= control target key end

     0   :  { %s1943_s12 = smov 0   ;;  %s1945_s13 = smov 0   ;;  %s2147_s0 = inlined_call_operand.vmem [shape: bf16[1024,128], index: 0, kind: input, shape index: {}]   ;;  %s2148_s1 = inlined_call_operand.vmem [shape: bf16[128,128], index: 1, kind: input, shape index: {}]   ;;  %s2149_s2 = inlined_call_operand.vmem [shape: f32[1,128], index: 2, kind: input, shape index: {}]   ;;  %s2150_s3 = inlined_call_operand.vmem [shape: bf16[1024,128], index: 3, kind: output, shape index: {}]  }
   0x1   :  { %s1947_s14 = smov 0  }
   0x2 LB: > { %s32_s15 = sadd.s32 1, %s1917_s13  ;;  %p1452_p0 = scmp.ge.s32.totalorder %s1921_s14, 1  ;;  %s1921_s14 = sphi %s1947_s14, %s13_s14   ;;  %s1917_s13 = sphi %s1945_s13, %s2152_s13   ;;  %s1913_s12 = sphi %s1943_s12, %s2151_s12  }
   0x3   : > { %p34_p1 = scmp.ge.s32.totalorder %s32_s15, 2  ;;  %p188_p2 = scmp.lt.s32.totalorder %s1921_s14, 3 }
   0x5   : > { %s2154_s15 = smov (%p34_p1, %s32_s15), 0  ;;  %p189_p3 = pnand %p1452_p0, %p188_p2 }
   0x6   : > { %s1453_s24 = sshll.u32 (!%p189_p3), %s1913_s12, 6 }
   0x7   : > { %192 = sbr.rel (%p189_p3) target bundleno = 305 (0x131), region = 32  ;;  %p230_p4 = scmp.lt.s32.totalorder (!%p189_p3), %s1453_s24, 127 }
   0xc   : > { %v1658_v0 = vld [vmem:[%s2148_s1 + $0x38] sm:$0xff]  ;;  %v1657_v1 = vld [vmem:[%s2148_s1 + $0x30] sm:$0xff]  ;;  %v1656_v2 = vld [vmem:[%s2148_s1 + $0x28] sm:$0xff]  ;;  %s2156_s24 = smov (!%p230_p4, %s1453_s24), 127 }
   0xd   : > { %711 = vmatpush.bf16.msra.mxu0 %v1658_v0  ;;  %1850 = vmatpush.bf16.msra.mxu1 %v1658_v0  ;;  %v1655_v3 = vld [vmem:[%s2148_s1 + $0x20] sm:$0xff]  ;;  %v1654_v4 = vld [vmem:[%s2148_s1 + $0x18] sm:$0xff]  ;;  %v1653_v5 = vld [vmem:[%s2148_s1 + $0x10] sm:$0xff]  ;;  %s1454_s4 = sshll.u32 %s2156_s24, 2 }
   0xe   : > { %1851 = vmatpush.bf16.msra.mxu2 %v1658_v0  ;;  %1852 = vmatpush.bf16.msra.mxu3 %v1658_v0  ;;  %v1652_v6 = vld [vmem:[%s2148_s1 + $0x8] sm:$0xff]  ;;  %v1651_v7 = vld [vmem:[%s2148_s1] sm:$0xff]  ;;  %s1996_s9 = scalar_lea.vmem %s2147_s0, %s1454_s4  ;;  %s2044_s17 = scalar_lea.vmem %s2150_s3, %s1454_s4 }
   0xf   : > { %v1619_v8 = vld [vmem:[%s1996_s9] sm:$0xff]  ;;  %v1620_v12 = vld [vmem:[%s1996_s9 + $0x8] sm:$0xff]  ;;  %v1621_v16 = vld [vmem:[%s1996_s9 + $0x10] sm:$0xff] }
  0x10   : > { %v1627_v9 = vld [vmem:[%s1996_s9 + $0x40] sm:$0xff]  ;;  %v1628_v13 = vld [vmem:[%s1996_s9 + $0x48] sm:$0xff]  ;;  %v1629_v17 = vld [vmem:[%s1996_s9 + $0x50] sm:$0xff] }
  0x11   : > { %712 = vmatpush.bf16.msra.mxu0 %v1657_v1  ;;  %1853 = vmatpush.bf16.msra.mxu1 %v1657_v1  ;;  %v1635_v10 = vld [vmem:[%s1996_s9 + $0x80] sm:$0xff]  ;;  %v1636_v14 = vld [vmem:[%s1996_s9 + $0x88] sm:$0xff]  ;;  %v1637_v18 = vld [vmem:[%s1996_s9 + $0x90] sm:$0xff] }
  0x12   : > { %1854 = vmatpush.bf16.msra.mxu2 %v1657_v1  ;;  %1855 = vmatpush.bf16.msra.mxu3 %v1657_v1  ;;  %v1643_v11 = vld [vmem:[%s1996_s9 + $0xc0] sm:$0xff]  ;;  %v1644_v15 = vld [vmem:[%s1996_s9 + $0xc8] sm:$0xff]  ;;  %v1645_v19 = vld [vmem:[%s1996_s9 + $0xd0] sm:$0xff] }
  0x13   : > { %v1622_v20 = vld [vmem:[%s1996_s9 + $0x18] sm:$0xff]  ;;  %v1623_v24 = vld [vmem:[%s1996_s9 + $0x20] sm:$0xff]  ;;  %v1624_v28 = vld [vmem:[%s1996_s9 + $0x28] sm:$0xff] }
  0x14   : > { %v1630_v21 = vld [vmem:[%s1996_s9 + $0x58] sm:$0xff]  ;;  %v1631_v25 = vld [vmem:[%s1996_s9 + $0x60] sm:$0xff]  ;;  %v1632_v29 = vld [vmem:[%s1996_s9 + $0x68] sm:$0xff] }
  0x15   : > { %713 = vmatpush.bf16.msra.mxu0 %v1656_v2  ;;  %1856 = vmatpush.bf16.msra.mxu1 %v1656_v2  ;;  %v1638_v22 = vld [vmem:[%s1996_s9 + $0x98] sm:$0xff]  ;;  %v1639_v26 = vld [vmem:[%s1996_s9 + $0xa0] sm:$0xff]  ;;  %v1640_v30 = vld [vmem:[%s1996_s9 + $0xa8] sm:$0xff] }
  0x16   : > { %1857 = vmatpush.bf16.msra.mxu2 %v1656_v2  ;;  %1858 = vmatpush.bf16.msra.mxu3 %v1656_v2  ;;  %v1646_v23 = vld [vmem:[%s1996_s9 + $0xd8] sm:$0xff]  ;;  %v1647_v27 = vld [vmem:[%s1996_s9 + $0xe0] sm:$0xff]  ;;  %v1648_v31 = vld [vmem:[%s1996_s9 + $0xe8] sm:$0xff] }
  0x17   : > { %v1625_v32 = vld [vmem:[%s1996_s9 + $0x30] sm:$0xff]  ;;  %v1626_v36 = vld [vmem:[%s1996_s9 + $0x38] sm:$0xff]  ;;  %v2033_v42 = vld [vmem:[%s2149_s2] ss:$0 sm:$0xff] }
  0x18   : > { %v1633_v33 = vld [vmem:[%s1996_s9 + $0x70] sm:$0xff]  ;;  %v1634_v37 = vld [vmem:[%s1996_s9 + $0x78] sm:$0xff] }
  0x19   : > { %714 = vmatpush.bf16.msra.mxu0 %v1655_v3  ;;  %1859 = vmatpush.bf16.msra.mxu1 %v1655_v3  ;;  %v1641_v34 = vld [vmem:[%s1996_s9 + $0xb0] sm:$0xff]  ;;  %v1642_v38 = vld [vmem:[%s1996_s9 + $0xb8] sm:$0xff] }
  0x1a   : > { %1860 = vmatpush.bf16.msra.mxu2 %v1655_v3  ;;  %1861 = vmatpush.bf16.msra.mxu3 %v1655_v3  ;;  %v1649_v35 = vld [vmem:[%s1996_s9 + $0xf0] sm:$0xff]  ;;  %v1650_v39 = vld [vmem:[%s1996_s9 + $0xf8] sm:$0xff] }
  0x1d   : > { %715 = vmatpush.bf16.msra.mxu0 %v1654_v4  ;;  %1862 = vmatpush.bf16.msra.mxu1 %v1654_v4 }
  0x1e   : > { %1863 = vmatpush.bf16.msra.mxu2 %v1654_v4  ;;  %1864 = vmatpush.bf16.msra.mxu3 %v1654_v4 }
  0x21   : > { %716 = vmatpush.bf16.msra.mxu0 %v1653_v5  ;;  %1865 = vmatpush.bf16.msra.mxu1 %v1653_v5 }
  0x22   : > { %1866 = vmatpush.bf16.msra.mxu2 %v1653_v5  ;;  %1867 = vmatpush.bf16.msra.mxu3 %v1653_v5 }
  0x25   : > { %717 = vmatpush.bf16.msra.mxu0 %v1652_v6  ;;  %1868 = vmatpush.bf16.msra.mxu1 %v1652_v6 }
  0x26   : > { %1869 = vmatpush.bf16.msra.mxu2 %v1652_v6  ;;  %1870 = vmatpush.bf16.msra.mxu3 %v1652_v6 }
  0x29   : > { %718 = vmatpush.bf16.msra.mxu0 %v1651_v7  ;;  %1871 = vmatpush.bf16.msra.mxu1 %v1651_v7 }
  0x2a   : > { %1872 = vmatpush.bf16.msra.mxu2 %v1651_v7  ;;  %1873 = vmatpush.bf16.msra.mxu3 %v1651_v7 }
  0x2c   : > { %719 = vmatmul.bf16.vlgmr.msra.gmra.mxu0 %v1619_v8  ;;  %759 = vmatmul.bf16.vlgmr.msra.gmra.mxu1 %v1627_v9 }
  0x2d   : > { %799 = vmatmul.bf16.vlgmr.msra.gmra.mxu2 %v1635_v10  ;;  %839 = vmatmul.bf16.vlgmr.msra.gmra.mxu3 %v1643_v11 }
  0x3c   : > { %724 = vmatmul.bf16.gmra.mxu0 %v1620_v12  ;;  %764 = vmatmul.bf16.gmra.mxu1 %v1628_v13 }
  0x3d   : > { %804 = vmatmul.bf16.gmra.mxu2 %v1636_v14  ;;  %844 = vmatmul.bf16.gmra.mxu3 %v1644_v15 }
  0x4c   : > { %729 = vmatmul.bf16.gmra.mxu0 %v1621_v16  ;;  %769 = vmatmul.bf16.gmra.mxu1 %v1629_v17 }
  0x4d   : > { %809 = vmatmul.bf16.gmra.mxu2 %v1637_v18  ;;  %849 = vmatmul.bf16.gmra.mxu3 %v1645_v19 }
  0x5c   : > { %734 = vmatmul.bf16.gmra.mxu0 %v1622_v20  ;;  %774 = vmatmul.bf16.gmra.mxu1 %v1630_v21 }
  0x5d   : > { %814 = vmatmul.bf16.gmra.mxu2 %v1638_v22  ;;  %854 = vmatmul.bf16.gmra.mxu3 %v1646_v23 }
  0x6c   : > { %739 = vmatmul.bf16.gmra.mxu0 %v1623_v24  ;;  %779 = vmatmul.bf16.gmra.mxu1 %v1631_v25 }
  0x6d   : > { %819 = vmatmul.bf16.gmra.mxu2 %v1639_v26  ;;  %859 = vmatmul.bf16.gmra.mxu3 %v1647_v27 }
  0x7c   : > { %744 = vmatmul.bf16.gmra.mxu0 %v1624_v28  ;;  %784 = vmatmul.bf16.gmra.mxu1 %v1632_v29 }
  0x7d   : > { %824 = vmatmul.bf16.gmra.mxu2 %v1640_v30  ;;  %864 = vmatmul.bf16.gmra.mxu3 %v1648_v31 }
  0x8c   : > { %749 = vmatmul.bf16.gmra.mxu0 %v1625_v32  ;;  %789 = vmatmul.bf16.gmra.mxu1 %v1633_v33 }
  0x8d   : > { %829 = vmatmul.bf16.gmra.mxu2 %v1641_v34  ;;  %869 = vmatmul.bf16.gmra.mxu3 %v1649_v35 }
  0x9c   : > { %754 = vmatmul.bf16.gmra.mxu0 %v1626_v36  ;;  %794 = vmatmul.bf16.gmra.mxu1 %v1634_v37 }
  0x9d   : > { %834 = vmatmul.bf16.gmra.mxu2 %v1642_v38  ;;  %874 = vmatmul.bf16.gmra.mxu3 %v1650_v39 }
  0xa9   : > { %v720_v40 = vpop.f32.mrf.mxu0  ;;  %v760_v41 = vpop.f32.mrf.mxu1 }
  0xaa   : > { %v1079_v43 = vadd.f32 %v2033_v42, %v720_v40  ;;  %v1095_v44 = vadd.f32 %v2033_v42, %v760_v41 }
  0xac   : > { %v1143_v51 = vmax.f32 %v1079_v43, 0.0  ;;  %v1159_v52 = vmax.f32 %v1095_v44, 0.0 }
  0xb0   : > { %v800_v45 = vpop.f32.mrf.mxu2  ;;  %v840_v46 = vpop.f32.mrf.mxu3 }
  0xb1   : > { %v722_v47 = vpop.f32.mrf.mxu0  ;;  %v762_v48 = vpop.f32.mrf.mxu1  ;;  %v1111_v57 = vadd.f32 %v2033_v42, %v800_v45  ;;  %v1127_v58 = vadd.f32 %v2033_v42, %v840_v46 }
  0xb2   : > { %v1080_v49 = vadd.f32 %v2033_v42, %v722_v47  ;;  %v1096_v50 = vadd.f32 %v2033_v42, %v762_v48 }
  0xb3   : > { %v1175_v1 = vmax.f32 %v1111_v57, 0.0  ;;  %v1191_v2 = vmax.f32 %v1127_v58, 0.0 }
  0xb4   : > { %v1144_v53 = vmax.f32 %v1080_v49, 0.0  ;;  %v1160_v54 = vmax.f32 %v1096_v50, 0.0 }
  0xb6   : > { %v1662_v55 = vpack.c.bf16 %v1144_v53, %v1143_v51  ;;  %v1702_v56 = vpack.c.bf16 %v1160_v54, %v1159_v52 }
  0xb8   : > { %1663 = vst [vmem:[%s2044_s17] sm:$0xff] %v1662_v55   ;;  %v802_v59 = vpop.f32.mrf.mxu2  ;;  %v842_v60 = vpop.f32.mrf.mxu3 }
  0xb9   : > { %1826 = vst [vmem:[%s2044_s17 + $0x40] sm:$0xff] %v1702_v56   ;;  %v1112_v61 = vadd.f32 %v2033_v42, %v802_v59  ;;  %v1128_v62 = vadd.f32 %v2033_v42, %v842_v60  ;;  %v725_v63 = vpop.f32.mrf.mxu0  ;;  %v765_v0 = vpop.f32.mrf.mxu1 }
  0xba   : > { %v1081_v7 = vadd.f32 %v2033_v42, %v725_v63  ;;  %v1097_v8 = vadd.f32 %v2033_v42, %v765_v0 }
  0xbb   : > { %v1176_v3 = vmax.f32 %v1112_v61, 0.0  ;;  %v1192_v4 = vmax.f32 %v1128_v62, 0.0 }
  0xbc   : > { %v1145_v15 = vmax.f32 %v1081_v7, 0.0  ;;  %v1161_v16 = vmax.f32 %v1097_v8, 0.0 }
  0xbd   : > { %v1742_v5 = vpack.c.bf16 %v1176_v3, %v1175_v1  ;;  %v1782_v6 = vpack.c.bf16 %v1192_v4, %v1191_v2 }
  0xbf   : > { %1834 = vst [vmem:[%s2044_s17 + $0x80] sm:$0xff] %v1742_v5  }
  0xc0   : > { %1842 = vst [vmem:[%s2044_s17 + $0xc0] sm:$0xff] %v1782_v6   ;;  %v805_v9 = vpop.f32.mrf.mxu2  ;;  %v845_v10 = vpop.f32.mrf.mxu3 }
  0xc1   : > { %v727_v11 = vpop.f32.mrf.mxu0  ;;  %v767_v12 = vpop.f32.mrf.mxu1  ;;  %v1113_v21 = vadd.f32 %v2033_v42, %v805_v9  ;;  %v1129_v22 = vadd.f32 %v2033_v42, %v845_v10 }
  0xc2   : > { %v1082_v13 = vadd.f32 %v2033_v42, %v727_v11  ;;  %v1098_v14 = vadd.f32 %v2033_v42, %v767_v12 }
  0xc3   : > { %v1177_v29 = vmax.f32 %v1113_v21, 0.0  ;;  %v1193_v30 = vmax.f32 %v1129_v22, 0.0 }
  0xc4   : > { %v1146_v17 = vmax.f32 %v1082_v13, 0.0  ;;  %v1162_v18 = vmax.f32 %v1098_v14, 0.0 }
  0xc6   : > { %v1667_v19 = vpack.c.bf16 %v1146_v17, %v1145_v15  ;;  %v1707_v20 = vpack.c.bf16 %v1162_v18, %v1161_v16 }
  0xc8   : > { %1819 = vst [vmem:[%s2044_s17 + $0x8] sm:$0xff] %v1667_v19   ;;  %v807_v23 = vpop.f32.mrf.mxu2  ;;  %v847_v24 = vpop.f32.mrf.mxu3 }
  0xc9   : > { %1827 = vst [vmem:[%s2044_s17 + $0x48] sm:$0xff] %v1707_v20   ;;  %v1114_v25 = vadd.f32 %v2033_v42, %v807_v23  ;;  %v1130_v26 = vadd.f32 %v2033_v42, %v847_v24  ;;  %v730_v27 = vpop.f32.mrf.mxu0  ;;  %v770_v28 = vpop.f32.mrf.mxu1 }
  0xca   : > { %v1083_v35 = vadd.f32 %v2033_v42, %v730_v27  ;;  %v1099_v36 = vadd.f32 %v2033_v42, %v770_v28 }
  0xcb   : > { %v1178_v31 = vmax.f32 %v1114_v25, 0.0  ;;  %v1194_v32 = vmax.f32 %v1130_v26, 0.0 }
  0xcc   : > { %v1147_v44 = vmax.f32 %v1083_v35, 0.0  ;;  %v1163_v45 = vmax.f32 %v1099_v36, 0.0 }
  0xcd   : > { %v1747_v33 = vpack.c.bf16 %v1178_v31, %v1177_v29  ;;  %v1787_v34 = vpack.c.bf16 %v1194_v32, %v1193_v30 }
  0xcf   : > { %1835 = vst [vmem:[%s2044_s17 + $0x88] sm:$0xff] %v1747_v33  }
  0xd0   : > { %1843 = vst [vmem:[%s2044_s17 + $0xc8] sm:$0xff] %v1787_v34   ;;  %v810_v37 = vpop.f32.mrf.mxu2  ;;  %v850_v38 = vpop.f32.mrf.mxu3 }
  0xd1   : > { %v732_v39 = vpop.f32.mrf.mxu0  ;;  %v772_v40 = vpop.f32.mrf.mxu1  ;;  %v1115_v50 = vadd.f32 %v2033_v42, %v810_v37  ;;  %v1131_v51 = vadd.f32 %v2033_v42, %v850_v38 }
  0xd2   : > { %v1084_v41 = vadd.f32 %v2033_v42, %v732_v39  ;;  %v1100_v43 = vadd.f32 %v2033_v42, %v772_v40 }
  0xd3   : > { %v1179_v58 = vmax.f32 %v1115_v50, 0.0  ;;  %v1195_v59 = vmax.f32 %v1131_v51, 0.0 }
  0xd4   : > { %v1148_v46 = vmax.f32 %v1084_v41, 0.0  ;;  %v1164_v47 = vmax.f32 %v1100_v43, 0.0 }
  0xd6   : > { %v1672_v48 = vpack.c.bf16 %v1148_v46, %v1147_v44  ;;  %v1712_v49 = vpack.c.bf16 %v1164_v47, %v1163_v45 }
  0xd8   : > { %1820 = vst [vmem:[%s2044_s17 + $0x10] sm:$0xff] %v1672_v48   ;;  %v812_v52 = vpop.f32.mrf.mxu2  ;;  %v852_v53 = vpop.f32.mrf.mxu3 }
  0xd9   : > { %1828 = vst [vmem:[%s2044_s17 + $0x50] sm:$0xff] %v1712_v49   ;;  %v1116_v54 = vadd.f32 %v2033_v42, %v812_v52  ;;  %v1132_v55 = vadd.f32 %v2033_v42, %v852_v53  ;;  %v735_v56 = vpop.f32.mrf.mxu0  ;;  %v775_v57 = vpop.f32.mrf.mxu1 }
  0xda   : > { %v1085_v0 = vadd.f32 %v2033_v42, %v735_v56  ;;  %v1101_v1 = vadd.f32 %v2033_v42, %v775_v57 }
  0xdb   : > { %v1180_v60 = vmax.f32 %v1116_v54, 0.0  ;;  %v1196_v61 = vmax.f32 %v1132_v55, 0.0 }
  0xdc   : > { %v1149_v8 = vmax.f32 %v1085_v0, 0.0  ;;  %v1165_v9 = vmax.f32 %v1101_v1, 0.0 }
  0xdd   : > { %v1752_v62 = vpack.c.bf16 %v1180_v60, %v1179_v58  ;;  %v1792_v63 = vpack.c.bf16 %v1196_v61, %v1195_v59 }
  0xdf   : > { %1836 = vst [vmem:[%s2044_s17 + $0x90] sm:$0xff] %v1752_v62  }
  0xe0   : > { %1844 = vst [vmem:[%s2044_s17 + $0xd0] sm:$0xff] %v1792_v63   ;;  %v815_v2 = vpop.f32.mrf.mxu2  ;;  %v855_v3 = vpop.f32.mrf.mxu3 }
  0xe1   : > { %v737_v4 = vpop.f32.mrf.mxu0  ;;  %v777_v5 = vpop.f32.mrf.mxu1  ;;  %v1117_v14 = vadd.f32 %v2033_v42, %v815_v2  ;;  %v1133_v15 = vadd.f32 %v2033_v42, %v855_v3 }
  0xe2   : > { %v1086_v6 = vadd.f32 %v2033_v42, %v737_v4  ;;  %v1102_v7 = vadd.f32 %v2033_v42, %v777_v5 }
  0xe3   : > { %v1181_v22 = vmax.f32 %v1117_v14, 0.0  ;;  %v1197_v23 = vmax.f32 %v1133_v15, 0.0 }
  0xe4   : > { %v1150_v10 = vmax.f32 %v1086_v6, 0.0  ;;  %v1166_v11 = vmax.f32 %v1102_v7, 0.0 }
  0xe6   : > { %v1677_v12 = vpack.c.bf16 %v1150_v10, %v1149_v8  ;;  %v1717_v13 = vpack.c.bf16 %v1166_v11, %v1165_v9 }
  0xe8   : > { %1821 = vst [vmem:[%s2044_s17 + $0x18] sm:$0xff] %v1677_v12   ;;  %v817_v16 = vpop.f32.mrf.mxu2  ;;  %v857_v17 = vpop.f32.mrf.mxu3 }
  0xe9   : > { %1829 = vst [vmem:[%s2044_s17 + $0x58] sm:$0xff] %v1717_v13   ;;  %v1118_v18 = vadd.f32 %v2033_v42, %v817_v16  ;;  %v1134_v19 = vadd.f32 %v2033_v42, %v857_v17  ;;  %v740_v20 = vpop.f32.mrf.mxu0  ;;  %v780_v21 = vpop.f32.mrf.mxu1 }
  0xea   : > { %v1087_v28 = vadd.f32 %v2033_v42, %v740_v20  ;;  %v1103_v29 = vadd.f32 %v2033_v42, %v780_v21 }
  0xeb   : > { %v1182_v24 = vmax.f32 %v1118_v18, 0.0  ;;  %v1198_v25 = vmax.f32 %v1134_v19, 0.0 }
  0xec   : > { %v1151_v36 = vmax.f32 %v1087_v28, 0.0  ;;  %v1167_v37 = vmax.f32 %v1103_v29, 0.0 }
  0xed   : > { %v1757_v26 = vpack.c.bf16 %v1182_v24, %v1181_v22  ;;  %v1797_v27 = vpack.c.bf16 %v1198_v25, %v1197_v23 }
  0xef   : > { %1837 = vst [vmem:[%s2044_s17 + $0x98] sm:$0xff] %v1757_v26  }
  0xf0   : > { %1845 = vst [vmem:[%s2044_s17 + $0xd8] sm:$0xff] %v1797_v27   ;;  %v820_v30 = vpop.f32.mrf.mxu2  ;;  %v860_v31 = vpop.f32.mrf.mxu3 }
  0xf1   : > { %v742_v32 = vpop.f32.mrf.mxu0  ;;  %v782_v33 = vpop.f32.mrf.mxu1  ;;  %v1119_v43 = vadd.f32 %v2033_v42, %v820_v30  ;;  %v1135_v44 = vadd.f32 %v2033_v42, %v860_v31 }
  0xf2   : > { %v1088_v34 = vadd.f32 %v2033_v42, %v742_v32  ;;  %v1104_v35 = vadd.f32 %v2033_v42, %v782_v33 }
  0xf3   : > { %v1183_v51 = vmax.f32 %v1119_v43, 0.0  ;;  %v1199_v52 = vmax.f32 %v1135_v44, 0.0 }
  0xf4   : > { %v1152_v38 = vmax.f32 %v1088_v34, 0.0  ;;  %v1168_v39 = vmax.f32 %v1104_v35, 0.0 }
  0xf6   : > { %v1682_v40 = vpack.c.bf16 %v1152_v38, %v1151_v36  ;;  %v1722_v41 = vpack.c.bf16 %v1168_v39, %v1167_v37 }
  0xf8   : > { %1822 = vst [vmem:[%s2044_s17 + $0x20] sm:$0xff] %v1682_v40   ;;  %v822_v45 = vpop.f32.mrf.mxu2  ;;  %v862_v46 = vpop.f32.mrf.mxu3 }
  0xf9   : > { %1830 = vst [vmem:[%s2044_s17 + $0x60] sm:$0xff] %v1722_v41   ;;  %v1120_v47 = vadd.f32 %v2033_v42, %v822_v45  ;;  %v1136_v48 = vadd.f32 %v2033_v42, %v862_v46  ;;  %v745_v49 = vpop.f32.mrf.mxu0  ;;  %v785_v50 = vpop.f32.mrf.mxu1 }
  0xfa   : > { %v1089_v57 = vadd.f32 %v2033_v42, %v745_v49  ;;  %v1105_v58 = vadd.f32 %v2033_v42, %v785_v50 }
  0xfb   : > { %v1184_v53 = vmax.f32 %v1120_v47, 0.0  ;;  %v1200_v54 = vmax.f32 %v1136_v48, 0.0 }
  0xfc   : > { %v1153_v1 = vmax.f32 %v1089_v57, 0.0  ;;  %v1169_v2 = vmax.f32 %v1105_v58, 0.0 }
  0xfd   : > { %v1762_v55 = vpack.c.bf16 %v1184_v53, %v1183_v51  ;;  %v1802_v56 = vpack.c.bf16 %v1200_v54, %v1199_v52 }
  0xff   : > { %1838 = vst [vmem:[%s2044_s17 + $0xa0] sm:$0xff] %v1762_v55  }
 0x100   : > { %1846 = vst [vmem:[%s2044_s17 + $0xe0] sm:$0xff] %v1802_v56   ;;  %v825_v59 = vpop.f32.mrf.mxu2  ;;  %v865_v60 = vpop.f32.mrf.mxu3 }
 0x101   : > { %v747_v61 = vpop.f32.mrf.mxu0  ;;  %v787_v62 = vpop.f32.mrf.mxu1  ;;  %v1121_v7 = vadd.f32 %v2033_v42, %v825_v59  ;;  %v1137_v8 = vadd.f32 %v2033_v42, %v865_v60 }
 0x102   : > { %v1090_v63 = vadd.f32 %v2033_v42, %v747_v61  ;;  %v1106_v0 = vadd.f32 %v2033_v42, %v787_v62 }
 0x103   : > { %v1185_v15 = vmax.f32 %v1121_v7, 0.0  ;;  %v1201_v16 = vmax.f32 %v1137_v8, 0.0 }
 0x104   : > { %v1154_v3 = vmax.f32 %v1090_v63, 0.0  ;;  %v1170_v4 = vmax.f32 %v1106_v0, 0.0 }
 0x106   : > { %v1687_v5 = vpack.c.bf16 %v1154_v3, %v1153_v1  ;;  %v1727_v6 = vpack.c.bf16 %v1170_v4, %v1169_v2 }
 0x108   : > { %1823 = vst [vmem:[%s2044_s17 + $0x28] sm:$0xff] %v1687_v5   ;;  %v827_v9 = vpop.f32.mrf.mxu2  ;;  %v867_v10 = vpop.f32.mrf.mxu3 }
 0x109   : > { %1831 = vst [vmem:[%s2044_s17 + $0x68] sm:$0xff] %v1727_v6   ;;  %v1122_v11 = vadd.f32 %v2033_v42, %v827_v9  ;;  %v1138_v12 = vadd.f32 %v2033_v42, %v867_v10  ;;  %v750_v13 = vpop.f32.mrf.mxu0  ;;  %v790_v14 = vpop.f32.mrf.mxu1 }
 0x10a   : > { %v1091_v21 = vadd.f32 %v2033_v42, %v750_v13  ;;  %v1107_v22 = vadd.f32 %v2033_v42, %v790_v14 }
 0x10b   : > { %v1186_v17 = vmax.f32 %v1122_v11, 0.0  ;;  %v1202_v18 = vmax.f32 %v1138_v12, 0.0 }
 0x10c   : > { %v1155_v29 = vmax.f32 %v1091_v21, 0.0  ;;  %v1171_v30 = vmax.f32 %v1107_v22, 0.0 }
 0x10d   : > { %v1767_v19 = vpack.c.bf16 %v1186_v17, %v1185_v15  ;;  %v1807_v20 = vpack.c.bf16 %v1202_v18, %v1201_v16 }
 0x10f   : > { %1839 = vst [vmem:[%s2044_s17 + $0xa8] sm:$0xff] %v1767_v19  }
 0x110   : > { %1847 = vst [vmem:[%s2044_s17 + $0xe8] sm:$0xff] %v1807_v20   ;;  %v830_v23 = vpop.f32.mrf.mxu2  ;;  %v870_v24 = vpop.f32.mrf.mxu3 }
 0x111   : > { %v752_v25 = vpop.f32.mrf.mxu0  ;;  %v792_v26 = vpop.f32.mrf.mxu1  ;;  %v1123_v35 = vadd.f32 %v2033_v42, %v830_v23  ;;  %v1139_v36 = vadd.f32 %v2033_v42, %v870_v24 }
 0x112   : > { %v1092_v27 = vadd.f32 %v2033_v42, %v752_v25  ;;  %v1108_v28 = vadd.f32 %v2033_v42, %v792_v26 }
 0x113   : > { %v1187_v44 = vmax.f32 %v1123_v35, 0.0  ;;  %v1203_v45 = vmax.f32 %v1139_v36, 0.0 }
 0x114   : > { %v1156_v31 = vmax.f32 %v1092_v27, 0.0  ;;  %v1172_v32 = vmax.f32 %v1108_v28, 0.0 }
 0x116   : > { %v1692_v33 = vpack.c.bf16 %v1156_v31, %v1155_v29  ;;  %v1732_v34 = vpack.c.bf16 %v1172_v32, %v1171_v30 }
 0x118   : > { %1824 = vst [vmem:[%s2044_s17 + $0x30] sm:$0xff] %v1692_v33   ;;  %v832_v37 = vpop.f32.mrf.mxu2  ;;  %v872_v38 = vpop.f32.mrf.mxu3 }
 0x119   : > { %1832 = vst [vmem:[%s2044_s17 + $0x70] sm:$0xff] %v1732_v34   ;;  %v1124_v39 = vadd.f32 %v2033_v42, %v832_v37  ;;  %v1140_v40 = vadd.f32 %v2033_v42, %v872_v38  ;;  %v755_v41 = vpop.f32.mrf.mxu0  ;;  %v795_v43 = vpop.f32.mrf.mxu1 }
 0x11a   : > { %v1093_v50 = vadd.f32 %v2033_v42, %v755_v41  ;;  %v1109_v51 = vadd.f32 %v2033_v42, %v795_v43 }
 0x11b   : > { %v1188_v46 = vmax.f32 %v1124_v39, 0.0  ;;  %v1204_v47 = vmax.f32 %v1140_v40, 0.0 }
 0x11c   : > { %v1157_v58 = vmax.f32 %v1093_v50, 0.0  ;;  %v1173_v59 = vmax.f32 %v1109_v51, 0.0 }
 0x11d   : > { %v1772_v48 = vpack.c.bf16 %v1188_v46, %v1187_v44  ;;  %v1812_v49 = vpack.c.bf16 %v1204_v47, %v1203_v45 }
 0x11f   : > { %1840 = vst [vmem:[%s2044_s17 + $0xb0] sm:$0xff] %v1772_v48  }
 0x120   : > { %1848 = vst [vmem:[%s2044_s17 + $0xf0] sm:$0xff] %v1812_v49   ;;  %v835_v52 = vpop.f32.mrf.mxu2  ;;  %v875_v53 = vpop.f32.mrf.mxu3 }
 0x121   : > { %v757_v54 = vpop.f32.mrf.mxu0  ;;  %v797_v55 = vpop.f32.mrf.mxu1  ;;  %v1125_v0 = vadd.f32 %v2033_v42, %v835_v52  ;;  %v1141_v1 = vadd.f32 %v2033_v42, %v875_v53 }
 0x122   : > { %v1094_v56 = vadd.f32 %v2033_v42, %v757_v54  ;;  %v1110_v57 = vadd.f32 %v2033_v42, %v797_v55 }
 0x123   : > { %v1189_v6 = vmax.f32 %v1125_v0, 0.0  ;;  %v1205_v7 = vmax.f32 %v1141_v1, 0.0 }
 0x124   : > { %v1158_v60 = vmax.f32 %v1094_v56, 0.0  ;;  %v1174_v61 = vmax.f32 %v1110_v57, 0.0 }
 0x126   : > { %v1697_v62 = vpack.c.bf16 %v1158_v60, %v1157_v58  ;;  %v1737_v63 = vpack.c.bf16 %v1174_v61, %v1173_v59 }
 0x128   : > { %1825 = vst [vmem:[%s2044_s17 + $0x38] sm:$0xff] %v1697_v62   ;;  %v837_v2 = vpop.f32.mrf.mxu2  ;;  %v877_v3 = vpop.f32.mrf.mxu3 }
 0x129   : > { %1833 = vst [vmem:[%s2044_s17 + $0x78] sm:$0xff] %v1737_v63   ;;  %v1126_v4 = vadd.f32 %v2033_v42, %v837_v2  ;;  %v1142_v5 = vadd.f32 %v2033_v42, %v877_v3 }
 0x12b   : > { %v1190_v8 = vmax.f32 %v1126_v4, 0.0  ;;  %v1206_v9 = vmax.f32 %v1142_v5, 0.0 }
 0x12d   : > { %v1777_v10 = vpack.c.bf16 %v1190_v8, %v1189_v6  ;;  %v1817_v11 = vpack.c.bf16 %v1206_v9, %v1205_v7 }
 0x12f   : > { %1841 = vst [vmem:[%s2044_s17 + $0xb8] sm:$0xff] %v1777_v10  }
 0x130   : > { %1849 = vst [vmem:[%s2044_s17 + $0xf8] sm:$0xff] %v1817_v11  }
 0x131 PF: > { %s13_s14 = sadd.s32 1, %s1921_s14   ;;  %s2151_s12 = smov %s1917_s13 }
 0x132   : > { %p10_p5 = scmp.ge.s32.totalorder %s13_s14, 4   ;;  %s2152_s13 = smov %s2154_s15 }
 0x134   :  { %12 = sbr.rel (!%p10_p5) target bundleno = 2 (0x2), region = 76 }

// kernel: cnn_lstm_forward.5
= control target key start
LH: loop header
LB: loop body
LE: loop exit
PB: predicated region body
PF: predicated region fallthrough
CT: control target
= control target key end

     0   :  { %s7640_s0 = inlined_call_operand.vmem [shape: bf16[16,8192], index: 0, kind: input, shape index: {}]   ;;  %s7641_s1 = inlined_call_operand.vmem [shape: bf16[8192,512], index: 1, kind: input, shape index: {}]   ;;  %s7642_s2 = inlined_call_operand.vmem [shape: f32[1,512], index: 2, kind: input, shape index: {}]   ;;  %s7643_s3 = inlined_call_operand.vmem [shape: bf16[16,512], index: 3, kind: output, shape index: {}]  }
   0x1   :  { %7645 = sst [smem:[#allocation7_spill]] %s7640_s0 }
   0x2   :  { %7646 = sst [smem:[#allocation8_spill]] %s7641_s1 }
   0x3   :  { %s6280_s12 = smov 0   ;;  %s6282_s13 = smov 0  }
   0x4   :  { %s6284_s14 = smov 0   ;;  %s6286_s15 = smov 0  }
   0x5   :  { %s6288_s16 = smov 0   ;;  %s6290_s17 = smov 0  }
   0x6   :  { %s6292_s18 = smov 0   ;;  %s6294_s19 = smov 0  }
   0x7   :  { %s6296_s20 = smov 0   ;;  %s6298_s21 = smov 0  }
   0x8   :  { %s6300_s22 = smov 0  }
   0x9 LB: > { %s4695_s23 = sadd.s32 4294967295, %s6257_s22   ;;  %s25_s24 = sadd.s32 1, %s6249_s20  ;;  %s6257_s22 = sphi %s6300_s22, %s13_s22   ;;  %s6253_s21 = sphi %s6298_s21, %s7663_s21   ;;  %s6249_s20 = sphi %s6296_s20, %s7662_s20   ;;  %s6245_s19 = sphi %s6294_s19, %s7661_s19   ;;  %s6241_s18 = sphi %s6292_s18, %s7660_s18   ;;  %s6237_s17 = sphi %s6290_s17, %s7659_s17   ;;  %s6233_s16 = sphi %s6288_s16, %s7658_s16   ;;  %s6229_s15 = sphi %s6286_s15, %s7657_s15   ;;  %s6225_s14 = sphi %s6284_s14, %s7656_s14   ;;  %s6221_s13 = sphi %s6282_s13, %s7655_s13   ;;  %s6217_s12 = sphi %s6280_s12, %s7654_s12  }
   0xa   : > { %p26_p0 = scmp.ge.s32.totalorder %s25_s24, 4  ;;  %s28_s25 = sadd.s32 1, %s6253_s21 }
   0xb   : > { %s41_s26 = sadd.s32 1, %s6237_s17  ;;  %p48_p1 = scmp.ne.s32.totalorder %s6237_s17, %s6233_s16 }
   0xc   : > { %s7665_s24 = smov (%p26_p0, %s25_s24), 0  ;;  %s7667_s25 = smov (!%p26_p0, %s28_s25), %s6253_s21 }
   0xd   : > { %s37_s27 = ssub.s32 %s6249_s20, %s7665_s24  ;;  %p49_p2 = scmp.eq.s32.totalorder %s6257_s22, 0 }
   0xe   : > { %p30_p3 = scmp.ge.s32.totalorder %s7667_s25, 2  ;;  %p39_p4 = scmp.eq.s32.totalorder %s37_s27, 0 }
   0xf   : > { %p6347_p5 = por %p49_p2, %p48_p1  ;;  %s69_s29 = sadd.s32 1, %s6229_s15 }
  0x10   : > { %s7669_s25 = smov (%p30_p3, %s7667_s25), 0  ;;  %p76_p6 = scmp.ne.s32.totalorder %s6229_s15, %s6225_s14 }
  0x11   : > { %7648 = sst [smem:[#allocation6_spill]] %s7669_s25  ;;  %s65_s4 = ssub.s32 %s6253_s21, %s7669_s25 }
  0x12   : > { %s6355_s30 = scalar_select %p39_p4, %s6237_s17, %s41_s26  }
  0x13   : > { %s66_s5 = sor.u32 %s65_s4, %s37_s27  ;;  %p121_p7 = scmp.eq.s32.totalorder %s65_s4, 0 }
  0x14   : > { %p67_p8 = scmp.eq.s32.totalorder %s66_s5, 0  ;;  %p6361_p9 = por %p76_p6, %p49_p2 }
  0x15   : > { %s123_s7 = sadd.s32 1, %s6221_s13  ;;  %p133_p10 = scmp.ne.s32.totalorder %s6221_s13, %s6217_s12 }
  0x16   : > { %s6369_s8 = scalar_select %p67_p8, %s6229_s15, %s69_s29  }
  0x17   : > { %s6372_s9 = scalar_select %p121_p7, %s6221_s13, %s123_s7  }
  0x18   : > { %p134_p11 = scmp.eq.s32.totalorder %s4695_s23, 7  ;;  %p4698_p13 = scmp.ge.s32.totalorder %s6257_s22, 8 }
  0x1a   : > { %p6374_p12 = por %p134_p11, %p133_p10  ;;  %156 = sbr.rel (%p4698_p13) target bundleno = 323 (0x143), region = 16 }
  0x1f   : > { %159 = sbr.rel (!%p6347_p5) target bundleno = 57 (0x39), region = 20  ;;  %s161_s11 = sand.u32 (%p6347_p5), 1, %s6237_s17  }
  0x20   : > { %s5807_s26 = sshll.u32 (%p6347_p5), %s6249_s20, 6  ;;  %s4699_s27 = sshll.u32 (%p6347_p5), %s161_s11, 7 }
  0x21   : > { %s7651_s0 = sld [smem:[#allocation7_spill]] (%p6347_p5)  ;;  %s163_s23 = scalar_lea.vmem (%p6347_p5), [#allocation3], %s4699_s27 }
  0x27   : > { %s6386_s5 = scalar_lea.vmem %s7651_s0, %s5807_s26 }
  0x28   : > { %v182_v0 = vld [vmem:[%s6386_s5] sm:$0xff]  ;;  %v184_v1 = vld [vmem:[%s6386_s5 + $0x8] sm:$0xff]  ;;  %v186_v2 = vld [vmem:[%s6386_s5 + $0x10] sm:$0xff] }
  0x29   : > { %183 = vst [vmem:[%s163_s23] sm:$0xff] %v182_v0  ;;  %v188_v3 = vld [vmem:[%s6386_s5 + $0x18] sm:$0xff]  ;;  %v190_v4 = vld [vmem:[%s6386_s5 + $0x20] sm:$0xff]  ;;  %v192_v5 = vld [vmem:[%s6386_s5 + $0x28] sm:$0xff] }
  0x2a   : > { %185 = vst [vmem:[%s163_s23 + $0x8] sm:$0xff] %v184_v1  ;;  %v194_v6 = vld [vmem:[%s6386_s5 + $0x30] sm:$0xff]  ;;  %v196_v7 = vld [vmem:[%s6386_s5 + $0x38] sm:$0xff]  ;;  %v198_v8 = vld [vmem:[%s6386_s5 + $0x100] sm:$0xff] }
  0x2b   : > { %187 = vst [vmem:[%s163_s23 + $0x10] sm:$0xff] %v186_v2  ;;  %v200_v9 = vld [vmem:[%s6386_s5 + $0x108] sm:$0xff]  ;;  %v202_v10 = vld [vmem:[%s6386_s5 + $0x110] sm:$0xff]  ;;  %v204_v11 = vld [vmem:[%s6386_s5 + $0x118] sm:$0xff] }
  0x2c   : > { %189 = vst [vmem:[%s163_s23 + $0x18] sm:$0xff] %v188_v3  ;;  %v206_v12 = vld [vmem:[%s6386_s5 + $0x120] sm:$0xff]  ;;  %v208_v13 = vld [vmem:[%s6386_s5 + $0x128] sm:$0xff]  ;;  %v210_v14 = vld [vmem:[%s6386_s5 + $0x130] sm:$0xff] }
  0x2d   : > { %191 = vst [vmem:[%s163_s23 + $0x20] sm:$0xff] %v190_v4  ;;  %v212_v15 = vld [vmem:[%s6386_s5 + $0x138] sm:$0xff] }
  0x2e   : > { %193 = vst [vmem:[%s163_s23 + $0x28] sm:$0xff] %v192_v5 }
  0x2f   : > { %195 = vst [vmem:[%s163_s23 + $0x30] sm:$0xff] %v194_v6 }
  0x30   : > { %197 = vst [vmem:[%s163_s23 + $0x38] sm:$0xff] %v196_v7 }
  0x31   : > { %199 = vst [vmem:[%s163_s23 + $0x40] sm:$0xff] %v198_v8 }
  0x32   : > { %201 = vst [vmem:[%s163_s23 + $0x48] sm:$0xff] %v200_v9 }
  0x33   : > { %203 = vst [vmem:[%s163_s23 + $0x50] sm:$0xff] %v202_v10 }
  0x34   : > { %205 = vst [vmem:[%s163_s23 + $0x58] sm:$0xff] %v204_v11 }
  0x35   : > { %207 = vst [vmem:[%s163_s23 + $0x60] sm:$0xff] %v206_v12 }
  0x36   : > { %209 = vst [vmem:[%s163_s23 + $0x68] sm:$0xff] %v208_v13 }
  0x37   : > { %211 = vst [vmem:[%s163_s23 + $0x70] sm:$0xff] %v210_v14 }
  0x38   : > { %213 = vst [vmem:[%s163_s23 + $0x78] sm:$0xff] %v212_v15 }
  0x39 PF: > { %219 = sbr.rel (!%p6361_p9) target bundleno = 323 (0x143), region = 43  ;;  %s221_s28 = sand.u32 (%p6361_p9), 1, %s6229_s15  }
  0x3a   : > { %s4704_s7 = sshll.u32 (%p6361_p9), %s6253_s21, 1  ;;  %s4702_s11 = sshll.u32 (%p6361_p9), %s221_s28, 11 }
  0x3b   : > { %s5808_s26 = sshll.u32 (%p6361_p9), %s6249_s20, 10  ;;  %s7652_s1 = sld [smem:[#allocation8_spill]] (%p6361_p9) }
  0x3c   : > { %s227_s27 = sadd.s32 (%p6361_p9), %s5808_s26, %s4704_s7  ;;  %s6417_s6 = scalar_lea.vmem (%p6361_p9), [#allocation4], %s4702_s11 }
  0x3d   : > { %s4706_s29 = sshll.u32 (%p6361_p9), %s227_s27, 2 }
  0x41   : > { %s6412_s5 = scalar_lea.vmem %s7652_s1, %s4706_s29 }
  0x42   : > { %v769_v16 = vld [vmem:[%s6412_s5] sm:$0xff]  ;;  %v771_v17 = vld [vmem:[%s6412_s5 + $0x10] sm:$0xff] }
  0x43   : > { %v773_v18 = vld [vmem:[%s6412_s5 + $0x20] sm:$0xff]  ;;  %770 = vst [vmem:[%s6417_s6] sm:$0xff] %v769_v16  ;;  %v775_v19 = vld [vmem:[%s6412_s5 + $0x30] sm:$0xff] }
  0x44   : > { %772 = vst [vmem:[%s6417_s6 + $0x8] sm:$0xff] %v771_v17  ;;  %v777_v20 = vld [vmem:[%s6412_s5 + $0x40] sm:$0xff]  ;;  %v779_v21 = vld [vmem:[%s6412_s5 + $0x50] sm:$0xff] }
  0x45   : > { %774 = vst [vmem:[%s6417_s6 + $0x10] sm:$0xff] %v773_v18  ;;  %v781_v22 = vld [vmem:[%s6412_s5 + $0x60] sm:$0xff]  ;;  %v783_v23 = vld [vmem:[%s6412_s5 + $0x70] sm:$0xff] }
  0x46   : > { %776 = vst [vmem:[%s6417_s6 + $0x18] sm:$0xff] %v775_v19  ;;  %v785_v24 = vld [vmem:[%s6412_s5 + $0x80] sm:$0xff]  ;;  %v787_v25 = vld [vmem:[%s6412_s5 + $0x90] sm:$0xff] }
  0x47   : > { %778 = vst [vmem:[%s6417_s6 + $0x20] sm:$0xff] %v777_v20  ;;  %v789_v26 = vld [vmem:[%s6412_s5 + $0xa0] sm:$0xff]  ;;  %v791_v27 = vld [vmem:[%s6412_s5 + $0xb0] sm:$0xff] }
  0x48   : > { %780 = vst [vmem:[%s6417_s6 + $0x28] sm:$0xff] %v779_v21  ;;  %v793_v28 = vld [vmem:[%s6412_s5 + $0xc0] sm:$0xff]  ;;  %v795_v29 = vld [vmem:[%s6412_s5 + $0xd0] sm:$0xff] }
  0x49   : > { %782 = vst [vmem:[%s6417_s6 + $0x30] sm:$0xff] %v781_v22  ;;  %v797_v30 = vld [vmem:[%s6412_s5 + $0xe0] sm:$0xff]  ;;  %v799_v31 = vld [vmem:[%s6412_s5 + $0xf0] sm:$0xff] }
  0x4a   : > { %784 = vst [vmem:[%s6417_s6 + $0x38] sm:$0xff] %v783_v23  ;;  %v801_v32 = vld [vmem:[%s6412_s5 + $0x100] sm:$0xff]  ;;  %v803_v33 = vld [vmem:[%s6412_s5 + $0x110] sm:$0xff] }
  0x4b   : > { %786 = vst [vmem:[%s6417_s6 + $0x40] sm:$0xff] %v785_v24  ;;  %v805_v34 = vld [vmem:[%s6412_s5 + $0x120] sm:$0xff]  ;;  %v807_v35 = vld [vmem:[%s6412_s5 + $0x130] sm:$0xff] }
  0x4c   : > { %788 = vst [vmem:[%s6417_s6 + $0x48] sm:$0xff] %v787_v25  ;;  %v809_v36 = vld [vmem:[%s6412_s5 + $0x140] sm:$0xff]  ;;  %v811_v37 = vld [vmem:[%s6412_s5 + $0x150] sm:$0xff] }
  0x4d   : > { %790 = vst [vmem:[%s6417_s6 + $0x50] sm:$0xff] %v789_v26  ;;  %v813_v38 = vld [vmem:[%s6412_s5 + $0x160] sm:$0xff]  ;;  %v815_v39 = vld [vmem:[%s6412_s5 + $0x170] sm:$0xff] }
  0x4e   : > { %792 = vst [vmem:[%s6417_s6 + $0x58] sm:$0xff] %v791_v27  ;;  %v817_v40 = vld [vmem:[%s6412_s5 + $0x180] sm:$0xff]  ;;  %v819_v41 = vld [vmem:[%s6412_s5 + $0x190] sm:$0xff] }
  0x4f   : > { %794 = vst [vmem:[%s6417_s6 + $0x60] sm:$0xff] %v793_v28  ;;  %v821_v42 = vld [vmem:[%s6412_s5 + $0x1a0] sm:$0xff]  ;;  %v823_v43 = vld [vmem:[%s6412_s5 + $0x1b0] sm:$0xff] }
  0x50   : > { %796 = vst [vmem:[%s6417_s6 + $0x68] sm:$0xff] %v795_v29  ;;  %v825_v44 = vld [vmem:[%s6412_s5 + $0x1c0] sm:$0xff]  ;;  %v827_v45 = vld [vmem:[%s6412_s5 + $0x1d0] sm:$0xff] }
  0x51   : > { %798 = vst [vmem:[%s6417_s6 + $0x70] sm:$0xff] %v797_v30  ;;  %v829_v46 = vld [vmem:[%s6412_s5 + $0x1e0] sm:$0xff]  ;;  %v831_v47 = vld [vmem:[%s6412_s5 + $0x1f0] sm:$0xff] }
  0x52   : > { %800 = vst [vmem:[%s6417_s6 + $0x78] sm:$0xff] %v799_v31  ;;  %v833_v48 = vld [vmem:[%s6412_s5 + $0x200] sm:$0xff]  ;;  %v835_v49 = vld [vmem:[%s6412_s5 + $0x210] sm:$0xff] }
  0x53   : > { %802 = vst [vmem:[%s6417_s6 + $0x80] sm:$0xff] %v801_v32  ;;  %v837_v50 = vld [vmem:[%s6412_s5 + $0x220] sm:$0xff]  ;;  %v839_v51 = vld [vmem:[%s6412_s5 + $0x230] sm:$0xff] }
  0x54   : > { %804 = vst [vmem:[%s6417_s6 + $0x88] sm:$0xff] %v803_v33  ;;  %v841_v52 = vld [vmem:[%s6412_s5 + $0x240] sm:$0xff]  ;;  %v843_v53 = vld [vmem:[%s6412_s5 + $0x250] sm:$0xff] }
  0x55   : > { %806 = vst [vmem:[%s6417_s6 + $0x90] sm:$0xff] %v805_v34  ;;  %v845_v54 = vld [vmem:[%s6412_s5 + $0x260] sm:$0xff]  ;;  %v847_v55 = vld [vmem:[%s6412_s5 + $0x270] sm:$0xff] }
  0x56   : > { %808 = vst [vmem:[%s6417_s6 + $0x98] sm:$0xff] %v807_v35  ;;  %v849_v56 = vld [vmem:[%s6412_s5 + $0x280] sm:$0xff]  ;;  %v851_v57 = vld [vmem:[%s6412_s5 + $0x290] sm:$0xff] }
  0x57   : > { %810 = vst [vmem:[%s6417_s6 + $0xa0] sm:$0xff] %v809_v36  ;;  %v853_v58 = vld [vmem:[%s6412_s5 + $0x2a0] sm:$0xff]  ;;  %v855_v59 = vld [vmem:[%s6412_s5 + $0x2b0] sm:$0xff] }
  0x58   : > { %812 = vst [vmem:[%s6417_s6 + $0xa8] sm:$0xff] %v811_v37  ;;  %v857_v60 = vld [vmem:[%s6412_s5 + $0x2c0] sm:$0xff]  ;;  %v859_v61 = vld [vmem:[%s6412_s5 + $0x2d0] sm:$0xff] }
  0x59   : > { %814 = vst [vmem:[%s6417_s6 + $0xb0] sm:$0xff] %v813_v38  ;;  %v861_v62 = vld [vmem:[%s6412_s5 + $0x2e0] sm:$0xff]  ;;  %v863_v63 = vld [vmem:[%s6412_s5 + $0x2f0] sm:$0xff] }
  0x5a   : > { %816 = vst [vmem:[%s6417_s6 + $0xb8] sm:$0xff] %v815_v39  ;;  %v865_v0 = vld [vmem:[%s6412_s5 + $0x300] sm:$0xff]  ;;  %v867_v1 = vld [vmem:[%s6412_s5 + $0x310] sm:$0xff] }
  0x5b   : > { %818 = vst [vmem:[%s6417_s6 + $0xc0] sm:$0xff] %v817_v40  ;;  %v869_v2 = vld [vmem:[%s6412_s5 + $0x320] sm:$0xff]  ;;  %v871_v3 = vld [vmem:[%s6412_s5 + $0x330] sm:$0xff] }
  0x5c   : > { %820 = vst [vmem:[%s6417_s6 + $0xc8] sm:$0xff] %v819_v41  ;;  %v873_v4 = vld [vmem:[%s6412_s5 + $0x340] sm:$0xff]  ;;  %v875_v5 = vld [vmem:[%s6412_s5 + $0x350] sm:$0xff] }
  0x5d   : > { %822 = vst [vmem:[%s6417_s6 + $0xd0] sm:$0xff] %v821_v42  ;;  %v877_v6 = vld [vmem:[%s6412_s5 + $0x360] sm:$0xff]  ;;  %v879_v7 = vld [vmem:[%s6412_s5 + $0x370] sm:$0xff] }
  0x5e   : > { %824 = vst [vmem:[%s6417_s6 + $0xd8] sm:$0xff] %v823_v43  ;;  %v881_v8 = vld [vmem:[%s6412_s5 + $0x380] sm:$0xff]  ;;  %v883_v9 = vld [vmem:[%s6412_s5 + $0x390] sm:$0xff] }
  0x5f   : > { %826 = vst [vmem:[%s6417_s6 + $0xe0] sm:$0xff] %v825_v44  ;;  %v885_v10 = vld [vmem:[%s6412_s5 + $0x3a0] sm:$0xff]  ;;  %v887_v11 = vld [vmem:[%s6412_s5 + $0x3b0] sm:$0xff] }
  0x60   : > { %828 = vst [vmem:[%s6417_s6 + $0xe8] sm:$0xff] %v827_v45  ;;  %v889_v12 = vld [vmem:[%s6412_s5 + $0x3c0] sm:$0xff]  ;;  %v891_v13 = vld [vmem:[%s6412_s5 + $0x3d0] sm:$0xff] }
  0x61   : > { %830 = vst [vmem:[%s6417_s6 + $0xf0] sm:$0xff] %v829_v46  ;;  %v893_v14 = vld [vmem:[%s6412_s5 + $0x3e0] sm:$0xff]  ;;  %v895_v15 = vld [vmem:[%s6412_s5 + $0x3f0] sm:$0xff] }
  0x62   : > { %832 = vst [vmem:[%s6417_s6 + $0xf8] sm:$0xff] %v831_v47  ;;  %v897_v16 = vld [vmem:[%s6412_s5 + $0x400] sm:$0xff]  ;;  %v899_v17 = vld [vmem:[%s6412_s5 + $0x410] sm:$0xff] }
  0x63   : > { %834 = vst [vmem:[%s6417_s6 + $0x100] sm:$0xff] %v833_v48  ;;  %v901_v18 = vld [vmem:[%s6412_s5 + $0x420] sm:$0xff]  ;;  %v903_v19 = vld [vmem:[%s6412_s5 + $0x430] sm:$0xff] }
  0x64   : > { %836 = vst [vmem:[%s6417_s6 + $0x108] sm:$0xff] %v835_v49  ;;  %v905_v20 = vld [vmem:[%s6412_s5 + $0x440] sm:$0xff]  ;;  %v907_v21 = vld [vmem:[%s6412_s5 + $0x450] sm:$0xff] }
  0x65   : > { %838 = vst [vmem:[%s6417_s6 + $0x110] sm:$0xff] %v837_v50  ;;  %v909_v22 = vld [vmem:[%s6412_s5 + $0x460] sm:$0xff]  ;;  %v911_v23 = vld [vmem:[%s6412_s5 + $0x470] sm:$0xff] }
  0x66   : > { %840 = vst [vmem:[%s6417_s6 + $0x118] sm:$0xff] %v839_v51  ;;  %v913_v24 = vld [vmem:[%s6412_s5 + $0x480] sm:$0xff]  ;;  %v915_v25 = vld [vmem:[%s6412_s5 + $0x490] sm:$0xff] }
  0x67   : > { %842 = vst [vmem:[%s6417_s6 + $0x120] sm:$0xff] %v841_v52  ;;  %v917_v26 = vld [vmem:[%s6412_s5 + $0x4a0] sm:$0xff]  ;;  %v919_v27 = vld [vmem:[%s6412_s5 + $0x4b0] sm:$0xff] }
  0x68   : > { %844 = vst [vmem:[%s6417_s6 + $0x128] sm:$0xff] %v843_v53  ;;  %v921_v28 = vld [vmem:[%s6412_s5 + $0x4c0] sm:$0xff]  ;;  %v923_v29 = vld [vmem:[%s6412_s5 + $0x4d0] sm:$0xff] }
  0x69   : > { %846 = vst [vmem:[%s6417_s6 + $0x130] sm:$0xff] %v845_v54  ;;  %v925_v30 = vld [vmem:[%s6412_s5 + $0x4e0] sm:$0xff]  ;;  %v927_v31 = vld [vmem:[%s6412_s5 + $0x4f0] sm:$0xff] }
  0x6a   : > { %848 = vst [vmem:[%s6417_s6 + $0x138] sm:$0xff] %v847_v55  ;;  %v929_v32 = vld [vmem:[%s6412_s5 + $0x500] sm:$0xff]  ;;  %v931_v33 = vld [vmem:[%s6412_s5 + $0x510] sm:$0xff] }
  0x6b   : > { %850 = vst [vmem:[%s6417_s6 + $0x140] sm:$0xff] %v849_v56  ;;  %v933_v34 = vld [vmem:[%s6412_s5 + $0x520] sm:$0xff]  ;;  %v935_v35 = vld [vmem:[%s6412_s5 + $0x530] sm:$0xff] }
  0x6c   : > { %852 = vst [vmem:[%s6417_s6 + $0x148] sm:$0xff] %v851_v57  ;;  %v937_v36 = vld [vmem:[%s6412_s5 + $0x540] sm:$0xff]  ;;  %v939_v37 = vld [vmem:[%s6412_s5 + $0x550] sm:$0xff] }
  0x6d   : > { %854 = vst [vmem:[%s6417_s6 + $0x150] sm:$0xff] %v853_v58  ;;  %v941_v38 = vld [vmem:[%s6412_s5 + $0x560] sm:$0xff]  ;;  %v943_v39 = vld [vmem:[%s6412_s5 + $0x570] sm:$0xff] }
  0x6e   : > { %856 = vst [vmem:[%s6417_s6 + $0x158] sm:$0xff] %v855_v59  ;;  %v945_v40 = vld [vmem:[%s6412_s5 + $0x580] sm:$0xff]  ;;  %v947_v41 = vld [vmem:[%s6412_s5 + $0x590] sm:$0xff] }
  0x6f   : > { %858 = vst [vmem:[%s6417_s6 + $0x160] sm:$0xff] %v857_v60  ;;  %v949_v42 = vld [vmem:[%s6412_s5 + $0x5a0] sm:$0xff]  ;;  %v951_v43 = vld [vmem:[%s6412_s5 + $0x5b0] sm:$0xff] }
  0x70   : > { %860 = vst [vmem:[%s6417_s6 + $0x168] sm:$0xff] %v859_v61  ;;  %v953_v44 = vld [vmem:[%s6412_s5 + $0x5c0] sm:$0xff]  ;;  %v955_v45 = vld [vmem:[%s6412_s5 + $0x5d0] sm:$0xff] }
  0x71   : > { %862 = vst [vmem:[%s6417_s6 + $0x170] sm:$0xff] %v861_v62  ;;  %v957_v46 = vld [vmem:[%s6412_s5 + $0x5e0] sm:$0xff]  ;;  %v959_v47 = vld [vmem:[%s6412_s5 + $0x5f0] sm:$0xff] }
  0x72   : > { %864 = vst [vmem:[%s6417_s6 + $0x178] sm:$0xff] %v863_v63  ;;  %v961_v48 = vld [vmem:[%s6412_s5 + $0x600] sm:$0xff]  ;;  %v963_v49 = vld [vmem:[%s6412_s5 + $0x610] sm:$0xff] }
  0x73   : > { %866 = vst [vmem:[%s6417_s6 + $0x180] sm:$0xff] %v865_v0  ;;  %v965_v50 = vld [vmem:[%s6412_s5 + $0x620] sm:$0xff]  ;;  %v967_v51 = vld [vmem:[%s6412_s5 + $0x630] sm:$0xff] }
  0x74   : > { %868 = vst [vmem:[%s6417_s6 + $0x188] sm:$0xff] %v867_v1  ;;  %v969_v52 = vld [vmem:[%s6412_s5 + $0x640] sm:$0xff]  ;;  %v971_v53 = vld [vmem:[%s6412_s5 + $0x650] sm:$0xff] }
  0x75   : > { %870 = vst [vmem:[%s6417_s6 + $0x190] sm:$0xff] %v869_v2  ;;  %v973_v54 = vld [vmem:[%s6412_s5 + $0x660] sm:$0xff]  ;;  %v975_v55 = vld [vmem:[%s6412_s5 + $0x670] sm:$0xff] }
  0x76   : > { %872 = vst [vmem:[%s6417_s6 + $0x198] sm:$0xff] %v871_v3  ;;  %v977_v56 = vld [vmem:[%s6412_s5 + $0x680] sm:$0xff]  ;;  %v979_v57 = vld [vmem:[%s6412_s5 + $0x690] sm:$0xff] }
  0x77   : > { %874 = vst [vmem:[%s6417_s6 + $0x1a0] sm:$0xff] %v873_v4  ;;  %v981_v58 = vld [vmem:[%s6412_s5 + $0x6a0] sm:$0xff]  ;;  %v983_v59 = vld [vmem:[%s6412_s5 + $0x6b0] sm:$0xff] }
  0x78   : > { %876 = vst [vmem:[%s6417_s6 + $0x1a8] sm:$0xff] %v875_v5  ;;  %v985_v60 = vld [vmem:[%s6412_s5 + $0x6c0] sm:$0xff]  ;;  %v987_v61 = vld [vmem:[%s6412_s5 + $0x6d0] sm:$0xff] }
  0x79   : > { %878 = vst [vmem:[%s6417_s6 + $0x1b0] sm:$0xff] %v877_v6  ;;  %v989_v62 = vld [vmem:[%s6412_s5 + $0x6e0] sm:$0xff]  ;;  %v991_v63 = vld [vmem:[%s6412_s5 + $0x6f0] sm:$0xff] }
  0x7a   : > { %880 = vst [vmem:[%s6417_s6 + $0x1b8] sm:$0xff] %v879_v7  ;;  %v993_v0 = vld [vmem:[%s6412_s5 + $0x700] sm:$0xff]  ;;  %v995_v1 = vld [vmem:[%s6412_s5 + $0x710] sm:$0xff] }
  0x7b   : > { %882 = vst [vmem:[%s6417_s6 + $0x1c0] sm:$0xff] %v881_v8  ;;  %v997_v2 = vld [vmem:[%s6412_s5 + $0x720] sm:$0xff]  ;;  %v999_v3 = vld [vmem:[%s6412_s5 + $0x730] sm:$0xff] }
  0x7c   : > { %884 = vst [vmem:[%s6417_s6 + $0x1c8] sm:$0xff] %v883_v9  ;;  %v1001_v4 = vld [vmem:[%s6412_s5 + $0x740] sm:$0xff]  ;;  %v1003_v5 = vld [vmem:[%s6412_s5 + $0x750] sm:$0xff] }
  0x7d   : > { %886 = vst [vmem:[%s6417_s6 + $0x1d0] sm:$0xff] %v885_v10  ;;  %v1005_v6 = vld [vmem:[%s6412_s5 + $0x760] sm:$0xff]  ;;  %v1007_v7 = vld [vmem:[%s6412_s5 + $0x770] sm:$0xff] }
  0x7e   : > { %888 = vst [vmem:[%s6417_s6 + $0x1d8] sm:$0xff] %v887_v11  ;;  %v1009_v8 = vld [vmem:[%s6412_s5 + $0x780] sm:$0xff]  ;;  %v1011_v9 = vld [vmem:[%s6412_s5 + $0x790] sm:$0xff] }
  0x7f   : > { %890 = vst [vmem:[%s6417_s6 + $0x1e0] sm:$0xff] %v889_v12  ;;  %v1013_v10 = vld [vmem:[%s6412_s5 + $0x7a0] sm:$0xff]  ;;  %v1015_v11 = vld [vmem:[%s6412_s5 + $0x7b0] sm:$0xff] }
  0x80   : > { %892 = vst [vmem:[%s6417_s6 + $0x1e8] sm:$0xff] %v891_v13  ;;  %v1017_v12 = vld [vmem:[%s6412_s5 + $0x7c0] sm:$0xff]  ;;  %v1019_v13 = vld [vmem:[%s6412_s5 + $0x7d0] sm:$0xff] }
  0x81   : > { %894 = vst [vmem:[%s6417_s6 + $0x1f0] sm:$0xff] %v893_v14  ;;  %v1021_v14 = vld [vmem:[%s6412_s5 + $0x7e0] sm:$0xff] }
  0x82   : > { %896 = vst [vmem:[%s6417_s6 + $0x1f8] sm:$0xff] %v895_v15  ;;  %v1023_v15 = vld [vmem:[%s6412_s5 + $0x7f0] sm:$0xff] }
  0x83   : > { %898 = vst [vmem:[%s6417_s6 + $0x200] sm:$0xff] %v897_v16  ;;  %v1025_v16 = vld [vmem:[%s6412_s5 + $0x800] sm:$0xff] }
  0x84   : > { %900 = vst [vmem:[%s6417_s6 + $0x208] sm:$0xff] %v899_v17  ;;  %v1027_v17 = vld [vmem:[%s6412_s5 + $0x810] sm:$0xff] }
  0x85   : > { %902 = vst [vmem:[%s6417_s6 + $0x210] sm:$0xff] %v901_v18  ;;  %v1029_v18 = vld [vmem:[%s6412_s5 + $0x820] sm:$0xff] }
  0x86   : > { %904 = vst [vmem:[%s6417_s6 + $0x218] sm:$0xff] %v903_v19  ;;  %v1031_v19 = vld [vmem:[%s6412_s5 + $0x830] sm:$0xff] }
  0x87   : > { %906 = vst [vmem:[%s6417_s6 + $0x220] sm:$0xff] %v905_v20  ;;  %v1033_v20 = vld [vmem:[%s6412_s5 + $0x840] sm:$0xff] }
  0x88   : > { %908 = vst [vmem:[%s6417_s6 + $0x228] sm:$0xff] %v907_v21  ;;  %v1035_v21 = vld [vmem:[%s6412_s5 + $0x850] sm:$0xff] }
  0x89   : > { %910 = vst [vmem:[%s6417_s6 + $0x230] sm:$0xff] %v909_v22  ;;  %v1037_v22 = vld [vmem:[%s6412_s5 + $0x860] sm:$0xff] }
  0x8a   : > { %912 = vst [vmem:[%s6417_s6 + $0x238] sm:$0xff] %v911_v23  ;;  %v1039_v23 = vld [vmem:[%s6412_s5 + $0x870] sm:$0xff] }
  0x8b   : > { %914 = vst [vmem:[%s6417_s6 + $0x240] sm:$0xff] %v913_v24  ;;  %v1041_v24 = vld [vmem:[%s6412_s5 + $0x880] sm:$0xff] }
  0x8c   : > { %916 = vst [vmem:[%s6417_s6 + $0x248] sm:$0xff] %v915_v25  ;;  %v1043_v25 = vld [vmem:[%s6412_s5 + $0x890] sm:$0xff] }
  0x8d   : > { %918 = vst [vmem:[%s6417_s6 + $0x250] sm:$0xff] %v917_v26  ;;  %v1045_v26 = vld [vmem:[%s6412_s5 + $0x8a0] sm:$0xff] }
  0x8e   : > { %920 = vst [vmem:[%s6417_s6 + $0x258] sm:$0xff] %v919_v27  ;;  %v1047_v27 = vld [vmem:[%s6412_s5 + $0x8b0] sm:$0xff] }
  0x8f   : > { %922 = vst [vmem:[%s6417_s6 + $0x260] sm:$0xff] %v921_v28  ;;  %v1049_v28 = vld [vmem:[%s6412_s5 + $0x8c0] sm:$0xff] }
  0x90   : > { %924 = vst [vmem:[%s6417_s6 + $0x268] sm:$0xff] %v923_v29  ;;  %v1051_v29 = vld [vmem:[%s6412_s5 + $0x8d0] sm:$0xff] }
  0x91   : > { %926 = vst [vmem:[%s6417_s6 + $0x270] sm:$0xff] %v925_v30  ;;  %v1053_v30 = vld [vmem:[%s6412_s5 + $0x8e0] sm:$0xff] }
  0x92   : > { %928 = vst [vmem:[%s6417_s6 + $0x278] sm:$0xff] %v927_v31  ;;  %v1055_v31 = vld [vmem:[%s6412_s5 + $0x8f0] sm:$0xff] }
  0x93   : > { %930 = vst [vmem:[%s6417_s6 + $0x280] sm:$0xff] %v929_v32  ;;  %v1057_v32 = vld [vmem:[%s6412_s5 + $0x900] sm:$0xff] }
  0x94   : > { %932 = vst [vmem:[%s6417_s6 + $0x288] sm:$0xff] %v931_v33  ;;  %v1059_v33 = vld [vmem:[%s6412_s5 + $0x910] sm:$0xff] }
  0x95   : > { %934 = vst [vmem:[%s6417_s6 + $0x290] sm:$0xff] %v933_v34  ;;  %v1061_v34 = vld [vmem:[%s6412_s5 + $0x920] sm:$0xff] }
  0x96   : > { %936 = vst [vmem:[%s6417_s6 + $0x298] sm:$0xff] %v935_v35  ;;  %v1063_v35 = vld [vmem:[%s6412_s5 + $0x930] sm:$0xff] }
  0x97   : > { %938 = vst [vmem:[%s6417_s6 + $0x2a0] sm:$0xff] %v937_v36  ;;  %v1065_v36 = vld [vmem:[%s6412_s5 + $0x940] sm:$0xff] }
  0x98   : > { %940 = vst [vmem:[%s6417_s6 + $0x2a8] sm:$0xff] %v939_v37  ;;  %v1067_v37 = vld [vmem:[%s6412_s5 + $0x950] sm:$0xff] }
  0x99   : > { %942 = vst [vmem:[%s6417_s6 + $0x2b0] sm:$0xff] %v941_v38  ;;  %v1069_v38 = vld [vmem:[%s6412_s5 + $0x960] sm:$0xff] }
  0x9a   : > { %944 = vst [vmem:[%s6417_s6 + $0x2b8] sm:$0xff] %v943_v39  ;;  %v1071_v39 = vld [vmem:[%s6412_s5 + $0x970] sm:$0xff] }
  0x9b   : > { %946 = vst [vmem:[%s6417_s6 + $0x2c0] sm:$0xff] %v945_v40  ;;  %v1073_v40 = vld [vmem:[%s6412_s5 + $0x980] sm:$0xff] }
  0x9c   : > { %948 = vst [vmem:[%s6417_s6 + $0x2c8] sm:$0xff] %v947_v41  ;;  %v1075_v41 = vld [vmem:[%s6412_s5 + $0x990] sm:$0xff] }
  0x9d   : > { %950 = vst [vmem:[%s6417_s6 + $0x2d0] sm:$0xff] %v949_v42  ;;  %v1077_v42 = vld [vmem:[%s6412_s5 + $0x9a0] sm:$0xff] }
  0x9e   : > { %952 = vst [vmem:[%s6417_s6 + $0x2d8] sm:$0xff] %v951_v43  ;;  %v1079_v43 = vld [vmem:[%s6412_s5 + $0x9b0] sm:$0xff] }
  0x9f   : > { %954 = vst [vmem:[%s6417_s6 + $0x2e0] sm:$0xff] %v953_v44  ;;  %v1081_v44 = vld [vmem:[%s6412_s5 + $0x9c0] sm:$0xff] }
  0xa0   : > { %956 = vst [vmem:[%s6417_s6 + $0x2e8] sm:$0xff] %v955_v45  ;;  %v1083_v45 = vld [vmem:[%s6412_s5 + $0x9d0] sm:$0xff] }
  0xa1   : > { %958 = vst [vmem:[%s6417_s6 + $0x2f0] sm:$0xff] %v957_v46  ;;  %v1085_v46 = vld [vmem:[%s6412_s5 + $0x9e0] sm:$0xff] }
  0xa2   : > { %960 = vst [vmem:[%s6417_s6 + $0x2f8] sm:$0xff] %v959_v47  ;;  %v1087_v47 = vld [vmem:[%s6412_s5 + $0x9f0] sm:$0xff] }
  0xa3   : > { %962 = vst [vmem:[%s6417_s6 + $0x300] sm:$0xff] %v961_v48  ;;  %v1089_v48 = vld [vmem:[%s6412_s5 + $0xa00] sm:$0xff] }
  0xa4   : > { %964 = vst [vmem:[%s6417_s6 + $0x308] sm:$0xff] %v963_v49  ;;  %v1091_v49 = vld [vmem:[%s6412_s5 + $0xa10] sm:$0xff] }
  0xa5   : > { %966 = vst [vmem:[%s6417_s6 + $0x310] sm:$0xff] %v965_v50  ;;  %v1093_v50 = vld [vmem:[%s6412_s5 + $0xa20] sm:$0xff] }
  0xa6   : > { %968 = vst [vmem:[%s6417_s6 + $0x318] sm:$0xff] %v967_v51  ;;  %v1095_v51 = vld [vmem:[%s6412_s5 + $0xa30] sm:$0xff] }
  0xa7   : > { %970 = vst [vmem:[%s6417_s6 + $0x320] sm:$0xff] %v969_v52  ;;  %v1097_v52 = vld [vmem:[%s6412_s5 + $0xa40] sm:$0xff] }
  0xa8   : > { %972 = vst [vmem:[%s6417_s6 + $0x328] sm:$0xff] %v971_v53  ;;  %v1099_v53 = vld [vmem:[%s6412_s5 + $0xa50] sm:$0xff] }
  0xa9   : > { %974 = vst [vmem:[%s6417_s6 + $0x330] sm:$0xff] %v973_v54  ;;  %v1101_v54 = vld [vmem:[%s6412_s5 + $0xa60] sm:$0xff] }
  0xaa   : > { %976 = vst [vmem:[%s6417_s6 + $0x338] sm:$0xff] %v975_v55  ;;  %v1103_v55 = vld [vmem:[%s6412_s5 + $0xa70] sm:$0xff] }
  0xab   : > { %978 = vst [vmem:[%s6417_s6 + $0x340] sm:$0xff] %v977_v56  ;;  %v1105_v56 = vld [vmem:[%s6412_s5 + $0xa80] sm:$0xff] }
  0xac   : > { %980 = vst [vmem:[%s6417_s6 + $0x348] sm:$0xff] %v979_v57  ;;  %v1107_v57 = vld [vmem:[%s6412_s5 + $0xa90] sm:$0xff] }
  0xad   : > { %982 = vst [vmem:[%s6417_s6 + $0x350] sm:$0xff] %v981_v58  ;;  %v1109_v58 = vld [vmem:[%s6412_s5 + $0xaa0] sm:$0xff] }
  0xae   : > { %984 = vst [vmem:[%s6417_s6 + $0x358] sm:$0xff] %v983_v59  ;;  %v1111_v59 = vld [vmem:[%s6412_s5 + $0xab0] sm:$0xff] }
  0xaf   : > { %986 = vst [vmem:[%s6417_s6 + $0x360] sm:$0xff] %v985_v60  ;;  %v1113_v60 = vld [vmem:[%s6412_s5 + $0xac0] sm:$0xff] }
  0xb0   : > { %988 = vst [vmem:[%s6417_s6 + $0x368] sm:$0xff] %v987_v61  ;;  %v1115_v61 = vld [vmem:[%s6412_s5 + $0xad0] sm:$0xff] }
  0xb1   : > { %990 = vst [vmem:[%s6417_s6 + $0x370] sm:$0xff] %v989_v62  ;;  %v1117_v62 = vld [vmem:[%s6412_s5 + $0xae0] sm:$0xff] }
  0xb2   : > { %992 = vst [vmem:[%s6417_s6 + $0x378] sm:$0xff] %v991_v63  ;;  %v1119_v63 = vld [vmem:[%s6412_s5 + $0xaf0] sm:$0xff] }
  0xb3   : > { %994 = vst [vmem:[%s6417_s6 + $0x380] sm:$0xff] %v993_v0  ;;  %v1121_v0 = vld [vmem:[%s6412_s5 + $0xb00] sm:$0xff] }
  0xb4   : > { %996 = vst [vmem:[%s6417_s6 + $0x388] sm:$0xff] %v995_v1  ;;  %v1123_v1 = vld [vmem:[%s6412_s5 + $0xb10] sm:$0xff] }
  0xb5   : > { %998 = vst [vmem:[%s6417_s6 + $0x390] sm:$0xff] %v997_v2  ;;  %v1125_v2 = vld [vmem:[%s6412_s5 + $0xb20] sm:$0xff] }
  0xb6   : > { %1000 = vst [vmem:[%s6417_s6 + $0x398] sm:$0xff] %v999_v3  ;;  %v1127_v3 = vld [vmem:[%s6412_s5 + $0xb30] sm:$0xff] }
  0xb7   : > { %1002 = vst [vmem:[%s6417_s6 + $0x3a0] sm:$0xff] %v1001_v4  ;;  %v1129_v4 = vld [vmem:[%s6412_s5 + $0xb40] sm:$0xff] }
  0xb8   : > { %1004 = vst [vmem:[%s6417_s6 + $0x3a8] sm:$0xff] %v1003_v5  ;;  %v1131_v5 = vld [vmem:[%s6412_s5 + $0xb50] sm:$0xff] }
  0xb9   : > { %1006 = vst [vmem:[%s6417_s6 + $0x3b0] sm:$0xff] %v1005_v6  ;;  %v1133_v6 = vld [vmem:[%s6412_s5 + $0xb60] sm:$0xff] }
  0xba   : > { %1008 = vst [vmem:[%s6417_s6 + $0x3b8] sm:$0xff] %v1007_v7  ;;  %v1135_v7 = vld [vmem:[%s6412_s5 + $0xb70] sm:$0xff] }
  0xbb   : > { %1010 = vst [vmem:[%s6417_s6 + $0x3c0] sm:$0xff] %v1009_v8  ;;  %v1137_v8 = vld [vmem:[%s6412_s5 + $0xb80] sm:$0xff] }
  0xbc   : > { %1012 = vst [vmem:[%s6417_s6 + $0x3c8] sm:$0xff] %v1011_v9  ;;  %v1139_v9 = vld [vmem:[%s6412_s5 + $0xb90] sm:$0xff] }
  0xbd   : > { %1014 = vst [vmem:[%s6417_s6 + $0x3d0] sm:$0xff] %v1013_v10  ;;  %v1141_v10 = vld [vmem:[%s6412_s5 + $0xba0] sm:$0xff] }
  0xbe   : > { %1016 = vst [vmem:[%s6417_s6 + $0x3d8] sm:$0xff] %v1015_v11  ;;  %v1143_v11 = vld [vmem:[%s6412_s5 + $0xbb0] sm:$0xff] }
  0xbf   : > { %1018 = vst [vmem:[%s6417_s6 + $0x3e0] sm:$0xff] %v1017_v12  ;;  %v1145_v12 = vld [vmem:[%s6412_s5 + $0xbc0] sm:$0xff] }
  0xc0   : > { %1020 = vst [vmem:[%s6417_s6 + $0x3e8] sm:$0xff] %v1019_v13  ;;  %v1147_v13 = vld [vmem:[%s6412_s5 + $0xbd0] sm:$0xff] }
  0xc1   : > { %1022 = vst [vmem:[%s6417_s6 + $0x3f0] sm:$0xff] %v1021_v14  ;;  %v1149_v14 = vld [vmem:[%s6412_s5 + $0xbe0] sm:$0xff] }
  0xc2   : > { %1024 = vst [vmem:[%s6417_s6 + $0x3f8] sm:$0xff] %v1023_v15  ;;  %v1151_v15 = vld [vmem:[%s6412_s5 + $0xbf0] sm:$0xff] }
  0xc3   : > { %1026 = vst [vmem:[%s6417_s6 + $0x400] sm:$0xff] %v1025_v16  ;;  %v1153_v16 = vld [vmem:[%s6412_s5 + $0xc00] sm:$0xff] }
  0xc4   : > { %1028 = vst [vmem:[%s6417_s6 + $0x408] sm:$0xff] %v1027_v17  ;;  %v1155_v17 = vld [vmem:[%s6412_s5 + $0xc10] sm:$0xff] }
  0xc5   : > { %1030 = vst [vmem:[%s6417_s6 + $0x410] sm:$0xff] %v1029_v18  ;;  %v1157_v18 = vld [vmem:[%s6412_s5 + $0xc20] sm:$0xff] }
  0xc6   : > { %1032 = vst [vmem:[%s6417_s6 + $0x418] sm:$0xff] %v1031_v19  ;;  %v1159_v19 = vld [vmem:[%s6412_s5 + $0xc30] sm:$0xff] }
  0xc7   : > { %1034 = vst [vmem:[%s6417_s6 + $0x420] sm:$0xff] %v1033_v20  ;;  %v1161_v20 = vld [vmem:[%s6412_s5 + $0xc40] sm:$0xff] }
  0xc8   : > { %1036 = vst [vmem:[%s6417_s6 + $0x428] sm:$0xff] %v1035_v21  ;;  %v1163_v21 = vld [vmem:[%s6412_s5 + $0xc50] sm:$0xff] }
  0xc9   : > { %1038 = vst [vmem:[%s6417_s6 + $0x430] sm:$0xff] %v1037_v22  ;;  %v1165_v22 = vld [vmem:[%s6412_s5 + $0xc60] sm:$0xff] }
  0xca   : > { %1040 = vst [vmem:[%s6417_s6 + $0x438] sm:$0xff] %v1039_v23  ;;  %v1167_v23 = vld [vmem:[%s6412_s5 + $0xc70] sm:$0xff] }
  0xcb   : > { %1042 = vst [vmem:[%s6417_s6 + $0x440] sm:$0xff] %v1041_v24  ;;  %v1169_v24 = vld [vmem:[%s6412_s5 + $0xc80] sm:$0xff] }
  0xcc   : > { %1044 = vst [vmem:[%s6417_s6 + $0x448] sm:$0xff] %v1043_v25  ;;  %v1171_v25 = vld [vmem:[%s6412_s5 + $0xc90] sm:$0xff] }
  0xcd   : > { %1046 = vst [vmem:[%s6417_s6 + $0x450] sm:$0xff] %v1045_v26  ;;  %v1173_v26 = vld [vmem:[%s6412_s5 + $0xca0] sm:$0xff] }
  0xce   : > { %1048 = vst [vmem:[%s6417_s6 + $0x458] sm:$0xff] %v1047_v27  ;;  %v1175_v27 = vld [vmem:[%s6412_s5 + $0xcb0] sm:$0xff] }
  0xcf   : > { %1050 = vst [vmem:[%s6417_s6 + $0x460] sm:$0xff] %v1049_v28  ;;  %v1177_v28 = vld [vmem:[%s6412_s5 + $0xcc0] sm:$0xff] }
  0xd0   : > { %1052 = vst [vmem:[%s6417_s6 + $0x468] sm:$0xff] %v1051_v29  ;;  %v1179_v29 = vld [vmem:[%s6412_s5 + $0xcd0] sm:$0xff] }
  0xd1   : > { %1054 = vst [vmem:[%s6417_s6 + $0x470] sm:$0xff] %v1053_v30  ;;  %v1181_v30 = vld [vmem:[%s6412_s5 + $0xce0] sm:$0xff] }
  0xd2   : > { %1056 = vst [vmem:[%s6417_s6 + $0x478] sm:$0xff] %v1055_v31  ;;  %v1183_v31 = vld [vmem:[%s6412_s5 + $0xcf0] sm:$0xff] }
  0xd3   : > { %1058 = vst [vmem:[%s6417_s6 + $0x480] sm:$0xff] %v1057_v32  ;;  %v1185_v32 = vld [vmem:[%s6412_s5 + $0xd00] sm:$0xff] }
  0xd4   : > { %1060 = vst [vmem:[%s6417_s6 + $0x488] sm:$0xff] %v1059_v33  ;;  %v1187_v33 = vld [vmem:[%s6412_s5 + $0xd10] sm:$0xff] }
  0xd5   : > { %1062 = vst [vmem:[%s6417_s6 + $0x490] sm:$0xff] %v1061_v34  ;;  %v1189_v34 = vld [vmem:[%s6412_s5 + $0xd20] sm:$0xff] }
  0xd6   : > { %1064 = vst [vmem:[%s6417_s6 + $0x498] sm:$0xff] %v1063_v35  ;;  %v1191_v35 = vld [vmem:[%s6412_s5 + $0xd30] sm:$0xff] }
  0xd7   : > { %1066 = vst [vmem:[%s6417_s6 + $0x4a0] sm:$0xff] %v1065_v36  ;;  %v1193_v36 = vld [vmem:[%s6412_s5 + $0xd40] sm:$0xff] }
  0xd8   : > { %1068 = vst [vmem:[%s6417_s6 + $0x4a8] sm:$0xff] %v1067_v37  ;;  %v1195_v37 = vld [vmem:[%s6412_s5 + $0xd50] sm:$0xff] }
  0xd9   : > { %1070 = vst [vmem:[%s6417_s6 + $0x4b0] sm:$0xff] %v1069_v38  ;;  %v1197_v38 = vld [vmem:[%s6412_s5 + $0xd60] sm:$0xff] }
  0xda   : > { %1072 = vst [vmem:[%s6417_s6 + $0x4b8] sm:$0xff] %v1071_v39  ;;  %v1199_v39 = vld [vmem:[%s6412_s5 + $0xd70] sm:$0xff] }
  0xdb   : > { %1074 = vst [vmem:[%s6417_s6 + $0x4c0] sm:$0xff] %v1073_v40  ;;  %v1201_v40 = vld [vmem:[%s6412_s5 + $0xd80] sm:$0xff] }
  0xdc   : > { %1076 = vst [vmem:[%s6417_s6 + $0x4c8] sm:$0xff] %v1075_v41  ;;  %v1203_v41 = vld [vmem:[%s6412_s5 + $0xd90] sm:$0xff] }
  0xdd   : > { %1078 = vst [vmem:[%s6417_s6 + $0x4d0] sm:$0xff] %v1077_v42  ;;  %v1205_v42 = vld [vmem:[%s6412_s5 + $0xda0] sm:$0xff] }
  0xde   : > { %1080 = vst [vmem:[%s6417_s6 + $0x4d8] sm:$0xff] %v1079_v43  ;;  %v1207_v43 = vld [vmem:[%s6412_s5 + $0xdb0] sm:$0xff] }
  0xdf   : > { %1082 = vst [vmem:[%s6417_s6 + $0x4e0] sm:$0xff] %v1081_v44  ;;  %v1209_v44 = vld [vmem:[%s6412_s5 + $0xdc0] sm:$0xff] }
  0xe0   : > { %1084 = vst [vmem:[%s6417_s6 + $0x4e8] sm:$0xff] %v1083_v45  ;;  %v1211_v45 = vld [vmem:[%s6412_s5 + $0xdd0] sm:$0xff] }
  0xe1   : > { %1086 = vst [vmem:[%s6417_s6 + $0x4f0] sm:$0xff] %v1085_v46  ;;  %v1213_v46 = vld [vmem:[%s6412_s5 + $0xde0] sm:$0xff] }
  0xe2   : > { %1088 = vst [vmem:[%s6417_s6 + $0x4f8] sm:$0xff] %v1087_v47  ;;  %v1215_v47 = vld [vmem:[%s6412_s5 + $0xdf0] sm:$0xff] }
  0xe3   : > { %1090 = vst [vmem:[%s6417_s6 + $0x500] sm:$0xff] %v1089_v48  ;;  %v1217_v48 = vld [vmem:[%s6412_s5 + $0xe00] sm:$0xff] }
  0xe4   : > { %1092 = vst [vmem:[%s6417_s6 + $0x508] sm:$0xff] %v1091_v49  ;;  %v1219_v49 = vld [vmem:[%s6412_s5 + $0xe10] sm:$0xff] }
  0xe5   : > { %1094 = vst [vmem:[%s6417_s6 + $0x510] sm:$0xff] %v1093_v50  ;;  %v1221_v50 = vld [vmem:[%s6412_s5 + $0xe20] sm:$0xff] }
  0xe6   : > { %1096 = vst [vmem:[%s6417_s6 + $0x518] sm:$0xff] %v1095_v51  ;;  %v1223_v51 = vld [vmem:[%s6412_s5 + $0xe30] sm:$0xff] }
  0xe7   : > { %1098 = vst [vmem:[%s6417_s6 + $0x520] sm:$0xff] %v1097_v52  ;;  %v1225_v52 = vld [vmem:[%s6412_s5 + $0xe40] sm:$0xff] }
  0xe8   : > { %1100 = vst [vmem:[%s6417_s6 + $0x528] sm:$0xff] %v1099_v53  ;;  %v1227_v53 = vld [vmem:[%s6412_s5 + $0xe50] sm:$0xff] }
  0xe9   : > { %1102 = vst [vmem:[%s6417_s6 + $0x530] sm:$0xff] %v1101_v54  ;;  %v1229_v54 = vld [vmem:[%s6412_s5 + $0xe60] sm:$0xff] }
  0xea   : > { %1104 = vst [vmem:[%s6417_s6 + $0x538] sm:$0xff] %v1103_v55  ;;  %v1231_v55 = vld [vmem:[%s6412_s5 + $0xe70] sm:$0xff] }
  0xeb   : > { %1106 = vst [vmem:[%s6417_s6 + $0x540] sm:$0xff] %v1105_v56  ;;  %v1233_v56 = vld [vmem:[%s6412_s5 + $0xe80] sm:$0xff] }
  0xec   : > { %1108 = vst [vmem:[%s6417_s6 + $0x548] sm:$0xff] %v1107_v57  ;;  %v1235_v57 = vld [vmem:[%s6412_s5 + $0xe90] sm:$0xff] }
  0xed   : > { %1110 = vst [vmem:[%s6417_s6 + $0x550] sm:$0xff] %v1109_v58  ;;  %v1237_v58 = vld [vmem:[%s6412_s5 + $0xea0] sm:$0xff] }
  0xee   : > { %1112 = vst [vmem:[%s6417_s6 + $0x558] sm:$0xff] %v1111_v59  ;;  %v1239_v59 = vld [vmem:[%s6412_s5 + $0xeb0] sm:$0xff] }
  0xef   : > { %1114 = vst [vmem:[%s6417_s6 + $0x560] sm:$0xff] %v1113_v60  ;;  %v1241_v60 = vld [vmem:[%s6412_s5 + $0xec0] sm:$0xff] }
  0xf0   : > { %1116 = vst [vmem:[%s6417_s6 + $0x568] sm:$0xff] %v1115_v61  ;;  %v1243_v61 = vld [vmem:[%s6412_s5 + $0xed0] sm:$0xff] }
  0xf1   : > { %1118 = vst [vmem:[%s6417_s6 + $0x570] sm:$0xff] %v1117_v62  ;;  %v1245_v62 = vld [vmem:[%s6412_s5 + $0xee0] sm:$0xff] }
  0xf2   : > { %1120 = vst [vmem:[%s6417_s6 + $0x578] sm:$0xff] %v1119_v63  ;;  %v1247_v63 = vld [vmem:[%s6412_s5 + $0xef0] sm:$0xff] }
  0xf3   : > { %1122 = vst [vmem:[%s6417_s6 + $0x580] sm:$0xff] %v1121_v0  ;;  %v1249_v0 = vld [vmem:[%s6412_s5 + $0xf00] sm:$0xff] }
  0xf4   : > { %1124 = vst [vmem:[%s6417_s6 + $0x588] sm:$0xff] %v1123_v1  ;;  %v1251_v1 = vld [vmem:[%s6412_s5 + $0xf10] sm:$0xff] }
  0xf5   : > { %1126 = vst [vmem:[%s6417_s6 + $0x590] sm:$0xff] %v1125_v2  ;;  %v1253_v2 = vld [vmem:[%s6412_s5 + $0xf20] sm:$0xff] }
  0xf6   : > { %1128 = vst [vmem:[%s6417_s6 + $0x598] sm:$0xff] %v1127_v3  ;;  %v1255_v3 = vld [vmem:[%s6412_s5 + $0xf30] sm:$0xff] }
  0xf7   : > { %1130 = vst [vmem:[%s6417_s6 + $0x5a0] sm:$0xff] %v1129_v4  ;;  %v1257_v4 = vld [vmem:[%s6412_s5 + $0xf40] sm:$0xff] }
  0xf8   : > { %1132 = vst [vmem:[%s6417_s6 + $0x5a8] sm:$0xff] %v1131_v5  ;;  %v1259_v5 = vld [vmem:[%s6412_s5 + $0xf50] sm:$0xff] }
  0xf9   : > { %1134 = vst [vmem:[%s6417_s6 + $0x5b0] sm:$0xff] %v1133_v6  ;;  %v1261_v6 = vld [vmem:[%s6412_s5 + $0xf60] sm:$0xff] }
  0xfa   : > { %1136 = vst [vmem:[%s6417_s6 + $0x5b8] sm:$0xff] %v1135_v7  ;;  %v1263_v7 = vld [vmem:[%s6412_s5 + $0xf70] sm:$0xff] }
  0xfb   : > { %1138 = vst [vmem:[%s6417_s6 + $0x5c0] sm:$0xff] %v1137_v8  ;;  %v1265_v8 = vld [vmem:[%s6412_s5 + $0xf80] sm:$0xff] }
  0xfc   : > { %1140 = vst [vmem:[%s6417_s6 + $0x5c8] sm:$0xff] %v1139_v9  ;;  %v1267_v9 = vld [vmem:[%s6412_s5 + $0xf90] sm:$0xff] }
  0xfd   : > { %1142 = vst [vmem:[%s6417_s6 + $0x5d0] sm:$0xff] %v1141_v10  ;;  %v1269_v10 = vld [vmem:[%s6412_s5 + $0xfa0] sm:$0xff] }
  0xfe   : > { %1144 = vst [vmem:[%s6417_s6 + $0x5d8] sm:$0xff] %v1143_v11  ;;  %v1271_v11 = vld [vmem:[%s6412_s5 + $0xfb0] sm:$0xff] }
  0xff   : > { %1146 = vst [vmem:[%s6417_s6 + $0x5e0] sm:$0xff] %v1145_v12  ;;  %v1273_v12 = vld [vmem:[%s6412_s5 + $0xfc0] sm:$0xff] }
 0x100   : > { %1148 = vst [vmem:[%s6417_s6 + $0x5e8] sm:$0xff] %v1147_v13  ;;  %v1275_v13 = vld [vmem:[%s6412_s5 + $0xfd0] sm:$0xff] }
 0x101   : > { %1150 = vst [vmem:[%s6417_s6 + $0x5f0] sm:$0xff] %v1149_v14  ;;  %v1277_v14 = vld [vmem:[%s6412_s5 + $0xfe0] sm:$0xff] }
 0x102   : > { %1152 = vst [vmem:[%s6417_s6 + $0x5f8] sm:$0xff] %v1151_v15  ;;  %v1279_v15 = vld [vmem:[%s6412_s5 + $0xff0] sm:$0xff] }
 0x103   : > { %1154 = vst [vmem:[%s6417_s6 + $0x600] sm:$0xff] %v1153_v16 }
 0x104   : > { %1156 = vst [vmem:[%s6417_s6 + $0x608] sm:$0xff] %v1155_v17 }
 0x105   : > { %1158 = vst [vmem:[%s6417_s6 + $0x610] sm:$0xff] %v1157_v18 }
 0x106   : > { %1160 = vst [vmem:[%s6417_s6 + $0x618] sm:$0xff] %v1159_v19 }
 0x107   : > { %1162 = vst [vmem:[%s6417_s6 + $0x620] sm:$0xff] %v1161_v20 }
 0x108   : > { %1164 = vst [vmem:[%s6417_s6 + $0x628] sm:$0xff] %v1163_v21 }
 0x109   : > { %1166 = vst [vmem:[%s6417_s6 + $0x630] sm:$0xff] %v1165_v22 }
 0x10a   : > { %1168 = vst [vmem:[%s6417_s6 + $0x638] sm:$0xff] %v1167_v23 }
 0x10b   : > { %1170 = vst [vmem:[%s6417_s6 + $0x640] sm:$0xff] %v1169_v24 }
 0x10c   : > { %1172 = vst [vmem:[%s6417_s6 + $0x648] sm:$0xff] %v1171_v25 }
 0x10d   : > { %1174 = vst [vmem:[%s6417_s6 + $0x650] sm:$0xff] %v1173_v26 }
 0x10e   : > { %1176 = vst [vmem:[%s6417_s6 + $0x658] sm:$0xff] %v1175_v27 }
 0x10f   : > { %1178 = vst [vmem:[%s6417_s6 + $0x660] sm:$0xff] %v1177_v28 }
 0x110   : > { %1180 = vst [vmem:[%s6417_s6 + $0x668] sm:$0xff] %v1179_v29 }
 0x111   : > { %1182 = vst [vmem:[%s6417_s6 + $0x670] sm:$0xff] %v1181_v30 }
 0x112   : > { %1184 = vst [vmem:[%s6417_s6 + $0x678] sm:$0xff] %v1183_v31 }
 0x113   : > { %1186 = vst [vmem:[%s6417_s6 + $0x680] sm:$0xff] %v1185_v32 }
 0x114   : > { %1188 = vst [vmem:[%s6417_s6 + $0x688] sm:$0xff] %v1187_v33 }
 0x115   : > { %1190 = vst [vmem:[%s6417_s6 + $0x690] sm:$0xff] %v1189_v34 }
 0x116   : > { %1192 = vst [vmem:[%s6417_s6 + $0x698] sm:$0xff] %v1191_v35 }
 0x117   : > { %1194 = vst [vmem:[%s6417_s6 + $0x6a0] sm:$0xff] %v1193_v36 }
 0x118   : > { %1196 = vst [vmem:[%s6417_s6 + $0x6a8] sm:$0xff] %v1195_v37 }
 0x119   : > { %1198 = vst [vmem:[%s6417_s6 + $0x6b0] sm:$0xff] %v1197_v38 }
 0x11a   : > { %1200 = vst [vmem:[%s6417_s6 + $0x6b8] sm:$0xff] %v1199_v39 }
 0x11b   : > { %1202 = vst [vmem:[%s6417_s6 + $0x6c0] sm:$0xff] %v1201_v40 }
 0x11c   : > { %1204 = vst [vmem:[%s6417_s6 + $0x6c8] sm:$0xff] %v1203_v41 }
 0x11d   : > { %1206 = vst [vmem:[%s6417_s6 + $0x6d0] sm:$0xff] %v1205_v42 }
 0x11e   : > { %1208 = vst [vmem:[%s6417_s6 + $0x6d8] sm:$0xff] %v1207_v43 }
 0x11f   : > { %1210 = vst [vmem:[%s6417_s6 + $0x6e0] sm:$0xff] %v1209_v44 }
 0x120   : > { %1212 = vst [vmem:[%s6417_s6 + $0x6e8] sm:$0xff] %v1211_v45 }
 0x121   : > { %1214 = vst [vmem:[%s6417_s6 + $0x6f0] sm:$0xff] %v1213_v46 }
 0x122   : > { %1216 = vst [vmem:[%s6417_s6 + $0x6f8] sm:$0xff] %v1215_v47 }
 0x123   : > { %1218 = vst [vmem:[%s6417_s6 + $0x700] sm:$0xff] %v1217_v48 }
 0x124   : > { %1220 = vst [vmem:[%s6417_s6 + $0x708] sm:$0xff] %v1219_v49 }
 0x125   : > { %1222 = vst [vmem:[%s6417_s6 + $0x710] sm:$0xff] %v1221_v50 }
 0x126   : > { %1224 = vst [vmem:[%s6417_s6 + $0x718] sm:$0xff] %v1223_v51 }
 0x127   : > { %1226 = vst [vmem:[%s6417_s6 + $0x720] sm:$0xff] %v1225_v52 }
 0x128   : > { %1228 = vst [vmem:[%s6417_s6 + $0x728] sm:$0xff] %v1227_v53 }
 0x129   : > { %1230 = vst [vmem:[%s6417_s6 + $0x730] sm:$0xff] %v1229_v54 }
 0x12a   : > { %1232 = vst [vmem:[%s6417_s6 + $0x738] sm:$0xff] %v1231_v55 }
 0x12b   : > { %1234 = vst [vmem:[%s6417_s6 + $0x740] sm:$0xff] %v1233_v56 }
 0x12c   : > { %1236 = vst [vmem:[%s6417_s6 + $0x748] sm:$0xff] %v1235_v57 }
 0x12d   : > { %1238 = vst [vmem:[%s6417_s6 + $0x750] sm:$0xff] %v1237_v58 }
 0x12e   : > { %1240 = vst [vmem:[%s6417_s6 + $0x758] sm:$0xff] %v1239_v59 }
 0x12f   : > { %1242 = vst [vmem:[%s6417_s6 + $0x760] sm:$0xff] %v1241_v60 }
 0x130   : > { %1244 = vst [vmem:[%s6417_s6 + $0x768] sm:$0xff] %v1243_v61 }
 0x131   : > { %1246 = vst [vmem:[%s6417_s6 + $0x770] sm:$0xff] %v1245_v62 }
 0x132   : > { %1248 = vst [vmem:[%s6417_s6 + $0x778] sm:$0xff] %v1247_v63 }
 0x133   : > { %1250 = vst [vmem:[%s6417_s6 + $0x780] sm:$0xff] %v1249_v0 }
 0x134   : > { %1252 = vst [vmem:[%s6417_s6 + $0x788] sm:$0xff] %v1251_v1 }
 0x135   : > { %1254 = vst [vmem:[%s6417_s6 + $0x790] sm:$0xff] %v1253_v2 }
 0x136   : > { %1256 = vst [vmem:[%s6417_s6 + $0x798] sm:$0xff] %v1255_v3 }
 0x137   : > { %1258 = vst [vmem:[%s6417_s6 + $0x7a0] sm:$0xff] %v1257_v4 }
 0x138   : > { %1260 = vst [vmem:[%s6417_s6 + $0x7a8] sm:$0xff] %v1259_v5 }
 0x139   : > { %1262 = vst [vmem:[%s6417_s6 + $0x7b0] sm:$0xff] %v1261_v6 }
 0x13a   : > { %1264 = vst [vmem:[%s6417_s6 + $0x7b8] sm:$0xff] %v1263_v7 }
 0x13b   : > { %1266 = vst [vmem:[%s6417_s6 + $0x7c0] sm:$0xff] %v1265_v8 }
 0x13c   : > { %1268 = vst [vmem:[%s6417_s6 + $0x7c8] sm:$0xff] %v1267_v9 }
 0x13d   : > { %1270 = vst [vmem:[%s6417_s6 + $0x7d0] sm:$0xff] %v1269_v10 }
 0x13e   : > { %1272 = vst [vmem:[%s6417_s6 + $0x7d8] sm:$0xff] %v1271_v11 }
 0x13f   : > { %1274 = vst [vmem:[%s6417_s6 + $0x7e0] sm:$0xff] %v1273_v12 }
 0x140   : > { %1276 = vst [vmem:[%s6417_s6 + $0x7e8] sm:$0xff] %v1275_v13 }
 0x141   : > { %1278 = vst [vmem:[%s6417_s6 + $0x7f0] sm:$0xff] %v1277_v14 }
 0x142   : > { %1280 = vst [vmem:[%s6417_s6 + $0x7f8] sm:$0xff] %v1279_v15 }
 0x143 PF: > { %p4707_p0 = scmp.ge.s32.totalorder %s6257_s22, 1  ;;  %p2352_p1 = scmp.lt.s32.totalorder %s6257_s22, 9 }
 0x145   : > { %p2353_p2 = pnand %p4707_p0, %p2352_p1 }
 0x146   : > { %s2359_s0 = sand.u32 (!%p2353_p2), 1, %s6233_s16   ;;  %s2366_s23 = sand.u32 (!%p2353_p2), 1, %s6225_s14  }
 0x147   : > { %2356 = sbr.rel (%p2353_p2) target bundleno = 771 (0x303), region = 99  ;;  %s4708_s28 = sshll.u32 (!%p2353_p2), %s2359_s0, 7 }
 0x148   : > { %s4709_s7 = sshll.u32 (!%p2353_p2), %s2366_s23, 11  ;;  %s2393_s11 = sand.u32 (!%p2353_p2), 1, %s6217_s12  }
 0x149   : > { %s4711_s26 = sshll.u32 (!%p2353_p2), %s6245_s19, 1  ;;  %s4710_s27 = sshll.u32 (!%p2353_p2), %s2393_s11, 4 }
 0x14a   : > { %p2401_p3 = scmp.lt.s32.totalorder (!%p2353_p2), %s4711_s26, 3  ;;  %s6940_s6 = scalar_lea.vmem (!%p2353_p2), [#allocation3], %s4708_s28 }
 0x14b   : > { %s6942_s1 = scalar_lea.vmem (!%p2353_p2), [#allocation4], %s4709_s7  ;;  %s6944_s25 = scalar_lea.vmem (!%p2353_p2), [#allocation5], %s4710_s27 }
 0x14c   : > { %s7671_s26 = smov (!%p2401_p3, %s4711_s26), 3  ;;  %p4712_p4 = scmp.ne.s32.totalorder %s6241_s18, 0 }
 0x14d   : > { %s2403_s5 = scalar_lea.vmem %s7642_s2, %s7671_s26 }
 0x14e   : > { %2410 = sbr.rel (%p4712_p4) target bundleno = 344 (0x158), region = 111 }
 0x153   : > { %v6259_v16 = vmov 0.0  }
 0x154   : > { %2411 = vst [vmem:[#allocation2 + $0x10] sm:$0xff] %v6259_v16 }
 0x155   : > { %2412 = vst [vmem:[#allocation2] sm:$0xff] %v6259_v16 }
 0x156   : > { %2413 = vst [vmem:[#allocation2 + $0x18] sm:$0xff] %v6259_v16 }
 0x157   : > { %2414 = vst [vmem:[#allocation2 + $0x8] sm:$0xff] %v6259_v16 }
 0x158 PF: > { %v4835_v17 = vld [vmem:[%s6942_s1 + $0x70] sm:$0xf]  ;;  %v5840_v18 = vld [vmem:[%s6942_s1 + $0x74] sm:$0xf0]  ;;  %v4827_v28 = vld [vmem:[%s6942_s1 + $0x60] sm:$0xf] }
 0x159   : > { %v4899_v19 = vld [vmem:[%s6942_s1 + $0xf0] sm:$0xf]  ;;  %v4836_v20 = vor.u32 %v5840_v18, %v4835_v17  ;;  %v5856_v21 = vld [vmem:[%s6942_s1 + $0xf4] sm:$0xf0]  ;;  %v5838_v30 = vld [vmem:[%s6942_s1 + $0x64] sm:$0xf0] }
 0x15a   : > { %v4963_v22 = vld [vmem:[%s6942_s1 + $0x170] sm:$0xf]  ;;  %v5872_v23 = vld [vmem:[%s6942_s1 + $0x174] sm:$0xf0]  ;;  %v4900_v24 = vor.u32 %v5856_v21, %v4899_v19  ;;  %v4891_v31 = vld [vmem:[%s6942_s1 + $0xe0] sm:$0xf]  ;;  %v4828_v33 = vor.u32 %v5838_v30, %v4827_v28 }
 0x15b   : > { %v4964_v25 = vor.u32 %v5872_v23, %v4963_v22  ;;  %v5027_v26 = vld [vmem:[%s6942_s1 + $0x1f0] sm:$0xf]  ;;  %v5888_v27 = vld [vmem:[%s6942_s1 + $0x1f4] sm:$0xf0]  ;;  %4051 = vmatpush.bf16.msra.mxu0 %v4836_v20  ;;  %v5854_v32 = vld [vmem:[%s6942_s1 + $0xe4] sm:$0xf0] }
 0x15c   : > { %v5028_v29 = vor.u32 %v5888_v27, %v5027_v26  ;;  %4065 = vmatpush.bf16.msra.mxu1 %v4900_v24  ;;  %v4892_v34 = vor.u32 %v5854_v32, %v4891_v31  ;;  %v4955_v35 = vld [vmem:[%s6942_s1 + $0x160] sm:$0xf]  ;;  %v5870_v36 = vld [vmem:[%s6942_s1 + $0x164] sm:$0xf0]  ;;  %v4819_v40 = vld [vmem:[%s6942_s1 + $0x50] sm:$0xf] }
 0x15d   : > { %4079 = vmatpush.bf16.msra.mxu2 %v4964_v25  ;;  %v5019_v37 = vld [vmem:[%s6942_s1 + $0x1e0] sm:$0xf]  ;;  %v4956_v38 = vor.u32 %v5870_v36, %v4955_v35  ;;  %v5886_v39 = vld [vmem:[%s6942_s1 + $0x1e4] sm:$0xf0]  ;;  %v5836_v41 = vld [vmem:[%s6942_s1 + $0x54] sm:$0xf0] }
 0x15e   : > { %4093 = vmatpush.bf16.msra.mxu3 %v5028_v29  ;;  %v5020_v42 = vor.u32 %v5886_v39, %v5019_v37  ;;  %v4883_v43 = vld [vmem:[%s6942_s1 + $0xd0] sm:$0xf]  ;;  %v5852_v44 = vld [vmem:[%s6942_s1 + $0xd4] sm:$0xf0]  ;;  %v4820_v46 = vor.u32 %v5836_v41, %v4819_v40  ;;  %v4811_v52 = vld [vmem:[%s6942_s1 + $0x40] sm:$0xf] }
 0x15f   : > { %v4947_v45 = vld [vmem:[%s6942_s1 + $0x150] sm:$0xf]  ;;  %4052 = vmatpush.bf16.msra.mxu0 %v4828_v33  ;;  %v5868_v47 = vld [vmem:[%s6942_s1 + $0x154] sm:$0xf0]  ;;  %v4884_v50 = vor.u32 %v5852_v44, %v4883_v43  ;;  %v5834_v53 = vld [vmem:[%s6942_s1 + $0x44] sm:$0xf0] }
 0x160   : > { %v5011_v48 = vld [vmem:[%s6942_s1 + $0x1d0] sm:$0xf]  ;;  %v5884_v49 = vld [vmem:[%s6942_s1 + $0x1d4] sm:$0xf0]  ;;  %4066 = vmatpush.bf16.msra.mxu1 %v4892_v34  ;;  %v4948_v51 = vor.u32 %v5868_v47, %v4947_v45  ;;  %v4875_v54 = vld [vmem:[%s6942_s1 + $0xc0] sm:$0xf]  ;;  %v4812_v61 = vor.u32 %v5834_v53, %v4811_v52 }
 0x161   : > { %4080 = vmatpush.bf16.msra.mxu2 %v4956_v38  ;;  %v5012_v55 = vor.u32 %v5884_v49, %v5011_v48  ;;  %v5850_v56 = vld [vmem:[%s6942_s1 + $0xc4] sm:$0xf0]  ;;  %v4939_v57 = vld [vmem:[%s6942_s1 + $0x140] sm:$0xf]  ;;  %v4803_v0 = vld [vmem:[%s6942_s1 + $0x30] sm:$0xf] }
 0x162   : > { %4094 = vmatpush.bf16.msra.mxu3 %v5020_v42  ;;  %v5866_v58 = vld [vmem:[%s6942_s1 + $0x144] sm:$0xf0]  ;;  %v5003_v59 = vld [vmem:[%s6942_s1 + $0x1c0] sm:$0xf]  ;;  %v4876_v62 = vor.u32 %v5850_v56, %v4875_v54  ;;  %v5832_v1 = vld [vmem:[%s6942_s1 + $0x34] sm:$0xf0] }
 0x163   : > { %v5882_v60 = vld [vmem:[%s6942_s1 + $0x1c4] sm:$0xf0]  ;;  %4053 = vmatpush.bf16.msra.mxu0 %v4820_v46  ;;  %v4940_v63 = vor.u32 %v5866_v58, %v4939_v57  ;;  %v4867_v2 = vld [vmem:[%s6942_s1 + $0xb0] sm:$0xf]  ;;  %v5848_v4 = vld [vmem:[%s6942_s1 + $0xb4] sm:$0xf0]  ;;  %v4804_v9 = vor.u32 %v5832_v1, %v4803_v0 }
 0x164   : > { %4067 = vmatpush.bf16.msra.mxu1 %v4884_v50  ;;  %v5004_v3 = vor.u32 %v5882_v60, %v5003_v59  ;;  %v4931_v5 = vld [vmem:[%s6942_s1 + $0x130] sm:$0xf]  ;;  %v5864_v6 = vld [vmem:[%s6942_s1 + $0x134] sm:$0xf0]  ;;  %v4868_v10 = vor.u32 %v5848_v4, %v4867_v2  ;;  %v4795_v12 = vld [vmem:[%s6942_s1 + $0x20] sm:$0xf] }
 0x165   : > { %4081 = vmatpush.bf16.msra.mxu2 %v4948_v51  ;;  %v4995_v7 = vld [vmem:[%s6942_s1 + $0x1b0] sm:$0xf]  ;;  %v5880_v8 = vld [vmem:[%s6942_s1 + $0x1b4] sm:$0xf0]  ;;  %v4932_v11 = vor.u32 %v5864_v6, %v4931_v5  ;;  %v5830_v13 = vld [vmem:[%s6942_s1 + $0x24] sm:$0xf0] }
 0x166   : > { %4095 = vmatpush.bf16.msra.mxu3 %v5012_v55  ;;  %v4859_v14 = vld [vmem:[%s6942_s1 + $0xa0] sm:$0xf]  ;;  %v4996_v15 = vor.u32 %v5880_v8, %v4995_v7  ;;  %v5846_v16 = vld [vmem:[%s6942_s1 + $0xa4] sm:$0xf0]  ;;  %v4796_v21 = vor.u32 %v5830_v13, %v4795_v12  ;;  %v4787_v24 = vld [vmem:[%s6942_s1 + $0x10] sm:$0xf] }
 0x167   : > { %4054 = vmatpush.bf16.msra.mxu0 %v4812_v61  ;;  %v4923_v17 = vld [vmem:[%s6942_s1 + $0x120] sm:$0xf]  ;;  %v5862_v18 = vld [vmem:[%s6942_s1 + $0x124] sm:$0xf0]  ;;  %v4860_v22 = vor.u32 %v5846_v16, %v4859_v14  ;;  %v5828_v25 = vld [vmem:[%s6942_s1 + $0x14] sm:$0xf0] }
 0x168   : > { %4068 = vmatpush.bf16.msra.mxu1 %v4876_v62  ;;  %v4987_v19 = vld [vmem:[%s6942_s1 + $0x1a0] sm:$0xf]  ;;  %v5878_v20 = vld [vmem:[%s6942_s1 + $0x1a4] sm:$0xf0]  ;;  %v4924_v23 = vor.u32 %v5862_v18, %v4923_v17  ;;  %v4851_v26 = vld [vmem:[%s6942_s1 + $0x90] sm:$0xf]  ;;  %v4788_v33 = vor.u32 %v5828_v25, %v4787_v24 }
 0x169   : > { %4082 = vmatpush.bf16.msra.mxu2 %v4940_v63  ;;  %v4988_v27 = vor.u32 %v5878_v20, %v4987_v19  ;;  %v5844_v28 = vld [vmem:[%s6942_s1 + $0x94] sm:$0xf0]  ;;  %v4915_v29 = vld [vmem:[%s6942_s1 + $0x110] sm:$0xf]  ;;  %v4779_v34 = vld [vmem:[%s6942_s1] sm:$0xf] }
 0x16a   : > { %4096 = vmatpush.bf16.msra.mxu3 %v5004_v3  ;;  %v5860_v30 = vld [vmem:[%s6942_s1 + $0x114] sm:$0xf0]  ;;  %v4979_v31 = vld [vmem:[%s6942_s1 + $0x190] sm:$0xf]  ;;  %v5826_v35 = vld [vmem:[%s6942_s1 + $0x4] sm:$0xf0]  ;;  %v4852_v36 = vor.u32 %v5844_v28, %v4851_v26 }
 0x16b   : > { %4055 = vmatpush.bf16.msra.mxu0 %v4804_v9  ;;  %v5876_v32 = vld [vmem:[%s6942_s1 + $0x194] sm:$0xf0]  ;;  %v4916_v37 = vor.u32 %v5860_v30, %v4915_v29  ;;  %v4843_v38 = vld [vmem:[%s6942_s1 + $0x80] sm:$0xf]  ;;  %v5842_v39 = vld [vmem:[%s6942_s1 + $0x84] sm:$0xf0]  ;;  %v4780_v48 = vor.u32 %v5826_v35, %v4779_v34 }
 0x16c   : > { %4069 = vmatpush.bf16.msra.mxu1 %v4868_v10  ;;  %v4907_v40 = vld [vmem:[%s6942_s1 + $0x100] sm:$0xf]  ;;  %v4980_v41 = vor.u32 %v5876_v32, %v4979_v31  ;;  %v5858_v42 = vld [vmem:[%s6942_s1 + $0x104] sm:$0xf0]  ;;  %v5091_v45 = vld [vmem:[%s6942_s1 + $0x270] sm:$0xf]  ;;  %v4844_v52 = vor.u32 %v5842_v39, %v4843_v38 }
 0x16d   : > { %4083 = vmatpush.bf16.msra.mxu2 %v4932_v11  ;;  %v4971_v43 = vld [vmem:[%s6942_s1 + $0x180] sm:$0xf]  ;;  %v5874_v44 = vld [vmem:[%s6942_s1 + $0x184] sm:$0xf0]  ;;  %v5904_v46 = vld [vmem:[%s6942_s1 + $0x274] sm:$0xf0]  ;;  %v4908_v53 = vor.u32 %v5858_v42, %v4907_v40 }
 0x16e   : > { %4097 = vmatpush.bf16.msra.mxu3 %v4996_v15  ;;  %v5155_v47 = vld [vmem:[%s6942_s1 + $0x2f0] sm:$0xf]  ;;  %v5920_v49 = vld [vmem:[%s6942_s1 + $0x2f4] sm:$0xf0]  ;;  %v4972_v56 = vor.u32 %v5874_v44, %v4971_v43  ;;  %v5092_v57 = vor.u32 %v5904_v46, %v5091_v45  ;;  %v5083_v58 = vld [vmem:[%s6942_s1 + $0x260] sm:$0xf] }
 0x16f   : > { %4056 = vmatpush.bf16.msra.mxu0 %v4796_v21  ;;  %v5219_v50 = vld [vmem:[%s6942_s1 + $0x370] sm:$0xf]  ;;  %v5936_v51 = vld [vmem:[%s6942_s1 + $0x374] sm:$0xf0]  ;;  %v5902_v59 = vld [vmem:[%s6942_s1 + $0x264] sm:$0xf0]  ;;  %v5156_v60 = vor.u32 %v5920_v49, %v5155_v47 }
 0x170   : > { %4070 = vmatpush.bf16.msra.mxu1 %v4860_v22  ;;  %v5283_v54 = vld [vmem:[%s6942_s1 + $0x3f0] sm:$0xf]  ;;  %v5952_v55 = vld [vmem:[%s6942_s1 + $0x3f4] sm:$0xf0]  ;;  %v5220_v61 = vor.u32 %v5936_v51, %v5219_v50  ;;  %v5147_v62 = vld [vmem:[%s6942_s1 + $0x2e0] sm:$0xf]  ;;  %v5084_v8 = vor.u32 %v5902_v59, %v5083_v58 }
 0x171   : > { %4084 = vmatpush.bf16.msra.mxu2 %v4924_v23  ;;  %v5918_v63 = vld [vmem:[%s6942_s1 + $0x2e4] sm:$0xf0]  ;;  %v5211_v0 = vld [vmem:[%s6942_s1 + $0x360] sm:$0xf]  ;;  %v5284_v1 = vor.u32 %v5952_v55, %v5283_v54  ;;  %v5075_v9 = vld [vmem:[%s6942_s1 + $0x250] sm:$0xf] }
 0x172   : > { %4098 = vmatpush.bf16.msra.mxu3 %v4988_v27  ;;  %v5934_v2 = vld [vmem:[%s6942_s1 + $0x364] sm:$0xf0]  ;;  %v5275_v3 = vld [vmem:[%s6942_s1 + $0x3e0] sm:$0xf]  ;;  %v5900_v10 = vld [vmem:[%s6942_s1 + $0x254] sm:$0xf0]  ;;  %v5148_v13 = vor.u32 %v5918_v63, %v5147_v62 }
 0x173   : > { %4057 = vmatpush.bf16.msra.mxu0 %v4788_v33  ;;  %v5950_v4 = vld [vmem:[%s6942_s1 + $0x3e4] sm:$0xf0]  ;;  %v4715_v5 = vld [vmem:[%s6940_s6] sm:$0xf]  ;;  %v5212_v14 = vor.u32 %v5934_v2, %v5211_v0  ;;  %v5139_v15 = vld [vmem:[%s6942_s1 + $0x2d0] sm:$0xf]  ;;  %v5076_v26 = vor.u32 %v5900_v10, %v5075_v9 }
 0x174   : > { %4071 = vmatpush.bf16.msra.mxu1 %v4852_v36  ;;  %v5817_v6 = vld [vmem:[%s6940_s6 + $0x3c] sm:$0xf0]  ;;  %v4723_v7 = vld [vmem:[%s6940_s6 + $0x8] sm:$0xf]  ;;  %v5916_v16 = vld [vmem:[%s6942_s1 + $0x2d4] sm:$0xf0]  ;;  %v5276_v19 = vor.u32 %v5950_v4, %v5275_v3 }
 0x175   : > { %4085 = vmatpush.bf16.msra.mxu2 %v4916_v37  ;;  %v7032_v11 = vor.u32 %v5817_v6, %v4715_v5  ;;  %v5818_v12 = vld [vmem:[%s6940_s6 + $0x44] sm:$0xf0]  ;;  %v5203_v17 = vld [vmem:[%s6942_s1 + $0x350] sm:$0xf]  ;;  %v5932_v20 = vld [vmem:[%s6942_s1 + $0x354] sm:$0xf0]  ;;  %v5140_v29 = vor.u32 %v5916_v16, %v5139_v15 }
 0x176   : > { %4099 = vmatpush.bf16.msra.mxu3 %v4980_v41  ;;  %v7038_v18 = vor.u32 %v5818_v12, %v4723_v7  ;;  %v5267_v21 = vld [vmem:[%s6942_s1 + $0x3d0] sm:$0xf]  ;;  %v5948_v22 = vld [vmem:[%s6942_s1 + $0x3d4] sm:$0xf0]  ;;  %v5809_v23 = vld [vmem:[%s6940_s6 + $0x4] sm:$0xf]  ;;  %v5204_v30 = vor.u32 %v5932_v20, %v5203_v17 }
 0x177   : > { %4058 = vmatpush.bf16.msra.mxu0 %v4780_v48  ;;  %v4717_v24 = vld [vmem:[%s6940_s6 + $0x40] sm:$0xf0]  ;;  %v5810_v25 = vld [vmem:[%s6940_s6 + $0xc] sm:$0xf]  ;;  %v5067_v31 = vld [vmem:[%s6942_s1 + $0x240] sm:$0xf]  ;;  %v5268_v35 = vor.u32 %v5948_v22, %v5267_v21 }
 0x178   : > { %4072 = vmatpush.bf16.msra.mxu1 %v4844_v52  ;;  %v7048_v27 = vor.u32 %v5809_v23, %v4717_v24  ;;  %v4725_v28 = vld [vmem:[%s6940_s6 + $0x48] sm:$0xf0]  ;;  %v5898_v32 = vld [vmem:[%s6942_s1 + $0x244] sm:$0xf0]  ;;  %v5131_v33 = vld [vmem:[%s6942_s1 + $0x2c0] sm:$0xf] }
 0x179   : > { %4086 = vmatpush.bf16.msra.mxu2 %v4908_v53  ;;  %v7054_v34 = vor.u32 %v5810_v25, %v4725_v28  ;;  %v5914_v36 = vld [vmem:[%s6942_s1 + $0x2c4] sm:$0xf0]  ;;  %v5195_v37 = vld [vmem:[%s6942_s1 + $0x340] sm:$0xf]  ;;  %v5068_v41 = vor.u32 %v5898_v32, %v5067_v31  ;;  %v5059_v44 = vld [vmem:[%s6942_s1 + $0x230] sm:$0xf] }
 0x17a   : > { %4100 = vmatpush.bf16.msra.mxu3 %v4972_v56  ;;  %4059 = vmatmul.bf16.vlgmr.msra.gmra.mxu0 %v7032_v11  ;;  %v5930_v38 = vld [vmem:[%s6942_s1 + $0x344] sm:$0xf0]  ;;  %v5259_v39 = vld [vmem:[%s6942_s1 + $0x3c0] sm:$0xf]  ;;  %v5132_v42 = vor.u32 %v5914_v36, %v5131_v33  ;;  %v5896_v45 = vld [vmem:[%s6942_s1 + $0x234] sm:$0xf0] }
 0x17b   : > { %4107 = vmatpush.bf16.msrb.mxu0 %v5092_v57  ;;  %4073 = vmatmul.bf16.vlgmr.msra.gmra.mxu1 %v7048_v27  ;;  %v5946_v40 = vld [vmem:[%s6942_s1 + $0x3c4] sm:$0xf0]  ;;  %v5196_v43 = vor.u32 %v5930_v38, %v5195_v37  ;;  %v5123_v46 = vld [vmem:[%s6942_s1 + $0x2b0] sm:$0xf]  ;;  %v5912_v48 = vld [vmem:[%s6942_s1 + $0x2b4] sm:$0xf0]  ;;  %v5060_v53 = vor.u32 %v5896_v45, %v5059_v44 }
 0x17c   : > { %4121 = vmatpush.bf16.msrb.mxu1 %v5156_v60  ;;  %4087 = vmatmul.bf16.vlgmr.msra.gmra.mxu2 %v7038_v18  ;;  %v5260_v47 = vor.u32 %v5946_v40, %v5259_v39  ;;  %v5187_v49 = vld [vmem:[%s6942_s1 + $0x330] sm:$0xf]  ;;  %v5928_v50 = vld [vmem:[%s6942_s1 + $0x334] sm:$0xf0]  ;;  %v5124_v54 = vor.u32 %v5912_v48, %v5123_v46  ;;  %v5051_v56 = vld [vmem:[%s6942_s1 + $0x220] sm:$0xf] }
 0x17d   : > { %4135 = vmatpush.bf16.msrb.mxu2 %v5220_v61  ;;  %4101 = vmatmul.bf16.vlgmr.msra.gmra.mxu3 %v7054_v34  ;;  %v5251_v51 = vld [vmem:[%s6942_s1 + $0x3b0] sm:$0xf]  ;;  %v5944_v52 = vld [vmem:[%s6942_s1 + $0x3b4] sm:$0xf0]  ;;  %v5188_v55 = vor.u32 %v5928_v50, %v5187_v49  ;;  %v5894_v57 = vld [vmem:[%s6942_s1 + $0x224] sm:$0xf0] }
 0x17e   : > { %4149 = vmatpush.bf16.msrb.mxu3 %v5284_v1  ;;  %v5115_v58 = vld [vmem:[%s6942_s1 + $0x2a0] sm:$0xf]  ;;  %v5252_v59 = vor.u32 %v5944_v52, %v5251_v51  ;;  %v5910_v60 = vld [vmem:[%s6942_s1 + $0x2a4] sm:$0xf0]  ;;  %v5052_v1 = vor.u32 %v5894_v57, %v5051_v56  ;;  %v5043_v2 = vld [vmem:[%s6942_s1 + $0x210] sm:$0xf] }
 0x17f   : > { %4108 = vmatpush.bf16.msrb.mxu0 %v5084_v8  ;;  %v5179_v61 = vld [vmem:[%s6942_s1 + $0x320] sm:$0xf]  ;;  %v5926_v62 = vld [vmem:[%s6942_s1 + $0x324] sm:$0xf0]  ;;  %v5116_v3 = vor.u32 %v5910_v60, %v5115_v58  ;;  %v5892_v5 = vld [vmem:[%s6942_s1 + $0x214] sm:$0xf0] }
 0x180   : > { %4122 = vmatpush.bf16.msrb.mxu1 %v5148_v13  ;;  %v5243_v63 = vld [vmem:[%s6942_s1 + $0x3a0] sm:$0xf]  ;;  %v5942_v0 = vld [vmem:[%s6942_s1 + $0x3a4] sm:$0xf0]  ;;  %v5180_v4 = vor.u32 %v5926_v62, %v5179_v61  ;;  %v5107_v6 = vld [vmem:[%s6942_s1 + $0x290] sm:$0xf]  ;;  %v5044_v16 = vor.u32 %v5892_v5, %v5043_v2 }
 0x181   : > { %4136 = vmatpush.bf16.msrb.mxu2 %v5212_v14  ;;  %v5908_v7 = vld [vmem:[%s6942_s1 + $0x294] sm:$0xf0]  ;;  %v5244_v8 = vor.u32 %v5942_v0, %v5243_v63  ;;  %v5171_v9 = vld [vmem:[%s6942_s1 + $0x310] sm:$0xf]  ;;  %v5035_v14 = vld [vmem:[%s6942_s1 + $0x200] sm:$0xf] }
 0x182   : > { %4150 = vmatpush.bf16.msrb.mxu3 %v5276_v19  ;;  %v5924_v10 = vld [vmem:[%s6942_s1 + $0x314] sm:$0xf0]  ;;  %v5235_v12 = vld [vmem:[%s6942_s1 + $0x390] sm:$0xf]  ;;  %v5890_v15 = vld [vmem:[%s6942_s1 + $0x204] sm:$0xf0]  ;;  %v5108_v22 = vor.u32 %v5908_v7, %v5107_v6 }
 0x183   : > { %4109 = vmatpush.bf16.msrb.mxu0 %v5076_v26  ;;  %v5940_v13 = vld [vmem:[%s6942_s1 + $0x394] sm:$0xf0]  ;;  %v5099_v17 = vld [vmem:[%s6942_s1 + $0x280] sm:$0xf]  ;;  %v5906_v19 = vld [vmem:[%s6942_s1 + $0x284] sm:$0xf0]  ;;  %v5172_v23 = vor.u32 %v5924_v10, %v5171_v9  ;;  %v5036_v36 = vor.u32 %v5890_v15, %v5035_v14 }
 0x184   : > { %4123 = vmatpush.bf16.msrb.mxu1 %v5140_v29  ;;  %v5163_v20 = vld [vmem:[%s6942_s1 + $0x300] sm:$0xf]  ;;  %v5922_v21 = vld [vmem:[%s6942_s1 + $0x304] sm:$0xf0]  ;;  %v5347_v26 = vld [vmem:[%s6942_s1 + $0x470] sm:$0xf]  ;;  %v5236_v28 = vor.u32 %v5940_v13, %v5235_v12  ;;  %v5100_v40 = vor.u32 %v5906_v19, %v5099_v17 }
 0x185   : > { %4137 = vmatpush.bf16.msrb.mxu2 %v5204_v30  ;;  %v5227_v24 = vld [vmem:[%s6942_s1 + $0x380] sm:$0xf]  ;;  %v5938_v25 = vld [vmem:[%s6942_s1 + $0x384] sm:$0xf0]  ;;  %v5968_v29 = vld [vmem:[%s6942_s1 + $0x474] sm:$0xf0] }
 0x186   : > { %4151 = vmatpush.bf16.msrb.mxu3 %v5268_v35  ;;  %v5411_v30 = vld [vmem:[%s6942_s1 + $0x4f0] sm:$0xf]  ;;  %v5984_v31 = vld [vmem:[%s6942_s1 + $0x4f4] sm:$0xf0]  ;;  %v5811_v44 = vld [vmem:[%s6940_s6 + $0x14] sm:$0xf]  ;;  %v5228_v45 = vor.u32 %v5938_v25, %v5227_v24  ;;  %v5348_v46 = vor.u32 %v5968_v29, %v5347_v26 }
 0x187   : > { %4110 = vmatpush.bf16.msrb.mxu0 %v5068_v41  ;;  %v5475_v32 = vld [vmem:[%s6942_s1 + $0x570] sm:$0xf]  ;;  %v6000_v33 = vld [vmem:[%s6942_s1 + $0x574] sm:$0xf0]  ;;  %v5164_v41 = vor.u32 %v5922_v21, %v5163_v20  ;;  %v5812_v48 = vld [vmem:[%s6940_s6 + $0x1c] sm:$0xf]  ;;  %v5412_v50 = vor.u32 %v5984_v31, %v5411_v30 }
 0x188   : > { %4124 = vmatpush.bf16.msrb.mxu1 %v5132_v42  ;;  %v5539_v35 = vld [vmem:[%s6942_s1 + $0x5f0] sm:$0xf]  ;;  %v6016_v37 = vld [vmem:[%s6942_s1 + $0x5f4] sm:$0xf0]  ;;  %v4741_v49 = vld [vmem:[%s6940_s6 + $0x58] sm:$0xf0]  ;;  %v5476_v51 = vor.u32 %v6000_v33, %v5475_v32 }
 0x189   : > { %4138 = vmatpush.bf16.msrb.mxu2 %v5196_v43  ;;  %v4731_v38 = vld [vmem:[%s6940_s6 + $0x10] sm:$0xf]  ;;  %v4739_v42 = vld [vmem:[%s6940_s6 + $0x18] sm:$0xf]  ;;  %v5339_v52 = vld [vmem:[%s6942_s1 + $0x460] sm:$0xf]  ;;  %v7125_v0 = vor.u32 %v5812_v48, %v4741_v49 }
 0x18a   : > { %4152 = vmatpush.bf16.msrb.mxu3 %v5260_v47  ;;  %v5819_v39 = vld [vmem:[%s6940_s6 + $0x4c] sm:$0xf0]  ;;  %v5820_v43 = vld [vmem:[%s6940_s6 + $0x54] sm:$0xf0]  ;;  %v4733_v47 = vld [vmem:[%s6940_s6 + $0x50] sm:$0xf0] }
 0x18b   : > { %4111 = vmatpush.bf16.msrb.mxu0 %v5060_v53  ;;  %v5966_v53 = vld [vmem:[%s6942_s1 + $0x464] sm:$0xf0]  ;;  %v7114_v56 = vor.u32 %v5819_v39, %v4731_v38  ;;  %v5467_v58 = vld [vmem:[%s6942_s1 + $0x560] sm:$0xf]  ;;  %v7119_v60 = vor.u32 %v5820_v43, %v4739_v42  ;;  %v7121_v61 = vor.u32 %v5811_v44, %v4733_v47  ;;  %v5964_v5 = vld [vmem:[%s6942_s1 + $0x454] sm:$0xf0] }
 0x18c   : > { %4125 = vmatpush.bf16.msrb.mxu1 %v5124_v54  ;;  %v5403_v54 = vld [vmem:[%s6942_s1 + $0x4e0] sm:$0xf]  ;;  %v5982_v57 = vld [vmem:[%s6942_s1 + $0x4e4] sm:$0xf0]  ;;  %v5395_v6 = vld [vmem:[%s6942_s1 + $0x4d0] sm:$0xf] }
 0x18d   : > { %4139 = vmatpush.bf16.msrb.mxu2 %v5188_v55  ;;  %v5540_v55 = vor.u32 %v6016_v37, %v5539_v35  ;;  %v5531_v62 = vld [vmem:[%s6942_s1 + $0x5e0] sm:$0xf]  ;;  %v6014_v63 = vld [vmem:[%s6942_s1 + $0x5e4] sm:$0xf0]  ;;  %v5404_v2 = vor.u32 %v5982_v57, %v5403_v54  ;;  %v5459_v9 = vld [vmem:[%s6942_s1 + $0x550] sm:$0xf] }
 0x18e   : > { %4153 = vmatpush.bf16.msrb.mxu3 %v5252_v59  ;;  %v5998_v59 = vld [vmem:[%s6942_s1 + $0x564] sm:$0xf0]  ;;  %v5532_v7 = vor.u32 %v6014_v63, %v5531_v62  ;;  %v5996_v10 = vld [vmem:[%s6942_s1 + $0x554] sm:$0xf0]  ;;  %v5523_v12 = vld [vmem:[%s6942_s1 + $0x5d0] sm:$0xf] }
 0x18f   : > { %4112 = vmatpush.bf16.msrb.mxu0 %v5052_v1  ;;  %v5340_v1 = vor.u32 %v5966_v53, %v5339_v52  ;;  %v6012_v13 = vld [vmem:[%s6942_s1 + $0x5d4] sm:$0xf0]  ;;  %v5323_v17 = vld [vmem:[%s6942_s1 + $0x440] sm:$0xf]  ;;  %v5962_v19 = vld [vmem:[%s6942_s1 + $0x444] sm:$0xf0] }
 0x190   : > { %4126 = vmatpush.bf16.msrb.mxu1 %v5116_v3  ;;  %v5468_v3 = vor.u32 %v5998_v59, %v5467_v58  ;;  %v5387_v20 = vld [vmem:[%s6942_s1 + $0x4c0] sm:$0xf]  ;;  %v5524_v21 = vor.u32 %v6012_v13, %v5523_v12  ;;  %v5994_v24 = vld [vmem:[%s6942_s1 + $0x544] sm:$0xf0]  ;;  %v5315_v31 = vld [vmem:[%s6942_s1 + $0x430] sm:$0xf] }
 0x191   : > { %4140 = vmatpush.bf16.msrb.mxu2 %v5180_v4  ;;  %v5331_v4 = vld [vmem:[%s6942_s1 + $0x450] sm:$0xf]  ;;  %v5515_v25 = vld [vmem:[%s6942_s1 + $0x5c0] sm:$0xf]  ;;  %v6010_v26 = vld [vmem:[%s6942_s1 + $0x5c4] sm:$0xf0] }
 0x192   : > { %4154 = vmatpush.bf16.msrb.mxu3 %v5244_v8  ;;  %v5980_v8 = vld [vmem:[%s6942_s1 + $0x4d4] sm:$0xf0]  ;;  %v5332_v14 = vor.u32 %v5964_v5, %v5331_v4  ;;  %v5379_v33 = vld [vmem:[%s6942_s1 + $0x4b0] sm:$0xf]  ;;  %v5516_v35 = vor.u32 %v6010_v26, %v5515_v25  ;;  %v5307_v44 = vld [vmem:[%s6942_s1 + $0x420] sm:$0xf] }
 0x193   : > { %4113 = vmatpush.bf16.msrb.mxu0 %v5044_v16  ;;  %v5396_v15 = vor.u32 %v5980_v8, %v5395_v6  ;;  %v5460_v16 = vor.u32 %v5996_v10, %v5459_v9  ;;  %v5960_v32 = vld [vmem:[%s6942_s1 + $0x434] sm:$0xf0]  ;;  %v5443_v37 = vld [vmem:[%s6942_s1 + $0x530] sm:$0xf]  ;;  %v5974_v48 = vld [vmem:[%s6942_s1 + $0x4a4] sm:$0xf0] }
 0x194   : > { %4127 = vmatpush.bf16.msrb.mxu1 %v5108_v22  ;;  %v5978_v22 = vld [vmem:[%s6942_s1 + $0x4c4] sm:$0xf0]  ;;  %v5992_v38 = vld [vmem:[%s6942_s1 + $0x534] sm:$0xf0]  ;;  %v5507_v39 = vld [vmem:[%s6942_s1 + $0x5b0] sm:$0xf] }
 0x195   : > { %4141 = vmatpush.bf16.msrb.mxu2 %v5172_v23  ;;  %v5451_v23 = vld [vmem:[%s6942_s1 + $0x540] sm:$0xf]  ;;  %v5388_v29 = vor.u32 %v5978_v22, %v5387_v20  ;;  %v5444_v43 = vor.u32 %v5992_v38, %v5443_v37  ;;  %v6006_v52 = vld [vmem:[%s6942_s1 + $0x5a4] sm:$0xf0]  ;;  %v5299_v54 = vld [vmem:[%s6942_s1 + $0x410] sm:$0xf] }
 0x196   : > { %4155 = vmatpush.bf16.msrb.mxu3 %v5236_v28  ;;  %v5324_v28 = vor.u32 %v5962_v19, %v5323_v17  ;;  %v5452_v30 = vor.u32 %v5994_v24, %v5451_v23  ;;  %v5435_v49 = vld [vmem:[%s6942_s1 + $0x520] sm:$0xf]  ;;  %v5956_v58 = vld [vmem:[%s6942_s1 + $0x414] sm:$0xf0]  ;;  %v5363_v59 = vld [vmem:[%s6942_s1 + $0x490] sm:$0xf] }
 0x197   : > { %4114 = vmatpush.bf16.msrb.mxu0 %v5036_v36  ;;  %v5976_v36 = vld [vmem:[%s6942_s1 + $0x4b4] sm:$0xf0]  ;;  %v5291_v5 = vld [vmem:[%s6942_s1 + $0x400] sm:$0xf]  ;;  %v5954_v6 = vld [vmem:[%s6942_s1 + $0x404] sm:$0xf0] }
 0x198   : > { %4128 = vmatpush.bf16.msrb.mxu1 %v5100_v40  ;;  %v6008_v40 = vld [vmem:[%s6942_s1 + $0x5b4] sm:$0xf0]  ;;  %v5380_v42 = vor.u32 %v5976_v36, %v5379_v33  ;;  %v5355_v8 = vld [vmem:[%s6942_s1 + $0x480] sm:$0xf]  ;;  %v5970_v9 = vld [vmem:[%s6942_s1 + $0x484] sm:$0xf0]  ;;  %v5292_v26 = vor.u32 %v5954_v6, %v5291_v5 }
 0x199   : > { %4142 = vmatpush.bf16.msrb.mxu2 %v5164_v41  ;;  %v5316_v41 = vor.u32 %v5960_v32, %v5315_v31  ;;  %v5508_v47 = vor.u32 %v6008_v40, %v5507_v39  ;;  %v5972_v62 = vld [vmem:[%s6942_s1 + $0x494] sm:$0xf0]  ;;  %v5419_v10 = vld [vmem:[%s6942_s1 + $0x500] sm:$0xf]  ;;  %v5986_v12 = vld [vmem:[%s6942_s1 + $0x504] sm:$0xf0]  ;;  %v5356_v31 = vor.u32 %v5970_v9, %v5355_v8 }
 0x19a   : > { %4156 = vmatpush.bf16.msrb.mxu3 %v5228_v45  ;;  %4115 = vmatmul.bf16.vlgmr.msrb.gmra.mxu0 %v7114_v56  ;;  %v5958_v45 = vld [vmem:[%s6942_s1 + $0x424] sm:$0xf0]  ;;  %v6004_v4 = vld [vmem:[%s6942_s1 + $0x594] sm:$0xf0]  ;;  %v5364_v13 = vor.u32 %v5972_v62, %v5363_v59  ;;  %v5603_v17 = vld [vmem:[%s6942_s1 + $0x670] sm:$0xf]  ;;  %v5420_v32 = vor.u32 %v5986_v12, %v5419_v10 }
 0x19b   : > { %4163 = vmatpush.bf16.msra.mxu0 %v5348_v46  ;;  %4129 = vmatmul.bf16.vlgmr.msrb.gmra.mxu1 %v7121_v61  ;;  %v5371_v46 = vld [vmem:[%s6942_s1 + $0x4a0] sm:$0xf]  ;;  %v5308_v53 = vor.u32 %v5958_v45, %v5307_v44  ;;  %v6032_v20 = vld [vmem:[%s6942_s1 + $0x674] sm:$0xf0]  ;;  %v5731_v23 = vld [vmem:[%s6942_s1 + $0x770] sm:$0xf] }
 0x19c   : > { %4177 = vmatpush.bf16.msra.mxu1 %v5412_v50  ;;  %4143 = vmatmul.bf16.vlgmr.msrb.gmra.mxu2 %v7119_v60  ;;  %v5990_v50 = vld [vmem:[%s6942_s1 + $0x524] sm:$0xf0]  ;;  %v6048_v22 = vld [vmem:[%s6942_s1 + $0x6f4] sm:$0xf0]  ;;  %v5795_v25 = vld [vmem:[%s6942_s1 + $0x7f0] sm:$0xf]  ;;  %v5604_v38 = vor.u32 %v6032_v20, %v5603_v17 }
 0x19d   : > { %4191 = vmatpush.bf16.msra.mxu2 %v5476_v51  ;;  %4157 = vmatmul.bf16.vlgmr.msrb.gmra.mxu3 %v7125_v0  ;;  %v5499_v51 = vld [vmem:[%s6942_s1 + $0x5a0] sm:$0xf]  ;;  %v5436_v57 = vor.u32 %v5990_v50, %v5435_v49  ;;  %v6064_v24 = vld [vmem:[%s6942_s1 + $0x774] sm:$0xf0]  ;;  %v4755_v33 = vld [vmem:[%s6940_s6 + $0x28] sm:$0xf] }
 0x19e   : > { %4205 = vmatpush.bf16.msra.mxu3 %v5540_v55  ;;  %v5372_v55 = vor.u32 %v5974_v48, %v5371_v46  ;;  %v5500_v63 = vor.u32 %v6006_v52, %v5499_v51  ;;  %v5813_v36 = vld [vmem:[%s6940_s6 + $0x24] sm:$0xf]  ;;  %v5814_v40 = vld [vmem:[%s6940_s6 + $0x2c] sm:$0xf]  ;;  %v5595_v44 = vld [vmem:[%s6942_s1 + $0x660] sm:$0xf] }
 0x19f   : > { %4164 = vmatpush.bf16.msra.mxu0 %v5340_v1  ;;  %v5427_v1 = vld [vmem:[%s6942_s1 + $0x510] sm:$0xf]  ;;  %v4749_v39 = vld [vmem:[%s6940_s6 + $0x60] sm:$0xf0]  ;;  %v6030_v45 = vld [vmem:[%s6942_s1 + $0x664] sm:$0xf0] }
 0x1a0   : > { %4178 = vmatpush.bf16.msra.mxu1 %v5404_v2  ;;  %v5988_v2 = vld [vmem:[%s6942_s1 + $0x514] sm:$0xf0]  ;;  %v5659_v46 = vld [vmem:[%s6942_s1 + $0x6e0] sm:$0xf]  ;;  %v6046_v49 = vld [vmem:[%s6942_s1 + $0x6e4] sm:$0xf0] }
 0x1a1   : > { %4192 = vmatpush.bf16.msra.mxu2 %v5468_v3  ;;  %v5491_v3 = vld [vmem:[%s6942_s1 + $0x590] sm:$0xf]  ;;  %v5723_v50 = vld [vmem:[%s6942_s1 + $0x760] sm:$0xf]  ;;  %v6062_v51 = vld [vmem:[%s6942_s1 + $0x764] sm:$0xf0]  ;;  %v5660_v59 = vor.u32 %v6046_v49, %v5659_v46 }
 0x1a2   : > { %4206 = vmatpush.bf16.msra.mxu3 %v5532_v7  ;;  %v5300_v7 = vor.u32 %v5956_v58, %v5299_v54  ;;  %v5492_v19 = vor.u32 %v6004_v4, %v5491_v3  ;;  %v5787_v54 = vld [vmem:[%s6942_s1 + $0x7e0] sm:$0xf]  ;;  %v5596_v58 = vor.u32 %v6030_v45, %v5595_v44  ;;  %v5724_v62 = vor.u32 %v6062_v51, %v5723_v50  ;;  %v6044_v4 = vld [vmem:[%s6942_s1 + $0x6d4] sm:$0xf0]  ;;  %v5715_v5 = vld [vmem:[%s6942_s1 + $0x750] sm:$0xf] }
 0x1a3   : > { %4165 = vmatpush.bf16.msra.mxu0 %v5332_v14  ;;  %v5428_v14 = vor.u32 %v5988_v2, %v5427_v1  ;;  %v6028_v1 = vld [vmem:[%s6942_s1 + $0x654] sm:$0xf0]  ;;  %v5651_v2 = vld [vmem:[%s6942_s1 + $0x6d0] sm:$0xf]  ;;  %v6042_v17 = vld [vmem:[%s6942_s1 + $0x6c4] sm:$0xf0] }
 0x1a4   : > { %4179 = vmatpush.bf16.msra.mxu1 %v5396_v15  ;;  %v5483_v15 = vld [vmem:[%s6942_s1 + $0x580] sm:$0xf]  ;;  %v6060_v6 = vld [vmem:[%s6942_s1 + $0x754] sm:$0xf0]  ;;  %v5652_v10 = vor.u32 %v6044_v4, %v5651_v2  ;;  %v6058_v20 = vld [vmem:[%s6942_s1 + $0x744] sm:$0xf0] }
 0x1a5   : > { %4193 = vmatpush.bf16.msra.mxu2 %v5460_v16  ;;  %v6002_v16 = vld [vmem:[%s6942_s1 + $0x584] sm:$0xf0]  ;;  %v6076_v8 = vld [vmem:[%s6942_s1 + $0x7d4] sm:$0xf0]  ;;  %v5716_v12 = vor.u32 %v6060_v6, %v5715_v5  ;;  %v5691_v45 = vld [vmem:[%s6942_s1 + $0x720] sm:$0xf] }
 0x1a6   : > { %4207 = vmatpush.bf16.msra.mxu3 %v5524_v21  ;;  %v5667_v21 = vld [vmem:[%s6942_s1 + $0x6f0] sm:$0xf]  ;;  %v5484_v37 = vor.u32 %v6002_v16, %v5483_v15  ;;  %v5643_v15 = vld [vmem:[%s6942_s1 + $0x6c0] sm:$0xf]  ;;  %v6038_v44 = vld [vmem:[%s6942_s1 + $0x6a4] sm:$0xf0] }
 0x1a7   : > { %4166 = vmatpush.bf16.msra.mxu0 %v5324_v28  ;;  %v6080_v28 = vld [vmem:[%s6942_s1 + $0x7f4] sm:$0xf0]  ;;  %v6054_v46 = vld [vmem:[%s6942_s1 + $0x724] sm:$0xf0]  ;;  %v5555_v51 = vld [vmem:[%s6942_s1 + $0x610] sm:$0xf] }
 0x1a8   : > { %4180 = vmatpush.bf16.msra.mxu1 %v5388_v29  ;;  %v4747_v29 = vld [vmem:[%s6940_s6 + $0x20] sm:$0xf]  ;;  %v6070_v49 = vld [vmem:[%s6942_s1 + $0x7a4] sm:$0xf0]  ;;  %v6052_v2 = vld [vmem:[%s6942_s1 + $0x714] sm:$0xf0] }
 0x1a9   : > { %4194 = vmatpush.bf16.msra.mxu2 %v5452_v30  ;;  %v5821_v30 = vld [vmem:[%s6940_s6 + $0x5c] sm:$0xf0]  ;;  %v6068_v4 = vld [vmem:[%s6942_s1 + $0x794] sm:$0xf0]  ;;  %v6018_v6 = vld [vmem:[%s6942_s1 + $0x604] sm:$0xf0] }
 0x1aa   : > { %4208 = vmatpush.bf16.msra.mxu3 %v5516_v35  ;;  %v5822_v35 = vld [vmem:[%s6940_s6 + $0x64] sm:$0xf0]  ;;  %v7198_v48 = vor.u32 %v5821_v30, %v4747_v29  ;;  %v5635_v29 = vld [vmem:[%s6942_s1 + $0x6b0] sm:$0xf]  ;;  %v5547_v5 = vld [vmem:[%s6942_s1 + $0x600] sm:$0xf] }
 0x1ab   : > { %4167 = vmatpush.bf16.msra.mxu0 %v5316_v41  ;;  %v4757_v41 = vld [vmem:[%s6940_s6 + $0x68] sm:$0xf0]  ;;  %v7203_v52 = vor.u32 %v5822_v35, %v4755_v33  ;;  %v6056_v33 = vld [vmem:[%s6942_s1 + $0x734] sm:$0xf0]  ;;  %v5763_v35 = vld [vmem:[%s6942_s1 + $0x7b0] sm:$0xf] }
 0x1ac   : > { %4181 = vmatpush.bf16.msra.mxu1 %v5380_v42  ;;  %v5668_v42 = vor.u32 %v6048_v22, %v5667_v21  ;;  %v5771_v21 = vld [vmem:[%s6942_s1 + $0x7c0] sm:$0xf]  ;;  %v6074_v22 = vld [vmem:[%s6942_s1 + $0x7c4] sm:$0xf0]  ;;  %p5801_p5 = scmp.ne.s32.totalorder %s6241_s18, 3 }
 0x1ad   : > { %4195 = vmatpush.bf16.msra.mxu2 %v5444_v43  ;;  %v5732_v43 = vor.u32 %v6064_v24, %v5731_v23  ;;  %v5644_v24 = vor.u32 %v6042_v17, %v5643_v15  ;;  %v5772_v30 = vor.u32 %v6074_v22, %v5771_v21  ;;  %v5739_v15 = vld [vmem:[%s6942_s1 + $0x780] sm:$0xf]  ;;  %v5839_v17 = vld [vmem:[%s6942_s1 + $0x74] sm:$0xf]  ;;  %v4901_v22 = vld [vmem:[%s6942_s1 + $0xf8] sm:$0xf0] }
 0x1ae   : > { %4209 = vmatpush.bf16.msra.mxu3 %v5508_v47  ;;  %v5796_v47 = vor.u32 %v6080_v28, %v5795_v25  ;;  %v6024_v28 = vld [vmem:[%s6942_s1 + $0x634] sm:$0xf0]  ;;  %v5855_v21 = vld [vmem:[%s6942_s1 + $0xf4] sm:$0xf] }
 0x1af   : > { %4168 = vmatpush.bf16.msra.mxu0 %v5308_v53  ;;  %v7205_v53 = vor.u32 %v5813_v36, %v4749_v39  ;;  %v6072_v36 = vld [vmem:[%s6942_s1 + $0x7b4] sm:$0xf0] }
 0x1b0   : > { %4182 = vmatpush.bf16.msra.mxu1 %v5372_v55  ;;  %v6078_v55 = vld [vmem:[%s6942_s1 + $0x7e4] sm:$0xf0] }
 0x1b1   : > { %4196 = vmatpush.bf16.msra.mxu2 %v5436_v57  ;;  %v7209_v57 = vor.u32 %v5814_v40, %v4757_v41  ;;  %v5788_v3 = vor.u32 %v6078_v55, %v5787_v54  ;;  %v5563_v40 = vld [vmem:[%s6942_s1 + $0x620] sm:$0xf]  ;;  %v6022_v41 = vld [vmem:[%s6942_s1 + $0x624] sm:$0xf0]  ;;  %v5692_v55 = vor.u32 %v6054_v46, %v5691_v45  ;;  %v4829_v45 = vld [vmem:[%s6942_s1 + $0x68] sm:$0xf0] }
 0x1b2   : > { %4210 = vmatpush.bf16.msra.mxu3 %v5500_v63  ;;  %v5587_v63 = vld [vmem:[%s6942_s1 + $0x650] sm:$0xf]  ;;  %v5564_v50 = vor.u32 %v6022_v41, %v5563_v40  ;;  %v5816_v40 = vld [vmem:[%s6940_s6 + $0x3c] sm:$0xf]  ;;  %v5853_v46 = vld [vmem:[%s6942_s1 + $0xe4] sm:$0xf] }
 0x1b3   : > { %4169 = vmatpush.bf16.msra.mxu0 %v5300_v7  ;;  %v5779_v7 = vld [vmem:[%s6942_s1 + $0x7d0] sm:$0xf]  ;;  %v5588_v9 = vor.u32 %v6028_v1, %v5587_v63  ;;  %v4773_v41 = vld [vmem:[%s6940_s6 + $0x78] sm:$0xf0] }
 0x1b4   : > { %4183 = vmatpush.bf16.msra.mxu1 %v5364_v13  ;;  %v5579_v13 = vld [vmem:[%s6942_s1 + $0x640] sm:$0xf]  ;;  %v5780_v16 = vor.u32 %v6076_v8, %v5779_v7  ;;  %v5683_v1 = vld [vmem:[%s6942_s1 + $0x710] sm:$0xf] }
 0x1b5   : > { %4197 = vmatpush.bf16.msra.mxu2 %v5428_v14  ;;  %v6026_v14 = vld [vmem:[%s6942_s1 + $0x644] sm:$0xf0]  ;;  %v5611_v8 = vld [vmem:[%s6942_s1 + $0x680] sm:$0xf] }
 0x1b6   : > { %4211 = vmatpush.bf16.msra.mxu3 %v5492_v19  ;;  %v5707_v19 = vld [vmem:[%s6942_s1 + $0x740] sm:$0xf]  ;;  %v5580_v23 = vor.u32 %v6026_v14, %v5579_v13  ;;  %v5684_v14 = vor.u32 %v6052_v2, %v5683_v1 }
 0x1b7   : > { %4170 = vmatpush.bf16.msra.mxu0 %v5292_v26  ;;  %v5708_v25 = vor.u32 %v6058_v20, %v5707_v19  ;;  %v5571_v26 = vld [vmem:[%s6942_s1 + $0x630] sm:$0xf]  ;;  %v4837_v20 = vld [vmem:[%s6942_s1 + $0x78] sm:$0xf0] }
 0x1b8   : > { %4184 = vmatpush.bf16.msra.mxu1 %v5356_v31  ;;  %v6040_v31 = vld [vmem:[%s6942_s1 + $0x6b4] sm:$0xf0] }
 0x1b9   : > { %4198 = vmatpush.bf16.msra.mxu2 %v5420_v32  ;;  %v5699_v32 = vld [vmem:[%s6942_s1 + $0x730] sm:$0xf] }
 0x1ba   : > { %4212 = vmatpush.bf16.msra.mxu3 %v5484_v37  ;;  %4171 = vmatmul.bf16.vlgmr.msra.gmra.mxu0 %v7198_v48  ;;  %v5572_v37 = vor.u32 %v6024_v28, %v5571_v26  ;;  %v5700_v39 = vor.u32 %v6056_v33, %v5699_v32  ;;  %v5548_v26 = vor.u32 %v6018_v6, %v5547_v5  ;;  %v5029_v28 = vld [vmem:[%s6942_s1 + $0x1f8] sm:$0xf0]  ;;  %v4771_v33 = vld [vmem:[%s6940_s6 + $0x38] sm:$0xf]  ;;  %v5851_v6 = vld [vmem:[%s6942_s1 + $0xd4] sm:$0xf] }
 0x1bb   : > { %4219 = vmatpush.bf16.msrb.mxu0 %v5604_v38  ;;  %4185 = vmatmul.bf16.vlgmr.msra.gmra.mxu1 %v7205_v53  ;;  %v5636_v38 = vor.u32 %v6040_v31, %v5635_v29  ;;  %v4763_v29 = vld [vmem:[%s6940_s6 + $0x30] sm:$0xf]  ;;  %v4821_v5 = vld [vmem:[%s6942_s1 + $0x58] sm:$0xf0] }
 0x1bc   : > { %4233 = vmatpush.bf16.msrb.mxu1 %v5668_v42  ;;  %4199 = vmatmul.bf16.vlgmr.msra.gmra.mxu2 %v7203_v52  ;;  %v5627_v42 = vld [vmem:[%s6942_s1 + $0x6a0] sm:$0xf] }
 0x1bd   : > { %4247 = vmatpush.bf16.msrb.mxu2 %v5732_v43  ;;  %4213 = vmatmul.bf16.vlgmr.msra.gmra.mxu3 %v7209_v57  ;;  %v5764_v43 = vor.u32 %v6072_v36, %v5763_v35  ;;  %v5628_v54 = vor.u32 %v6038_v44, %v5627_v42  ;;  %v5824_v35 = vld [vmem:[%s6940_s6 + $0x74] sm:$0xf0]  ;;  %v5815_v36 = vld [vmem:[%s6940_s6 + $0x34] sm:$0xf]  ;;  %v4904_v42 = vor.u32 %v5855_v21, %v4901_v22  ;;  %v5837_v44 = vld [vmem:[%s6942_s1 + $0x64] sm:$0xf] }
 0x1be   : > { %4261 = vmatpush.bf16.msrb.mxu3 %v5796_v47  ;;  %v5755_v47 = vld [vmem:[%s6942_s1 + $0x7a0] sm:$0xf]  ;;  %v4832_v1 = vor.u32 %v5837_v44, %v4829_v45  ;;  %v4877_v22 = vld [vmem:[%s6942_s1 + $0xc8] sm:$0xf0]  ;;  %v5829_v44 = vld [vmem:[%s6942_s1 + $0x24] sm:$0xf] }
 0x1bf   : > { %4220 = vmatpush.bf16.msrb.mxu0 %v5596_v58  ;;  %v6020_v58 = vld [vmem:[%s6942_s1 + $0x614] sm:$0xf0]  ;;  %v5756_v63 = vor.u32 %v6070_v49, %v5755_v47  ;;  %v4797_v45 = vld [vmem:[%s6942_s1 + $0x28] sm:$0xf0] }
 0x1c0   : > { %4234 = vmatpush.bf16.msrb.mxu1 %v5660_v59  ;;  %v5619_v59 = vld [vmem:[%s6942_s1 + $0x690] sm:$0xf]  ;;  %v5556_v7 = vor.u32 %v6020_v58, %v5555_v51  ;;  %v5869_v51 = vld [vmem:[%s6942_s1 + $0x164] sm:$0xf] }
 0x1c1   : > { %4248 = vmatpush.bf16.msrb.mxu2 %v5724_v62  ;;  %v6036_v62 = vld [vmem:[%s6942_s1 + $0x694] sm:$0xf0] }
 0x1c2   : > { %4262 = vmatpush.bf16.msrb.mxu3 %v5788_v3  ;;  %v5747_v3 = vld [vmem:[%s6942_s1 + $0x790] sm:$0xf]  ;;  %v5620_v13 = vor.u32 %v6036_v62, %v5619_v59  ;;  %v5885_v59 = vld [vmem:[%s6942_s1 + $0x1e4] sm:$0xf]  ;;  %v5021_v62 = vld [vmem:[%s6942_s1 + $0x1e8] sm:$0xf0] }
 0x1c3   : > { %4221 = vmatpush.bf16.msrb.mxu0 %v5588_v9  ;;  %v6034_v9 = vld [vmem:[%s6942_s1 + $0x684] sm:$0xf0]  ;;  %v5748_v19 = vor.u32 %v6068_v4, %v5747_v3  ;;  %v5835_v4 = vld [vmem:[%s6942_s1 + $0x54] sm:$0xf] }
 0x1c4   : > { %4235 = vmatpush.bf16.msrb.mxu1 %v5652_v10  ;;  %v5675_v10 = vld [vmem:[%s6942_s1 + $0x700] sm:$0xf]  ;;  %v5612_v31 = vor.u32 %v6034_v9, %v5611_v8  ;;  %v4885_v8 = vld [vmem:[%s6942_s1 + $0xd8] sm:$0xf0]  ;;  %v5867_v9 = vld [vmem:[%s6942_s1 + $0x154] sm:$0xf] }
 0x1c5   : > { %4249 = vmatpush.bf16.msrb.mxu2 %v5716_v12  ;;  %v6050_v12 = vld [vmem:[%s6942_s1 + $0x704] sm:$0xf0] }
 0x1c6   : > { %4263 = vmatpush.bf16.msrb.mxu3 %v5780_v16  ;;  %v6066_v16 = vld [vmem:[%s6942_s1 + $0x784] sm:$0xf0]  ;;  %v5676_v32 = vor.u32 %v6050_v12, %v5675_v10  ;;  %v4949_v10 = vld [vmem:[%s6942_s1 + $0x158] sm:$0xf0]  ;;  %v5883_v12 = vld [vmem:[%s6942_s1 + $0x1d4] sm:$0xf] }
 0x1c7   : > { %4222 = vmatpush.bf16.msrb.mxu0 %v5580_v23  ;;  %v5871_v23 = vld [vmem:[%s6942_s1 + $0x174] sm:$0xf] }
 0x1c8   : > { %4236 = vmatpush.bf16.msrb.mxu1 %v5644_v24  ;;  %v4965_v24 = vld [vmem:[%s6942_s1 + $0x178] sm:$0xf0] }
 0x1c9   : > { %4250 = vmatpush.bf16.msrb.mxu2 %v5708_v25  ;;  %v5887_v25 = vld [vmem:[%s6942_s1 + $0x1f4] sm:$0xf] }
 0x1ca   : > { %4264 = vmatpush.bf16.msrb.mxu3 %v5772_v30  ;;  %v5823_v30 = vld [vmem:[%s6940_s6 + $0x6c] sm:$0xf0]  ;;  %v5032_v47 = vor.u32 %v5887_v25, %v5029_v28  ;;  %v5881_v25 = vld [vmem:[%s6942_s1 + $0x1c4] sm:$0xf] }
 0x1cb   : > { %4223 = vmatpush.bf16.msrb.mxu0 %v5572_v37  ;;  %v5740_v37 = vor.u32 %v6066_v16, %v5739_v15  ;;  %v7282_v49 = vor.u32 %v5823_v30, %v4763_v29  ;;  %v4888_v15 = vor.u32 %v5851_v6, %v4885_v8  ;;  %v4952_v16 = vor.u32 %v5867_v9, %v4949_v10  ;;  %v5843_v6 = vld [vmem:[%s6942_s1 + $0x94] sm:$0xf]  ;;  %v4853_v8 = vld [vmem:[%s6942_s1 + $0x98] sm:$0xf0] }
 0x1cc   : > { %4237 = vmatpush.bf16.msrb.mxu1 %v5636_v38  ;;  %v4840_v38 = vor.u32 %v5839_v17, %v4837_v20  ;;  %v5833_v17 = vld [vmem:[%s6942_s1 + $0x44] sm:$0xf]  ;;  %v5859_v9 = vld [vmem:[%s6942_s1 + $0x114] sm:$0xf]  ;;  %v4917_v10 = vld [vmem:[%s6942_s1 + $0x118] sm:$0xf0] }
 0x1cd   : > { %4251 = vmatpush.bf16.msrb.mxu2 %v5700_v39  ;;  %v4765_v39 = vld [vmem:[%s6940_s6 + $0x70] sm:$0xf0]  ;;  %v5849_v20 = vld [vmem:[%s6942_s1 + $0xc4] sm:$0xf] }
 0x1ce   : > { %4265 = vmatpush.bf16.msrb.mxu3 %v5764_v43  ;;  %v4968_v43 = vor.u32 %v5871_v23, %v4965_v24  ;;  %v7289_v58 = vor.u32 %v5815_v36, %v4765_v39  ;;  %v5865_v23 = vld [vmem:[%s6942_s1 + $0x144] sm:$0xf]  ;;  %v4941_v24 = vld [vmem:[%s6942_s1 + $0x148] sm:$0xf0]  ;;  %v4880_v29 = vor.u32 %v5849_v20, %v4877_v22  ;;  %v4869_v36 = vld [vmem:[%s6942_s1 + $0xb8] sm:$0xf0] }
 0x1cf   : > { %4224 = vmatpush.bf16.msrb.mxu0 %v5564_v50  ;;  %v4893_v50 = vld [vmem:[%s6942_s1 + $0xe8] sm:$0xf0]  ;;  %v4944_v30 = vor.u32 %v5865_v23, %v4941_v24  ;;  %v5879_v39 = vld [vmem:[%s6942_s1 + $0x1b4] sm:$0xf]  ;;  %v5841_v20 = vld [vmem:[%s6942_s1 + $0x84] sm:$0xf] }
 0x1d0   : > { %4238 = vmatpush.bf16.msrb.mxu1 %v5628_v54  ;;  %v4957_v54 = vld [vmem:[%s6942_s1 + $0x168] sm:$0xf0]  ;;  %v4896_v2 = vor.u32 %v5853_v46, %v4893_v50  ;;  %v5845_v46 = vld [vmem:[%s6942_s1 + $0xa4] sm:$0xf] }
 0x1d1   : > { %4252 = vmatpush.bf16.msrb.mxu2 %v5692_v55  ;;  %v7287_v55 = vor.u32 %v5824_v35, %v4771_v33  ;;  %v4960_v3 = vor.u32 %v5869_v51, %v4957_v54  ;;  %v5847_v33 = vld [vmem:[%s6942_s1 + $0xb4] sm:$0xf]  ;;  %v4861_v50 = vld [vmem:[%s6942_s1 + $0xa8] sm:$0xf0]  ;;  %v5861_v51 = vld [vmem:[%s6942_s1 + $0x124] sm:$0xf] }
 0x1d2   : > { %4266 = vmatpush.bf16.msrb.mxu3 %v5756_v63  ;;  %v7293_v63 = vor.u32 %v5816_v40, %v4773_v41  ;;  %v4997_v40 = vld [vmem:[%s6942_s1 + $0x1b8] sm:$0xf0]  ;;  %v4925_v54 = vld [vmem:[%s6942_s1 + $0x128] sm:$0xf0]  ;;  %v5857_v22 = vld [vmem:[%s6942_s1 + $0x104] sm:$0xf] }
 0x1d3   : > { %4225 = vmatpush.bf16.msrb.mxu0 %v5556_v7  ;;  %v5024_v7 = vor.u32 %v5885_v59, %v5021_v62  ;;  %v5877_v59 = vld [vmem:[%s6942_s1 + $0x1a4] sm:$0xf]  ;;  %v4989_v62 = vld [vmem:[%s6942_s1 + $0x1a8] sm:$0xf0] }
 0x1d4   : > { %4239 = vmatpush.bf16.msrb.mxu1 %v5620_v13  ;;  %v5013_v13 = vld [vmem:[%s6942_s1 + $0x1d8] sm:$0xf0]  ;;  %v4909_v24 = vld [vmem:[%s6942_s1 + $0x108] sm:$0xf0] }
 0x1d5   : > { %4253 = vmatpush.bf16.msrb.mxu2 %v5684_v14  ;;  %v4824_v14 = vor.u32 %v5835_v4, %v4821_v5  ;;  %v5016_v21 = vor.u32 %v5883_v12, %v5013_v13  ;;  %v5827_v4 = vld [vmem:[%s6942_s1 + $0x14] sm:$0xf]  ;;  %v4789_v5 = vld [vmem:[%s6942_s1 + $0x18] sm:$0xf0] }
 0x1d6   : > { %4267 = vmatpush.bf16.msrb.mxu3 %v5748_v19  ;;  %v4813_v19 = vld [vmem:[%s6942_s1 + $0x48] sm:$0xf0]  ;;  %v5875_v12 = vld [vmem:[%s6942_s1 + $0x194] sm:$0xf]  ;;  %v4981_v13 = vld [vmem:[%s6942_s1 + $0x198] sm:$0xf0] }
 0x1d7   : > { %4226 = vmatpush.bf16.msrb.mxu0 %v5548_v26  ;;  %v5005_v26 = vld [vmem:[%s6942_s1 + $0x1c8] sm:$0xf0]  ;;  %v4816_v28 = vor.u32 %v5833_v17, %v4813_v19  ;;  %v4856_v17 = vor.u32 %v5843_v6, %v4853_v8  ;;  %v4920_v19 = vor.u32 %v5859_v9, %v4917_v10  ;;  %v4984_v23 = vor.u32 %v5875_v12, %v4981_v13  ;;  %v5915_v6 = vld [vmem:[%s6942_s1 + $0x2d4] sm:$0xf]  ;;  %v5141_v8 = vld [vmem:[%s6942_s1 + $0x2d8] sm:$0xf0] }
 0x1d8   : > { %4240 = vmatpush.bf16.msrb.mxu1 %v5612_v31  ;;  %v5831_v31 = vld [vmem:[%s6942_s1 + $0x34] sm:$0xf]  ;;  %v5008_v35 = vor.u32 %v5881_v25, %v5005_v26  ;;  %v5873_v25 = vld [vmem:[%s6942_s1 + $0x184] sm:$0xf]  ;;  %v4973_v26 = vld [vmem:[%s6942_s1 + $0x188] sm:$0xf0] }
 0x1d9   : > { %4254 = vmatpush.bf16.msrb.mxu2 %v5676_v32  ;;  %v4805_v32 = vld [vmem:[%s6942_s1 + $0x38] sm:$0xf0]  ;;  %v5931_v9 = vld [vmem:[%s6942_s1 + $0x354] sm:$0xf] }
 0x1da   : > { %4268 = vmatpush.bf16.msrb.mxu3 %v5740_v37  ;;  %4227 = vmatmul.bf16.vlgmr.msrb.gmra.mxu0 %v7282_v49  ;;  %v5863_v37 = vld [vmem:[%s6942_s1 + $0x134] sm:$0xf]  ;;  %v4808_v41 = vor.u32 %v5831_v31, %v4805_v32  ;;  %v5157_v32 = vld [vmem:[%s6942_s1 + $0x2f8] sm:$0xf0] }
 0x1db   : > { %4275 = vmatpush.bf16.msra.mxu0 %v4840_v38  ;;  %4241 = vmatmul.bf16.vlgmr.msrb.gmra.mxu1 %v7289_v58  ;;  %v4933_v38 = vld [vmem:[%s6942_s1 + $0x138] sm:$0xf0]  ;;  %v5947_v12 = vld [vmem:[%s6942_s1 + $0x3d4] sm:$0xf] }
 0x1dc   : > { %4289 = vmatpush.bf16.msra.mxu1 %v4904_v42  ;;  %4255 = vmatmul.bf16.vlgmr.msrb.gmra.mxu2 %v7287_v55  ;;  %v4872_v42 = vor.u32 %v5847_v33, %v4869_v36  ;;  %v5935_v33 = vld [vmem:[%s6942_s1 + $0x374] sm:$0xf]  ;;  %v5205_v10 = vld [vmem:[%s6942_s1 + $0x358] sm:$0xf0] }
 0x1dd   : > { %4303 = vmatpush.bf16.msra.mxu2 %v4968_v43  ;;  %4269 = vmatmul.bf16.vlgmr.msrb.gmra.mxu3 %v7293_v63  ;;  %v4936_v43 = vor.u32 %v5863_v37, %v4933_v38  ;;  %v4912_v37 = vor.u32 %v5857_v22, %v4909_v24  ;;  %v5951_v38 = vld [vmem:[%s6942_s1 + $0x3f4] sm:$0xf]  ;;  %v5269_v13 = vld [vmem:[%s6942_s1 + $0x3d8] sm:$0xf0]  ;;  %v5945_v22 = vld [vmem:[%s6942_s1 + $0x3c4] sm:$0xf] }
 0x1de   : > { %4317 = vmatpush.bf16.msra.mxu3 %v5032_v47  ;;  %v5000_v47 = vor.u32 %v5879_v39, %v4997_v40  ;;  %v5285_v39 = vld [vmem:[%s6942_s1 + $0x3f8] sm:$0xf0]  ;;  %v4976_v40 = vor.u32 %v5873_v25, %v4973_v26  ;;  %v5895_v26 = vld [vmem:[%s6942_s1 + $0x234] sm:$0xf] }
 0x1df   : > { %4276 = vmatpush.bf16.msra.mxu0 %v4832_v1  ;;  %v4800_v1 = vor.u32 %v5829_v44, %v4797_v45  ;;  %v5901_v44 = vld [vmem:[%s6942_s1 + $0x264] sm:$0xf]  ;;  %v5085_v45 = vld [vmem:[%s6942_s1 + $0x268] sm:$0xf0] }
 0x1e0   : > { %4290 = vmatpush.bf16.msra.mxu1 %v4896_v2  ;;  %v4864_v2 = vor.u32 %v5845_v46, %v4861_v50  ;;  %v5917_v46 = vld [vmem:[%s6942_s1 + $0x2e4] sm:$0xf]  ;;  %v5149_v50 = vld [vmem:[%s6942_s1 + $0x2e8] sm:$0xf0] }
 0x1e1   : > { %4304 = vmatpush.bf16.msra.mxu2 %v4960_v3  ;;  %v4928_v3 = vor.u32 %v5861_v51, %v4925_v54  ;;  %v5933_v51 = vld [vmem:[%s6942_s1 + $0x364] sm:$0xf]  ;;  %v5213_v54 = vld [vmem:[%s6942_s1 + $0x368] sm:$0xf0] }
 0x1e2   : > { %4318 = vmatpush.bf16.msra.mxu3 %v5024_v7  ;;  %v4992_v7 = vor.u32 %v5877_v59, %v4989_v62  ;;  %v5949_v59 = vld [vmem:[%s6942_s1 + $0x3e4] sm:$0xf]  ;;  %v5277_v62 = vld [vmem:[%s6942_s1 + $0x3e8] sm:$0xf0] }
 0x1e3   : > { %4277 = vmatpush.bf16.msra.mxu0 %v4824_v14  ;;  %v4792_v14 = vor.u32 %v5827_v4, %v4789_v5  ;;  %v5899_v4 = vld [vmem:[%s6942_s1 + $0x254] sm:$0xf]  ;;  %v5077_v5 = vld [vmem:[%s6942_s1 + $0x258] sm:$0xf0] }
 0x1e4   : > { %4291 = vmatpush.bf16.msra.mxu1 %v4888_v15  ;;  %v5825_v15 = vld [vmem:[%s6942_s1 + $0x4] sm:$0xf] }
 0x1e5   : > { %4305 = vmatpush.bf16.msra.mxu2 %v4952_v16  ;;  %v4781_v16 = vld [vmem:[%s6942_s1 + $0x8] sm:$0xf0] }
 0x1e6   : > { %4319 = vmatpush.bf16.msra.mxu3 %v5016_v21  ;;  %v4845_v21 = vld [vmem:[%s6942_s1 + $0x88] sm:$0xf0]  ;;  %v4784_v31 = vor.u32 %v5825_v15, %v4781_v16  ;;  %v5144_v15 = vor.u32 %v5915_v6, %v5141_v8  ;;  %v5208_v16 = vor.u32 %v5931_v9, %v5205_v10  ;;  %v5173_v6 = vld [vmem:[%s6942_s1 + $0x318] sm:$0xf0]  ;;  %v5889_v10 = vld [vmem:[%s6942_s1 + $0x204] sm:$0xf] }
 0x1e7   : > { %4278 = vmatpush.bf16.msra.mxu0 %v4816_v28  ;;  %v5903_v28 = vld [vmem:[%s6942_s1 + $0x274] sm:$0xf]  ;;  %v4848_v36 = vor.u32 %v5841_v20, %v4845_v21  ;;  %v5133_v20 = vld [vmem:[%s6942_s1 + $0x2c8] sm:$0xf0]  ;;  %v5237_v8 = vld [vmem:[%s6942_s1 + $0x398] sm:$0xf0] }
 0x1e8   : > { %4292 = vmatpush.bf16.msra.mxu1 %v4880_v29  ;;  %v5093_v29 = vld [vmem:[%s6942_s1 + $0x278] sm:$0xf0]  ;;  %v5197_v21 = vld [vmem:[%s6942_s1 + $0x348] sm:$0xf0] }
 0x1e9   : > { %4306 = vmatpush.bf16.msra.mxu2 %v4944_v30  ;;  %v5919_v30 = vld [vmem:[%s6942_s1 + $0x2f4] sm:$0xf] }
 0x1ea   : > { %4320 = vmatpush.bf16.msra.mxu3 %v5008_v35  ;;  %v5221_v35 = vld [vmem:[%s6942_s1 + $0x378] sm:$0xf0] }
 0x1eb   : > { %4279 = vmatpush.bf16.msra.mxu0 %v4808_v41  ;;  %v5096_v41 = vor.u32 %v5903_v28, %v5093_v29  ;;  %v5061_v28 = vld [vmem:[%s6942_s1 + $0x238] sm:$0xf0]  ;;  %v5911_v29 = vld [vmem:[%s6942_s1 + $0x2b4] sm:$0xf] }
 0x1ec   : > { %4293 = vmatpush.bf16.msra.mxu1 %v4872_v42  ;;  %v5160_v42 = vor.u32 %v5919_v30, %v5157_v32  ;;  %v5927_v32 = vld [vmem:[%s6942_s1 + $0x334] sm:$0xf] }
 0x1ed   : > { %4307 = vmatpush.bf16.msra.mxu2 %v4936_v43  ;;  %v5224_v43 = vor.u32 %v5935_v33, %v5221_v35  ;;  %v5189_v33 = vld [vmem:[%s6942_s1 + $0x338] sm:$0xf0]  ;;  %v5943_v35 = vld [vmem:[%s6942_s1 + $0x3b4] sm:$0xf] }
 0x1ee   : > { %4321 = vmatpush.bf16.msra.mxu3 %v5000_v47  ;;  %v5288_v47 = vor.u32 %v5951_v38, %v5285_v39  ;;  %v5192_v39 = vor.u32 %v5927_v32, %v5189_v33 }
 0x1ef   : > { %4280 = vmatpush.bf16.msra.mxu0 %v4800_v1  ;;  %v5088_v1 = vor.u32 %v5901_v44, %v5085_v45  ;;  %v5117_v44 = vld [vmem:[%s6942_s1 + $0x2a8] sm:$0xf0]  ;;  %v5925_v45 = vld [vmem:[%s6942_s1 + $0x324] sm:$0xf] }
 0x1f0   : > { %4294 = vmatpush.bf16.msra.mxu1 %v4864_v2  ;;  %v5152_v2 = vor.u32 %v5917_v46, %v5149_v50  ;;  %v5181_v46 = vld [vmem:[%s6942_s1 + $0x328] sm:$0xf0] }
 0x1f1   : > { %4308 = vmatpush.bf16.msra.mxu2 %v4928_v3  ;;  %v5216_v3 = vor.u32 %v5933_v51, %v5213_v54  ;;  %v5245_v50 = vld [vmem:[%s6942_s1 + $0x3a8] sm:$0xf0] }
 0x1f2   : > { %4322 = vmatpush.bf16.msra.mxu3 %v4992_v7  ;;  %v5280_v7 = vor.u32 %v5949_v59, %v5277_v62  ;;  %v5184_v59 = vor.u32 %v5925_v45, %v5181_v46  ;;  %v5891_v62 = vld [vmem:[%s6942_s1 + $0x214] sm:$0xf] }
 0x1f3   : > { %4281 = vmatpush.bf16.msra.mxu0 %v4792_v14  ;;  %v5080_v14 = vor.u32 %v5899_v4, %v5077_v5  ;;  %v5109_v4 = vld [vmem:[%s6942_s1 + $0x298] sm:$0xf0]  ;;  %v5923_v5 = vld [vmem:[%s6942_s1 + $0x314] sm:$0xf] }
 0x1f4   : > { %4295 = vmatpush.bf16.msra.mxu1 %v4856_v17  ;;  %v5069_v17 = vld [vmem:[%s6942_s1 + $0x248] sm:$0xf0] }
 0x1f5   : > { %4309 = vmatpush.bf16.msra.mxu2 %v4920_v19  ;;  %v5913_v19 = vld [vmem:[%s6942_s1 + $0x2c4] sm:$0xf] }
 0x1f6   : > { %4323 = vmatpush.bf16.msra.mxu3 %v4984_v23  ;;  %v5136_v24 = vor.u32 %v5913_v19, %v5133_v20  ;;  %v5165_v19 = vld [vmem:[%s6942_s1 + $0x308] sm:$0xf0] }
 0x1f7   : > { %4282 = vmatpush.bf16.msra.mxu0 %v4784_v31  ;;  %v5125_v31 = vld [vmem:[%s6942_s1 + $0x2b8] sm:$0xf0]  ;;  %v5229_v20 = vld [vmem:[%s6942_s1 + $0x388] sm:$0xf0] }
 0x1f8   : > { %4296 = vmatpush.bf16.msra.mxu1 %v4848_v36  ;;  %v5253_v36 = vld [vmem:[%s6942_s1 + $0x3b8] sm:$0xf0]  ;;  %v5128_v38 = vor.u32 %v5911_v29, %v5125_v31  ;;  %v6015_v29 = vld [vmem:[%s6942_s1 + $0x5f4] sm:$0xf] }
 0x1f9   : > { %4310 = vmatpush.bf16.msra.mxu2 %v4912_v37  ;;  %v5064_v37 = vor.u32 %v5895_v26, %v5061_v28 }
 0x1fa   : > { %4324 = vmatpush.bf16.msra.mxu3 %v4976_v40  ;;  %4283 = vmatmul.bf16.vlgmr.msra.gmra.mxu0 %v7032_v11  ;;  %v5897_v11 = vld [vmem:[%s6942_s1 + $0x244] sm:$0xf] }
 0x1fb   : > { %4331 = vmatpush.bf16.msrb.mxu0 %v5096_v41  ;;  %4297 = vmatmul.bf16.vlgmr.msra.gmra.mxu1 %v7048_v27  ;;  %v5929_v27 = vld [vmem:[%s6942_s1 + $0x344] sm:$0xf]  ;;  %v5072_v23 = vor.u32 %v5897_v11, %v5069_v17  ;;  %v5053_v41 = vld [vmem:[%s6942_s1 + $0x228] sm:$0xf0] }
 0x1fc   : > { %4345 = vmatpush.bf16.msrb.mxu1 %v5160_v42  ;;  %4311 = vmatmul.bf16.vlgmr.msra.gmra.mxu2 %v7038_v18  ;;  %v5272_v18 = vor.u32 %v5947_v12, %v5269_v13  ;;  %v5200_v25 = vor.u32 %v5929_v27, %v5197_v21  ;;  %v5893_v40 = vld [vmem:[%s6942_s1 + $0x224] sm:$0xf]  ;;  %v5037_v12 = vld [vmem:[%s6942_s1 + $0x208] sm:$0xf0]  ;;  %v5967_v27 = vld [vmem:[%s6942_s1 + $0x474] sm:$0xf] }
 0x1fd   : > { %4359 = vmatpush.bf16.msrb.mxu2 %v5224_v43  ;;  %4325 = vmatmul.bf16.vlgmr.msra.gmra.mxu3 %v7054_v34  ;;  %v5261_v34 = vld [vmem:[%s6942_s1 + $0x3c8] sm:$0xf0]  ;;  %v5909_v42 = vld [vmem:[%s6942_s1 + $0x2a4] sm:$0xf]  ;;  %v5256_v43 = vor.u32 %v5943_v35, %v5253_v36  ;;  %v5056_v51 = vor.u32 %v5893_v40, %v5053_v41  ;;  %v5349_v21 = vld [vmem:[%s6942_s1 + $0x478] sm:$0xf0] }
 0x1fe   : > { %4373 = vmatpush.bf16.msrb.mxu3 %v5288_v47  ;;  %v5264_v30 = vor.u32 %v5945_v22, %v5261_v34  ;;  %v5941_v47 = vld [vmem:[%s6942_s1 + $0x3a4] sm:$0xf]  ;;  %v5120_v54 = vor.u32 %v5909_v42, %v5117_v44  ;;  %v5983_v22 = vld [vmem:[%s6942_s1 + $0x4f4] sm:$0xf]  ;;  %v5040_v34 = vor.u32 %v5889_v10, %v5037_v12  ;;  %v5352_v32 = vor.u32 %v5967_v27, %v5349_v21  ;;  %v5405_v40 = vld [vmem:[%s6942_s1 + $0x4e8] sm:$0xf0] }
 0x1ff   : > { %4332 = vmatpush.bf16.msrb.mxu0 %v5088_v1  ;;  %v5045_v1 = vld [vmem:[%s6942_s1 + $0x218] sm:$0xf0]  ;;  %v5921_v11 = vld [vmem:[%s6942_s1 + $0x304] sm:$0xf]  ;;  %v5469_v42 = vld [vmem:[%s6942_s1 + $0x568] sm:$0xf0] }
 0x200   : > { %4346 = vmatpush.bf16.msrb.mxu1 %v5152_v2  ;;  %v5907_v2 = vld [vmem:[%s6942_s1 + $0x294] sm:$0xf]  ;;  %v5048_v9 = vor.u32 %v5891_v62, %v5045_v1  ;;  %v5168_v28 = vor.u32 %v5921_v11, %v5165_v19  ;;  %v5965_v36 = vld [vmem:[%s6942_s1 + $0x464] sm:$0xf]  ;;  %v5533_v44 = vld [vmem:[%s6942_s1 + $0x5e8] sm:$0xf0] }
 0x201   : > { %4360 = vmatpush.bf16.msrb.mxu2 %v5216_v3  ;;  %v5248_v3 = vor.u32 %v5941_v47, %v5245_v50  ;;  %v5112_v13 = vor.u32 %v5907_v2, %v5109_v4  ;;  %v5997_v41 = vld [vmem:[%s6942_s1 + $0x564] sm:$0xf]  ;;  %v5963_v50 = vld [vmem:[%s6942_s1 + $0x454] sm:$0xf]  ;;  %v5397_v62 = vld [vmem:[%s6942_s1 + $0x4d8] sm:$0xf0] }
 0x202   : > { %4374 = vmatpush.bf16.msrb.mxu3 %v5280_v7  ;;  %v5939_v7 = vld [vmem:[%s6942_s1 + $0x394] sm:$0xf]  ;;  %v5472_v47 = vor.u32 %v5997_v41, %v5469_v42  ;;  %v5461_v2 = vld [vmem:[%s6942_s1 + $0x558] sm:$0xf0]  ;;  %v5993_v10 = vld [vmem:[%s6942_s1 + $0x544] sm:$0xf] }
 0x203   : > { %4333 = vmatpush.bf16.msrb.mxu0 %v5080_v14  ;;  %v5176_v14 = vor.u32 %v5923_v5, %v5173_v6  ;;  %v5240_v17 = vor.u32 %v5939_v7, %v5237_v8  ;;  %v5995_v1 = vld [vmem:[%s6942_s1 + $0x554] sm:$0xf]  ;;  %v5525_v4 = vld [vmem:[%s6942_s1 + $0x5d8] sm:$0xf0]  ;;  %v5961_v7 = vld [vmem:[%s6942_s1 + $0x444] sm:$0xf] }
 0x204   : > { %4347 = vmatpush.bf16.msrb.mxu1 %v5144_v15  ;;  %v5905_v15 = vld [vmem:[%s6942_s1 + $0x284] sm:$0xf]  ;;  %v5464_v6 = vor.u32 %v5995_v1, %v5461_v2  ;;  %v5959_v11 = vld [vmem:[%s6942_s1 + $0x434] sm:$0xf]  ;;  %v5445_v21 = vld [vmem:[%s6942_s1 + $0x538] sm:$0xf0] }
 0x205   : > { %4361 = vmatpush.bf16.msrb.mxu2 %v5208_v16  ;;  %v5101_v16 = vld [vmem:[%s6942_s1 + $0x288] sm:$0xf0]  ;;  %v5977_v8 = vld [vmem:[%s6942_s1 + $0x4c4] sm:$0xf]  ;;  %v5975_v19 = vld [vmem:[%s6942_s1 + $0x4b4] sm:$0xf] }
 0x206   : > { %4375 = vmatpush.bf16.msrb.mxu3 %v5272_v18  ;;  %v5937_v18 = vld [vmem:[%s6942_s1 + $0x384] sm:$0xf]  ;;  %v5104_v26 = vor.u32 %v5905_v15, %v5101_v16  ;;  %v5991_v27 = vld [vmem:[%s6942_s1 + $0x534] sm:$0xf] }
 0x207   : > { %4334 = vmatpush.bf16.msrb.mxu0 %v5072_v23  ;;  %v5413_v23 = vld [vmem:[%s6942_s1 + $0x4f8] sm:$0xf0]  ;;  %v5232_v31 = vor.u32 %v5937_v18, %v5229_v20  ;;  %v6009_v12 = vld [vmem:[%s6942_s1 + $0x5c4] sm:$0xf]  ;;  %v5955_v42 = vld [vmem:[%s6942_s1 + $0x414] sm:$0xf] }
 0x208   : > { %4348 = vmatpush.bf16.msrb.mxu1 %v5136_v24  ;;  %v5999_v24 = vld [vmem:[%s6942_s1 + $0x574] sm:$0xf]  ;;  %v5416_v33 = vor.u32 %v5983_v22, %v5413_v23  ;;  %v5381_v20 = vld [vmem:[%s6942_s1 + $0x4b8] sm:$0xf0]  ;;  %v7457_v22 = vpop.f32.mrf.mxu0  ;;  %v5953_v2 = vld [vmem:[%s6942_s1 + $0x404] sm:$0xf] }
 0x209   : > { %4362 = vmatpush.bf16.msrb.mxu2 %v5200_v25  ;;  %v5477_v25 = vld [vmem:[%s6942_s1 + $0x578] sm:$0xf0] }
 0x20a   : > { %4376 = vmatpush.bf16.msrb.mxu3 %v5264_v30  ;;  %v5541_v30 = vld [vmem:[%s6942_s1 + $0x5f8] sm:$0xf0]  ;;  %v5480_v35 = vor.u32 %v5999_v24, %v5477_v25  ;;  %v7461_v24 = vpop.f32.mrf.mxu1 }
 0x20b   : > { %4335 = vmatpush.bf16.msrb.mxu0 %v5064_v37  ;;  %v5341_v37 = vld [vmem:[%s6942_s1 + $0x468] sm:$0xf0]  ;;  %v5509_v23 = vld [vmem:[%s6942_s1 + $0x5b8] sm:$0xf0] }
 0x20c   : > { %4349 = vmatpush.bf16.msrb.mxu1 %v5128_v38  ;;  %v5981_v38 = vld [vmem:[%s6942_s1 + $0x4e4] sm:$0xf]  ;;  %v5344_v45 = vor.u32 %v5965_v36, %v5341_v37  ;;  %v5437_v36 = vld [vmem:[%s6942_s1 + $0x528] sm:$0xf0] }
 0x20d   : > { %4363 = vmatpush.bf16.msrb.mxu2 %v5192_v39  ;;  %v5544_v39 = vor.u32 %v6015_v29, %v5541_v30  ;;  %v5408_v46 = vor.u32 %v5981_v38, %v5405_v40  ;;  %v5957_v29 = vld [vmem:[%s6942_s1 + $0x424] sm:$0xf]  ;;  %v5309_v30 = vld [vmem:[%s6942_s1 + $0x428] sm:$0xf0] }
 0x20e   : > { %4377 = vmatpush.bf16.msrb.mxu3 %v5256_v43  ;;  %v6013_v43 = vld [vmem:[%s6942_s1 + $0x5e4] sm:$0xf]  ;;  %v5501_v38 = vld [vmem:[%s6942_s1 + $0x5a8] sm:$0xf0] }
 0x20f   : > { %4336 = vmatpush.bf16.msrb.mxu0 %v5056_v51  ;;  %v5333_v51 = vld [vmem:[%s6942_s1 + $0x458] sm:$0xf0]  ;;  %v6005_v37 = vld [vmem:[%s6942_s1 + $0x5a4] sm:$0xf] }
 0x210   : > { %4350 = vmatpush.bf16.msrb.mxu1 %v5120_v54  ;;  %v5979_v54 = vld [vmem:[%s6942_s1 + $0x4d4] sm:$0xf] }
 0x211   : > { %4364 = vmatpush.bf16.msrb.mxu2 %v5184_v59  ;;  %v5536_v59 = vor.u32 %v6013_v43, %v5533_v44  ;;  %v5400_v5 = vor.u32 %v5979_v54, %v5397_v62  ;;  %v5301_v43 = vld [vmem:[%s6942_s1 + $0x418] sm:$0xf0]  ;;  %v5971_v44 = vld [vmem:[%s6942_s1 + $0x494] sm:$0xf]  ;;  %v7479_v54 = vpop.f32.mrf.mxu3 }
 0x212   : > { %4378 = vmatpush.bf16.msrb.mxu3 %v5248_v3  ;;  %v6011_v3 = vld [vmem:[%s6942_s1 + $0x5d4] sm:$0xf]  ;;  %v5493_v62 = vld [vmem:[%s6942_s1 + $0x598] sm:$0xf0]  ;;  %v5304_v1 = vor.u32 %v5955_v42, %v5301_v43 }
 0x213   : > { %4337 = vmatpush.bf16.msrb.mxu0 %v5048_v9  ;;  %v5389_v9 = vld [vmem:[%s6942_s1 + $0x4c8] sm:$0xf0] }
 0x214   : > { %4351 = vmatpush.bf16.msrb.mxu1 %v5112_v13  ;;  %v5517_v13 = vld [vmem:[%s6942_s1 + $0x5c8] sm:$0xf0]  ;;  %v5392_v15 = vor.u32 %v5977_v8, %v5389_v9  ;;  %v7490_v8 = vpop.f32.mrf.mxu1 }
 0x215   : > { %4365 = vmatpush.bf16.msrb.mxu2 %v5176_v14  ;;  %v5520_v18 = vor.u32 %v6009_v12, %v5517_v13  ;;  %v5421_v9 = vld [vmem:[%s6942_s1 + $0x508] sm:$0xf0]  ;;  %v6031_v12 = vld [vmem:[%s6942_s1 + $0x674] sm:$0xf]  ;;  %v5605_v13 = vld [vmem:[%s6942_s1 + $0x678] sm:$0xf0] }
 0x216   : > { %4379 = vmatpush.bf16.msrb.mxu3 %v5240_v17  ;;  %v5317_v17 = vld [vmem:[%s6942_s1 + $0x438] sm:$0xf0] }
 0x217   : > { %4338 = vmatpush.bf16.msrb.mxu0 %v5040_v34  ;;  %v6007_v34 = vld [vmem:[%s6942_s1 + $0x5b4] sm:$0xf]  ;;  %v5320_v25 = vor.u32 %v5959_v11, %v5317_v17  ;;  %v5733_v17 = vld [vmem:[%s6942_s1 + $0x778] sm:$0xf0] }
 0x218   : > { %4352 = vmatpush.bf16.msrb.mxu1 %v5104_v26  ;;  %v5384_v26 = vor.u32 %v5975_v19, %v5381_v20  ;;  %v6063_v11 = vld [vmem:[%s6942_s1 + $0x774] sm:$0xf] }
 0x219   : > { %4366 = vmatpush.bf16.msrb.mxu2 %v5168_v28  ;;  %v5448_v28 = vor.u32 %v5991_v27, %v5445_v21  ;;  %v6079_v20 = vld [vmem:[%s6942_s1 + $0x7f4] sm:$0xf]  ;;  %v5797_v27 = vld [vmem:[%s6942_s1 + $0x7f8] sm:$0xf0] }
 0x21a   : > { %4380 = vmatpush.bf16.msrb.mxu3 %v5232_v31  ;;  %4339 = vmatmul.bf16.vlgmr.msrb.gmra.mxu0 %v7114_v56  ;;  %v5336_v56 = vor.u32 %v5963_v50, %v5333_v51  ;;  %v5973_v31 = vld [vmem:[%s6942_s1 + $0x4a4] sm:$0xf]  ;;  %v5987_v50 = vld [vmem:[%s6942_s1 + $0x514] sm:$0xf]  ;;  %v5429_v51 = vld [vmem:[%s6942_s1 + $0x518] sm:$0xf0] }
 0x21b   : > { %4387 = vmatpush.bf16.msra.mxu0 %v5352_v32  ;;  %4353 = vmatmul.bf16.vlgmr.msrb.gmra.mxu1 %v7121_v61  ;;  %v5528_v61 = vor.u32 %v6011_v3, %v5525_v4  ;;  %v5512_v32 = vor.u32 %v6007_v34, %v5509_v23  ;;  %v5293_v3 = vld [vmem:[%s6942_s1 + $0x408] sm:$0xf0]  ;;  %v7485_v4 = vpop.f32.mrf.mxu0  ;;  %v5608_v34 = vor.u32 %v6031_v12, %v5605_v13 }
 0x21c   : > { %4401 = vmatpush.bf16.msra.mxu1 %v5416_v33  ;;  %4367 = vmatmul.bf16.vlgmr.msrb.gmra.mxu2 %v7119_v60  ;;  %v5325_v60 = vld [vmem:[%s6942_s1 + $0x448] sm:$0xf0] }
 0x21d   : > { %4415 = vmatpush.bf16.msra.mxu2 %v5480_v35  ;;  %4381 = vmatmul.bf16.vlgmr.msrb.gmra.mxu3 %v7125_v0  ;;  %v5453_v0 = vld [vmem:[%s6942_s1 + $0x548] sm:$0xf0]  ;;  %v5328_v14 = vor.u32 %v5961_v7, %v5325_v60  ;;  %v5989_v35 = vld [vmem:[%s6942_s1 + $0x524] sm:$0xf] }
 0x21e   : > { %4429 = vmatpush.bf16.msra.mxu3 %v5544_v39  ;;  %v5456_v16 = vor.u32 %v5993_v10, %v5453_v0  ;;  %v5373_v33 = vld [vmem:[%s6942_s1 + $0x4a8] sm:$0xf0]  ;;  %v5312_v39 = vor.u32 %v5957_v29, %v5309_v30  ;;  %v5440_v41 = vor.u32 %v5989_v35, %v5437_v36  ;;  %v5985_v60 = vld [vmem:[%s6942_s1 + $0x504] sm:$0xf]  ;;  %v7511_v36 = vpop.f32.mrf.mxu3 }
 0x21f   : > { %4388 = vmatpush.bf16.msra.mxu0 %v5344_v45  ;;  %v5376_v40 = vor.u32 %v5973_v31, %v5373_v33  ;;  %v7474_v45 = vpop.f32.mrf.mxu2  ;;  %v5357_v7 = vld [vmem:[%s6942_s1 + $0x488] sm:$0xf0]  ;;  %v6001_v10 = vld [vmem:[%s6942_s1 + $0x584] sm:$0xf]  ;;  %v5800_v31 = vor.u32 %v6079_v20, %v5797_v27  ;;  %v5701_v20 = vld [vmem:[%s6942_s1 + $0x738] sm:$0xf0] }
 0x220   : > { %4402 = vmatpush.bf16.msra.mxu1 %v5408_v46  ;;  %v5504_v46 = vor.u32 %v6005_v37, %v5501_v38  ;;  %v5485_v0 = vld [vmem:[%s6942_s1 + $0x588] sm:$0xf0]  ;;  %v6045_v29 = vld [vmem:[%s6942_s1 + $0x6e4] sm:$0xf] }
 0x221   : > { %4416 = vmatpush.bf16.msra.mxu2 %v5472_v47  ;;  %v5365_v47 = vld [vmem:[%s6942_s1 + $0x498] sm:$0xf0]  ;;  %v5488_v21 = vor.u32 %v6001_v10, %v5485_v0  ;;  %v6061_v33 = vld [vmem:[%s6942_s1 + $0x764] sm:$0xf]  ;;  %v5725_v35 = vld [vmem:[%s6942_s1 + $0x768] sm:$0xf0] }
 0x222   : > { %4430 = vmatpush.bf16.msra.mxu3 %v5536_v59  ;;  %v6003_v59 = vld [vmem:[%s6942_s1 + $0x594] sm:$0xf]  ;;  %v6077_v37 = vld [vmem:[%s6942_s1 + $0x7e4] sm:$0xf]  ;;  %v5789_v38 = vld [vmem:[%s6942_s1 + $0x7e8] sm:$0xf0]  ;;  %v5728_v43 = vor.u32 %v6061_v33, %v5725_v35 }
 0x223   : > { %4389 = vmatpush.bf16.msra.mxu0 %v5336_v56  ;;  %v5368_v56 = vor.u32 %v5971_v44, %v5365_v47  ;;  %v6027_v44 = vld [vmem:[%s6942_s1 + $0x654] sm:$0xf]  ;;  %v6037_v33 = vld [vmem:[%s6942_s1 + $0x6a4] sm:$0xf] }
 0x224   : > { %4403 = vmatpush.bf16.msra.mxu1 %v5400_v5  ;;  %v5432_v5 = vor.u32 %v5987_v50, %v5429_v51  ;;  %v6043_v47 = vld [vmem:[%s6942_s1 + $0x6d4] sm:$0xf]  ;;  %v7520_v50 = vpop.f32.mrf.mxu1  ;;  %v5792_v51 = vor.u32 %v6077_v37, %v5789_v38  ;;  %v5693_v37 = vld [vmem:[%s6942_s1 + $0x728] sm:$0xf0]  ;;  %v6069_v38 = vld [vmem:[%s6942_s1 + $0x7a4] sm:$0xf] }
 0x225   : > { %4417 = vmatpush.bf16.msra.mxu2 %v5464_v6  ;;  %v5969_v6 = vld [vmem:[%s6942_s1 + $0x484] sm:$0xf] }
 0x226   : > { %4431 = vmatpush.bf16.msra.mxu3 %v5528_v61  ;;  %v5496_v61 = vor.u32 %v6003_v59, %v5493_v62  ;;  %v5360_v19 = vor.u32 %v5969_v6, %v5357_v7  ;;  %v5653_v59 = vld [vmem:[%s6942_s1 + $0x6d8] sm:$0xf0]  ;;  %v6075_v62 = vld [vmem:[%s6942_s1 + $0x7d4] sm:$0xf]  ;;  %v5645_v7 = vld [vmem:[%s6942_s1 + $0x6c8] sm:$0xf0]  ;;  %v7543_v12 = vpop.f32.mrf.mxu3 }
 0x227   : > { %4390 = vmatpush.bf16.msra.mxu0 %v5328_v14  ;;  %v6047_v14 = vld [vmem:[%s6942_s1 + $0x6f4] sm:$0xf]  ;;  %v7506_v30 = vpop.f32.mrf.mxu2 }
 0x228   : > { %4404 = vmatpush.bf16.msra.mxu1 %v5392_v15  ;;  %v5296_v15 = vor.u32 %v5953_v2, %v5293_v3  ;;  %v5656_v3 = vor.u32 %v6043_v47, %v5653_v59  ;;  %v5557_v47 = vld [vmem:[%s6942_s1 + $0x618] sm:$0xf0] }
 0x229   : > { %4418 = vmatpush.bf16.msra.mxu2 %v5456_v16  ;;  %v5669_v16 = vld [vmem:[%s6942_s1 + $0x6f8] sm:$0xf0] }
 0x22a   : > { %4432 = vmatpush.bf16.msra.mxu3 %v5520_v18  ;;  %v5424_v18 = vor.u32 %v5985_v60, %v5421_v9  ;;  %v5672_v23 = vor.u32 %v6047_v14, %v5669_v16  ;;  %v5709_v60 = vld [vmem:[%s6942_s1 + $0x748] sm:$0xf0]  ;;  %v5573_v16 = vld [vmem:[%s6942_s1 + $0x638] sm:$0xf0] }
 0x22b   : > { %4391 = vmatpush.bf16.msra.mxu0 %v5320_v25  ;;  %v5736_v25 = vor.u32 %v6063_v11, %v5733_v17  ;;  %v5773_v9 = vld [vmem:[%s6942_s1 + $0x7c8] sm:$0xf0]  ;;  %v6039_v11 = vld [vmem:[%s6942_s1 + $0x6b4] sm:$0xf] }
 0x22c   : > { %4405 = vmatpush.bf16.msra.mxu1 %v5384_v26  ;;  %v6029_v26 = vld [vmem:[%s6942_s1 + $0x664] sm:$0xf] }
 0x22d   : > { %4419 = vmatpush.bf16.msra.mxu2 %v5448_v28  ;;  %v5597_v28 = vld [vmem:[%s6942_s1 + $0x668] sm:$0xf0] }
 0x22e   : > { %4433 = vmatpush.bf16.msra.mxu3 %v5512_v32  ;;  %v5661_v32 = vld [vmem:[%s6942_s1 + $0x6e8] sm:$0xf0] }
 0x22f   : > { %4392 = vmatpush.bf16.msra.mxu0 %v5312_v39  ;;  %v5600_v39 = vor.u32 %v6029_v26, %v5597_v28  ;;  %v5664_v42 = vor.u32 %v6045_v29, %v5661_v32  ;;  %v5565_v32 = vld [vmem:[%s6942_s1 + $0x628] sm:$0xf0] }
 0x230   : > { %4406 = vmatpush.bf16.msra.mxu1 %v5376_v40  ;;  %v4075_v40 = vadd.f32 %v7461_v24, %v7457_v22  ;;  %v6059_v22 = vld [vmem:[%s6942_s1 + $0x754] sm:$0xf]  ;;  %v5717_v24 = vld [vmem:[%s6942_s1 + $0x758] sm:$0xf0] }
 0x231   : > { %4420 = vmatpush.bf16.msra.mxu2 %v5440_v41  ;;  %v4116_v41 = vpop.f32.mrf.mxu0 }
 0x232   : > { %4434 = vmatpush.bf16.msra.mxu3 %v5504_v46  ;;  %v5589_v46 = vld [vmem:[%s6942_s1 + $0x658] sm:$0xf0]  ;;  %v4089_v2 = vadd.f32 %v7474_v45, %v4075_v40  ;;  %v7540_v45 = vpop.f32.mrf.mxu2 }
 0x233   : > { %4393 = vmatpush.bf16.msra.mxu0 %v5304_v1  ;;  %v5781_v1 = vld [vmem:[%s6942_s1 + $0x7d8] sm:$0xf0] }
 0x234   : > { %4407 = vmatpush.bf16.msra.mxu1 %v5368_v56  ;;  %v5720_v56 = vor.u32 %v6059_v22, %v5717_v24  ;;  %v5784_v6 = vor.u32 %v6075_v62, %v5781_v1  ;;  %v4103_v0 = vadd.f32 %v7479_v54, %v4089_v2  ;;  %v6071_v54 = vld [vmem:[%s6942_s1 + $0x7b4] sm:$0xf]  ;;  %v5621_v24 = vld [vmem:[%s6942_s1 + $0x698] sm:$0xf0]  ;;  %v4160_v1 = vpop.f32.mrf.mxu3 }
 0x235   : > { %4421 = vmatpush.bf16.msra.mxu2 %v5432_v5  ;;  %v5581_v5 = vld [vmem:[%s6942_s1 + $0x648] sm:$0xf0]  ;;  %v5685_v62 = vld [vmem:[%s6942_s1 + $0x718] sm:$0xf0] }
 0x236   : > { %4435 = vmatpush.bf16.msra.mxu3 %v5496_v61  ;;  %v6073_v61 = vld [vmem:[%s6942_s1 + $0x7c4] sm:$0xf]  ;;  %v4117_v26 = vadd.f32 %v4116_v41, %v4103_v0  ;;  %v5749_v2 = vld [vmem:[%s6942_s1 + $0x798] sm:$0xf0] }
 0x237   : > { %4394 = vmatpush.bf16.msra.mxu0 %v5296_v15  ;;  %v6023_v15 = vld [vmem:[%s6942_s1 + $0x634] sm:$0xf]  ;;  %v5776_v17 = vor.u32 %v6073_v61, %v5773_v9  ;;  %v5613_v9 = vld [vmem:[%s6942_s1 + $0x688] sm:$0xf0] }
 0x238   : > { %4408 = vmatpush.bf16.msra.mxu1 %v5360_v19  ;;  %v5637_v19 = vld [vmem:[%s6942_s1 + $0x6b8] sm:$0xf0] }
 0x239   : > { %4422 = vmatpush.bf16.msra.mxu2 %v5424_v18  ;;  %v6055_v18 = vld [vmem:[%s6942_s1 + $0x734] sm:$0xf]  ;;  %v4118_v27 = vpop.f32.mrf.mxu0  ;;  %v5640_v28 = vor.u32 %v6039_v11, %v5637_v19 }
 0x23a   : > { %4436 = vmatpush.bf16.msra.mxu3 %v5488_v21  ;;  %4395 = vmatmul.bf16.vlgmr.msra.gmra.mxu0 %v7198_v48  ;;  %v5592_v48 = vor.u32 %v6027_v44, %v5589_v46  ;;  %v5765_v21 = vld [vmem:[%s6942_s1 + $0x7b8] sm:$0xf0]  ;;  %v5704_v29 = vor.u32 %v6055_v18, %v5701_v20  ;;  %v6019_v46 = vld [vmem:[%s6942_s1 + $0x614] sm:$0xf]  ;;  %v4146_v59 = vpop.f32.mrf.mxu2 }
 0x23b   : > { %4443 = vmatpush.bf16.msrb.mxu0 %v5608_v34  ;;  %4409 = vmatmul.bf16.vlgmr.msra.gmra.mxu1 %v7205_v53  ;;  %v6041_v53 = vld [vmem:[%s6942_s1 + $0x6c4] sm:$0xf]  ;;  %v4077_v34 = vadd.f32 %v7490_v8, %v7485_v4  ;;  %v5768_v35 = vor.u32 %v6071_v54, %v5765_v21  ;;  %v5629_v4 = vld [vmem:[%s6942_s1 + $0x6a8] sm:$0xf0] }
 0x23c   : > { %4457 = vmatpush.bf16.msrb.mxu1 %v5672_v23  ;;  %4423 = vmatmul.bf16.vlgmr.msra.gmra.mxu2 %v7203_v52  ;;  %v6025_v52 = vld [vmem:[%s6942_s1 + $0x644] sm:$0xf]  ;;  %v5648_v13 = vor.u32 %v6041_v53, %v5645_v7  ;;  %v7555_v23 = vpop.f32.mrf.mxu1 }
 0x23d   : > { %4471 = vmatpush.bf16.msrb.mxu2 %v5736_v25  ;;  %4437 = vmatmul.bf16.vlgmr.msra.gmra.mxu3 %v7209_v57  ;;  %v6057_v57 = vld [vmem:[%s6942_s1 + $0x744] sm:$0xf]  ;;  %v5584_v10 = vor.u32 %v6025_v52, %v5581_v5  ;;  %v5576_v25 = vor.u32 %v6023_v15, %v5573_v16  ;;  %v4091_v40 = vadd.f32 %v7506_v30, %v4077_v34  ;;  %v6051_v30 = vld [vmem:[%s6942_s1 + $0x714] sm:$0xf] }
 0x23e   : > { %4485 = vmatpush.bf16.msrb.mxu3 %v5800_v31  ;;  %v5712_v14 = vor.u32 %v6057_v57, %v5709_v60  ;;  %v6021_v31 = vld [vmem:[%s6942_s1 + $0x624] sm:$0xf]  ;;  %v5560_v52 = vor.u32 %v6019_v46, %v5557_v47  ;;  %v5549_v57 = vld [vmem:[%s6942_s1 + $0x608] sm:$0xf0] }
 0x23f   : > { %4444 = vmatpush.bf16.msrb.mxu0 %v5600_v39  ;;  %v6053_v8 = vld [vmem:[%s6942_s1 + $0x724] sm:$0xf]  ;;  %v5757_v39 = vld [vmem:[%s6942_s1 + $0x7a8] sm:$0xf0]  ;;  %v5568_v41 = vor.u32 %v6021_v31, %v5565_v32 }
 0x240   : > { %4458 = vmatpush.bf16.msrb.mxu1 %v5664_v42  ;;  %v4131_v42 = vadd.f32 %v7520_v50, %v4117_v26  ;;  %v5696_v44 = vor.u32 %v6053_v8, %v5693_v37  ;;  %v5760_v22 = vor.u32 %v6069_v38, %v5757_v39  ;;  %v6017_v7 = vld [vmem:[%s6942_s1 + $0x604] sm:$0xf]  ;;  %v4214_v54 = vpop.f32.mrf.mxu3 }
 0x241   : > { %4472 = vmatpush.bf16.msrb.mxu2 %v5728_v43  ;;  %v5632_v43 = vor.u32 %v6037_v33, %v5629_v4  ;;  %v4172_v50 = vpop.f32.mrf.mxu0  ;;  %v6033_v60 = vld [vmem:[%s6942_s1 + $0x684] sm:$0xf]  ;;  %v5552_v15 = vor.u32 %v6017_v7, %v5549_v57 }
 0x242   : > { %4486 = vmatpush.bf16.msrb.mxu3 %v5792_v51  ;;  %v6035_v51 = vld [vmem:[%s6942_s1 + $0x694] sm:$0xf]  ;;  %v4145_v5 = vadd.f32 %v7540_v45, %v4131_v42  ;;  %v5616_v45 = vor.u32 %v6033_v60, %v5613_v9 }
 0x243   : > { %4445 = vmatpush.bf16.msrb.mxu0 %v5592_v48  ;;  %v6067_v48 = vld [vmem:[%s6942_s1 + $0x794] sm:$0xf]  ;;  %v5624_v53 = vor.u32 %v6035_v51, %v5621_v24 }
 0x244   : > { %4459 = vmatpush.bf16.msrb.mxu1 %v5656_v3  ;;  %v4105_v3 = vadd.f32 %v7511_v36, %v4091_v40  ;;  %v5752_v61 = vor.u32 %v6067_v48, %v5749_v2  ;;  %v5677_v36 = vld [vmem:[%s6942_s1 + $0x708] sm:$0xf0]  ;;  %v4159_v16 = vadd.f32 %v7543_v12, %v4145_v5 }
 0x245   : > { %4473 = vmatpush.bf16.msrb.mxu2 %v5720_v56  ;;  %v4186_v56 = vpop.f32.mrf.mxu1 }
 0x246   : > { %4487 = vmatpush.bf16.msrb.mxu3 %v5784_v6  ;;  %v5688_v6 = vor.u32 %v6051_v30, %v5685_v62  ;;  %v4119_v0 = vadd.f32 %v4118_v27, %v4105_v3  ;;  %v4173_v20 = vadd.f32 %v4172_v50, %v4159_v16 }
 0x247   : > { %4446 = vmatpush.bf16.msrb.mxu0 %v5584_v10  ;;  %v6049_v10 = vld [vmem:[%s6942_s1 + $0x704] sm:$0xf] }
 0x248   : > { %4460 = vmatpush.bf16.msrb.mxu1 %v5648_v13  ;;  %v6065_v13 = vld [vmem:[%s6942_s1 + $0x784] sm:$0xf]  ;;  %v5680_v11 = vor.u32 %v6049_v10, %v5677_v36  ;;  %v4133_v18 = vadd.f32 %v7555_v23, %v4119_v0  ;;  %v4216_v31 = vpop.f32.mrf.mxu3 }
 0x249   : > { %4474 = vmatpush.bf16.msrb.mxu2 %v5712_v14  ;;  %v5741_v14 = vld [vmem:[%s6942_s1 + $0x788] sm:$0xf0]  ;;  %v4174_v27 = vpop.f32.mrf.mxu0 }
 0x24a   : > { %4488 = vmatpush.bf16.msrb.mxu3 %v5776_v17  ;;  %v4200_v17 = vpop.f32.mrf.mxu2  ;;  %v5744_v19 = vor.u32 %v6065_v13, %v5741_v14  ;;  %v4147_v21 = vadd.f32 %v4146_v59, %v4133_v18  ;;  %v2417_v59 = vld [vmem:[#allocation2 + $0x18] sm:$0xff] }
 0x24b   : > { %4447 = vmatpush.bf16.msrb.mxu0 %v5576_v25  ;;  %v4187_v25 = vadd.f32 %v4186_v56, %v4173_v20 }
 0x24c   : > { %4461 = vmatpush.bf16.msrb.mxu1 %v5640_v28  ;;  %v4161_v12 = vadd.f32 %v4160_v1, %v4147_v21 }
 0x24d   : > { %4475 = vmatpush.bf16.msrb.mxu2 %v5704_v29  ;;  %v4188_v34 = vpop.f32.mrf.mxu1  ;;  %v4201_v26 = vadd.f32 %v4200_v17, %v4187_v25 }
 0x24e   : > { %4489 = vmatpush.bf16.msrb.mxu3 %v5768_v35  ;;  %v4175_v23 = vadd.f32 %v4174_v27, %v4161_v12 }
 0x24f   : > { %4448 = vmatpush.bf16.msrb.mxu0 %v5568_v41  ;;  %v4215_v29 = vadd.f32 %v4214_v54, %v4201_v26 }
 0x250   : > { %4462 = vmatpush.bf16.msrb.mxu1 %v5632_v43  ;;  %v4189_v35 = vadd.f32 %v4188_v34, %v4175_v23 }
 0x251   : > { %4476 = vmatpush.bf16.msrb.mxu2 %v5696_v44 }
 0x252   : > { %4490 = vmatpush.bf16.msrb.mxu3 %v5760_v22  ;;  %v4202_v28 = vpop.f32.mrf.mxu2 }
 0x253   : > { %4449 = vmatpush.bf16.msrb.mxu0 %v5560_v52  ;;  %v4203_v8 = vadd.f32 %v4202_v28, %v4189_v35 }
 0x254   : > { %4463 = vmatpush.bf16.msrb.mxu1 %v5624_v53 }
 0x255   : > { %4477 = vmatpush.bf16.msrb.mxu2 %v5688_v6 }
 0x256   : > { %4491 = vmatpush.bf16.msrb.mxu3 %v5752_v61 }
 0x257   : > { %4450 = vmatpush.bf16.msrb.mxu0 %v5552_v15  ;;  %v4228_v32 = vpop.f32.mrf.mxu0 }
 0x258   : > { %4464 = vmatpush.bf16.msrb.mxu1 %v5616_v45  ;;  %v4242_v33 = vpop.f32.mrf.mxu1  ;;  %v4229_v4 = vadd.f32 %v4228_v32, %v4215_v29 }
 0x259   : > { %4478 = vmatpush.bf16.msrb.mxu2 %v5680_v11 }
 0x25a   : > { %4492 = vmatpush.bf16.msrb.mxu3 %v5744_v19  ;;  %4451 = vmatmul.bf16.vlgmr.msrb.gmra.mxu0 %v7282_v49  ;;  %v4243_v37 = vadd.f32 %v4242_v33, %v4229_v4  ;;  %v4217_v49 = vadd.f32 %v4216_v31, %v4203_v8 }
 0x25b   : > { %4465 = vmatmul.bf16.vlgmr.msrb.gmra.mxu1 %v7289_v58 }
 0x25c   : > { %4479 = vmatmul.bf16.vlgmr.msrb.gmra.mxu2 %v7287_v55  ;;  %v2415_v55 = vld [vmem:[#allocation2 + $0x10] sm:$0xff] }
 0x25d   : > { %4493 = vmatmul.bf16.vlgmr.msrb.gmra.mxu3 %v7293_v63 }
 0x25f   : > { %v4256_v38 = vpop.f32.mrf.mxu2  ;;  %v4230_v58 = vpop.f32.mrf.mxu0 }
 0x260   : > { %v4257_v39 = vadd.f32 %v4256_v38, %v4243_v37  ;;  %v4270_v40 = vpop.f32.mrf.mxu3  ;;  %v4231_v41 = vadd.f32 %v4230_v58, %v4217_v49  ;;  %v4244_v43 = vpop.f32.mrf.mxu1 }
 0x262   : > { %v4271_v42 = vadd.f32 %v4270_v40, %v4257_v39  ;;  %v4245_v44 = vadd.f32 %v4244_v43, %v4231_v41 }
 0x264   : > { %v4499_v63 = vadd.f32 %v4271_v42, %v2415_v55  ;;  %v2416_v42 = vld [vmem:[#allocation2] sm:$0xff] }
 0x266   : > { %4503 = vst [vmem:[#allocation2 + $0x10] sm:$0xff] %v4499_v63 }
 0x267   : > { %v4258_v46 = vpop.f32.mrf.mxu2 }
 0x268   : > { %v4259_v47 = vadd.f32 %v4258_v46, %v4245_v44  ;;  %v4272_v51 = vpop.f32.mrf.mxu3 }
 0x26a   : > { %v4273_v22 = vadd.f32 %v4272_v51, %v4259_v47 }
 0x26c   : > { %v4501_v24 = vadd.f32 %v4273_v22, %v2417_v59  ;;  %v2418_v22 = vld [vmem:[#allocation2 + $0x8] sm:$0xff] }
 0x26e   : > { %4505 = vst [vmem:[#allocation2 + $0x18] sm:$0xff] %v4501_v24 }
 0x277   : > { %v4284_v30 = vpop.f32.mrf.mxu0 }
 0x278   : > { %v4298_v62 = vpop.f32.mrf.mxu1 }
 0x279   : > { %v4299_v52 = vadd.f32 %v4298_v62, %v4284_v30 }
 0x27f   : > { %v4312_v1 = vpop.f32.mrf.mxu2  ;;  %v4286_v48 = vpop.f32.mrf.mxu0 }
 0x280   : > { %v4326_v50 = vpop.f32.mrf.mxu3  ;;  %v4300_v2 = vpop.f32.mrf.mxu1  ;;  %v4313_v6 = vadd.f32 %v4312_v1, %v4299_v52 }
 0x281   : > { %v4301_v9 = vadd.f32 %v4300_v2, %v4286_v48 }
 0x282   : > { %v4327_v57 = vadd.f32 %v4326_v50, %v4313_v6 }
 0x287   : > { %v4314_v3 = vpop.f32.mrf.mxu2 }
 0x288   : > { %v4328_v56 = vpop.f32.mrf.mxu3  ;;  %v4315_v0 = vadd.f32 %v4314_v3, %v4301_v9 }
 0x28a   : > { %v4329_v45 = vadd.f32 %v4328_v56, %v4315_v0 }
 0x297   : > { %v4340_v5 = vpop.f32.mrf.mxu0 }
 0x298   : > { %v4354_v53 = vpop.f32.mrf.mxu1  ;;  %v4341_v10 = vadd.f32 %v4340_v5, %v4327_v57 }
 0x29a   : > { %v4355_v13 = vadd.f32 %v4354_v53, %v4341_v10 }
 0x29f   : > { %v4368_v7 = vpop.f32.mrf.mxu2  ;;  %v4342_v61 = vpop.f32.mrf.mxu0 }
 0x2a0   : > { %v4382_v60 = vpop.f32.mrf.mxu3  ;;  %v4356_v36 = vpop.f32.mrf.mxu1  ;;  %v4369_v11 = vadd.f32 %v4368_v7, %v4355_v13  ;;  %v4343_v19 = vadd.f32 %v4342_v61, %v4329_v45 }
 0x2a2   : > { %v4383_v18 = vadd.f32 %v4382_v60, %v4369_v11  ;;  %v4357_v54 = vadd.f32 %v4356_v36, %v4343_v19 }
 0x2a7   : > { %v4370_v14 = vpop.f32.mrf.mxu2 }
 0x2a8   : > { %v4384_v15 = vpop.f32.mrf.mxu3  ;;  %v4371_v34 = vadd.f32 %v4370_v14, %v4357_v54 }
 0x2aa   : > { %v4385_v23 = vadd.f32 %v4384_v15, %v4371_v34 }
 0x2b7   : > { %v4396_v16 = vpop.f32.mrf.mxu0 }
 0x2b8   : > { %v4410_v17 = vpop.f32.mrf.mxu1  ;;  %v4397_v21 = vadd.f32 %v4396_v16, %v4383_v18 }
 0x2ba   : > { %v4411_v12 = vadd.f32 %v4410_v17, %v4397_v21 }
 0x2bf   : > { %v4424_v20 = vpop.f32.mrf.mxu2  ;;  %v4398_v25 = vpop.f32.mrf.mxu0 }
 0x2c0   : > { %v4438_v27 = vpop.f32.mrf.mxu3  ;;  %v4412_v26 = vpop.f32.mrf.mxu1  ;;  %v4425_v28 = vadd.f32 %v4424_v20, %v4411_v12  ;;  %v4399_v29 = vadd.f32 %v4398_v25, %v4385_v23 }
 0x2c2   : > { %v4439_v32 = vadd.f32 %v4438_v27, %v4425_v28  ;;  %v4413_v4 = vadd.f32 %v4412_v26, %v4399_v29 }
 0x2c7   : > { %v4426_v31 = vpop.f32.mrf.mxu2 }
 0x2c8   : > { %v4440_v33 = vpop.f32.mrf.mxu3  ;;  %v4427_v38 = vadd.f32 %v4426_v31, %v4413_v4 }
 0x2ca   : > { %v4441_v58 = vadd.f32 %v4440_v33, %v4427_v38 }
 0x2d7   : > { %v4452_v35 = vpop.f32.mrf.mxu0 }
 0x2d8   : > { %v4453_v8 = vadd.f32 %v4452_v35, %v4439_v32  ;;  %v4466_v37 = vpop.f32.mrf.mxu1 }
 0x2da   : > { %v4467_v49 = vadd.f32 %v4466_v37, %v4453_v8 }
 0x2df   : > { %v4480_v39 = vpop.f32.mrf.mxu2  ;;  %v4454_v41 = vpop.f32.mrf.mxu0 }
 0x2e0   : > { %v4481_v40 = vadd.f32 %v4480_v39, %v4467_v49  ;;  %v4494_v55 = vpop.f32.mrf.mxu3  ;;  %v4455_v63 = vadd.f32 %v4454_v41, %v4441_v58  ;;  %v4468_v46 = vpop.f32.mrf.mxu1 }
 0x2e2   : > { %v4495_v43 = vadd.f32 %v4494_v55, %v4481_v40  ;;  %v4469_v47 = vadd.f32 %v4468_v46, %v4455_v63 }
 0x2e4   : > { %v4500_v44 = vadd.f32 %v4495_v43, %v2416_v42 }
 0x2e6   : > { %4504 = vst [vmem:[#allocation2] sm:$0xff] %v4500_v44 }
 0x2e7   : > { %v4482_v51 = vpop.f32.mrf.mxu2 }
 0x2e8   : > { %v4483_v59 = vadd.f32 %v4482_v51, %v4469_v47  ;;  %v4496_v24 = vpop.f32.mrf.mxu3 }
 0x2ea   : > { %v4497_v30 = vadd.f32 %v4496_v24, %v4483_v59  ;;  %4510 = sbr.rel (%p5801_p5) target bundleno = 763 (0x2fb), region = 115 }
 0x2ec   : > { %v4502_v62 = vadd.f32 %v4497_v30, %v2418_v22 }
 0x2ee   : > { %4506 = vst [vmem:[#allocation2 + $0x8] sm:$0xff] %v4502_v62 }
 0x2ef   : > { %v4511_v1 = vld [vmem:[#allocation2 + $0x10] sm:$0xff]  ;;  %v4512_v50 = vld [vmem:[#allocation2] sm:$0xff]  ;;  %v4513_v56 = vld [vmem:[#allocation2 + $0x18] sm:$0xff] }
 0x2f0   : > { %v4515_v48 = vld [vmem:[%s2403_s5] sm:$0x3] }
 0x2f1   : > { %v4517_v2 = vperm.slane %v4515_v48, 0  ;;  %v4518_v3 = vperm.slane %v4515_v48, 1 }
 0x2f3   : > { %v4521_v5 = vadd.f32 %v4517_v2, %v4511_v1  ;;  %v4522_v53 = vadd.f32 %v4518_v3, %v4512_v50  ;;  %v4523_v6 = vadd.f32 %v4517_v2, %v4513_v56 }
 0x2f5   : > { %v4514_v52 = vld [vmem:[#allocation2 + $0x8] sm:$0xff]  ;;  %v4525_v57 = vpack.c.bf16 %v4522_v53, %v4521_v5 }
 0x2f6   : > { %v4524_v7 = vadd.f32 %v4518_v3, %v4514_v52 }
 0x2f7   : > { %4527 = vst [vmem:[%s6944_s25] sm:$0xff] %v4525_v57 }
 0x2f8   : > { %v4526_v60 = vpack.c.bf16 %v4524_v7, %v4523_v6 }
 0x2fa   : > { %4528 = vst [vmem:[%s6944_s25 + $0x8] sm:$0xff] %v4526_v60 }
 0x2fb PF: > { %4535 = sbr.rel (!%p6374_p12) target bundleno = 771 (0x303), region = 119  ;;  %s6081_s14 = sshll.u32 (%p6374_p12), %s6245_s19, 3 }
 0x2fc   : > { %s4541_s0 = scalar_lea.vmem (%p6374_p12), %s7643_s3, %s6081_s14 }
 0x2fe   : > { %v4572_v61 = vld [vmem:[%s6944_s25] sm:$0xff] (%p6374_p12) }
 0x2ff   : > { %4573 = vst [vmem:[%s4541_s0] sm:$0xff] (%p6374_p12), %v4572_v61 }
 0x301   : > { %v4574_v9 = vld [vmem:[%s6944_s25 + $0x8] sm:$0xff] }
 0x302   : > { %4575 = vst [vmem:[%s4541_s0 + $0x10] sm:$0xff] %v4574_v9 }
 0x303 PF: > { %s13_s22 = sadd.s32 1, %s6257_s22   ;;  %s7653_s25 = sld [smem:[#allocation6_spill]] }
 0x304   : > { %p10_p6 = scmp.ge.s32.totalorder %s13_s22, 10   ;;  %s7654_s12 = smov %s6221_s13 }
 0x305   : > { %s7655_s13 = smov %s6372_s9  ;;  %s7656_s14 = smov %s6229_s15 }
 0x306   : > { %s7657_s15 = smov %s6369_s8  ;;  %s7658_s16 = smov %s6237_s17 }
 0x307   : > { %s7659_s17 = smov %s6355_s30  ;;  %s7660_s18 = smov %s6249_s20 }
 0x308   : > { %s7661_s19 = smov %s6253_s21  ;;  %s7662_s20 = smov %s7665_s24 }
 0x309   : > { %s7663_s21 = smov %s7653_s25  ;;  %12 = sbr.rel (!%p10_p6) target bundleno = 9 (0x9), region = 205 }

// kernel: cnn_lstm_forward.6
= control target key start
LH: loop header
LB: loop body
LE: loop exit
PB: predicated region body
PF: predicated region fallthrough
CT: control target
= control target key end

     0   :  { %vm312_vm0 = vcmask 1041408   ;;  %vm314_vm1 = vcmask 1045508   ;;  %vm316_vm2 = vcmask 1043456   ;;  %vm619_vm15 = vcmask 1040384   ;;  %s3805_s1 = inlined_call_operand.vmem [shape: bf16[128,512], index: 1, kind: input, shape index: {}]   ;;  %s3806_s2 = inlined_call_operand.vmem [shape: bf16[128,512], index: 2, kind: input, shape index: {}]   ;;  %s3807_s0 = inlined_call_operand.vmem [shape: bf16[8,2,512], index: 0, kind: input, shape index: {}]   ;;  %s3808_s3 = inlined_call_operand.vmem [shape: f32[1,512], index: 3, kind: input, shape index: {}]   ;;  %s3809_s4 = inlined_call_operand.vmem [shape: bf16[8,2,512], index: 4, kind: output, shape index: {}]  }
   0x1   :  { %v2199_v0 = vld [vmem:[%s3805_s1 + $0xe0] sm:$0xf]  ;;  %v2409_v1 = vld [vmem:[%s3805_s1 + $0xec] sm:$0xf0]  ;;  %v2407_v2 = vld [vmem:[%s3805_s1 + $0xe4] sm:$0xf] }
   0x2   :  { %v2607_v3 = vor.u32 %v2409_v1, %v2199_v0  ;;  %v2201_v4 = vld [vmem:[%s3805_s1 + $0xf0] sm:$0xf0]  ;;  %v2207_v5 = vld [vmem:[%s3805_s1 + $0xe8] sm:$0xf]  ;;  %v2410_v6 = vld [vmem:[%s3805_s1 + $0xf4] sm:$0xf0] }
   0x3   :  { %v2618_v7 = vor.u32 %v2407_v2, %v2201_v4  ;;  %v2620_v8 = vor.u32 %v2410_v6, %v2207_v5  ;;  %v2408_v9 = vld [vmem:[%s3805_s1 + $0xec] sm:$0xf]  ;;  %v2209_v10 = vld [vmem:[%s3805_s1 + $0xf8] sm:$0xf0]  ;;  %v2183_v11 = vld [vmem:[%s3805_s1 + $0xc0] sm:$0xf] }
   0x4   :  { %253 = vmatpush.bf16.msra.mxu0 %v2607_v3  ;;  %v2632_v12 = vor.u32 %v2408_v9, %v2209_v10  ;;  %v2405_v13 = vld [vmem:[%s3805_s1 + $0xcc] sm:$0xf0]  ;;  %v2403_v14 = vld [vmem:[%s3805_s1 + $0xc4] sm:$0xf]  ;;  %v2185_v15 = vld [vmem:[%s3805_s1 + $0xd0] sm:$0xf0] }
   0x5   :  { %266 = vmatpush.bf16.msra.mxu1 %v2618_v7  ;;  %279 = vmatpush.bf16.msra.mxu2 %v2620_v8  ;;  %v2645_v16 = vor.u32 %v2405_v13, %v2183_v11  ;;  %v2647_v17 = vor.u32 %v2403_v14, %v2185_v15  ;;  %v2191_v18 = vld [vmem:[%s3805_s1 + $0xc8] sm:$0xf]  ;;  %v2406_v19 = vld [vmem:[%s3805_s1 + $0xd4] sm:$0xf0]  ;;  %v2404_v20 = vld [vmem:[%s3805_s1 + $0xcc] sm:$0xf] }
   0x6   :  { %292 = vmatpush.bf16.msra.mxu3 %v2632_v12  ;;  %v2659_v21 = vor.u32 %v2406_v19, %v2191_v18  ;;  %v2193_v22 = vld [vmem:[%s3805_s1 + $0xd8] sm:$0xf0]  ;;  %v2167_v23 = vld [vmem:[%s3805_s1 + $0xa0] sm:$0xf]  ;;  %v2401_v24 = vld [vmem:[%s3805_s1 + $0xac] sm:$0xf0] }
   0x7   :  { %3893 = vst [vmem:[#allocation4_spill] sm:$0xff] %v2647_v17  ;;  %v2670_v25 = vor.u32 %v2404_v20, %v2193_v22  ;;  %v2399_v26 = vld [vmem:[%s3805_s1 + $0xa4] sm:$0xf]  ;;  %v2169_v27 = vld [vmem:[%s3805_s1 + $0xb0] sm:$0xf0]  ;;  %v2682_v29 = vor.u32 %v2401_v24, %v2167_v23  ;;  %v2572_v20 = vmov 0.0  }
   0x8   :  { %3894 = vst [vmem:[#allocation5_spill] sm:$0xff] %v2659_v21  ;;  %v2175_v28 = vld [vmem:[%s3805_s1 + $0xa8] sm:$0xf]  ;;  %254 = vmatpush.bf16.msra.mxu0 %v2645_v16  ;;  %v2402_v30 = vld [vmem:[%s3805_s1 + $0xb4] sm:$0xf0]  ;;  %v2695_v33 = vor.u32 %v2399_v26, %v2169_v27 }
   0x9   :  { %3895 = vst [vmem:[#allocation6_spill] sm:$0xff] %v2670_v25  ;;  %v2400_v31 = vld [vmem:[%s3805_s1 + $0xac] sm:$0xf]  ;;  %v2177_v32 = vld [vmem:[%s3805_s1 + $0xb8] sm:$0xf0]  ;;  %267 = vmatpush.bf16.msra.mxu1 %v2647_v17  ;;  %280 = vmatpush.bf16.msra.mxu2 %v2659_v21  ;;  %v2697_v34 = vor.u32 %v2402_v30, %v2175_v28 }
   0xa   :  { %3896 = vst [vmem:[#allocation7_spill] sm:$0xff] %v2682_v29  ;;  %v2151_v35 = vld [vmem:[%s3805_s1 + $0x80] sm:$0xf]  ;;  %v2397_v36 = vld [vmem:[%s3805_s1 + $0x8c] sm:$0xf0]  ;;  %293 = vmatpush.bf16.msra.mxu3 %v2670_v25  ;;  %v2709_v38 = vor.u32 %v2400_v31, %v2177_v32 }
   0xb   :  { %3897 = vst [vmem:[#allocation8_spill] sm:$0xff] %v2695_v33  ;;  %v2395_v37 = vld [vmem:[%s3805_s1 + $0x84] sm:$0xf]  ;;  %v2153_v39 = vld [vmem:[%s3805_s1 + $0x90] sm:$0xf0]  ;;  %v2727_v44 = vor.u32 %v2397_v36, %v2151_v35 }
   0xc   :  { %3898 = vst [vmem:[#allocation9_spill] sm:$0xff] %v2697_v34  ;;  %v2159_v40 = vld [vmem:[%s3805_s1 + $0x88] sm:$0xf]  ;;  %v2398_v41 = vld [vmem:[%s3805_s1 + $0x94] sm:$0xf0]  ;;  %255 = vmatpush.bf16.msra.mxu0 %v2682_v29  ;;  %v2731_v45 = vor.u32 %v2395_v37, %v2153_v39 }
   0xd   :  { %3899 = vst [vmem:[#allocation10_spill] sm:$0xff] %v2709_v38  ;;  %v2396_v42 = vld [vmem:[%s3805_s1 + $0x8c] sm:$0xf]  ;;  %v2161_v43 = vld [vmem:[%s3805_s1 + $0x98] sm:$0xf0]  ;;  %268 = vmatpush.bf16.msra.mxu1 %v2695_v33  ;;  %281 = vmatpush.bf16.msra.mxu2 %v2697_v34  ;;  %v2733_v46 = vor.u32 %v2398_v41, %v2159_v40 }
   0xe   :  { %3900 = vst [vmem:[#allocation11_spill] sm:$0xff] %v2727_v44  ;;  %v2135_v47 = vld [vmem:[%s3805_s1 + $0x60] sm:$0xf]  ;;  %v2393_v48 = vld [vmem:[%s3805_s1 + $0x6c] sm:$0xf0]  ;;  %294 = vmatpush.bf16.msra.mxu3 %v2709_v38  ;;  %v2745_v50 = vor.u32 %v2396_v42, %v2161_v43 }
   0xf   :  { %3901 = vst [vmem:[#allocation12_spill] sm:$0xff] %v2731_v45  ;;  %v2391_v49 = vld [vmem:[%s3805_s1 + $0x64] sm:$0xf]  ;;  %v2137_v51 = vld [vmem:[%s3805_s1 + $0x70] sm:$0xf0]  ;;  %v2763_v56 = vor.u32 %v2393_v48, %v2135_v47 }
  0x10   :  { %3902 = vst [vmem:[#allocation13_spill] sm:$0xff] %v2733_v46  ;;  %v2143_v52 = vld [vmem:[%s3805_s1 + $0x68] sm:$0xf]  ;;  %v2394_v53 = vld [vmem:[%s3805_s1 + $0x74] sm:$0xf0]  ;;  %256 = vmatpush.bf16.msra.mxu0 %v2727_v44  ;;  %v2767_v57 = vor.u32 %v2391_v49, %v2137_v51 }
  0x11   :  { %3903 = vst [vmem:[#allocation14_spill] sm:$0xff] %v2745_v50  ;;  %v2392_v54 = vld [vmem:[%s3805_s1 + $0x6c] sm:$0xf]  ;;  %v2145_v55 = vld [vmem:[%s3805_s1 + $0x78] sm:$0xf0]  ;;  %269 = vmatpush.bf16.msra.mxu1 %v2731_v45  ;;  %282 = vmatpush.bf16.msra.mxu2 %v2733_v46  ;;  %v2769_v58 = vor.u32 %v2394_v53, %v2143_v52 }
  0x12   :  { %3904 = vst [vmem:[#allocation15_spill] sm:$0xff] %v2763_v56  ;;  %v2119_v59 = vld [vmem:[%s3805_s1 + $0x40] sm:$0xf]  ;;  %v2389_v60 = vld [vmem:[%s3805_s1 + $0x4c] sm:$0xf0]  ;;  %295 = vmatpush.bf16.msra.mxu3 %v2745_v50  ;;  %v2781_v62 = vor.u32 %v2392_v54, %v2145_v55 }
  0x13   :  { %3905 = vst [vmem:[#allocation16_spill] sm:$0xff] %v2767_v57  ;;  %v2387_v61 = vld [vmem:[%s3805_s1 + $0x44] sm:$0xf]  ;;  %v2121_v63 = vld [vmem:[%s3805_s1 + $0x50] sm:$0xf0]  ;;  %v2799_v5 = vor.u32 %v2389_v60, %v2119_v59 }
  0x14   :  { %3906 = vst [vmem:[#allocation17_spill] sm:$0xff] %v2769_v58  ;;  %v2127_v0 = vld [vmem:[%s3805_s1 + $0x48] sm:$0xf]  ;;  %v2390_v1 = vld [vmem:[%s3805_s1 + $0x54] sm:$0xf0]  ;;  %257 = vmatpush.bf16.msra.mxu0 %v2763_v56  ;;  %v2806_v9 = vor.u32 %v2387_v61, %v2121_v63 }
  0x15   :  { %3907 = vst [vmem:[#allocation18_spill] sm:$0xff] %v2781_v62  ;;  %v2388_v2 = vld [vmem:[%s3805_s1 + $0x4c] sm:$0xf]  ;;  %v2129_v4 = vld [vmem:[%s3805_s1 + $0x58] sm:$0xf0]  ;;  %270 = vmatpush.bf16.msra.mxu1 %v2767_v57  ;;  %283 = vmatpush.bf16.msra.mxu2 %v2769_v58  ;;  %v2808_v10 = vor.u32 %v2390_v1, %v2127_v0 }
  0x16   :  { %3908 = vst [vmem:[#allocation19_spill] sm:$0xff] %v2799_v5  ;;  %v2103_v6 = vld [vmem:[%s3805_s1 + $0x20] sm:$0xf]  ;;  %v2385_v11 = vld [vmem:[%s3805_s1 + $0x2c] sm:$0xf0]  ;;  %296 = vmatpush.bf16.msra.mxu3 %v2781_v62  ;;  %v2820_v15 = vor.u32 %v2388_v2, %v2129_v4 }
  0x17   :  { %3909 = vst [vmem:[#allocation20_spill] sm:$0xff] %v2806_v9  ;;  %v2383_v13 = vld [vmem:[%s3805_s1 + $0x24] sm:$0xf]  ;;  %v2105_v14 = vld [vmem:[%s3805_s1 + $0x30] sm:$0xf0]  ;;  %v2835_v24 = vor.u32 %v2385_v11, %v2103_v6 }
  0x18   :  { %3910 = vst [vmem:[#allocation21_spill] sm:$0xff] %v2808_v10  ;;  %v2111_v18 = vld [vmem:[%s3805_s1 + $0x28] sm:$0xf]  ;;  %v2386_v19 = vld [vmem:[%s3805_s1 + $0x34] sm:$0xf0]  ;;  %258 = vmatpush.bf16.msra.mxu0 %v2799_v5  ;;  %v2839_v26 = vor.u32 %v2383_v13, %v2105_v14 }
  0x19   :  { %3911 = vst [vmem:[#allocation22_spill] sm:$0xff] %v2820_v15  ;;  %v2384_v22 = vld [vmem:[%s3805_s1 + $0x2c] sm:$0xf]  ;;  %v2113_v23 = vld [vmem:[%s3805_s1 + $0x38] sm:$0xf0]  ;;  %271 = vmatpush.bf16.msra.mxu1 %v2806_v9  ;;  %284 = vmatpush.bf16.msra.mxu2 %v2808_v10  ;;  %v2841_v27 = vor.u32 %v2386_v19, %v2111_v18 }
  0x1a   :  { %21 = vst [vmem:[#allocation2] sm:$0x3] %v2572_v20  ;;  %v2087_v28 = vld [vmem:[%s3805_s1] sm:$0xf]  ;;  %v2381_v30 = vld [vmem:[%s3805_s1 + $0xc] sm:$0xf0]  ;;  %297 = vmatpush.bf16.msra.mxu3 %v2820_v15  ;;  %v2853_v32 = vor.u32 %v2384_v22, %v2113_v23 }
  0x1b   :  { %22 = vst [vmem:[#allocation3] sm:$0x3] %v2572_v20  ;;  %v2379_v31 = vld [vmem:[%s3805_s1 + $0x4] sm:$0xf]  ;;  %v2089_v35 = vld [vmem:[%s3805_s1 + $0x10] sm:$0xf0]  ;;  %v2871_v41 = vor.u32 %v2381_v30, %v2087_v28 }
  0x1c   :  { %3912 = vst [vmem:[#allocation23_spill] sm:$0xff] %v2835_v24  ;;  %v2095_v36 = vld [vmem:[%s3805_s1 + $0x8] sm:$0xf]  ;;  %v2382_v37 = vld [vmem:[%s3805_s1 + $0x14] sm:$0xf0]  ;;  %259 = vmatpush.bf16.msra.mxu0 %v2835_v24  ;;  %v2875_v42 = vor.u32 %v2379_v31, %v2089_v35 }
  0x1d   :  { %3913 = vst [vmem:[#allocation24_spill] sm:$0xff] %v2839_v26  ;;  %v2380_v39 = vld [vmem:[%s3805_s1 + $0xc] sm:$0xf]  ;;  %v2097_v40 = vld [vmem:[%s3805_s1 + $0x18] sm:$0xf0]  ;;  %272 = vmatpush.bf16.msra.mxu1 %v2839_v26  ;;  %285 = vmatpush.bf16.msra.mxu2 %v2841_v27  ;;  %v2877_v43 = vor.u32 %v2382_v37, %v2095_v36 }
  0x1e   :  { %3914 = vst [vmem:[#allocation25_spill] sm:$0xff] %v2841_v27  ;;  %298 = vmatpush.bf16.msra.mxu3 %v2853_v32  ;;  %v2880_v48 = vor.u32 %v2380_v39, %v2097_v40  ;;  %v2330_v51 = vld [vmem:[%s3806_s2 + $0xe0] sm:$0xf]  ;;  %v2441_v52 = vld [vmem:[%s3806_s2 + $0xec] sm:$0xf0] }
  0x1f   :  { %3915 = vst [vmem:[#allocation26_spill] sm:$0xff] %v2853_v32  ;;  %v2439_v53 = vld [vmem:[%s3806_s2 + $0xe4] sm:$0xf]  ;;  %v2895_v54 = vor.u32 %v2441_v52, %v2330_v51  ;;  %v2332_v55 = vld [vmem:[%s3806_s2 + $0xf0] sm:$0xf0] }
  0x20   :  { %3916 = vst [vmem:[#allocation27_spill] sm:$0xff] %v2871_v41  ;;  %260 = vmatpush.bf16.msra.mxu0 %v2871_v41  ;;  %v2338_v59 = vld [vmem:[%s3806_s2 + $0xe8] sm:$0xf]  ;;  %v2442_v60 = vld [vmem:[%s3806_s2 + $0xf4] sm:$0xf0]  ;;  %v2906_v61 = vor.u32 %v2439_v53, %v2332_v55 }
  0x21   :  { %3917 = vst [vmem:[#allocation28_spill] sm:$0xff] %v2875_v42  ;;  %v88_v47 = vld [vmem:[#allocation2] sm:$0x3]  ;;  %273 = vmatpush.bf16.msra.mxu1 %v2875_v42  ;;  %286 = vmatpush.bf16.msra.mxu2 %v2877_v43  ;;  %v2908_v63 = vor.u32 %v2442_v60, %v2338_v59  ;;  %v2440_v0 = vld [vmem:[%s3806_s2 + $0xec] sm:$0xf] }
  0x22   :  { %3918 = vst [vmem:[#allocation29_spill] sm:$0xff] %v2877_v43  ;;  %v92_v49 = vpack.c.bf16 %v88_v47, %v88_v47  ;;  %299 = vmatpush.bf16.msra.mxu3 %v2880_v48  ;;  %v2340_v1 = vld [vmem:[%s3806_s2 + $0xf8] sm:$0xf0]  ;;  %v2314_v4 = vld [vmem:[%s3806_s2 + $0xc0] sm:$0xf] }
  0x23   :  { %3919 = vst [vmem:[#allocation30_spill] sm:$0xff] %v2880_v48  ;;  %v2917_v2 = vor.u32 %v2440_v0, %v2340_v1  ;;  %v2437_v6 = vld [vmem:[%s3806_s2 + $0xcc] sm:$0xf0]  ;;  %v2435_v11 = vld [vmem:[%s3806_s2 + $0xc4] sm:$0xf] }
  0x24   :  { %261 = vmatmul.bf16.vlgmr.msra.gmra.mxu0 %v92_v49  ;;  %274 = vmatmul.bf16.vlgmr.msra.gmra.mxu1 %v92_v49  ;;  %v2931_v13 = vor.u32 %v2437_v6, %v2314_v4  ;;  %v2316_v14 = vld [vmem:[%s3806_s2 + $0xd0] sm:$0xf0]  ;;  %v2322_v18 = vld [vmem:[%s3806_s2 + $0xc8] sm:$0xf]  ;;  %v2438_v19 = vld [vmem:[%s3806_s2 + $0xd4] sm:$0xf0] }
  0x25   :  { %287 = vmatmul.bf16.vlgmr.msra.gmra.mxu2 %v92_v49  ;;  %300 = vmatmul.bf16.vlgmr.msra.gmra.mxu3 %v92_v49  ;;  %v2942_v20 = vor.u32 %v2435_v11, %v2316_v14  ;;  %v2944_v22 = vor.u32 %v2438_v19, %v2322_v18  ;;  %v2436_v23 = vld [vmem:[%s3806_s2 + $0xcc] sm:$0xf]  ;;  %v2324_v28 = vld [vmem:[%s3806_s2 + $0xd8] sm:$0xf0]  ;;  %v2298_v31 = vld [vmem:[%s3806_s2 + $0xa0] sm:$0xf] }
  0x26   :  { %560 = vmatpush.bf16.msrb.mxu0 %v2895_v54  ;;  %573 = vmatpush.bf16.msrb.mxu1 %v2906_v61  ;;  %v2953_v30 = vor.u32 %v2436_v23, %v2324_v28  ;;  %v2433_v35 = vld [vmem:[%s3806_s2 + $0xac] sm:$0xf0]  ;;  %v2431_v36 = vld [vmem:[%s3806_s2 + $0xa4] sm:$0xf]  ;;  %v2300_v39 = vld [vmem:[%s3806_s2 + $0xb0] sm:$0xf0] }
  0x27   :  { %586 = vmatpush.bf16.msrb.mxu2 %v2908_v63  ;;  %599 = vmatpush.bf16.msrb.mxu3 %v2917_v2  ;;  %v2967_v37 = vor.u32 %v2433_v35, %v2298_v31  ;;  %v2306_v40 = vld [vmem:[%s3806_s2 + $0xa8] sm:$0xf]  ;;  %v2434_v47 = vld [vmem:[%s3806_s2 + $0xb4] sm:$0xf0]  ;;  %v2978_v49 = vor.u32 %v2431_v36, %v2300_v39  ;;  %v2432_v52 = vld [vmem:[%s3806_s2 + $0xac] sm:$0xf] }
  0x28   :  { %v2980_v51 = vor.u32 %v2434_v47, %v2306_v40  ;;  %v2308_v53 = vld [vmem:[%s3806_s2 + $0xb8] sm:$0xf0]  ;;  %v2282_v59 = vld [vmem:[%s3806_s2 + $0x80] sm:$0xf]  ;;  %v2429_v60 = vld [vmem:[%s3806_s2 + $0x8c] sm:$0xf0] }
  0x29   :  { %v2989_v55 = vor.u32 %v2432_v52, %v2308_v53  ;;  %v2427_v0 = vld [vmem:[%s3806_s2 + $0x84] sm:$0xf]  ;;  %v3003_v1 = vor.u32 %v2429_v60, %v2282_v59  ;;  %v2284_v4 = vld [vmem:[%s3806_s2 + $0x90] sm:$0xf0]  ;;  %v2290_v6 = vld [vmem:[%s3806_s2 + $0x88] sm:$0xf] }
  0x2a   :  { %561 = vmatpush.bf16.msrb.mxu0 %v2931_v13  ;;  %574 = vmatpush.bf16.msrb.mxu1 %v2942_v20  ;;  %v2430_v11 = vld [vmem:[%s3806_s2 + $0x94] sm:$0xf0]  ;;  %v3014_v14 = vor.u32 %v2427_v0, %v2284_v4  ;;  %v2428_v19 = vld [vmem:[%s3806_s2 + $0x8c] sm:$0xf]  ;;  %v2292_v23 = vld [vmem:[%s3806_s2 + $0x98] sm:$0xf0] }
  0x2b   :  { %587 = vmatpush.bf16.msrb.mxu2 %v2944_v22  ;;  %600 = vmatpush.bf16.msrb.mxu3 %v2953_v30  ;;  %v3016_v18 = vor.u32 %v2430_v11, %v2290_v6  ;;  %v3025_v28 = vor.u32 %v2428_v19, %v2292_v23  ;;  %v2266_v31 = vld [vmem:[%s3806_s2 + $0x60] sm:$0xf]  ;;  %v2425_v35 = vld [vmem:[%s3806_s2 + $0x6c] sm:$0xf0]  ;;  %v2423_v36 = vld [vmem:[%s3806_s2 + $0x64] sm:$0xf] }
  0x2c   :  { %v3039_v40 = vor.u32 %v2425_v35, %v2266_v31  ;;  %v2268_v47 = vld [vmem:[%s3806_s2 + $0x70] sm:$0xf0]  ;;  %v2274_v52 = vld [vmem:[%s3806_s2 + $0x68] sm:$0xf]  ;;  %v2426_v53 = vld [vmem:[%s3806_s2 + $0x74] sm:$0xf0] }
  0x2d   :  { %3920 = vst [vmem:[#allocation31_spill] sm:$0xff] %v3025_v28  ;;  %v3050_v60 = vor.u32 %v2423_v36, %v2268_v47  ;;  %v3052_v0 = vor.u32 %v2426_v53, %v2274_v52  ;;  %v2424_v4 = vld [vmem:[%s3806_s2 + $0x6c] sm:$0xf]  ;;  %v2276_v6 = vld [vmem:[%s3806_s2 + $0x78] sm:$0xf0] }
  0x2e   :  { %562 = vmatpush.bf16.msrb.mxu0 %v2967_v37  ;;  %575 = vmatpush.bf16.msrb.mxu1 %v2978_v49  ;;  %3921 = vst [vmem:[#allocation32_spill] sm:$0xff] %v3039_v40  ;;  %v3061_v11 = vor.u32 %v2424_v4, %v2276_v6  ;;  %v90_v19 = vld [vmem:[%s3807_s0] sm:$0xf]  ;;  %v2421_v31 = vld [vmem:[%s3806_s2 + $0x4c] sm:$0xf0] }
  0x2f   :  { %588 = vmatpush.bf16.msrb.mxu2 %v2980_v51  ;;  %601 = vmatpush.bf16.msrb.mxu3 %v2989_v55  ;;  %3922 = vst [vmem:[#allocation33_spill] sm:$0xff] %v3050_v60  ;;  %v2250_v23 = vld [vmem:[%s3806_s2 + $0x40] sm:$0xf]  ;;  %v2419_v35 = vld [vmem:[%s3806_s2 + $0x44] sm:$0xf] }
  0x30   :  { %3923 = vst [vmem:[#allocation34_spill] sm:$0xff] %v3052_v0  ;;  %v3078_v36 = vor.u32 %v2421_v31, %v2250_v23  ;;  %v2252_v47 = vld [vmem:[%s3806_s2 + $0x50] sm:$0xf0]  ;;  %v2258_v52 = vld [vmem:[%s3806_s2 + $0x48] sm:$0xf] }
  0x31   :  { %3924 = vst [vmem:[#allocation35_spill] sm:$0xff] %v3061_v11  ;;  %v2422_v53 = vld [vmem:[%s3806_s2 + $0x54] sm:$0xf0]  ;;  %v3089_v6 = vor.u32 %v2419_v35, %v2252_v47  ;;  %v2420_v23 = vld [vmem:[%s3806_s2 + $0x4c] sm:$0xf] }
  0x32   :  { %563 = vmatpush.bf16.msrb.mxu0 %v3003_v1  ;;  %576 = vmatpush.bf16.msrb.mxu1 %v3014_v14  ;;  %3925 = vst [vmem:[#allocation36_spill] sm:$0xff] %v3078_v36  ;;  %v2260_v31 = vld [vmem:[%s3806_s2 + $0x58] sm:$0xf0]  ;;  %v2417_v35 = vld [vmem:[%s3806_s2 + $0x2c] sm:$0xf0] }
  0x33   :  { %589 = vmatpush.bf16.msrb.mxu2 %v3016_v18  ;;  %602 = vmatpush.bf16.msrb.mxu3 %v3025_v28  ;;  %3926 = vst [vmem:[#allocation37_spill] sm:$0xff] %v3089_v6  ;;  %v2415_v47 = vld [vmem:[%s3806_s2 + $0x24] sm:$0xf] }
  0x36   :  { %564 = vmatpush.bf16.msrb.mxu0 %v3039_v40  ;;  %577 = vmatpush.bf16.msrb.mxu1 %v3050_v60 }
  0x37   :  { %590 = vmatpush.bf16.msrb.mxu2 %v3052_v0  ;;  %603 = vmatpush.bf16.msrb.mxu3 %v3061_v11  ;;  %v3091_v0 = vor.u32 %v2422_v53, %v2258_v52  ;;  %v3100_v11 = vor.u32 %v2420_v23, %v2260_v31  ;;  %v91_v53 = vunpack.c.l.bf16 %v90_v19 }
  0x39   :  { %3927 = vst [vmem:[#allocation38_spill] sm:$0xff] %v3091_v0 }
  0x3a   :  { %565 = vmatpush.bf16.msrb.mxu0 %v3078_v36  ;;  %578 = vmatpush.bf16.msrb.mxu1 %v3089_v6  ;;  %v2236_v6 = vld [vmem:[%s3806_s2 + $0x30] sm:$0xf0]  ;;  %v2242_v36 = vld [vmem:[%s3806_s2 + $0x28] sm:$0xf] }
  0x3b   :  { %591 = vmatpush.bf16.msrb.mxu2 %v3091_v0  ;;  %604 = vmatpush.bf16.msrb.mxu3 %v3100_v11  ;;  %v3123_v19 = vor.u32 %v2415_v47, %v2236_v6  ;;  %v2218_v47 = vld [vmem:[%s3806_s2] sm:$0xf] }
  0x3e   :  { %579 = vmatpush.bf16.msrb.mxu1 %v3123_v19 }
  0xa1   :  { %v262_v39 = vpop.f32.mrf.mxu0  ;;  %v275_v59 = vpop.f32.mrf.mxu1 }
  0xa2   :  { %v309_v4 = vrot.slane %v275_v59, 6  ;;  %v2234_v59 = vld [vmem:[%s3806_s2 + $0x20] sm:$0xf] }
  0xa3   :  { %v3114_v0 = vor.u32 %v2417_v35, %v2234_v59  ;;  %v2418_v59 = vld [vmem:[%s3806_s2 + $0x34] sm:$0xf0]  ;;  %v2416_v35 = vld [vmem:[%s3806_s2 + $0x2c] sm:$0xf] }
  0xa4   :  { %v313_v40 = vsel %vm312_vm0, %v262_v39, %v309_v4  ;;  %v2244_v39 = vld [vmem:[%s3806_s2 + $0x38] sm:$0xf0] }
  0xa5   :  { %566 = vmatpush.bf16.msrb.mxu0 %v3114_v0  ;;  %v3139_v6 = vor.u32 %v2416_v35, %v2244_v39  ;;  %v2414_v35 = vld [vmem:[%s3806_s2 + $0x14] sm:$0xf0] }
  0xa7   :  { %605 = vmatpush.bf16.msrb.mxu3 %v3139_v6 }
  0xa8   :  { %v288_v60 = vpop.f32.mrf.mxu2  ;;  %v301_v23 = vpop.f32.mrf.mxu3 }
  0xa9   :  { %v310_v52 = vrot.slane %v288_v60, 4  ;;  %v264_v31 = vpop.f32.mrf.mxu0  ;;  %v311_v28 = vrot.slane %v301_v23, 2  ;;  %v277_v60 = vpop.f32.mrf.mxu1  ;;  %v2413_v23 = vld [vmem:[%s3806_s2 + $0xc] sm:$0xf0] }
  0xaa   :  { %v3132_v31 = vor.u32 %v2418_v59, %v2242_v36  ;;  %v2411_v36 = vld [vmem:[%s3806_s2 + $0x4] sm:$0xf]  ;;  %v2226_v59 = vld [vmem:[%s3806_s2 + $0x8] sm:$0xf] }
  0xab   :  { %v315_v4 = vsel %vm314_vm1, %v310_v52, %v311_v28  ;;  %v3152_v28 = vor.u32 %v2413_v23, %v2218_v47  ;;  %v2220_v52 = vld [vmem:[%s3806_s2 + $0x10] sm:$0xf0]  ;;  %v2412_v47 = vld [vmem:[%s3806_s2 + $0xc] sm:$0xf]  ;;  %v2228_v23 = vld [vmem:[%s3806_s2 + $0x18] sm:$0xf0] }
  0xac   :  { %3928 = vst [vmem:[#allocation39_spill] sm:$0xff] %v3132_v31  ;;  %v317_v60 = vsel %vm316_vm2, %v313_v40, %v315_v4  ;;  %592 = vmatpush.bf16.msrb.mxu2 %v3132_v31  ;;  %v3166_v40 = vor.u32 %v2411_v36, %v2220_v52  ;;  %v3168_v4 = vor.u32 %v2414_v35, %v2226_v59 }
  0xad   :  { %v3163_v39 = vadd.f32 %v317_v60, %v91_v53  ;;  %567 = vmatpush.bf16.msrb.mxu0 %v3152_v28  ;;  %v3177_v31 = vor.u32 %v2412_v47, %v2228_v23 }
  0xae   :  { %580 = vmatpush.bf16.msrb.mxu1 %v3166_v40 }
  0xaf   :  { %v2213_v53 = vmul.f32 -1.442695, %v3163_v39  ;;  %v340_v60 = vrot.slane %v3163_v39, 2  ;;  %v364_v36 = vrot.slane %v3163_v39, 6  ;;  %606 = vmatpush.bf16.msrb.mxu3 %v3177_v31 }
  0xb0   :  { %v290_v52 = vpop.f32.mrf.mxu2  ;;  %v303_v59 = vpop.f32.mrf.mxu3  ;;  %593 = vmatpush.bf16.msrb.mxu2 %v3168_v4 }
  0xb1   :  { %633 = vmatpush.bf16.msra.mxu0 %v2607_v3  ;;  %2444 = vpow2.f32 %v2213_v53  ;;  %v2214_v35 = vmul.f32 -1.442695, %v340_v60  ;;  %v2215_v47 = vmul.f32 -1.442695, %v364_v36 }
  0xb2   :  { %646 = vmatpush.bf16.msra.mxu1 %v2618_v7 }
  0xb3   :  { %672 = vmatpush.bf16.msra.mxu3 %v2632_v12  ;;  %2446 = vpow2.f32 %v2214_v35 }
  0xb4   :  { %659 = vmatpush.bf16.msra.mxu2 %v2620_v8  ;;  %2448 = vpow2.f32 %v2215_v47 }
  0xb5   :  { %634 = vmatpush.bf16.msra.mxu0 %v2645_v16 }
  0xb6   :  { %647 = vmatpush.bf16.msra.mxu1 %v2647_v17 }
  0xb7   :  { %673 = vmatpush.bf16.msra.mxu3 %v2670_v25  ;;  %v2445_v23 = vpop.eup %2444 }
  0xb8   :  { %660 = vmatpush.bf16.msra.mxu2 %v2659_v21  ;;  %v323_v53 = vadd.f32 1.0, %v2445_v23 }
  0xb9   :  { %635 = vmatpush.bf16.msra.mxu0 %v2682_v29  ;;  %v2447_v60 = vpop.eup %2446 }
  0xba   :  { %648 = vmatpush.bf16.msra.mxu1 %v2695_v33  ;;  %v2449_v36 = vpop.eup %2448  ;;  %2450 = vrcp.f32 %v323_v53  ;;  %v345_v52 = vadd.f32 1.0, %v2447_v60  ;;  %vm329_vm4 = vweird.f32 %v323_v53 }
  0xbb   :  { %674 = vmatpush.bf16.msra.mxu3 %v2709_v38  ;;  %v3197_v59 = vadd.f32 1.0, %v2449_v36  ;;  %v361_v36 = vrot.slane %v3163_v39, 4 }
  0xbc   :  { %661 = vmatpush.bf16.msra.mxu2 %v2697_v34  ;;  %2452 = vrcp.f32 %v345_v52  ;;  %v357_v39 = vand.u32 2147483648, %v345_v52  ;;  %vm351_vm8 = vweird.f32 %v345_v52 }
  0xbd   :  { %636 = vmatpush.bf16.msra.mxu0 %v2727_v44  ;;  %2454 = vrcp.f32 %v3197_v59  ;;  %vm375_vm12 = vweird.f32 %v3197_v59 }
  0xbe   :  { %649 = vmatpush.bf16.msra.mxu1 %v2731_v45  ;;  %2456 = vtanh.f32 %v361_v36  ;;  %v358_v36 = vor.u32 1.1754944e-38, %v357_v39 }
  0xbf   :  { %675 = vmatpush.bf16.msra.mxu3 %v2745_v50 }
  0xc0   :  { %662 = vmatpush.bf16.msra.mxu2 %v2733_v46  ;;  %v2451_v35 = vpop.eup %2450 }
  0xc1   :  { %637 = vmatpush.bf16.msra.mxu0 %v2763_v56  ;;  %v325_v47 = vmul.f32 %v2451_v35, %v323_v53  ;;  %vm330_vm3 = vweird.f32 %v2451_v35  ;;  %v335_v56 = vand.u32 2147483648, %v323_v53 }
  0xc2   :  { %650 = vmatpush.bf16.msra.mxu1 %v2767_v57  ;;  %v2453_v23 = vpop.eup %2452  ;;  %vm331_vm5 = vmor %vm329_vm4, %vm330_vm3  ;;  %vm623_vm3 = vcmask 1042434  }
  0xc3   :  { %676 = vmatpush.bf16.msra.mxu3 %v2781_v62  ;;  %v326_v60 = vsub.f32 1.0, %v325_v47  ;;  %v2455_v46 = vpop.eup %2454  ;;  %v347_v45 = vmul.f32 %v2453_v23, %v345_v52  ;;  %vm352_vm6 = vweird.f32 %v2453_v23  ;;  %v336_v62 = vor.u32 1.1754944e-38, %v335_v56 }
  0xc4   :  { %663 = vmatpush.bf16.msra.mxu2 %v2769_v58  ;;  %v371_v57 = vmul.f32 %v2455_v46, %v3197_v59  ;;  %v333_v58 = vand.u32 2147483647, %v323_v53  ;;  %vm353_vm9 = vmor %vm351_vm8, %vm352_vm6  ;;  %vm376_vm11 = vweird.f32 %v2455_v46 }
  0xc5   :  { %638 = vmatpush.bf16.msra.mxu0 %v2799_v5  ;;  %v327_v50 = vmul.f32 %v2451_v35, %v326_v60  ;;  %v348_v44 = vsub.f32 1.0, %v347_v45  ;;  %v355_v60 = vand.u32 2147483647, %v345_v52  ;;  %vm377_vm13 = vmor %vm375_vm12, %vm376_vm11 }
  0xc6   :  { %651 = vmatpush.bf16.msra.mxu1 %v2806_v9  ;;  %v372_v38 = vsub.f32 1.0, %v371_v57  ;;  %vm334_vm7 = vcmp.eq.f32.partialorder %v333_v58, 8.507059e+37 }
  0xc7   :  { %677 = vmatpush.bf16.msra.mxu3 %v2820_v15  ;;  %v328_v47 = vadd.f32 %v2451_v35, %v327_v50  ;;  %v349_v5 = vmul.f32 %v2453_v23, %v348_v44  ;;  %v89_v50 = vld [vmem:[#allocation3] sm:$0x3]  ;;  %vm356_vm10 = vcmp.eq.f32.partialorder %v355_v60, 8.507059e+37 }
  0xc8   :  { %664 = vmatpush.bf16.msra.mxu2 %v2808_v10  ;;  %v373_v57 = vmul.f32 %v2455_v46, %v372_v38 }
  0xc9   :  { %639 = vmatpush.bf16.msra.mxu0 %v2835_v24  ;;  %v332_v9 = vsel %vm331_vm5, %v2451_v35, %v328_v47  ;;  %v350_v45 = vadd.f32 %v2453_v23, %v349_v5  ;;  %v2457_v35 = vpop.eup %2456 }
  0xca   :  { %652 = vmatpush.bf16.msra.mxu1 %v2839_v26  ;;  %v337_v53 = vsel %vm334_vm7, %v336_v62, %v332_v9  ;;  %v374_v62 = vadd.f32 %v2455_v46, %v373_v57  ;;  %v381_v9 = vand.u32 2147483648, %v3197_v59  ;;  %v3936_v57 = vld [vmem:[#allocation38_spill] sm:$0xff] }
  0xcb   :  { %678 = vmatpush.bf16.msra.mxu3 %v2853_v32  ;;  %v354_v44 = vsel %vm353_vm9, %v2453_v23, %v350_v45  ;;  %v386_v5 = vmul.f32 %v2457_v35, %v337_v53  ;;  %v379_v23 = vand.u32 2147483647, %v3197_v59  ;;  %v3930_v59 = vld [vmem:[#allocation32_spill] sm:$0xff]  ;;  %v3931_v53 = vld [vmem:[#allocation33_spill] sm:$0xff] }
  0xcc   :  { %665 = vmatpush.bf16.msra.mxu2 %v2841_v27  ;;  %v359_v56 = vsel %vm356_vm10, %v358_v36, %v354_v44  ;;  %v378_v38 = vsel %vm377_vm13, %v2455_v46, %v374_v62  ;;  %v382_v47 = vor.u32 1.1754944e-38, %v381_v9  ;;  %v3929_v46 = vld [vmem:[#allocation31_spill] sm:$0xff]  ;;  %v3932_v36 = vld [vmem:[#allocation34_spill] sm:$0xff]  ;;  %v3934_v35 = vld [vmem:[#allocation36_spill] sm:$0xff] }
  0xcd   :  { %640 = vmatpush.bf16.msra.mxu0 %v2871_v41  ;;  %v385_v58 = vmul.f32 %v359_v56, %v89_v50  ;;  %vm380_vm14 = vcmp.eq.f32.partialorder %v379_v23, 8.507059e+37  ;;  %v3933_v44 = vld [vmem:[#allocation35_spill] sm:$0xff]  ;;  %v3935_v56 = vld [vmem:[#allocation37_spill] sm:$0xff]  ;;  %v3940_v9 = vld [vmem:[#allocation12_spill] sm:$0xff] }
  0xce   :  { %653 = vmatpush.bf16.msra.mxu1 %v2875_v42  ;;  %v383_v60 = vsel %vm380_vm14, %v382_v47, %v378_v38  ;;  %v3939_v62 = vld [vmem:[#allocation11_spill] sm:$0xff]  ;;  %v3941_v23 = vld [vmem:[#allocation13_spill] sm:$0xff]  ;;  %v3942_v38 = vld [vmem:[#allocation14_spill] sm:$0xff] }
  0xcf   :  { %679 = vmatpush.bf16.msra.mxu3 %v2880_v48  ;;  %v3222_v52 = vadd.f32 %v386_v5, %v385_v58  ;;  %v3937_v58 = vld [vmem:[#allocation39_spill] sm:$0xff]  ;;  %v3938_v5 = vld [vmem:[#allocation10_spill] sm:$0xff] }
  0xd0   :  { %666 = vmatpush.bf16.msra.mxu2 %v2877_v43  ;;  %v3943_v47 = vld [vmem:[#allocation15_spill] sm:$0xff] }
  0xd1   :  { %2458 = vtanh.f32 %v3222_v52 }
  0xd7   :  { %v2459_v39 = vpop.eup %2458 }
  0xd8   :  { %v389_v45 = vmul.f32 %v2459_v39, %v383_v60  ;;  %v3944_v39 = vld [vmem:[#allocation16_spill] sm:$0xff]  ;;  %v3945_v60 = vld [vmem:[#allocation17_spill] sm:$0xff] }
  0xda   :  { %v390_v50 = vpack.c.bf16 %v389_v45, %v389_v45  ;;  %v3946_v45 = vld [vmem:[#allocation18_spill] sm:$0xff] }
  0xdc   :  { %568 = vmatmul.bf16.vlgmr.msrb.gmra.mxu0 %v390_v50  ;;  %581 = vmatmul.bf16.vlgmr.msrb.gmra.mxu1 %v390_v50 }
  0xdd   :  { %594 = vmatmul.bf16.vlgmr.msrb.gmra.mxu2 %v390_v50  ;;  %607 = vmatmul.bf16.vlgmr.msrb.gmra.mxu3 %v390_v50 }
  0xde   :  { %768 = vmatpush.bf16.msrb.mxu0 %v2895_v54  ;;  %781 = vmatpush.bf16.msrb.mxu1 %v2906_v61 }
  0xdf   :  { %794 = vmatpush.bf16.msrb.mxu2 %v2908_v63  ;;  %807 = vmatpush.bf16.msrb.mxu3 %v2917_v2 }
  0xe2   :  { %769 = vmatpush.bf16.msrb.mxu0 %v2931_v13  ;;  %782 = vmatpush.bf16.msrb.mxu1 %v2942_v20 }
  0xe3   :  { %795 = vmatpush.bf16.msrb.mxu2 %v2944_v22  ;;  %808 = vmatpush.bf16.msrb.mxu3 %v2953_v30 }
  0xe6   :  { %770 = vmatpush.bf16.msrb.mxu0 %v2967_v37  ;;  %783 = vmatpush.bf16.msrb.mxu1 %v2978_v49 }
  0xe7   :  { %796 = vmatpush.bf16.msrb.mxu2 %v2980_v51  ;;  %809 = vmatpush.bf16.msrb.mxu3 %v2989_v55 }
  0xea   :  { %771 = vmatpush.bf16.msrb.mxu0 %v3003_v1  ;;  %784 = vmatpush.bf16.msrb.mxu1 %v3014_v14 }
  0xeb   :  { %797 = vmatpush.bf16.msrb.mxu2 %v3016_v18  ;;  %810 = vmatpush.bf16.msrb.mxu3 %v3929_v46 }
  0xec   :  { %641 = vmatmul.bf16.vlgmr.msra.gmra.mxu0 %v390_v50  ;;  %654 = vmatmul.bf16.vlgmr.msra.gmra.mxu1 %v390_v50 }
  0xed   :  { %667 = vmatmul.bf16.vlgmr.msra.gmra.mxu2 %v390_v50  ;;  %680 = vmatmul.bf16.vlgmr.msra.gmra.mxu3 %v390_v50  ;;  %v3947_v50 = vld [vmem:[#allocation19_spill] sm:$0xff] }
  0xee   :  { %772 = vmatpush.bf16.msrb.mxu0 %v3930_v59  ;;  %785 = vmatpush.bf16.msrb.mxu1 %v3931_v53 }
  0xef   :  { %798 = vmatpush.bf16.msrb.mxu2 %v3932_v36  ;;  %811 = vmatpush.bf16.msrb.mxu3 %v3933_v44 }
  0xf2   :  { %773 = vmatpush.bf16.msrb.mxu0 %v3934_v35  ;;  %786 = vmatpush.bf16.msrb.mxu1 %v3935_v56 }
  0xf3   :  { %799 = vmatpush.bf16.msrb.mxu2 %v3936_v57  ;;  %812 = vmatpush.bf16.msrb.mxu3 %v3100_v11 }
  0xf6   :  { %774 = vmatpush.bf16.msrb.mxu0 %v3114_v0  ;;  %787 = vmatpush.bf16.msrb.mxu1 %v3123_v19 }
  0xf7   :  { %800 = vmatpush.bf16.msrb.mxu2 %v3937_v58  ;;  %813 = vmatpush.bf16.msrb.mxu3 %v3139_v6 }
  0xfa   :  { %775 = vmatpush.bf16.msrb.mxu0 %v3152_v28  ;;  %788 = vmatpush.bf16.msrb.mxu1 %v3166_v40 }
  0xfb   :  { %801 = vmatpush.bf16.msrb.mxu2 %v3168_v4  ;;  %814 = vmatpush.bf16.msrb.mxu3 %v3177_v31 }
  0xfe   :  { %840 = vmatpush.bf16.msra.mxu0 %v2607_v3  ;;  %853 = vmatpush.bf16.msra.mxu1 %v2618_v7 }
  0xff   :  { %866 = vmatpush.bf16.msra.mxu2 %v2620_v8  ;;  %879 = vmatpush.bf16.msra.mxu3 %v2632_v12 }
 0x102   :  { %841 = vmatpush.bf16.msra.mxu0 %v2645_v16  ;;  %854 = vmatpush.bf16.msra.mxu1 %v2647_v17 }
 0x103   :  { %867 = vmatpush.bf16.msra.mxu2 %v2659_v21  ;;  %880 = vmatpush.bf16.msra.mxu3 %v2670_v25 }
 0x106   :  { %842 = vmatpush.bf16.msra.mxu0 %v2682_v29  ;;  %855 = vmatpush.bf16.msra.mxu1 %v2695_v33 }
 0x107   :  { %868 = vmatpush.bf16.msra.mxu2 %v2697_v34  ;;  %881 = vmatpush.bf16.msra.mxu3 %v3938_v5  ;;  %v3948_v34 = vld [vmem:[#allocation20_spill] sm:$0xff] }
 0x10a   :  { %843 = vmatpush.bf16.msra.mxu0 %v3939_v62  ;;  %856 = vmatpush.bf16.msra.mxu1 %v3940_v9 }
 0x10b   :  { %869 = vmatpush.bf16.msra.mxu2 %v3941_v23  ;;  %882 = vmatpush.bf16.msra.mxu3 %v3942_v38 }
 0x10e   :  { %844 = vmatpush.bf16.msra.mxu0 %v3943_v47  ;;  %857 = vmatpush.bf16.msra.mxu1 %v3944_v39 }
 0x10f   :  { %870 = vmatpush.bf16.msra.mxu2 %v3945_v60  ;;  %883 = vmatpush.bf16.msra.mxu3 %v3946_v45 }
 0x112   :  { %845 = vmatpush.bf16.msra.mxu0 %v3947_v50  ;;  %858 = vmatpush.bf16.msra.mxu1 %v3948_v34 }
 0x113   :  { %871 = vmatpush.bf16.msra.mxu2 %v2808_v10  ;;  %884 = vmatpush.bf16.msra.mxu3 %v2820_v15  ;;  %v87_v15 = vld [vmem:[%s3808_s3] sm:$0xf] }
 0x114   :  { %v3295_v10 = vperm.slane %v87_v15, 0  ;;  %v3301_v34 = vperm.slane %v87_v15, 2 }
 0x116   :  { %846 = vmatpush.bf16.msra.mxu0 %v2835_v24  ;;  %859 = vmatpush.bf16.msra.mxu1 %v2839_v26  ;;  %3949 = vst [vmem:[#allocation31_spill] sm:$0xff] %v3295_v10  ;;  %v3297_v24 = vperm.slane %v87_v15, 1 }
 0x117   :  { %872 = vmatpush.bf16.msra.mxu2 %v2841_v27  ;;  %885 = vmatpush.bf16.msra.mxu3 %v2853_v32  ;;  %3951 = vst [vmem:[#allocation33_spill] sm:$0xff] %v3301_v34 }
 0x118   :  { %3950 = vst [vmem:[#allocation32_spill] sm:$0xff] %v3297_v24 }
 0x11a   :  { %847 = vmatpush.bf16.msra.mxu0 %v2871_v41  ;;  %860 = vmatpush.bf16.msra.mxu1 %v2875_v42  ;;  %v3303_v42 = vperm.slane %v87_v15, 3 }
 0x11b   :  { %873 = vmatpush.bf16.msra.mxu2 %v2877_v43  ;;  %886 = vmatpush.bf16.msra.mxu3 %v2880_v48 }
 0x11c   :  { %3952 = vst [vmem:[#allocation34_spill] sm:$0xff] %v3303_v42 }
 0x159   :  { %v569_v26 = vpop.f32.mrf.mxu0  ;;  %v582_v27 = vpop.f32.mrf.mxu1 }
 0x15a   :  { %v570_v32 = vadd.f32 %v569_v26, %v3295_v10  ;;  %v583_v41 = vadd.f32 %v582_v27, %v3297_v24 }
 0x15c   :  { %v612_v43 = vpack.c.bf16 %v583_v41, %v570_v32 }
 0x15e   :  { %v616_v38 = vrot.slane %v612_v43, 3 }
 0x160   :  { %v595_v48 = vpop.f32.mrf.mxu2  ;;  %v608_v50 = vpop.f32.mrf.mxu3  ;;  %v622_v27 = vsel %vm619_vm15, %v612_v43, %v616_v38 }
 0x161   :  { %v596_v45 = vadd.f32 %v595_v48, %v3301_v34  ;;  %v609_v60 = vadd.f32 %v608_v50, %v3303_v42  ;;  %v571_v39 = vpop.f32.mrf.mxu0  ;;  %v584_v47 = vpop.f32.mrf.mxu1 }
 0x162   :  { %v3316_v39 = vld [vmem:[%s3807_s0 + $0x4] sm:$0xff]  }
 0x163   :  { %v613_v23 = vpack.c.bf16 %v609_v60, %v596_v45  ;;  %3953 = vst [vmem:[#allocation35_spill] sm:$0xff] %v3316_v39 }
 0x165   :  { %v617_v26 = vrot.slane %v613_v23, 6  ;;  %v618_v10 = vrot.slane %v613_v23, 1 }
 0x167   :  { %v626_v15 = vsel %vm623_vm3, %v617_v26, %v618_v10  ;;  %v632_v10 = vunpack.c.l.bf16 %v3316_v39 }
 0x168   :  { %v627_v32 = vsel %vm312_vm0, %v622_v27, %v626_v15  ;;  %v597_v41 = vpop.f32.mrf.mxu2  ;;  %v610_v24 = vpop.f32.mrf.mxu3 }
 0x169   :  { %629 = vst [vmem:[%s3809_s4] sm:$0xf] %v627_v32  ;;  %v642_v48 = vpop.f32.mrf.mxu0  ;;  %v655_v47 = vpop.f32.mrf.mxu1 }
 0x16a   :  { %v689_v23 = vrot.slane %v655_v47, 6 }
 0x16c   :  { %v692_v26 = vsel %vm312_vm0, %v642_v48, %v689_v23 }
 0x170   :  { %v668_v60 = vpop.f32.mrf.mxu2  ;;  %v681_v43 = vpop.f32.mrf.mxu3 }
 0x171   :  { %v690_v38 = vrot.slane %v668_v60, 4  ;;  %v691_v45 = vrot.slane %v681_v43, 2  ;;  %v644_v50 = vpop.f32.mrf.mxu0  ;;  %v657_v24 = vpop.f32.mrf.mxu1 }
 0x173   :  { %v693_v27 = vsel %vm314_vm1, %v690_v38, %v691_v45 }
 0x174   :  { %v694_v15 = vsel %vm316_vm2, %v692_v26, %v693_v27 }
 0x175   :  { %v696_v32 = vadd.f32 %v694_v15, %v632_v10 }
 0x177   :  { %v2345_v41 = vmul.f32 -1.442695, %v696_v32  ;;  %v717_v42 = vrot.slane %v696_v32, 2  ;;  %v741_v34 = vrot.slane %v696_v32, 6 }
 0x178   :  { %v670_v9 = vpop.f32.mrf.mxu2  ;;  %v683_v47 = vpop.f32.mrf.mxu3 }
 0x179   :  { %2460 = vpow2.f32 %v2345_v41  ;;  %v2346_v62 = vmul.f32 -1.442695, %v717_v42  ;;  %v2347_v60 = vmul.f32 -1.442695, %v741_v34  ;;  %v738_v9 = vrot.slane %v696_v32, 4 }
 0x17b   :  { %2462 = vpow2.f32 %v2346_v62 }
 0x17c   :  { %2464 = vpow2.f32 %v2347_v60 }
 0x17f   :  { %v2461_v43 = vpop.eup %2460 }
 0x180   :  { %v700_v50 = vadd.f32 1.0, %v2461_v43 }
 0x181   :  { %v2463_v24 = vpop.eup %2462 }
 0x182   :  { %v2465_v39 = vpop.eup %2464  ;;  %2466 = vrcp.f32 %v700_v50  ;;  %v722_v48 = vadd.f32 1.0, %v2463_v24  ;;  %v712_v34 = vand.u32 2147483648, %v700_v50  ;;  %v710_v41 = vand.u32 2147483647, %v700_v50 }
 0x183   :  { %v746_v23 = vadd.f32 1.0, %v2465_v39  ;;  %vm706_vm5 = vweird.f32 %v700_v50 }
 0x184   :  { %2468 = vrcp.f32 %v722_v48  ;;  %v734_v43 = vand.u32 2147483648, %v722_v48  ;;  %v732_v24 = vand.u32 2147483647, %v722_v48  ;;  %v713_v33 = vor.u32 1.1754944e-38, %v712_v34 }
 0x185   :  { %2470 = vrcp.f32 %v746_v23  ;;  %vm711_vm8 = vcmp.eq.f32.partialorder %v710_v41, 8.507059e+37  ;;  %vm728_vm9 = vweird.f32 %v722_v48  ;;  %vm752_vm13 = vweird.f32 %v746_v23  ;;  %v3960_v41 = vld [vmem:[#allocation10_spill] sm:$0xff] }
 0x186   :  { %2472 = vtanh.f32 %v738_v9  ;;  %v735_v29 = vor.u32 1.1754944e-38, %v734_v43  ;;  %vm733_vm11 = vcmp.eq.f32.partialorder %v732_v24, 8.507059e+37  ;;  %v3962_v43 = vld [vmem:[#allocation12_spill] sm:$0xff]  ;;  %v3964_v24 = vld [vmem:[#allocation14_spill] sm:$0xff] }
 0x188   :  { %v2467_v38 = vpop.eup %2466 }
 0x189   :  { %v702_v10 = vmul.f32 %v2467_v38, %v700_v50  ;;  %vm707_vm4 = vweird.f32 %v2467_v38 }
 0x18a   :  { %v2469_v45 = vpop.eup %2468  ;;  %vm708_vm6 = vmor %vm706_vm5, %vm707_vm4 }
 0x18b   :  { %v703_v26 = vsub.f32 1.0, %v702_v10  ;;  %v2471_v27 = vpop.eup %2470  ;;  %v724_v15 = vmul.f32 %v2469_v45, %v722_v48  ;;  %vm729_vm7 = vweird.f32 %v2469_v45  ;;  %v756_v48 = vand.u32 2147483647, %v746_v23 }
 0x18c   :  { %v748_v62 = vmul.f32 %v2471_v27, %v746_v23  ;;  %vm730_vm10 = vmor %vm728_vm9, %vm729_vm7  ;;  %vm753_vm12 = vweird.f32 %v2471_v27 }
 0x18d   :  { %v704_v42 = vmul.f32 %v2467_v38, %v703_v26  ;;  %v725_v47 = vsub.f32 1.0, %v724_v15  ;;  %v2473_v15 = vpop.eup %2472  ;;  %vm754_vm14 = vmor %vm752_vm13, %vm753_vm12  ;;  %vm757_vm4 = vcmp.eq.f32.partialorder %v756_v48, 8.507059e+37  ;;  %v3973_v48 = vld [vmem:[#allocation23_spill] sm:$0xff] }
 0x18e   :  { %v749_v10 = vsub.f32 1.0, %v748_v62  ;;  %v3959_v62 = vld [vmem:[#allocation9_spill] sm:$0xff] }
 0x18f   :  { %v705_v60 = vadd.f32 %v2467_v38, %v704_v42  ;;  %v726_v39 = vmul.f32 %v2469_v45, %v725_v47 }
 0x190   :  { %v750_v50 = vmul.f32 %v2471_v27, %v749_v10  ;;  %v3965_v10 = vld [vmem:[#allocation15_spill] sm:$0xff] }
 0x191   :  { %v709_v5 = vsel %vm708_vm6, %v2467_v38, %v705_v60  ;;  %v727_v32 = vadd.f32 %v2469_v45, %v726_v39  ;;  %v758_v38 = vand.u32 2147483648, %v746_v23  ;;  %v3957_v23 = vld [vmem:[#allocation7_spill] sm:$0xff]  ;;  %v3963_v39 = vld [vmem:[#allocation13_spill] sm:$0xff] }
 0x192   :  { %v714_v26 = vsel %vm711_vm8, %v713_v33, %v709_v5  ;;  %v751_v17 = vadd.f32 %v2471_v27, %v750_v50  ;;  %v3961_v60 = vld [vmem:[#allocation11_spill] sm:$0xff]  ;;  %v3970_v50 = vld [vmem:[#allocation20_spill] sm:$0xff] }
 0x193   :  { %v731_v25 = vsel %vm730_vm10, %v2469_v45, %v727_v32  ;;  %v763_v21 = vmul.f32 %v2473_v15, %v714_v26  ;;  %v759_v5 = vor.u32 1.1754944e-38, %v758_v38  ;;  %v3966_v32 = vld [vmem:[#allocation16_spill] sm:$0xff]  ;;  %v3967_v26 = vld [vmem:[#allocation17_spill] sm:$0xff]  ;;  %v3968_v15 = vld [vmem:[#allocation18_spill] sm:$0xff] }
 0x194   :  { %v736_v42 = vsel %vm733_vm11, %v735_v29, %v731_v25  ;;  %v755_v33 = vsel %vm754_vm14, %v2471_v27, %v751_v17  ;;  %v3954_v17 = vld [vmem:[#allocation4_spill] sm:$0xff]  ;;  %v3972_v38 = vld [vmem:[#allocation22_spill] sm:$0xff] }
 0x195   :  { %v762_v9 = vmul.f32 %v736_v42, %v3222_v52  ;;  %v760_v34 = vsel %vm757_vm4, %v759_v5, %v755_v33  ;;  %v3956_v52 = vld [vmem:[#allocation6_spill] sm:$0xff]  ;;  %v3958_v27 = vld [vmem:[#allocation8_spill] sm:$0xff]  ;;  %v3969_v42 = vld [vmem:[#allocation19_spill] sm:$0xff] }
 0x196   :  { %v3974_v33 = vld [vmem:[#allocation24_spill] sm:$0xff]  ;;  %v3975_v5 = vld [vmem:[#allocation25_spill] sm:$0xff] }
 0x197   :  { %v3323_v47 = vadd.f32 %v763_v21, %v762_v9  ;;  %v3955_v21 = vld [vmem:[#allocation5_spill] sm:$0xff] }
 0x198   :  { %v3971_v9 = vld [vmem:[#allocation21_spill] sm:$0xff] }
 0x199   :  { %2474 = vtanh.f32 %v3323_v47 }
 0x19f   :  { %v2475_v45 = vpop.eup %2474 }
 0x1a0   :  { %v766_v25 = vmul.f32 %v2475_v45, %v760_v34  ;;  %v3976_v45 = vld [vmem:[#allocation26_spill] sm:$0xff]  ;;  %v3977_v34 = vld [vmem:[#allocation27_spill] sm:$0xff] }
 0x1a2   :  { %v767_v29 = vpack.c.bf16 %v766_v25, %v766_v25  ;;  %v3978_v25 = vld [vmem:[#allocation28_spill] sm:$0xff] }
 0x1a4   :  { %776 = vmatmul.bf16.vlgmr.msrb.gmra.mxu0 %v767_v29  ;;  %789 = vmatmul.bf16.vlgmr.msrb.gmra.mxu1 %v767_v29 }
 0x1a5   :  { %802 = vmatmul.bf16.vlgmr.msrb.gmra.mxu2 %v767_v29  ;;  %815 = vmatmul.bf16.vlgmr.msrb.gmra.mxu3 %v767_v29 }
 0x1a6   :  { %975 = vmatpush.bf16.msrb.mxu0 %v2895_v54  ;;  %988 = vmatpush.bf16.msrb.mxu1 %v2906_v61 }
 0x1a7   :  { %1001 = vmatpush.bf16.msrb.mxu2 %v2908_v63  ;;  %1014 = vmatpush.bf16.msrb.mxu3 %v2917_v2 }
 0x1aa   :  { %976 = vmatpush.bf16.msrb.mxu0 %v2931_v13  ;;  %989 = vmatpush.bf16.msrb.mxu1 %v2942_v20 }
 0x1ab   :  { %1002 = vmatpush.bf16.msrb.mxu2 %v2944_v22  ;;  %1015 = vmatpush.bf16.msrb.mxu3 %v2953_v30 }
 0x1ae   :  { %977 = vmatpush.bf16.msrb.mxu0 %v2967_v37  ;;  %990 = vmatpush.bf16.msrb.mxu1 %v2978_v49 }
 0x1af   :  { %1003 = vmatpush.bf16.msrb.mxu2 %v2980_v51  ;;  %1016 = vmatpush.bf16.msrb.mxu3 %v2989_v55 }
 0x1b2   :  { %978 = vmatpush.bf16.msrb.mxu0 %v3003_v1  ;;  %991 = vmatpush.bf16.msrb.mxu1 %v3014_v14 }
 0x1b3   :  { %1004 = vmatpush.bf16.msrb.mxu2 %v3016_v18  ;;  %1017 = vmatpush.bf16.msrb.mxu3 %v3929_v46 }
 0x1b4   :  { %848 = vmatmul.bf16.vlgmr.msra.gmra.mxu0 %v767_v29  ;;  %861 = vmatmul.bf16.vlgmr.msra.gmra.mxu1 %v767_v29 }
 0x1b5   :  { %874 = vmatmul.bf16.vlgmr.msra.gmra.mxu2 %v767_v29  ;;  %887 = vmatmul.bf16.vlgmr.msra.gmra.mxu3 %v767_v29  ;;  %v3979_v29 = vld [vmem:[#allocation29_spill] sm:$0xff] }
 0x1b6   :  { %979 = vmatpush.bf16.msrb.mxu0 %v3930_v59  ;;  %992 = vmatpush.bf16.msrb.mxu1 %v3931_v53 }
 0x1b7   :  { %1005 = vmatpush.bf16.msrb.mxu2 %v3932_v36  ;;  %1018 = vmatpush.bf16.msrb.mxu3 %v3933_v44 }
 0x1ba   :  { %980 = vmatpush.bf16.msrb.mxu0 %v3934_v35  ;;  %993 = vmatpush.bf16.msrb.mxu1 %v3935_v56 }
 0x1bb   :  { %1006 = vmatpush.bf16.msrb.mxu2 %v3936_v57  ;;  %1019 = vmatpush.bf16.msrb.mxu3 %v3100_v11 }
 0x1be   :  { %981 = vmatpush.bf16.msrb.mxu0 %v3114_v0  ;;  %994 = vmatpush.bf16.msrb.mxu1 %v3123_v19 }
 0x1bf   :  { %1007 = vmatpush.bf16.msrb.mxu2 %v3937_v58  ;;  %1020 = vmatpush.bf16.msrb.mxu3 %v3139_v6 }
 0x1c2   :  { %982 = vmatpush.bf16.msrb.mxu0 %v3152_v28  ;;  %995 = vmatpush.bf16.msrb.mxu1 %v3166_v40 }
 0x1c3   :  { %1008 = vmatpush.bf16.msrb.mxu2 %v3168_v4  ;;  %1021 = vmatpush.bf16.msrb.mxu3 %v3177_v31 }
 0x1c6   :  { %1047 = vmatpush.bf16.msra.mxu0 %v2607_v3  ;;  %1060 = vmatpush.bf16.msra.mxu1 %v2618_v7 }
 0x1c7   :  { %1073 = vmatpush.bf16.msra.mxu2 %v2620_v8  ;;  %1086 = vmatpush.bf16.msra.mxu3 %v2632_v12 }
 0x1ca   :  { %1048 = vmatpush.bf16.msra.mxu0 %v2645_v16  ;;  %1061 = vmatpush.bf16.msra.mxu1 %v3954_v17 }
 0x1cb   :  { %1074 = vmatpush.bf16.msra.mxu2 %v3955_v21  ;;  %1087 = vmatpush.bf16.msra.mxu3 %v3956_v52 }
 0x1ce   :  { %1049 = vmatpush.bf16.msra.mxu0 %v3957_v23  ;;  %1062 = vmatpush.bf16.msra.mxu1 %v3958_v27 }
 0x1cf   :  { %1075 = vmatpush.bf16.msra.mxu2 %v3959_v62  ;;  %1088 = vmatpush.bf16.msra.mxu3 %v3960_v41 }
 0x1d2   :  { %1050 = vmatpush.bf16.msra.mxu0 %v3961_v60  ;;  %1063 = vmatpush.bf16.msra.mxu1 %v3962_v43 }
 0x1d3   :  { %1076 = vmatpush.bf16.msra.mxu2 %v3963_v39  ;;  %1089 = vmatpush.bf16.msra.mxu3 %v3964_v24 }
 0x1d6   :  { %1051 = vmatpush.bf16.msra.mxu0 %v3965_v10  ;;  %1064 = vmatpush.bf16.msra.mxu1 %v3966_v32 }
 0x1d7   :  { %1077 = vmatpush.bf16.msra.mxu2 %v3967_v26  ;;  %1090 = vmatpush.bf16.msra.mxu3 %v3968_v15  ;;  %v3981_v15 = vld [vmem:[#allocation31_spill] sm:$0xff]  ;;  %v3982_v26 = vld [vmem:[#allocation32_spill] sm:$0xff] }
 0x1da   :  { %1052 = vmatpush.bf16.msra.mxu0 %v3969_v42  ;;  %1065 = vmatpush.bf16.msra.mxu1 %v3970_v50  ;;  %v3980_v42 = vld [vmem:[#allocation30_spill] sm:$0xff] }
 0x1db   :  { %1078 = vmatpush.bf16.msra.mxu2 %v3971_v9  ;;  %1091 = vmatpush.bf16.msra.mxu3 %v3972_v38 }
 0x1de   :  { %1053 = vmatpush.bf16.msra.mxu0 %v3973_v48  ;;  %1066 = vmatpush.bf16.msra.mxu1 %v3974_v33 }
 0x1df   :  { %1079 = vmatpush.bf16.msra.mxu2 %v3975_v5  ;;  %1092 = vmatpush.bf16.msra.mxu3 %v3976_v45  ;;  %v3983_v5 = vld [vmem:[#allocation33_spill] sm:$0xff]  ;;  %v3984_v45 = vld [vmem:[#allocation34_spill] sm:$0xff] }
 0x1e2   :  { %1054 = vmatpush.bf16.msra.mxu0 %v3977_v34  ;;  %1067 = vmatpush.bf16.msra.mxu1 %v3978_v25 }
 0x1e3   :  { %1080 = vmatpush.bf16.msra.mxu2 %v3979_v29  ;;  %1093 = vmatpush.bf16.msra.mxu3 %v3980_v42 }
 0x221   :  { %v777_v50 = vpop.f32.mrf.mxu0  ;;  %v790_v9 = vpop.f32.mrf.mxu1 }
 0x222   :  { %v778_v38 = vadd.f32 %v777_v50, %v3981_v15  ;;  %v791_v48 = vadd.f32 %v790_v9, %v3982_v26 }
 0x224   :  { %v820_v32 = vpack.c.bf16 %v791_v48, %v778_v38 }
 0x226   :  { %v824_v25 = vrot.slane %v820_v32, 3 }
 0x228   :  { %v803_v33 = vpop.f32.mrf.mxu2  ;;  %v816_v10 = vpop.f32.mrf.mxu3  ;;  %v829_v42 = vsel %vm619_vm15, %v820_v32, %v824_v25 }
 0x229   :  { %v804_v24 = vadd.f32 %v803_v33, %v3983_v5  ;;  %v817_v39 = vadd.f32 %v816_v10, %v3984_v45  ;;  %v779_v34 = vpop.f32.mrf.mxu0  ;;  %v792_v43 = vpop.f32.mrf.mxu1 }
 0x22b   :  { %v821_v60 = vpack.c.bf16 %v817_v39, %v804_v24  ;;  %v3985_v24 = vld [vmem:[#allocation35_spill] sm:$0xff] }
 0x22d   :  { %v825_v29 = vrot.slane %v821_v60, 6  ;;  %v826_v41 = vrot.slane %v821_v60, 1  ;;  %v839_v60 = vunpack.c.h.bf16 %v3985_v24 }
 0x22f   :  { %v832_v62 = vsel %vm623_vm3, %v825_v29, %v826_v41 }
 0x230   :  { %v833_v50 = vsel %vm312_vm0, %v829_v42, %v832_v62  ;;  %v805_v9 = vpop.f32.mrf.mxu2  ;;  %v818_v38 = vpop.f32.mrf.mxu3 }
 0x231   :  { %2348 = vst [vmem:[%s3809_s4 + $0x4] sm:$0xf] %v833_v50  ;;  %v849_v48 = vpop.f32.mrf.mxu0  ;;  %v862_v10 = vpop.f32.mrf.mxu1 }
 0x232   :  { %v896_v33 = vrot.slane %v862_v10, 6 }
 0x234   :  { %v899_v41 = vsel %vm312_vm0, %v849_v48, %v896_v33 }
 0x238   :  { %v875_v43 = vpop.f32.mrf.mxu2  ;;  %v888_v34 = vpop.f32.mrf.mxu3 }
 0x239   :  { %v897_v39 = vrot.slane %v875_v43, 4  ;;  %v898_v45 = vrot.slane %v888_v34, 2  ;;  %v851_v32 = vpop.f32.mrf.mxu0  ;;  %v864_v25 = vpop.f32.mrf.mxu1 }
 0x23b   :  { %v900_v62 = vsel %vm314_vm1, %v897_v39, %v898_v45 }
 0x23c   :  { %v901_v42 = vsel %vm316_vm2, %v899_v41, %v900_v62 }
 0x23d   :  { %v903_v29 = vadd.f32 %v901_v42, %v839_v60 }
 0x23f   :  { %v2350_v9 = vmul.f32 -1.442695, %v903_v29  ;;  %v924_v50 = vrot.slane %v903_v29, 2  ;;  %v948_v38 = vrot.slane %v903_v29, 6 }
 0x240   :  { %v877_v5 = vpop.f32.mrf.mxu2  ;;  %v890_v10 = vpop.f32.mrf.mxu3 }
 0x241   :  { %2476 = vpow2.f32 %v2350_v9  ;;  %v2351_v26 = vmul.f32 -1.442695, %v924_v50  ;;  %v2352_v43 = vmul.f32 -1.442695, %v948_v38  ;;  %v945_v5 = vrot.slane %v903_v29, 4 }
 0x243   :  { %2478 = vpow2.f32 %v2351_v26 }
 0x244   :  { %2480 = vpow2.f32 %v2352_v43 }
 0x247   :  { %v2477_v34 = vpop.eup %2476 }
 0x248   :  { %v907_v24 = vadd.f32 1.0, %v2477_v34 }
 0x249   :  { %v2479_v32 = vpop.eup %2478 }
 0x24a   :  { %v2481_v25 = vpop.eup %2480  ;;  %2482 = vrcp.f32 %v907_v24  ;;  %v929_v48 = vadd.f32 1.0, %v2479_v32  ;;  %v919_v26 = vand.u32 2147483648, %v907_v24  ;;  %v917_v38 = vand.u32 2147483647, %v907_v24 }
 0x24b   :  { %v953_v45 = vadd.f32 1.0, %v2481_v25  ;;  %vm913_vm6 = vweird.f32 %v907_v24 }
 0x24c   :  { %2484 = vrcp.f32 %v929_v48  ;;  %v941_v34 = vand.u32 2147483648, %v929_v48  ;;  %v939_v25 = vand.u32 2147483647, %v929_v48  ;;  %v920_v27 = vor.u32 1.1754944e-38, %v919_v26 }
 0x24d   :  { %2486 = vrcp.f32 %v953_v45  ;;  %vm918_vm9 = vcmp.eq.f32.partialorder %v917_v38, 8.507059e+37  ;;  %vm935_vm10 = vweird.f32 %v929_v48  ;;  %vm959_vm14 = vweird.f32 %v953_v45  ;;  %v3992_v38 = vld [vmem:[#allocation10_spill] sm:$0xff] }
 0x24e   :  { %2488 = vtanh.f32 %v945_v5  ;;  %v942_v23 = vor.u32 1.1754944e-38, %v941_v34  ;;  %vm940_vm12 = vcmp.eq.f32.partialorder %v939_v25, 8.507059e+37  ;;  %v3994_v34 = vld [vmem:[#allocation12_spill] sm:$0xff]  ;;  %v3996_v25 = vld [vmem:[#allocation14_spill] sm:$0xff] }
 0x250   :  { %v2483_v33 = vpop.eup %2482 }
 0x251   :  { %v909_v39 = vmul.f32 %v2483_v33, %v907_v24  ;;  %vm914_vm5 = vweird.f32 %v2483_v33 }
 0x252   :  { %v2485_v60 = vpop.eup %2484  ;;  %vm915_vm7 = vmor %vm913_vm6, %vm914_vm5 }
 0x253   :  { %v910_v41 = vsub.f32 1.0, %v909_v39  ;;  %v2487_v62 = vpop.eup %2486  ;;  %v931_v42 = vmul.f32 %v2485_v60, %v929_v48  ;;  %vm936_vm8 = vweird.f32 %v2485_v60  ;;  %v963_v48 = vand.u32 2147483647, %v953_v45 }
 0x254   :  { %v955_v50 = vmul.f32 %v2487_v62, %v953_v45  ;;  %vm937_vm11 = vmor %vm935_vm10, %vm936_vm8  ;;  %vm960_vm13 = vweird.f32 %v2487_v62 }
 0x255   :  { %v911_v9 = vmul.f32 %v2483_v33, %v910_v41  ;;  %v932_v10 = vsub.f32 1.0, %v931_v42  ;;  %v2489_v42 = vpop.eup %2488  ;;  %vm961_vm4 = vmor %vm959_vm14, %vm960_vm13  ;;  %vm964_vm5 = vcmp.eq.f32.partialorder %v963_v48, 8.507059e+37  ;;  %v4005_v48 = vld [vmem:[#allocation23_spill] sm:$0xff] }
 0x256   :  { %v956_v39 = vsub.f32 1.0, %v955_v50  ;;  %v3991_v50 = vld [vmem:[#allocation9_spill] sm:$0xff] }
 0x257   :  { %v912_v43 = vadd.f32 %v2483_v33, %v911_v9  ;;  %v933_v32 = vmul.f32 %v2485_v60, %v932_v10 }
 0x258   :  { %v957_v24 = vmul.f32 %v2487_v62, %v956_v39  ;;  %v3997_v39 = vld [vmem:[#allocation15_spill] sm:$0xff] }
 0x259   :  { %v916_v15 = vsel %vm915_vm7, %v2483_v33, %v912_v43  ;;  %v934_v29 = vadd.f32 %v2485_v60, %v933_v32  ;;  %v965_v33 = vand.u32 2147483648, %v953_v45  ;;  %v3989_v45 = vld [vmem:[#allocation7_spill] sm:$0xff]  ;;  %v3995_v32 = vld [vmem:[#allocation13_spill] sm:$0xff] }
 0x25a   :  { %v921_v41 = vsel %vm918_vm9, %v920_v27, %v916_v15  ;;  %v958_v17 = vadd.f32 %v2487_v62, %v957_v24  ;;  %v3993_v43 = vld [vmem:[#allocation11_spill] sm:$0xff]  ;;  %v4002_v24 = vld [vmem:[#allocation20_spill] sm:$0xff] }
 0x25b   :  { %v938_v52 = vsel %vm937_vm11, %v2485_v60, %v934_v29  ;;  %v970_v21 = vmul.f32 %v2489_v42, %v921_v41  ;;  %v966_v15 = vor.u32 1.1754944e-38, %v965_v33  ;;  %v3998_v29 = vld [vmem:[#allocation16_spill] sm:$0xff]  ;;  %v3999_v41 = vld [vmem:[#allocation17_spill] sm:$0xff]  ;;  %v4000_v42 = vld [vmem:[#allocation18_spill] sm:$0xff] }
 0x25c   :  { %v943_v9 = vsel %vm940_vm12, %v942_v23, %v938_v52  ;;  %v962_v27 = vsel %vm961_vm4, %v2487_v62, %v958_v17  ;;  %v3987_v17 = vld [vmem:[#allocation5_spill] sm:$0xff]  ;;  %v3990_v62 = vld [vmem:[#allocation8_spill] sm:$0xff]  ;;  %v4004_v33 = vld [vmem:[#allocation22_spill] sm:$0xff] }
 0x25d   :  { %v969_v5 = vmul.f32 %v943_v9, %v3323_v47  ;;  %v967_v26 = vsel %vm964_vm5, %v966_v15, %v962_v27  ;;  %v3986_v47 = vld [vmem:[#allocation4_spill] sm:$0xff]  ;;  %v4001_v9 = vld [vmem:[#allocation19_spill] sm:$0xff]  ;;  %v4007_v15 = vld [vmem:[#allocation25_spill] sm:$0xff] }
 0x25e   :  { %v4006_v27 = vld [vmem:[#allocation24_spill] sm:$0xff] }
 0x25f   :  { %v3405_v10 = vadd.f32 %v970_v21, %v969_v5  ;;  %v3988_v21 = vld [vmem:[#allocation6_spill] sm:$0xff]  ;;  %v4003_v5 = vld [vmem:[#allocation21_spill] sm:$0xff] }
 0x261   :  { %2490 = vtanh.f32 %v3405_v10 }
 0x267   :  { %v2491_v60 = vpop.eup %2490 }
 0x268   :  { %v973_v52 = vmul.f32 %v2491_v60, %v967_v26  ;;  %v4008_v60 = vld [vmem:[#allocation26_spill] sm:$0xff]  ;;  %v4009_v26 = vld [vmem:[#allocation27_spill] sm:$0xff] }
 0x26a   :  { %v974_v23 = vpack.c.bf16 %v973_v52, %v973_v52  ;;  %v4010_v52 = vld [vmem:[#allocation28_spill] sm:$0xff] }
 0x26c   :  { %983 = vmatmul.bf16.vlgmr.msrb.gmra.mxu0 %v974_v23  ;;  %996 = vmatmul.bf16.vlgmr.msrb.gmra.mxu1 %v974_v23 }
 0x26d   :  { %1009 = vmatmul.bf16.vlgmr.msrb.gmra.mxu2 %v974_v23  ;;  %1022 = vmatmul.bf16.vlgmr.msrb.gmra.mxu3 %v974_v23 }
 0x26e   :  { %1182 = vmatpush.bf16.msrb.mxu0 %v2895_v54  ;;  %1195 = vmatpush.bf16.msrb.mxu1 %v2906_v61 }
 0x26f   :  { %1208 = vmatpush.bf16.msrb.mxu2 %v2908_v63  ;;  %1221 = vmatpush.bf16.msrb.mxu3 %v2917_v2 }
 0x272   :  { %1183 = vmatpush.bf16.msrb.mxu0 %v2931_v13  ;;  %1196 = vmatpush.bf16.msrb.mxu1 %v2942_v20 }
 0x273   :  { %1209 = vmatpush.bf16.msrb.mxu2 %v2944_v22  ;;  %1222 = vmatpush.bf16.msrb.mxu3 %v2953_v30 }
 0x276   :  { %1184 = vmatpush.bf16.msrb.mxu0 %v2967_v37  ;;  %1197 = vmatpush.bf16.msrb.mxu1 %v2978_v49 }
 0x277   :  { %1210 = vmatpush.bf16.msrb.mxu2 %v2980_v51  ;;  %1223 = vmatpush.bf16.msrb.mxu3 %v2989_v55 }
 0x27a   :  { %1185 = vmatpush.bf16.msrb.mxu0 %v3003_v1  ;;  %1198 = vmatpush.bf16.msrb.mxu1 %v3014_v14 }
 0x27b   :  { %1211 = vmatpush.bf16.msrb.mxu2 %v3016_v18  ;;  %1224 = vmatpush.bf16.msrb.mxu3 %v3929_v46 }
 0x27c   :  { %1055 = vmatmul.bf16.vlgmr.msra.gmra.mxu0 %v974_v23  ;;  %1068 = vmatmul.bf16.vlgmr.msra.gmra.mxu1 %v974_v23 }
 0x27d   :  { %1081 = vmatmul.bf16.vlgmr.msra.gmra.mxu2 %v974_v23  ;;  %1094 = vmatmul.bf16.vlgmr.msra.gmra.mxu3 %v974_v23  ;;  %v4011_v23 = vld [vmem:[#allocation29_spill] sm:$0xff] }
 0x27e   :  { %1186 = vmatpush.bf16.msrb.mxu0 %v3930_v59  ;;  %1199 = vmatpush.bf16.msrb.mxu1 %v3931_v53 }
 0x27f   :  { %1212 = vmatpush.bf16.msrb.mxu2 %v3932_v36  ;;  %1225 = vmatpush.bf16.msrb.mxu3 %v3933_v44 }
 0x282   :  { %1187 = vmatpush.bf16.msrb.mxu0 %v3934_v35  ;;  %1200 = vmatpush.bf16.msrb.mxu1 %v3935_v56 }
 0x283   :  { %1213 = vmatpush.bf16.msrb.mxu2 %v3936_v57  ;;  %1226 = vmatpush.bf16.msrb.mxu3 %v3100_v11 }
 0x286   :  { %1188 = vmatpush.bf16.msrb.mxu0 %v3114_v0  ;;  %1201 = vmatpush.bf16.msrb.mxu1 %v3123_v19 }
 0x287   :  { %1214 = vmatpush.bf16.msrb.mxu2 %v3937_v58  ;;  %1227 = vmatpush.bf16.msrb.mxu3 %v3139_v6 }
 0x28a   :  { %1189 = vmatpush.bf16.msrb.mxu0 %v3152_v28  ;;  %1202 = vmatpush.bf16.msrb.mxu1 %v3166_v40 }
 0x28b   :  { %1215 = vmatpush.bf16.msrb.mxu2 %v3168_v4  ;;  %1228 = vmatpush.bf16.msrb.mxu3 %v3177_v31 }
 0x28e   :  { %1254 = vmatpush.bf16.msra.mxu0 %v2607_v3  ;;  %1267 = vmatpush.bf16.msra.mxu1 %v2618_v7 }
 0x28f   :  { %1280 = vmatpush.bf16.msra.mxu2 %v2620_v8  ;;  %1293 = vmatpush.bf16.msra.mxu3 %v2632_v12 }
 0x292   :  { %1255 = vmatpush.bf16.msra.mxu0 %v2645_v16  ;;  %1268 = vmatpush.bf16.msra.mxu1 %v3986_v47 }
 0x293   :  { %1281 = vmatpush.bf16.msra.mxu2 %v3987_v17  ;;  %1294 = vmatpush.bf16.msra.mxu3 %v3988_v21 }
 0x296   :  { %1256 = vmatpush.bf16.msra.mxu0 %v3989_v45  ;;  %1269 = vmatpush.bf16.msra.mxu1 %v3990_v62 }
 0x297   :  { %1282 = vmatpush.bf16.msra.mxu2 %v3991_v50  ;;  %1295 = vmatpush.bf16.msra.mxu3 %v3992_v38 }
 0x29a   :  { %1257 = vmatpush.bf16.msra.mxu0 %v3993_v43  ;;  %1270 = vmatpush.bf16.msra.mxu1 %v3994_v34 }
 0x29b   :  { %1283 = vmatpush.bf16.msra.mxu2 %v3995_v32  ;;  %1296 = vmatpush.bf16.msra.mxu3 %v3996_v25 }
 0x29e   :  { %1258 = vmatpush.bf16.msra.mxu0 %v3997_v39  ;;  %1271 = vmatpush.bf16.msra.mxu1 %v3998_v29 }
 0x29f   :  { %1284 = vmatpush.bf16.msra.mxu2 %v3999_v41  ;;  %1297 = vmatpush.bf16.msra.mxu3 %v4000_v42  ;;  %v4013_v42 = vld [vmem:[#allocation31_spill] sm:$0xff]  ;;  %v4014_v41 = vld [vmem:[#allocation32_spill] sm:$0xff] }
 0x2a2   :  { %1259 = vmatpush.bf16.msra.mxu0 %v4001_v9  ;;  %1272 = vmatpush.bf16.msra.mxu1 %v4002_v24  ;;  %v4012_v9 = vld [vmem:[#allocation30_spill] sm:$0xff] }
 0x2a3   :  { %1285 = vmatpush.bf16.msra.mxu2 %v4003_v5  ;;  %1298 = vmatpush.bf16.msra.mxu3 %v4004_v33 }
 0x2a6   :  { %1260 = vmatpush.bf16.msra.mxu0 %v4005_v48  ;;  %1273 = vmatpush.bf16.msra.mxu1 %v4006_v27 }
 0x2a7   :  { %1286 = vmatpush.bf16.msra.mxu2 %v4007_v15  ;;  %1299 = vmatpush.bf16.msra.mxu3 %v4008_v60  ;;  %v4015_v15 = vld [vmem:[#allocation33_spill] sm:$0xff]  ;;  %v4016_v60 = vld [vmem:[#allocation34_spill] sm:$0xff] }
 0x2aa   :  { %1261 = vmatpush.bf16.msra.mxu0 %v4009_v26  ;;  %1274 = vmatpush.bf16.msra.mxu1 %v4010_v52 }
 0x2ab   :  { %1287 = vmatpush.bf16.msra.mxu2 %v4011_v23  ;;  %1300 = vmatpush.bf16.msra.mxu3 %v4012_v9 }
 0x2e9   :  { %v984_v24 = vpop.f32.mrf.mxu0  ;;  %v997_v5 = vpop.f32.mrf.mxu1 }
 0x2ea   :  { %v985_v33 = vadd.f32 %v984_v24, %v4013_v42  ;;  %v998_v48 = vadd.f32 %v997_v5, %v4014_v41 }
 0x2ec   :  { %v1027_v29 = vpack.c.bf16 %v998_v48, %v985_v33 }
 0x2ee   :  { %v1031_v52 = vrot.slane %v1027_v29, 3 }
 0x2f0   :  { %v1010_v27 = vpop.f32.mrf.mxu2  ;;  %v1023_v39 = vpop.f32.mrf.mxu3  ;;  %v1036_v9 = vsel %vm619_vm15, %v1027_v29, %v1031_v52 }
 0x2f1   :  { %v1011_v25 = vadd.f32 %v1010_v27, %v4015_v15  ;;  %v1024_v32 = vadd.f32 %v1023_v39, %v4016_v60  ;;  %v986_v26 = vpop.f32.mrf.mxu0  ;;  %v999_v34 = vpop.f32.mrf.mxu1 }
 0x2f2   :  { %v3485_v34 = vld [vmem:[%s3807_s0 + $0xc] sm:$0xff]  }
 0x2f3   :  { %v1028_v43 = vpack.c.bf16 %v1024_v32, %v1011_v25  ;;  %4017 = vst [vmem:[#allocation36_spill] sm:$0xff] %v3485_v34 }
 0x2f5   :  { %v1032_v23 = vrot.slane %v1028_v43, 6  ;;  %v1033_v38 = vrot.slane %v1028_v43, 1 }
 0x2f7   :  { %v1039_v50 = vsel %vm623_vm3, %v1032_v23, %v1033_v38  ;;  %v1046_v38 = vunpack.c.l.bf16 %v3485_v34 }
 0x2f8   :  { %v1040_v24 = vsel %vm312_vm0, %v1036_v9, %v1039_v50  ;;  %v1012_v5 = vpop.f32.mrf.mxu2  ;;  %v1025_v33 = vpop.f32.mrf.mxu3 }
 0x2f9   :  { %2353 = vst [vmem:[%s3809_s4 + $0x8] sm:$0xf] %v1040_v24  ;;  %v1056_v48 = vpop.f32.mrf.mxu0  ;;  %v1069_v39 = vpop.f32.mrf.mxu1 }
 0x2fa   :  { %v1103_v43 = vrot.slane %v1069_v39, 6 }
 0x2fc   :  { %v1106_v26 = vsel %vm312_vm0, %v1056_v48, %v1103_v43 }
 0x300   :  { %v1082_v32 = vpop.f32.mrf.mxu2  ;;  %v1095_v25 = vpop.f32.mrf.mxu3 }
 0x301   :  { %v1104_v29 = vrot.slane %v1082_v32, 4  ;;  %v1105_v50 = vrot.slane %v1095_v25, 2  ;;  %v1058_v9 = vpop.f32.mrf.mxu0  ;;  %v1071_v27 = vpop.f32.mrf.mxu1 }
 0x303   :  { %v1107_v52 = vsel %vm314_vm1, %v1104_v29, %v1105_v50 }
 0x304   :  { %v1108_v23 = vsel %vm316_vm2, %v1106_v26, %v1107_v52 }
 0x305   :  { %v1110_v24 = vadd.f32 %v1108_v23, %v1046_v38 }
 0x307   :  { %v2355_v5 = vmul.f32 -1.442695, %v1110_v24  ;;  %v1131_v33 = vrot.slane %v1110_v24, 2  ;;  %v1155_v60 = vrot.slane %v1110_v24, 6 }
 0x308   :  { %v1084_v15 = vpop.f32.mrf.mxu2  ;;  %v1097_v39 = vpop.f32.mrf.mxu3 }
 0x309   :  { %2492 = vpow2.f32 %v2355_v5  ;;  %v2356_v41 = vmul.f32 -1.442695, %v1131_v33  ;;  %v2357_v32 = vmul.f32 -1.442695, %v1155_v60  ;;  %v1152_v15 = vrot.slane %v1110_v24, 4 }
 0x30b   :  { %2494 = vpow2.f32 %v2356_v41 }
 0x30c   :  { %2496 = vpow2.f32 %v2357_v32 }
 0x30f   :  { %v2493_v25 = vpop.eup %2492 }
 0x310   :  { %v1114_v9 = vadd.f32 1.0, %v2493_v25 }
 0x311   :  { %v2495_v27 = vpop.eup %2494 }
 0x312   :  { %v2497_v34 = vpop.eup %2496  ;;  %2498 = vrcp.f32 %v1114_v9  ;;  %v1136_v48 = vadd.f32 1.0, %v2495_v27  ;;  %v1126_v41 = vand.u32 2147483648, %v1114_v9  ;;  %v1124_v33 = vand.u32 2147483647, %v1114_v9 }
 0x313   :  { %v1160_v43 = vadd.f32 1.0, %v2497_v34  ;;  %vm1120_vm7 = vweird.f32 %v1114_v9 }
 0x314   :  { %2500 = vrcp.f32 %v1136_v48  ;;  %v1148_v25 = vand.u32 2147483648, %v1136_v48  ;;  %v1146_v27 = vand.u32 2147483647, %v1136_v48  ;;  %v1127_v62 = vor.u32 1.1754944e-38, %v1126_v41 }
 0x315   :  { %2502 = vrcp.f32 %v1160_v43  ;;  %vm1125_vm10 = vcmp.eq.f32.partialorder %v1124_v33, 8.507059e+37  ;;  %vm1142_vm11 = vweird.f32 %v1136_v48  ;;  %vm1166_vm4 = vweird.f32 %v1160_v43  ;;  %v4024_v33 = vld [vmem:[#allocation10_spill] sm:$0xff] }
 0x316   :  { %2504 = vtanh.f32 %v1152_v15  ;;  %v1149_v45 = vor.u32 1.1754944e-38, %v1148_v25  ;;  %vm1147_vm13 = vcmp.eq.f32.partialorder %v1146_v27, 8.507059e+37  ;;  %v4026_v25 = vld [vmem:[#allocation12_spill] sm:$0xff]  ;;  %v4028_v27 = vld [vmem:[#allocation14_spill] sm:$0xff] }
 0x318   :  { %v2499_v29 = vpop.eup %2498 }
 0x319   :  { %v1116_v38 = vmul.f32 %v2499_v29, %v1114_v9  ;;  %vm1121_vm6 = vweird.f32 %v2499_v29 }
 0x31a   :  { %v2501_v50 = vpop.eup %2500  ;;  %vm1122_vm8 = vmor %vm1120_vm7, %vm1121_vm6 }
 0x31b   :  { %v1117_v26 = vsub.f32 1.0, %v1116_v38  ;;  %v2503_v52 = vpop.eup %2502  ;;  %v1138_v23 = vmul.f32 %v2501_v50, %v1136_v48  ;;  %vm1143_vm9 = vweird.f32 %v2501_v50  ;;  %v1170_v48 = vand.u32 2147483647, %v1160_v43 }
 0x31c   :  { %v1162_v60 = vmul.f32 %v2503_v52, %v1160_v43  ;;  %vm1144_vm12 = vmor %vm1142_vm11, %vm1143_vm9  ;;  %vm1167_vm14 = vweird.f32 %v2503_v52 }
 0x31d   :  { %v1118_v5 = vmul.f32 %v2499_v29, %v1117_v26  ;;  %v1139_v39 = vsub.f32 1.0, %v1138_v23  ;;  %v2505_v23 = vpop.eup %2504  ;;  %vm1168_vm5 = vmor %vm1166_vm4, %vm1167_vm14  ;;  %vm1171_vm6 = vcmp.eq.f32.partialorder %v1170_v48, 8.507059e+37  ;;  %v4037_v48 = vld [vmem:[#allocation23_spill] sm:$0xff] }
 0x31e   :  { %v1163_v38 = vsub.f32 1.0, %v1162_v60  ;;  %v4023_v60 = vld [vmem:[#allocation9_spill] sm:$0xff] }
 0x31f   :  { %v1119_v32 = vadd.f32 %v2499_v29, %v1118_v5  ;;  %v1140_v34 = vmul.f32 %v2501_v50, %v1139_v39 }
 0x320   :  { %v1164_v9 = vmul.f32 %v2503_v52, %v1163_v38  ;;  %v4029_v38 = vld [vmem:[#allocation15_spill] sm:$0xff] }
 0x321   :  { %v1123_v42 = vsel %vm1122_vm8, %v2499_v29, %v1119_v32  ;;  %v1141_v24 = vadd.f32 %v2501_v50, %v1140_v34  ;;  %v1172_v29 = vand.u32 2147483648, %v1160_v43  ;;  %v4021_v43 = vld [vmem:[#allocation7_spill] sm:$0xff]  ;;  %v4027_v34 = vld [vmem:[#allocation13_spill] sm:$0xff] }
 0x322   :  { %v1128_v26 = vsel %vm1125_vm10, %v1127_v62, %v1123_v42  ;;  %v1165_v47 = vadd.f32 %v2503_v52, %v1164_v9  ;;  %v4025_v32 = vld [vmem:[#allocation11_spill] sm:$0xff]  ;;  %v4034_v9 = vld [vmem:[#allocation20_spill] sm:$0xff] }
 0x323   :  { %v1145_v21 = vsel %vm1144_vm12, %v2501_v50, %v1141_v24  ;;  %v1177_v17 = vmul.f32 %v2505_v23, %v1128_v26  ;;  %v1173_v42 = vor.u32 1.1754944e-38, %v1172_v29  ;;  %v4030_v24 = vld [vmem:[#allocation16_spill] sm:$0xff]  ;;  %v4031_v26 = vld [vmem:[#allocation17_spill] sm:$0xff]  ;;  %v4032_v23 = vld [vmem:[#allocation18_spill] sm:$0xff] }
 0x324   :  { %v1150_v5 = vsel %vm1147_vm13, %v1149_v45, %v1145_v21  ;;  %v1169_v62 = vsel %vm1168_vm5, %v2503_v52, %v1165_v47  ;;  %v4019_v47 = vld [vmem:[#allocation5_spill] sm:$0xff]  ;;  %v4022_v52 = vld [vmem:[#allocation8_spill] sm:$0xff]  ;;  %v4036_v29 = vld [vmem:[#allocation22_spill] sm:$0xff] }
 0x325   :  { %v1176_v15 = vmul.f32 %v1150_v5, %v3405_v10  ;;  %v1174_v41 = vsel %vm1171_vm6, %v1173_v42, %v1169_v62  ;;  %v4018_v10 = vld [vmem:[#allocation4_spill] sm:$0xff]  ;;  %v4033_v5 = vld [vmem:[#allocation19_spill] sm:$0xff]  ;;  %v4039_v42 = vld [vmem:[#allocation25_spill] sm:$0xff] }
 0x326   :  { %v4038_v62 = vld [vmem:[#allocation24_spill] sm:$0xff] }
 0x327   :  { %v3492_v39 = vadd.f32 %v1177_v17, %v1176_v15  ;;  %v4020_v17 = vld [vmem:[#allocation6_spill] sm:$0xff]  ;;  %v4035_v15 = vld [vmem:[#allocation21_spill] sm:$0xff] }
 0x329   :  { %2506 = vtanh.f32 %v3492_v39 }
 0x32f   :  { %v2507_v50 = vpop.eup %2506 }
 0x330   :  { %v1180_v21 = vmul.f32 %v2507_v50, %v1174_v41  ;;  %v4040_v50 = vld [vmem:[#allocation26_spill] sm:$0xff]  ;;  %v4041_v41 = vld [vmem:[#allocation27_spill] sm:$0xff] }
 0x332   :  { %v1181_v45 = vpack.c.bf16 %v1180_v21, %v1180_v21  ;;  %v4042_v21 = vld [vmem:[#allocation28_spill] sm:$0xff] }
 0x334   :  { %1190 = vmatmul.bf16.vlgmr.msrb.gmra.mxu0 %v1181_v45  ;;  %1203 = vmatmul.bf16.vlgmr.msrb.gmra.mxu1 %v1181_v45 }
 0x335   :  { %1216 = vmatmul.bf16.vlgmr.msrb.gmra.mxu2 %v1181_v45  ;;  %1229 = vmatmul.bf16.vlgmr.msrb.gmra.mxu3 %v1181_v45 }
 0x336   :  { %1389 = vmatpush.bf16.msrb.mxu0 %v2895_v54  ;;  %1402 = vmatpush.bf16.msrb.mxu1 %v2906_v61 }
 0x337   :  { %1415 = vmatpush.bf16.msrb.mxu2 %v2908_v63  ;;  %1428 = vmatpush.bf16.msrb.mxu3 %v2917_v2 }
 0x33a   :  { %1390 = vmatpush.bf16.msrb.mxu0 %v2931_v13  ;;  %1403 = vmatpush.bf16.msrb.mxu1 %v2942_v20 }
 0x33b   :  { %1416 = vmatpush.bf16.msrb.mxu2 %v2944_v22  ;;  %1429 = vmatpush.bf16.msrb.mxu3 %v2953_v30 }
 0x33e   :  { %1391 = vmatpush.bf16.msrb.mxu0 %v2967_v37  ;;  %1404 = vmatpush.bf16.msrb.mxu1 %v2978_v49 }
 0x33f   :  { %1417 = vmatpush.bf16.msrb.mxu2 %v2980_v51  ;;  %1430 = vmatpush.bf16.msrb.mxu3 %v2989_v55 }
 0x342   :  { %1392 = vmatpush.bf16.msrb.mxu0 %v3003_v1  ;;  %1405 = vmatpush.bf16.msrb.mxu1 %v3014_v14 }
 0x343   :  { %1418 = vmatpush.bf16.msrb.mxu2 %v3016_v18  ;;  %1431 = vmatpush.bf16.msrb.mxu3 %v3929_v46 }
 0x344   :  { %1262 = vmatmul.bf16.vlgmr.msra.gmra.mxu0 %v1181_v45  ;;  %1275 = vmatmul.bf16.vlgmr.msra.gmra.mxu1 %v1181_v45 }
 0x345   :  { %1288 = vmatmul.bf16.vlgmr.msra.gmra.mxu2 %v1181_v45  ;;  %1301 = vmatmul.bf16.vlgmr.msra.gmra.mxu3 %v1181_v45  ;;  %v4043_v45 = vld [vmem:[#allocation29_spill] sm:$0xff] }
 0x346   :  { %1393 = vmatpush.bf16.msrb.mxu0 %v3930_v59  ;;  %1406 = vmatpush.bf16.msrb.mxu1 %v3931_v53 }
 0x347   :  { %1419 = vmatpush.bf16.msrb.mxu2 %v3932_v36  ;;  %1432 = vmatpush.bf16.msrb.mxu3 %v3933_v44 }
 0x34a   :  { %1394 = vmatpush.bf16.msrb.mxu0 %v3934_v35  ;;  %1407 = vmatpush.bf16.msrb.mxu1 %v3935_v56 }
 0x34b   :  { %1420 = vmatpush.bf16.msrb.mxu2 %v3936_v57  ;;  %1433 = vmatpush.bf16.msrb.mxu3 %v3100_v11 }
 0x34e   :  { %1395 = vmatpush.bf16.msrb.mxu0 %v3114_v0  ;;  %1408 = vmatpush.bf16.msrb.mxu1 %v3123_v19 }
 0x34f   :  { %1421 = vmatpush.bf16.msrb.mxu2 %v3937_v58  ;;  %1434 = vmatpush.bf16.msrb.mxu3 %v3139_v6 }
 0x352   :  { %1396 = vmatpush.bf16.msrb.mxu0 %v3152_v28  ;;  %1409 = vmatpush.bf16.msrb.mxu1 %v3166_v40 }
 0x353   :  { %1422 = vmatpush.bf16.msrb.mxu2 %v3168_v4  ;;  %1435 = vmatpush.bf16.msrb.mxu3 %v3177_v31 }
 0x356   :  { %1461 = vmatpush.bf16.msra.mxu0 %v2607_v3  ;;  %1474 = vmatpush.bf16.msra.mxu1 %v2618_v7 }
 0x357   :  { %1487 = vmatpush.bf16.msra.mxu2 %v2620_v8  ;;  %1500 = vmatpush.bf16.msra.mxu3 %v2632_v12 }
 0x35a   :  { %1462 = vmatpush.bf16.msra.mxu0 %v2645_v16  ;;  %1475 = vmatpush.bf16.msra.mxu1 %v4018_v10 }
 0x35b   :  { %1488 = vmatpush.bf16.msra.mxu2 %v4019_v47  ;;  %1501 = vmatpush.bf16.msra.mxu3 %v4020_v17 }
 0x35e   :  { %1463 = vmatpush.bf16.msra.mxu0 %v4021_v43  ;;  %1476 = vmatpush.bf16.msra.mxu1 %v4022_v52 }
 0x35f   :  { %1489 = vmatpush.bf16.msra.mxu2 %v4023_v60  ;;  %1502 = vmatpush.bf16.msra.mxu3 %v4024_v33 }
 0x362   :  { %1464 = vmatpush.bf16.msra.mxu0 %v4025_v32  ;;  %1477 = vmatpush.bf16.msra.mxu1 %v4026_v25 }
 0x363   :  { %1490 = vmatpush.bf16.msra.mxu2 %v4027_v34  ;;  %1503 = vmatpush.bf16.msra.mxu3 %v4028_v27 }
 0x366   :  { %1465 = vmatpush.bf16.msra.mxu0 %v4029_v38  ;;  %1478 = vmatpush.bf16.msra.mxu1 %v4030_v24 }
 0x367   :  { %1491 = vmatpush.bf16.msra.mxu2 %v4031_v26  ;;  %1504 = vmatpush.bf16.msra.mxu3 %v4032_v23  ;;  %v4045_v23 = vld [vmem:[#allocation31_spill] sm:$0xff]  ;;  %v4046_v26 = vld [vmem:[#allocation32_spill] sm:$0xff] }
 0x36a   :  { %1466 = vmatpush.bf16.msra.mxu0 %v4033_v5  ;;  %1479 = vmatpush.bf16.msra.mxu1 %v4034_v9  ;;  %v4044_v5 = vld [vmem:[#allocation30_spill] sm:$0xff] }
 0x36b   :  { %1492 = vmatpush.bf16.msra.mxu2 %v4035_v15  ;;  %1505 = vmatpush.bf16.msra.mxu3 %v4036_v29 }
 0x36e   :  { %1467 = vmatpush.bf16.msra.mxu0 %v4037_v48  ;;  %1480 = vmatpush.bf16.msra.mxu1 %v4038_v62 }
 0x36f   :  { %1493 = vmatpush.bf16.msra.mxu2 %v4039_v42  ;;  %1506 = vmatpush.bf16.msra.mxu3 %v4040_v50  ;;  %v4047_v42 = vld [vmem:[#allocation33_spill] sm:$0xff]  ;;  %v4048_v50 = vld [vmem:[#allocation34_spill] sm:$0xff] }
 0x372   :  { %1468 = vmatpush.bf16.msra.mxu0 %v4041_v41  ;;  %1481 = vmatpush.bf16.msra.mxu1 %v4042_v21 }
 0x373   :  { %1494 = vmatpush.bf16.msra.mxu2 %v4043_v45  ;;  %1507 = vmatpush.bf16.msra.mxu3 %v4044_v5 }
 0x3b1   :  { %v1191_v9 = vpop.f32.mrf.mxu0  ;;  %v1204_v15 = vpop.f32.mrf.mxu1 }
 0x3b2   :  { %v1192_v29 = vadd.f32 %v1191_v9, %v4045_v23  ;;  %v1205_v48 = vadd.f32 %v1204_v15, %v4046_v26 }
 0x3b4   :  { %v1234_v24 = vpack.c.bf16 %v1205_v48, %v1192_v29 }
 0x3b6   :  { %v1238_v21 = vrot.slane %v1234_v24, 3 }
 0x3b8   :  { %v1217_v62 = vpop.f32.mrf.mxu2  ;;  %v1230_v38 = vpop.f32.mrf.mxu3  ;;  %v1243_v5 = vsel %vm619_vm15, %v1234_v24, %v1238_v21 }
 0x3b9   :  { %v1218_v27 = vadd.f32 %v1217_v62, %v4047_v42  ;;  %v1231_v34 = vadd.f32 %v1230_v38, %v4048_v50  ;;  %v1193_v41 = vpop.f32.mrf.mxu0  ;;  %v1206_v25 = vpop.f32.mrf.mxu1 }
 0x3bb   :  { %v1235_v32 = vpack.c.bf16 %v1231_v34, %v1218_v27  ;;  %v4049_v27 = vld [vmem:[#allocation36_spill] sm:$0xff] }
 0x3bd   :  { %v1239_v45 = vrot.slane %v1235_v32, 6  ;;  %v1240_v33 = vrot.slane %v1235_v32, 1  ;;  %v1253_v32 = vunpack.c.h.bf16 %v4049_v27 }
 0x3bf   :  { %v1246_v60 = vsel %vm623_vm3, %v1239_v45, %v1240_v33 }
 0x3c0   :  { %v1247_v9 = vsel %vm312_vm0, %v1243_v5, %v1246_v60  ;;  %v1219_v15 = vpop.f32.mrf.mxu2  ;;  %v1232_v29 = vpop.f32.mrf.mxu3 }
 0x3c1   :  { %2358 = vst [vmem:[%s3809_s4 + $0xc] sm:$0xf] %v1247_v9  ;;  %v1263_v48 = vpop.f32.mrf.mxu0  ;;  %v1276_v38 = vpop.f32.mrf.mxu1 }
 0x3c2   :  { %v1310_v62 = vrot.slane %v1276_v38, 6 }
 0x3c4   :  { %v1313_v33 = vsel %vm312_vm0, %v1263_v48, %v1310_v62 }
 0x3c8   :  { %v1289_v25 = vpop.f32.mrf.mxu2  ;;  %v1302_v41 = vpop.f32.mrf.mxu3 }
 0x3c9   :  { %v1311_v34 = vrot.slane %v1289_v25, 4  ;;  %v1312_v50 = vrot.slane %v1302_v41, 2  ;;  %v1265_v24 = vpop.f32.mrf.mxu0  ;;  %v1278_v21 = vpop.f32.mrf.mxu1 }
 0x3cb   :  { %v1314_v60 = vsel %vm314_vm1, %v1311_v34, %v1312_v50 }
 0x3cc   :  { %v1315_v5 = vsel %vm316_vm2, %v1313_v33, %v1314_v60 }
 0x3cd   :  { %v1317_v45 = vadd.f32 %v1315_v5, %v1253_v32 }
 0x3cf   :  { %v2360_v15 = vmul.f32 -1.442695, %v1317_v45  ;;  %v1338_v9 = vrot.slane %v1317_v45, 2  ;;  %v1362_v29 = vrot.slane %v1317_v45, 6 }
 0x3d0   :  { %v1291_v42 = vpop.f32.mrf.mxu2  ;;  %v1304_v38 = vpop.f32.mrf.mxu3 }
 0x3d1   :  { %2508 = vpow2.f32 %v2360_v15  ;;  %v2361_v26 = vmul.f32 -1.442695, %v1338_v9  ;;  %v2362_v25 = vmul.f32 -1.442695, %v1362_v29  ;;  %v1359_v42 = vrot.slane %v1317_v45, 4 }
 0x3d3   :  { %2510 = vpow2.f32 %v2361_v26 }
 0x3d4   :  { %2512 = vpow2.f32 %v2362_v25 }
 0x3d7   :  { %v2509_v41 = vpop.eup %2508 }
 0x3d8   :  { %v1321_v27 = vadd.f32 1.0, %v2509_v41 }
 0x3d9   :  { %v2511_v24 = vpop.eup %2510 }
 0x3da   :  { %v2513_v21 = vpop.eup %2512  ;;  %2514 = vrcp.f32 %v1321_v27  ;;  %v1343_v48 = vadd.f32 1.0, %v2511_v24  ;;  %v1333_v26 = vand.u32 2147483648, %v1321_v27  ;;  %v1331_v29 = vand.u32 2147483647, %v1321_v27 }
 0x3db   :  { %v1367_v50 = vadd.f32 1.0, %v2513_v21  ;;  %vm1327_vm8 = vweird.f32 %v1321_v27 }
 0x3dc   :  { %2516 = vrcp.f32 %v1343_v48  ;;  %v1355_v41 = vand.u32 2147483648, %v1343_v48  ;;  %v1353_v21 = vand.u32 2147483647, %v1343_v48  ;;  %v1334_v52 = vor.u32 1.1754944e-38, %v1333_v26 }
 0x3dd   :  { %2518 = vrcp.f32 %v1367_v50  ;;  %vm1332_vm11 = vcmp.eq.f32.partialorder %v1331_v29, 8.507059e+37  ;;  %vm1349_vm12 = vweird.f32 %v1343_v48  ;;  %vm1373_vm5 = vweird.f32 %v1367_v50  ;;  %v4056_v29 = vld [vmem:[#allocation10_spill] sm:$0xff] }
 0x3de   :  { %2520 = vtanh.f32 %v1359_v42  ;;  %v1356_v43 = vor.u32 1.1754944e-38, %v1355_v41  ;;  %vm1354_vm14 = vcmp.eq.f32.partialorder %v1353_v21, 8.507059e+37  ;;  %v4058_v41 = vld [vmem:[#allocation12_spill] sm:$0xff]  ;;  %v4060_v21 = vld [vmem:[#allocation14_spill] sm:$0xff] }
 0x3e0   :  { %v2515_v62 = vpop.eup %2514 }
 0x3e1   :  { %v1323_v34 = vmul.f32 %v2515_v62, %v1321_v27  ;;  %vm1328_vm7 = vweird.f32 %v2515_v62 }
 0x3e2   :  { %v2517_v32 = vpop.eup %2516  ;;  %vm1329_vm9 = vmor %vm1327_vm8, %vm1328_vm7 }
 0x3e3   :  { %v1324_v33 = vsub.f32 1.0, %v1323_v34  ;;  %v2519_v60 = vpop.eup %2518  ;;  %v1345_v5 = vmul.f32 %v2517_v32, %v1343_v48  ;;  %vm1350_vm10 = vweird.f32 %v2517_v32  ;;  %v1377_v48 = vand.u32 2147483647, %v1367_v50 }
 0x3e4   :  { %v1369_v9 = vmul.f32 %v2519_v60, %v1367_v50  ;;  %vm1351_vm13 = vmor %vm1349_vm12, %vm1350_vm10  ;;  %vm1374_vm4 = vweird.f32 %v2519_v60 }
 0x3e5   :  { %v1325_v15 = vmul.f32 %v2515_v62, %v1324_v33  ;;  %v1346_v38 = vsub.f32 1.0, %v1345_v5  ;;  %v2521_v5 = vpop.eup %2520  ;;  %vm1375_vm6 = vmor %vm1373_vm5, %vm1374_vm4  ;;  %vm1378_vm7 = vcmp.eq.f32.partialorder %v1377_v48, 8.507059e+37  ;;  %v4069_v48 = vld [vmem:[#allocation23_spill] sm:$0xff] }
 0x3e6   :  { %v1370_v34 = vsub.f32 1.0, %v1369_v9  ;;  %v4055_v9 = vld [vmem:[#allocation9_spill] sm:$0xff] }
 0x3e7   :  { %v1326_v25 = vadd.f32 %v2515_v62, %v1325_v15  ;;  %v1347_v24 = vmul.f32 %v2517_v32, %v1346_v38 }
 0x3e8   :  { %v1371_v27 = vmul.f32 %v2519_v60, %v1370_v34  ;;  %v4061_v34 = vld [vmem:[#allocation15_spill] sm:$0xff] }
 0x3e9   :  { %v1330_v23 = vsel %vm1329_vm9, %v2515_v62, %v1326_v25  ;;  %v1348_v45 = vadd.f32 %v2517_v32, %v1347_v24  ;;  %v1379_v62 = vand.u32 2147483648, %v1367_v50  ;;  %v4053_v50 = vld [vmem:[#allocation7_spill] sm:$0xff]  ;;  %v4059_v24 = vld [vmem:[#allocation13_spill] sm:$0xff] }
 0x3ea   :  { %v1335_v33 = vsel %vm1332_vm11, %v1334_v52, %v1330_v23  ;;  %v1372_v10 = vadd.f32 %v2519_v60, %v1371_v27  ;;  %v4057_v25 = vld [vmem:[#allocation11_spill] sm:$0xff]  ;;  %v4066_v27 = vld [vmem:[#allocation20_spill] sm:$0xff] }
 0x3eb   :  { %v1352_v17 = vsel %vm1351_vm13, %v2517_v32, %v1348_v45  ;;  %v1384_v47 = vmul.f32 %v2521_v5, %v1335_v33  ;;  %v1380_v23 = vor.u32 1.1754944e-38, %v1379_v62  ;;  %v4062_v45 = vld [vmem:[#allocation16_spill] sm:$0xff]  ;;  %v4063_v33 = vld [vmem:[#allocation17_spill] sm:$0xff]  ;;  %v4064_v5 = vld [vmem:[#allocation18_spill] sm:$0xff] }
 0x3ec   :  { %v1357_v15 = vsel %vm1354_vm14, %v1356_v43, %v1352_v17  ;;  %v1376_v52 = vsel %vm1375_vm6, %v2519_v60, %v1372_v10  ;;  %v4051_v10 = vld [vmem:[#allocation5_spill] sm:$0xff]  ;;  %v4054_v60 = vld [vmem:[#allocation8_spill] sm:$0xff]  ;;  %v4068_v62 = vld [vmem:[#allocation22_spill] sm:$0xff] }
 0x3ed   :  { %v1383_v42 = vmul.f32 %v1357_v15, %v3492_v39  ;;  %v1381_v26 = vsel %vm1378_vm7, %v1380_v23, %v1376_v52  ;;  %v4050_v39 = vld [vmem:[#allocation4_spill] sm:$0xff]  ;;  %v4065_v15 = vld [vmem:[#allocation19_spill] sm:$0xff]  ;;  %v4071_v23 = vld [vmem:[#allocation25_spill] sm:$0xff] }
 0x3ee   :  { %v4070_v52 = vld [vmem:[#allocation24_spill] sm:$0xff] }
 0x3ef   :  { %v3574_v38 = vadd.f32 %v1384_v47, %v1383_v42  ;;  %v4052_v47 = vld [vmem:[#allocation6_spill] sm:$0xff]  ;;  %v4067_v42 = vld [vmem:[#allocation21_spill] sm:$0xff] }
 0x3f1   :  { %2522 = vtanh.f32 %v3574_v38 }
 0x3f7   :  { %v2523_v32 = vpop.eup %2522 }
 0x3f8   :  { %v1387_v17 = vmul.f32 %v2523_v32, %v1381_v26  ;;  %v4072_v32 = vld [vmem:[#allocation26_spill] sm:$0xff]  ;;  %v4073_v26 = vld [vmem:[#allocation27_spill] sm:$0xff] }
 0x3fa   :  { %v1388_v43 = vpack.c.bf16 %v1387_v17, %v1387_v17  ;;  %v4074_v17 = vld [vmem:[#allocation28_spill] sm:$0xff] }
 0x3fc   :  { %1397 = vmatmul.bf16.vlgmr.msrb.gmra.mxu0 %v1388_v43  ;;  %1410 = vmatmul.bf16.vlgmr.msrb.gmra.mxu1 %v1388_v43 }
 0x3fd   :  { %1423 = vmatmul.bf16.vlgmr.msrb.gmra.mxu2 %v1388_v43  ;;  %1436 = vmatmul.bf16.vlgmr.msrb.gmra.mxu3 %v1388_v43 }
 0x3fe   :  { %1596 = vmatpush.bf16.msrb.mxu0 %v2895_v54  ;;  %1609 = vmatpush.bf16.msrb.mxu1 %v2906_v61 }
 0x3ff   :  { %1622 = vmatpush.bf16.msrb.mxu2 %v2908_v63  ;;  %1635 = vmatpush.bf16.msrb.mxu3 %v2917_v2 }
 0x402   :  { %1597 = vmatpush.bf16.msrb.mxu0 %v2931_v13  ;;  %1610 = vmatpush.bf16.msrb.mxu1 %v2942_v20 }
 0x403   :  { %1623 = vmatpush.bf16.msrb.mxu2 %v2944_v22  ;;  %1636 = vmatpush.bf16.msrb.mxu3 %v2953_v30 }
 0x406   :  { %1598 = vmatpush.bf16.msrb.mxu0 %v2967_v37  ;;  %1611 = vmatpush.bf16.msrb.mxu1 %v2978_v49 }
 0x407   :  { %1624 = vmatpush.bf16.msrb.mxu2 %v2980_v51  ;;  %1637 = vmatpush.bf16.msrb.mxu3 %v2989_v55 }
 0x40a   :  { %1599 = vmatpush.bf16.msrb.mxu0 %v3003_v1  ;;  %1612 = vmatpush.bf16.msrb.mxu1 %v3014_v14 }
 0x40b   :  { %1625 = vmatpush.bf16.msrb.mxu2 %v3016_v18  ;;  %1638 = vmatpush.bf16.msrb.mxu3 %v3929_v46 }
 0x40c   :  { %1469 = vmatmul.bf16.vlgmr.msra.gmra.mxu0 %v1388_v43  ;;  %1482 = vmatmul.bf16.vlgmr.msra.gmra.mxu1 %v1388_v43 }
 0x40d   :  { %1495 = vmatmul.bf16.vlgmr.msra.gmra.mxu2 %v1388_v43  ;;  %1508 = vmatmul.bf16.vlgmr.msra.gmra.mxu3 %v1388_v43  ;;  %v4075_v43 = vld [vmem:[#allocation29_spill] sm:$0xff] }
 0x40e   :  { %1600 = vmatpush.bf16.msrb.mxu0 %v3930_v59  ;;  %1613 = vmatpush.bf16.msrb.mxu1 %v3931_v53 }
 0x40f   :  { %1626 = vmatpush.bf16.msrb.mxu2 %v3932_v36  ;;  %1639 = vmatpush.bf16.msrb.mxu3 %v3933_v44 }
 0x412   :  { %1601 = vmatpush.bf16.msrb.mxu0 %v3934_v35  ;;  %1614 = vmatpush.bf16.msrb.mxu1 %v3935_v56 }
 0x413   :  { %1627 = vmatpush.bf16.msrb.mxu2 %v3936_v57  ;;  %1640 = vmatpush.bf16.msrb.mxu3 %v3100_v11 }
 0x416   :  { %1602 = vmatpush.bf16.msrb.mxu0 %v3114_v0  ;;  %1615 = vmatpush.bf16.msrb.mxu1 %v3123_v19 }
 0x417   :  { %1628 = vmatpush.bf16.msrb.mxu2 %v3937_v58  ;;  %1641 = vmatpush.bf16.msrb.mxu3 %v3139_v6 }
 0x41a   :  { %1603 = vmatpush.bf16.msrb.mxu0 %v3152_v28  ;;  %1616 = vmatpush.bf16.msrb.mxu1 %v3166_v40 }
 0x41b   :  { %1629 = vmatpush.bf16.msrb.mxu2 %v3168_v4  ;;  %1642 = vmatpush.bf16.msrb.mxu3 %v3177_v31 }
 0x41e   :  { %1668 = vmatpush.bf16.msra.mxu0 %v2607_v3  ;;  %1681 = vmatpush.bf16.msra.mxu1 %v2618_v7 }
 0x41f   :  { %1694 = vmatpush.bf16.msra.mxu2 %v2620_v8  ;;  %1707 = vmatpush.bf16.msra.mxu3 %v2632_v12 }
 0x422   :  { %1669 = vmatpush.bf16.msra.mxu0 %v2645_v16  ;;  %1682 = vmatpush.bf16.msra.mxu1 %v4050_v39 }
 0x423   :  { %1695 = vmatpush.bf16.msra.mxu2 %v4051_v10  ;;  %1708 = vmatpush.bf16.msra.mxu3 %v4052_v47 }
 0x426   :  { %1670 = vmatpush.bf16.msra.mxu0 %v4053_v50  ;;  %1683 = vmatpush.bf16.msra.mxu1 %v4054_v60 }
 0x427   :  { %1696 = vmatpush.bf16.msra.mxu2 %v4055_v9  ;;  %1709 = vmatpush.bf16.msra.mxu3 %v4056_v29 }
 0x42a   :  { %1671 = vmatpush.bf16.msra.mxu0 %v4057_v25  ;;  %1684 = vmatpush.bf16.msra.mxu1 %v4058_v41 }
 0x42b   :  { %1697 = vmatpush.bf16.msra.mxu2 %v4059_v24  ;;  %1710 = vmatpush.bf16.msra.mxu3 %v4060_v21 }
 0x42e   :  { %1672 = vmatpush.bf16.msra.mxu0 %v4061_v34  ;;  %1685 = vmatpush.bf16.msra.mxu1 %v4062_v45 }
 0x42f   :  { %1698 = vmatpush.bf16.msra.mxu2 %v4063_v33  ;;  %1711 = vmatpush.bf16.msra.mxu3 %v4064_v5  ;;  %v4077_v5 = vld [vmem:[#allocation31_spill] sm:$0xff]  ;;  %v4078_v33 = vld [vmem:[#allocation32_spill] sm:$0xff] }
 0x432   :  { %1673 = vmatpush.bf16.msra.mxu0 %v4065_v15  ;;  %1686 = vmatpush.bf16.msra.mxu1 %v4066_v27  ;;  %v4076_v15 = vld [vmem:[#allocation30_spill] sm:$0xff] }
 0x433   :  { %1699 = vmatpush.bf16.msra.mxu2 %v4067_v42  ;;  %1712 = vmatpush.bf16.msra.mxu3 %v4068_v62 }
 0x436   :  { %1674 = vmatpush.bf16.msra.mxu0 %v4069_v48  ;;  %1687 = vmatpush.bf16.msra.mxu1 %v4070_v52 }
 0x437   :  { %1700 = vmatpush.bf16.msra.mxu2 %v4071_v23  ;;  %1713 = vmatpush.bf16.msra.mxu3 %v4072_v32  ;;  %v4079_v23 = vld [vmem:[#allocation33_spill] sm:$0xff]  ;;  %v4080_v32 = vld [vmem:[#allocation34_spill] sm:$0xff] }
 0x43a   :  { %1675 = vmatpush.bf16.msra.mxu0 %v4073_v26  ;;  %1688 = vmatpush.bf16.msra.mxu1 %v4074_v17 }
 0x43b   :  { %1701 = vmatpush.bf16.msra.mxu2 %v4075_v43  ;;  %1714 = vmatpush.bf16.msra.mxu3 %v4076_v15 }
 0x479   :  { %v1398_v27 = vpop.f32.mrf.mxu0  ;;  %v1411_v42 = vpop.f32.mrf.mxu1 }
 0x47a   :  { %v1399_v62 = vadd.f32 %v1398_v27, %v4077_v5  ;;  %v1412_v48 = vadd.f32 %v1411_v42, %v4078_v33 }
 0x47c   :  { %v1441_v45 = vpack.c.bf16 %v1412_v48, %v1399_v62 }
 0x47e   :  { %v1445_v17 = vrot.slane %v1441_v45, 3 }
 0x480   :  { %v1424_v52 = vpop.f32.mrf.mxu2  ;;  %v1437_v34 = vpop.f32.mrf.mxu3  ;;  %v1450_v15 = vsel %vm619_vm15, %v1441_v45, %v1445_v17 }
 0x481   :  { %v1425_v21 = vadd.f32 %v1424_v52, %v4079_v23  ;;  %v1438_v24 = vadd.f32 %v1437_v34, %v4080_v32  ;;  %v1400_v26 = vpop.f32.mrf.mxu0  ;;  %v1413_v41 = vpop.f32.mrf.mxu1 }
 0x482   :  { %v3654_v41 = vld [vmem:[%s3807_s0 + $0x14] sm:$0xff]  }
 0x483   :  { %v1442_v25 = vpack.c.bf16 %v1438_v24, %v1425_v21  ;;  %4081 = vst [vmem:[#allocation37_spill] sm:$0xff] %v3654_v41 }
 0x485   :  { %v1446_v43 = vrot.slane %v1442_v25, 6  ;;  %v1447_v29 = vrot.slane %v1442_v25, 1 }
 0x487   :  { %v1453_v9 = vsel %vm623_vm3, %v1446_v43, %v1447_v29  ;;  %v1460_v29 = vunpack.c.l.bf16 %v3654_v41 }
 0x488   :  { %v1454_v27 = vsel %vm312_vm0, %v1450_v15, %v1453_v9  ;;  %v1426_v42 = vpop.f32.mrf.mxu2  ;;  %v1439_v62 = vpop.f32.mrf.mxu3 }
 0x489   :  { %2363 = vst [vmem:[%s3809_s4 + $0x10] sm:$0xf] %v1454_v27  ;;  %v1470_v48 = vpop.f32.mrf.mxu0  ;;  %v1483_v34 = vpop.f32.mrf.mxu1 }
 0x48a   :  { %v1517_v25 = vrot.slane %v1483_v34, 6 }
 0x48c   :  { %v1520_v26 = vsel %vm312_vm0, %v1470_v48, %v1517_v25 }
 0x490   :  { %v1496_v24 = vpop.f32.mrf.mxu2  ;;  %v1509_v21 = vpop.f32.mrf.mxu3 }
 0x491   :  { %v1518_v45 = vrot.slane %v1496_v24, 4  ;;  %v1519_v9 = vrot.slane %v1509_v21, 2  ;;  %v1472_v15 = vpop.f32.mrf.mxu0  ;;  %v1485_v52 = vpop.f32.mrf.mxu1 }
 0x493   :  { %v1521_v17 = vsel %vm314_vm1, %v1518_v45, %v1519_v9 }
 0x494   :  { %v1522_v43 = vsel %vm316_vm2, %v1520_v26, %v1521_v17 }
 0x495   :  { %v1524_v27 = vadd.f32 %v1522_v43, %v1460_v29 }
 0x497   :  { %v2365_v42 = vmul.f32 -1.442695, %v1524_v27  ;;  %v1545_v62 = vrot.slane %v1524_v27, 2  ;;  %v1569_v32 = vrot.slane %v1524_v27, 6 }
 0x498   :  { %v1498_v23 = vpop.f32.mrf.mxu2  ;;  %v1511_v34 = vpop.f32.mrf.mxu3 }
 0x499   :  { %2524 = vpow2.f32 %v2365_v42  ;;  %v2366_v33 = vmul.f32 -1.442695, %v1545_v62  ;;  %v2367_v24 = vmul.f32 -1.442695, %v1569_v32  ;;  %v1566_v23 = vrot.slane %v1524_v27, 4 }
 0x49b   :  { %2526 = vpow2.f32 %v2366_v33 }
 0x49c   :  { %2528 = vpow2.f32 %v2367_v24 }
 0x49f   :  { %v2525_v21 = vpop.eup %2524 }
 0x4a0   :  { %v1528_v15 = vadd.f32 1.0, %v2525_v21 }
 0x4a1   :  { %v2527_v52 = vpop.eup %2526 }
 0x4a2   :  { %v2529_v41 = vpop.eup %2528  ;;  %2530 = vrcp.f32 %v1528_v15  ;;  %v1550_v48 = vadd.f32 1.0, %v2527_v52  ;;  %v1540_v33 = vand.u32 2147483648, %v1528_v15  ;;  %v1538_v62 = vand.u32 2147483647, %v1528_v15 }
 0x4a3   :  { %v1574_v25 = vadd.f32 1.0, %v2529_v41  ;;  %vm1534_vm9 = vweird.f32 %v1528_v15 }
 0x4a4   :  { %2532 = vrcp.f32 %v1550_v48  ;;  %v1562_v21 = vand.u32 2147483648, %v1550_v48  ;;  %v1560_v52 = vand.u32 2147483647, %v1550_v48  ;;  %v1541_v60 = vor.u32 1.1754944e-38, %v1540_v33 }
 0x4a5   :  { %2534 = vrcp.f32 %v1574_v25  ;;  %vm1539_vm12 = vcmp.eq.f32.partialorder %v1538_v62, 8.507059e+37  ;;  %vm1556_vm13 = vweird.f32 %v1550_v48  ;;  %vm1580_vm6 = vweird.f32 %v1574_v25  ;;  %v4093_v62 = vld [vmem:[#allocation15_spill] sm:$0xff] }
 0x4a6   :  { %2536 = vtanh.f32 %v1566_v23  ;;  %v1563_v50 = vor.u32 1.1754944e-38, %v1562_v21  ;;  %vm1561_vm4 = vcmp.eq.f32.partialorder %v1560_v52, 8.507059e+37  ;;  %v4095_v21 = vld [vmem:[#allocation17_spill] sm:$0xff]  ;;  %v4097_v52 = vld [vmem:[#allocation19_spill] sm:$0xff] }
 0x4a8   :  { %v2531_v45 = vpop.eup %2530 }
 0x4a9   :  { %v1530_v29 = vmul.f32 %v2531_v45, %v1528_v15  ;;  %vm1535_vm8 = vweird.f32 %v2531_v45 }
 0x4aa   :  { %v2533_v9 = vpop.eup %2532  ;;  %vm1536_vm10 = vmor %vm1534_vm9, %vm1535_vm8 }
 0x4ab   :  { %v1531_v26 = vsub.f32 1.0, %v1530_v29  ;;  %v2535_v17 = vpop.eup %2534  ;;  %v1552_v43 = vmul.f32 %v2533_v9, %v1550_v48  ;;  %vm1557_vm11 = vweird.f32 %v2533_v9  ;;  %v1584_v48 = vand.u32 2147483647, %v1574_v25 }
 0x4ac   :  { %v1576_v32 = vmul.f32 %v2535_v17, %v1574_v25  ;;  %vm1558_vm14 = vmor %vm1556_vm13, %vm1557_vm11  ;;  %vm1581_vm5 = vweird.f32 %v2535_v17 }
 0x4ad   :  { %v1532_v42 = vmul.f32 %v2531_v45, %v1531_v26  ;;  %v1553_v34 = vsub.f32 1.0, %v1552_v43  ;;  %v2537_v43 = vpop.eup %2536  ;;  %vm1582_vm7 = vmor %vm1580_vm6, %vm1581_vm5  ;;  %vm1585_vm8 = vcmp.eq.f32.partialorder %v1584_v48, 8.507059e+37  ;;  %v4106_v48 = vld [vmem:[#allocation28_spill] sm:$0xff] }
 0x4ae   :  { %v1577_v29 = vsub.f32 1.0, %v1576_v32  ;;  %v4087_v32 = vld [vmem:[#allocation9_spill] sm:$0xff] }
 0x4af   :  { %v1533_v24 = vadd.f32 %v2531_v45, %v1532_v42  ;;  %v1554_v41 = vmul.f32 %v2533_v9, %v1553_v34 }
 0x4b0   :  { %v1578_v15 = vmul.f32 %v2535_v17, %v1577_v29  ;;  %v4098_v29 = vld [vmem:[#allocation20_spill] sm:$0xff] }
 0x4b1   :  { %v1537_v5 = vsel %vm1536_vm10, %v2531_v45, %v1533_v24  ;;  %v1555_v27 = vadd.f32 %v2533_v9, %v1554_v41  ;;  %v1586_v45 = vand.u32 2147483648, %v1574_v25  ;;  %v4085_v25 = vld [vmem:[#allocation7_spill] sm:$0xff]  ;;  %v4094_v24 = vld [vmem:[#allocation16_spill] sm:$0xff]  ;;  %v4096_v41 = vld [vmem:[#allocation18_spill] sm:$0xff] }
 0x4b2   :  { %v1542_v26 = vsel %vm1539_vm12, %v1541_v60, %v1537_v5  ;;  %v1579_v39 = vadd.f32 %v2535_v17, %v1578_v15  ;;  %v4103_v15 = vld [vmem:[#allocation25_spill] sm:$0xff] }
 0x4b3   :  { %v1559_v47 = vsel %vm1558_vm14, %v2533_v9, %v1555_v27  ;;  %v1591_v10 = vmul.f32 %v2537_v43, %v1542_v26  ;;  %v1587_v5 = vor.u32 1.1754944e-38, %v1586_v45  ;;  %v4099_v27 = vld [vmem:[#allocation21_spill] sm:$0xff]  ;;  %v4100_v26 = vld [vmem:[#allocation22_spill] sm:$0xff]  ;;  %v4101_v43 = vld [vmem:[#allocation23_spill] sm:$0xff] }
 0x4b4   :  { %v1564_v42 = vsel %vm1561_vm4, %v1563_v50, %v1559_v47  ;;  %v1583_v60 = vsel %vm1582_vm7, %v2535_v17, %v1579_v39  ;;  %v4083_v39 = vld [vmem:[#allocation5_spill] sm:$0xff]  ;;  %v4086_v17 = vld [vmem:[#allocation8_spill] sm:$0xff]  ;;  %v4105_v45 = vld [vmem:[#allocation27_spill] sm:$0xff] }
 0x4b5   :  { %v1590_v23 = vmul.f32 %v1564_v42, %v3574_v38  ;;  %v1588_v33 = vsel %vm1585_vm8, %v1587_v5, %v1583_v60  ;;  %v4082_v38 = vld [vmem:[#allocation4_spill] sm:$0xff]  ;;  %v4107_v60 = vld [vmem:[#allocation29_spill] sm:$0xff]  ;;  %v4108_v5 = vld [vmem:[#allocation30_spill] sm:$0xff] }
 0x4b6   :  { %v4102_v42 = vld [vmem:[#allocation24_spill] sm:$0xff] }
 0x4b7   :  { %v3661_v34 = vadd.f32 %v1591_v10, %v1590_v23  ;;  %v4084_v10 = vld [vmem:[#allocation6_spill] sm:$0xff] }
 0x4b8   :  { %v4104_v23 = vld [vmem:[#allocation26_spill] sm:$0xff] }
 0x4b9   :  { %2538 = vtanh.f32 %v3661_v34 }
 0x4bf   :  { %v2539_v9 = vpop.eup %2538 }
 0x4c0   :  { %v1594_v47 = vmul.f32 %v2539_v9, %v1588_v33 }
 0x4c2   :  { %v1595_v50 = vpack.c.bf16 %v1594_v47, %v1594_v47  ;;  %v4109_v47 = vld [vmem:[#allocation31_spill] sm:$0xff] }
 0x4c4   :  { %1604 = vmatmul.bf16.vlgmr.msrb.gmra.mxu0 %v1595_v50  ;;  %1617 = vmatmul.bf16.vlgmr.msrb.gmra.mxu1 %v1595_v50 }
 0x4c5   :  { %1630 = vmatmul.bf16.vlgmr.msrb.gmra.mxu2 %v1595_v50  ;;  %1643 = vmatmul.bf16.vlgmr.msrb.gmra.mxu3 %v1595_v50 }
 0x4c6   :  { %1803 = vmatpush.bf16.msrb.mxu0 %v2895_v54  ;;  %1816 = vmatpush.bf16.msrb.mxu1 %v2906_v61 }
 0x4c7   :  { %1829 = vmatpush.bf16.msrb.mxu2 %v2908_v63  ;;  %1842 = vmatpush.bf16.msrb.mxu3 %v2917_v2 }
 0x4ca   :  { %1804 = vmatpush.bf16.msrb.mxu0 %v2931_v13  ;;  %1817 = vmatpush.bf16.msrb.mxu1 %v2942_v20 }
 0x4cb   :  { %1830 = vmatpush.bf16.msrb.mxu2 %v2944_v22  ;;  %1843 = vmatpush.bf16.msrb.mxu3 %v2953_v30 }
 0x4ce   :  { %1805 = vmatpush.bf16.msrb.mxu0 %v2967_v37  ;;  %1818 = vmatpush.bf16.msrb.mxu1 %v2978_v49 }
 0x4cf   :  { %1831 = vmatpush.bf16.msrb.mxu2 %v2980_v51  ;;  %1844 = vmatpush.bf16.msrb.mxu3 %v2989_v55 }
 0x4d2   :  { %1806 = vmatpush.bf16.msrb.mxu0 %v3003_v1  ;;  %1819 = vmatpush.bf16.msrb.mxu1 %v3014_v14 }
 0x4d3   :  { %1832 = vmatpush.bf16.msrb.mxu2 %v3016_v18  ;;  %1845 = vmatpush.bf16.msrb.mxu3 %v3929_v46 }
 0x4d4   :  { %1676 = vmatmul.bf16.vlgmr.msra.gmra.mxu0 %v1595_v50  ;;  %1689 = vmatmul.bf16.vlgmr.msra.gmra.mxu1 %v1595_v50 }
 0x4d5   :  { %1702 = vmatmul.bf16.vlgmr.msra.gmra.mxu2 %v1595_v50  ;;  %1715 = vmatmul.bf16.vlgmr.msra.gmra.mxu3 %v1595_v50 }
 0x4d6   :  { %1807 = vmatpush.bf16.msrb.mxu0 %v3930_v59  ;;  %1820 = vmatpush.bf16.msrb.mxu1 %v3931_v53 }
 0x4d7   :  { %1833 = vmatpush.bf16.msrb.mxu2 %v3932_v36  ;;  %1846 = vmatpush.bf16.msrb.mxu3 %v3933_v44 }
 0x4da   :  { %1808 = vmatpush.bf16.msrb.mxu0 %v3934_v35  ;;  %1821 = vmatpush.bf16.msrb.mxu1 %v3935_v56 }
 0x4db   :  { %1834 = vmatpush.bf16.msrb.mxu2 %v3936_v57  ;;  %1847 = vmatpush.bf16.msrb.mxu3 %v3100_v11 }
 0x4de   :  { %1809 = vmatpush.bf16.msrb.mxu0 %v3114_v0  ;;  %1822 = vmatpush.bf16.msrb.mxu1 %v3123_v19 }
 0x4df   :  { %1835 = vmatpush.bf16.msrb.mxu2 %v3937_v58  ;;  %1848 = vmatpush.bf16.msrb.mxu3 %v3139_v6 }
 0x4e2   :  { %1810 = vmatpush.bf16.msrb.mxu0 %v3152_v28  ;;  %1823 = vmatpush.bf16.msrb.mxu1 %v3166_v40 }
 0x4e3   :  { %1836 = vmatpush.bf16.msrb.mxu2 %v3168_v4  ;;  %1849 = vmatpush.bf16.msrb.mxu3 %v3177_v31 }
 0x4e6   :  { %1875 = vmatpush.bf16.msra.mxu0 %v2607_v3  ;;  %1888 = vmatpush.bf16.msra.mxu1 %v2618_v7  ;;  %v4088_v3 = vld [vmem:[#allocation10_spill] sm:$0xff]  ;;  %v4089_v7 = vld [vmem:[#allocation11_spill] sm:$0xff] }
 0x4e7   :  { %1901 = vmatpush.bf16.msra.mxu2 %v2620_v8  ;;  %1914 = vmatpush.bf16.msra.mxu3 %v2632_v12  ;;  %v4090_v8 = vld [vmem:[#allocation12_spill] sm:$0xff]  ;;  %v4091_v12 = vld [vmem:[#allocation13_spill] sm:$0xff] }
 0x4ea   :  { %1876 = vmatpush.bf16.msra.mxu0 %v2645_v16  ;;  %1889 = vmatpush.bf16.msra.mxu1 %v4082_v38  ;;  %v4092_v16 = vld [vmem:[#allocation14_spill] sm:$0xff]  ;;  %v4110_v38 = vld [vmem:[#allocation32_spill] sm:$0xff] }
 0x4eb   :  { %1902 = vmatpush.bf16.msra.mxu2 %v4083_v39  ;;  %1915 = vmatpush.bf16.msra.mxu3 %v4084_v10 }
 0x4ee   :  { %1877 = vmatpush.bf16.msra.mxu0 %v4085_v25  ;;  %1890 = vmatpush.bf16.msra.mxu1 %v4086_v17 }
 0x4ef   :  { %1903 = vmatpush.bf16.msra.mxu2 %v4087_v32  ;;  %1916 = vmatpush.bf16.msra.mxu3 %v4088_v3  ;;  %v4111_v32 = vld [vmem:[#allocation33_spill] sm:$0xff] }
 0x4f2   :  { %1878 = vmatpush.bf16.msra.mxu0 %v4089_v7  ;;  %1891 = vmatpush.bf16.msra.mxu1 %v4090_v8  ;;  %v4112_v7 = vld [vmem:[#allocation34_spill] sm:$0xff] }
 0x4f3   :  { %1904 = vmatpush.bf16.msra.mxu2 %v4091_v12  ;;  %1917 = vmatpush.bf16.msra.mxu3 %v4092_v16 }
 0x4f6   :  { %1879 = vmatpush.bf16.msra.mxu0 %v4093_v62  ;;  %1892 = vmatpush.bf16.msra.mxu1 %v4094_v24 }
 0x4f7   :  { %1905 = vmatpush.bf16.msra.mxu2 %v4095_v21  ;;  %1918 = vmatpush.bf16.msra.mxu3 %v4096_v41 }
 0x4fa   :  { %1880 = vmatpush.bf16.msra.mxu0 %v4097_v52  ;;  %1893 = vmatpush.bf16.msra.mxu1 %v4098_v29 }
 0x4fb   :  { %1906 = vmatpush.bf16.msra.mxu2 %v4099_v27  ;;  %1919 = vmatpush.bf16.msra.mxu3 %v4100_v26 }
 0x4fe   :  { %1881 = vmatpush.bf16.msra.mxu0 %v4101_v43  ;;  %1894 = vmatpush.bf16.msra.mxu1 %v4102_v42 }
 0x4ff   :  { %1907 = vmatpush.bf16.msra.mxu2 %v4103_v15  ;;  %1920 = vmatpush.bf16.msra.mxu3 %v4104_v23 }
 0x502   :  { %1882 = vmatpush.bf16.msra.mxu0 %v4105_v45  ;;  %1895 = vmatpush.bf16.msra.mxu1 %v4106_v48 }
 0x503   :  { %1908 = vmatpush.bf16.msra.mxu2 %v4107_v60  ;;  %1921 = vmatpush.bf16.msra.mxu3 %v4108_v5  ;;  %v4113_v5 = vld [vmem:[#allocation37_spill] sm:$0xff] }
 0x541   :  { %v1605_v9 = vpop.f32.mrf.mxu0  ;;  %v1618_v33 = vpop.f32.mrf.mxu1 }
 0x542   :  { %v1606_v50 = vadd.f32 %v1605_v9, %v4109_v47  ;;  %v1619_v39 = vadd.f32 %v1618_v33, %v4110_v38  ;;  %v1667_v9 = vunpack.c.h.bf16 %v4113_v5 }
 0x544   :  { %v1648_v10 = vpack.c.bf16 %v1619_v39, %v1606_v50 }
 0x546   :  { %v1652_v62 = vrot.slane %v1648_v10, 3 }
 0x548   :  { %v1631_v25 = vpop.f32.mrf.mxu2  ;;  %v1644_v17 = vpop.f32.mrf.mxu3  ;;  %v1657_v52 = vsel %vm619_vm15, %v1648_v10, %v1652_v62 }
 0x549   :  { %v1632_v3 = vadd.f32 %v1631_v25, %v4111_v32  ;;  %v1645_v8 = vadd.f32 %v1644_v17, %v4112_v7  ;;  %v1607_v12 = vpop.f32.mrf.mxu0  ;;  %v1620_v16 = vpop.f32.mrf.mxu1 }
 0x54b   :  { %v1649_v24 = vpack.c.bf16 %v1645_v8, %v1632_v3 }
 0x54d   :  { %v1653_v21 = vrot.slane %v1649_v24, 6  ;;  %v1654_v41 = vrot.slane %v1649_v24, 1 }
 0x54f   :  { %v1660_v29 = vsel %vm623_vm3, %v1653_v21, %v1654_v41 }
 0x550   :  { %v1661_v27 = vsel %vm312_vm0, %v1657_v52, %v1660_v29  ;;  %v1633_v26 = vpop.f32.mrf.mxu2  ;;  %v1646_v43 = vpop.f32.mrf.mxu3 }
 0x551   :  { %2368 = vst [vmem:[%s3809_s4 + $0x14] sm:$0xf] %v1661_v27  ;;  %v1677_v42 = vpop.f32.mrf.mxu0  ;;  %v1690_v15 = vpop.f32.mrf.mxu1 }
 0x552   :  { %v1724_v23 = vrot.slane %v1690_v15, 6 }
 0x554   :  { %v1727_v10 = vsel %vm312_vm0, %v1677_v42, %v1724_v23 }
 0x558   :  { %v1703_v45 = vpop.f32.mrf.mxu2  ;;  %v1716_v48 = vpop.f32.mrf.mxu3 }
 0x559   :  { %v1725_v60 = vrot.slane %v1703_v45, 4  ;;  %v1726_v33 = vrot.slane %v1716_v48, 2  ;;  %v1679_v50 = vpop.f32.mrf.mxu0  ;;  %v1692_v39 = vpop.f32.mrf.mxu1 }
 0x55b   :  { %v1728_v25 = vsel %vm314_vm1, %v1725_v60, %v1726_v33 }
 0x55c   :  { %v1729_v17 = vsel %vm316_vm2, %v1727_v10, %v1728_v25 }
 0x55d   :  { %v1731_v3 = vadd.f32 %v1729_v17, %v1667_v9 }
 0x55f   :  { %v2370_v8 = vmul.f32 -1.442695, %v1731_v3  ;;  %v1752_v12 = vrot.slane %v1731_v3, 2  ;;  %v1776_v16 = vrot.slane %v1731_v3, 6  ;;  %v1773_v60 = vrot.slane %v1731_v3, 4 }
 0x560   :  { %v1705_v62 = vpop.f32.mrf.mxu2  ;;  %v1718_v24 = vpop.f32.mrf.mxu3 }
 0x561   :  { %2540 = vpow2.f32 %v2370_v8  ;;  %v2371_v21 = vmul.f32 -1.442695, %v1752_v12  ;;  %v2372_v41 = vmul.f32 -1.442695, %v1776_v16 }
 0x563   :  { %2542 = vpow2.f32 %v2371_v21 }
 0x564   :  { %2544 = vpow2.f32 %v2372_v41 }
 0x567   :  { %v2541_v52 = vpop.eup %2540 }
 0x568   :  { %v1735_v29 = vadd.f32 1.0, %v2541_v52 }
 0x569   :  { %v2543_v27 = vpop.eup %2542 }
 0x56a   :  { %v2545_v26 = vpop.eup %2544  ;;  %2546 = vrcp.f32 %v1735_v29  ;;  %v1757_v43 = vadd.f32 1.0, %v2543_v27  ;;  %v1747_v50 = vand.u32 2147483648, %v1735_v29  ;;  %v1745_v10 = vand.u32 2147483647, %v1735_v29 }
 0x56b   :  { %v1781_v42 = vadd.f32 1.0, %v2545_v26  ;;  %vm1741_vm10 = vweird.f32 %v1735_v29 }
 0x56c   :  { %2548 = vrcp.f32 %v1757_v43  ;;  %v1769_v8 = vand.u32 2147483648, %v1757_v43  ;;  %v1767_v16 = vand.u32 2147483647, %v1757_v43  ;;  %v1748_v24 = vor.u32 1.1754944e-38, %v1747_v50 }
 0x56d   :  { %2550 = vrcp.f32 %v1781_v42  ;;  %vm1746_vm13 = vcmp.eq.f32.partialorder %v1745_v10, 8.507059e+37  ;;  %vm1763_vm14 = vweird.f32 %v1757_v43  ;;  %vm1787_vm7 = vweird.f32 %v1781_v42 }
 0x56e   :  { %2552 = vtanh.f32 %v1773_v60  ;;  %v1770_v52 = vor.u32 1.1754944e-38, %v1769_v8  ;;  %vm1768_vm5 = vcmp.eq.f32.partialorder %v1767_v16, 8.507059e+37 }
 0x570   :  { %v2547_v15 = vpop.eup %2546 }
 0x571   :  { %v1737_v23 = vmul.f32 %v2547_v15, %v1735_v29  ;;  %vm1742_vm9 = vweird.f32 %v2547_v15 }
 0x572   :  { %v2549_v45 = vpop.eup %2548  ;;  %vm1743_vm11 = vmor %vm1741_vm10, %vm1742_vm9 }
 0x573   :  { %v1738_v48 = vsub.f32 1.0, %v1737_v23  ;;  %v2551_v5 = vpop.eup %2550  ;;  %v1759_v9 = vmul.f32 %v2549_v45, %v1757_v43  ;;  %vm1764_vm12 = vweird.f32 %v2549_v45  ;;  %v1791_v43 = vand.u32 2147483647, %v1781_v42 }
 0x574   :  { %v1783_v39 = vmul.f32 %v2551_v5, %v1781_v42  ;;  %vm1765_vm4 = vmor %vm1763_vm14, %vm1764_vm12  ;;  %v2553_v26 = vpop.eup %2552  ;;  %vm1788_vm6 = vweird.f32 %v2551_v5 }
 0x575   :  { %v1739_v33 = vmul.f32 %v2547_v15, %v1738_v48  ;;  %v1760_v25 = vsub.f32 1.0, %v1759_v9  ;;  %vm1789_vm8 = vmor %vm1787_vm7, %vm1788_vm6  ;;  %vm1792_vm9 = vcmp.eq.f32.partialorder %v1791_v43, 8.507059e+37 }
 0x576   :  { %v1784_v21 = vsub.f32 1.0, %v1783_v39 }
 0x577   :  { %v1740_v17 = vadd.f32 %v2547_v15, %v1739_v33  ;;  %v1761_v12 = vmul.f32 %v2549_v45, %v1760_v25 }
 0x578   :  { %v1785_v29 = vmul.f32 %v2551_v5, %v1784_v21 }
 0x579   :  { %v1744_v62 = vsel %vm1743_vm11, %v2547_v15, %v1740_v17  ;;  %v1762_v3 = vadd.f32 %v2549_v45, %v1761_v12  ;;  %v1793_v15 = vand.u32 2147483648, %v1781_v42 }
 0x57a   :  { %v1749_v41 = vsel %vm1746_vm13, %v1748_v24, %v1744_v62  ;;  %v1786_v33 = vadd.f32 %v2551_v5, %v1785_v29 }
 0x57b   :  { %v1766_v27 = vsel %vm1765_vm4, %v2549_v45, %v1762_v3  ;;  %v1798_v60 = vmul.f32 %v2553_v26, %v1749_v41  ;;  %v1794_v39 = vor.u32 1.1754944e-38, %v1793_v15 }
 0x57c   :  { %v1771_v23 = vsel %vm1768_vm5, %v1770_v52, %v1766_v27  ;;  %v1790_v50 = vsel %vm1789_vm8, %v2551_v5, %v1786_v33 }
 0x57d   :  { %v1797_v48 = vmul.f32 %v1771_v23, %v3661_v34  ;;  %v1795_v10 = vsel %vm1792_vm9, %v1794_v39, %v1790_v50 }
 0x57f   :  { %v3743_v9 = vadd.f32 %v1798_v60, %v1797_v48 }
 0x581   :  { %2554 = vtanh.f32 %v3743_v9 }
 0x587   :  { %v2555_v45 = vpop.eup %2554 }
 0x588   :  { %v1801_v25 = vmul.f32 %v2555_v45, %v1795_v10 }
 0x58a   :  { %v1802_v17 = vpack.c.bf16 %v1801_v25, %v1801_v25 }
 0x58c   :  { %1811 = vmatmul.bf16.vlgmr.msrb.gmra.mxu0 %v1802_v17  ;;  %1824 = vmatmul.bf16.vlgmr.msrb.gmra.mxu1 %v1802_v17 }
 0x58d   :  { %1837 = vmatmul.bf16.vlgmr.msrb.gmra.mxu2 %v1802_v17  ;;  %1850 = vmatmul.bf16.vlgmr.msrb.gmra.mxu3 %v1802_v17 }
 0x58e   :  { %2010 = vmatpush.bf16.msrb.mxu0 %v2895_v54  ;;  %2023 = vmatpush.bf16.msrb.mxu1 %v2906_v61 }
 0x58f   :  { %2036 = vmatpush.bf16.msrb.mxu2 %v2908_v63  ;;  %2049 = vmatpush.bf16.msrb.mxu3 %v2917_v2 }
 0x592   :  { %2011 = vmatpush.bf16.msrb.mxu0 %v2931_v13  ;;  %2024 = vmatpush.bf16.msrb.mxu1 %v2942_v20 }
 0x593   :  { %2037 = vmatpush.bf16.msrb.mxu2 %v2944_v22  ;;  %2050 = vmatpush.bf16.msrb.mxu3 %v2953_v30 }
 0x596   :  { %2012 = vmatpush.bf16.msrb.mxu0 %v2967_v37  ;;  %2025 = vmatpush.bf16.msrb.mxu1 %v2978_v49 }
 0x597   :  { %2038 = vmatpush.bf16.msrb.mxu2 %v2980_v51  ;;  %2051 = vmatpush.bf16.msrb.mxu3 %v2989_v55 }
 0x59a   :  { %2013 = vmatpush.bf16.msrb.mxu0 %v3003_v1  ;;  %2026 = vmatpush.bf16.msrb.mxu1 %v3014_v14 }
 0x59b   :  { %2039 = vmatpush.bf16.msrb.mxu2 %v3016_v18  ;;  %2052 = vmatpush.bf16.msrb.mxu3 %v3929_v46 }
 0x59c   :  { %1883 = vmatmul.bf16.vlgmr.msra.gmra.mxu0 %v1802_v17  ;;  %1896 = vmatmul.bf16.vlgmr.msra.gmra.mxu1 %v1802_v17 }
 0x59d   :  { %1909 = vmatmul.bf16.vlgmr.msra.gmra.mxu2 %v1802_v17  ;;  %1922 = vmatmul.bf16.vlgmr.msra.gmra.mxu3 %v1802_v17 }
 0x59e   :  { %2014 = vmatpush.bf16.msrb.mxu0 %v3930_v59  ;;  %2027 = vmatpush.bf16.msrb.mxu1 %v3931_v53 }
 0x59f   :  { %2040 = vmatpush.bf16.msrb.mxu2 %v3932_v36  ;;  %2053 = vmatpush.bf16.msrb.mxu3 %v3933_v44 }
 0x5a2   :  { %2015 = vmatpush.bf16.msrb.mxu0 %v3934_v35  ;;  %2028 = vmatpush.bf16.msrb.mxu1 %v3935_v56 }
 0x5a3   :  { %2041 = vmatpush.bf16.msrb.mxu2 %v3936_v57  ;;  %2054 = vmatpush.bf16.msrb.mxu3 %v3100_v11 }
 0x5a6   :  { %2016 = vmatpush.bf16.msrb.mxu0 %v3114_v0  ;;  %2029 = vmatpush.bf16.msrb.mxu1 %v3123_v19 }
 0x5a7   :  { %2042 = vmatpush.bf16.msrb.mxu2 %v3937_v58  ;;  %2055 = vmatpush.bf16.msrb.mxu3 %v3139_v6 }
 0x5aa   :  { %2017 = vmatpush.bf16.msrb.mxu0 %v3152_v28  ;;  %2030 = vmatpush.bf16.msrb.mxu1 %v3166_v40 }
 0x5ab   :  { %2043 = vmatpush.bf16.msrb.mxu2 %v3168_v4  ;;  %2056 = vmatpush.bf16.msrb.mxu3 %v3177_v31  ;;  %v2374_v4 = vld [vmem:[%s3807_s0 + $0x1c] sm:$0xf] }
 0x5ac   :  { %v1874_v44 = vunpack.c.l.bf16 %v2374_v4 }
 0x609   :  { %v1812_v54 = vpop.f32.mrf.mxu0  ;;  %v1825_v61 = vpop.f32.mrf.mxu1 }
 0x60a   :  { %v1813_v63 = vadd.f32 %v1812_v54, %v4109_v47  ;;  %v1826_v2 = vadd.f32 %v1825_v61, %v4110_v38 }
 0x60c   :  { %v1855_v13 = vpack.c.bf16 %v1826_v2, %v1813_v63 }
 0x60e   :  { %v1859_v55 = vrot.slane %v1855_v13, 3 }
 0x610   :  { %v1838_v20 = vpop.f32.mrf.mxu2  ;;  %v1851_v22 = vpop.f32.mrf.mxu3  ;;  %v1864_v0 = vsel %vm619_vm15, %v1855_v13, %v1859_v55 }
 0x611   :  { %v1839_v30 = vadd.f32 %v1838_v20, %v4111_v32  ;;  %v1852_v37 = vadd.f32 %v1851_v22, %v4112_v7  ;;  %v1814_v49 = vpop.f32.mrf.mxu0  ;;  %v1827_v51 = vpop.f32.mrf.mxu1 }
 0x613   :  { %v1856_v1 = vpack.c.bf16 %v1852_v37, %v1839_v30 }
 0x615   :  { %v1860_v14 = vrot.slane %v1856_v1, 6  ;;  %v1861_v18 = vrot.slane %v1856_v1, 1 }
 0x617   :  { %v1867_v11 = vsel %vm623_vm3, %v1860_v14, %v1861_v18 }
 0x618   :  { %v1868_v19 = vsel %vm312_vm0, %v1864_v0, %v1867_v11  ;;  %v1840_v31 = vpop.f32.mrf.mxu2  ;;  %v1853_v6 = vpop.f32.mrf.mxu3 }
 0x619   :  { %2373 = vst [vmem:[%s3809_s4 + $0x18] sm:$0xf] %v1868_v19  ;;  %v1884_v28 = vpop.f32.mrf.mxu0  ;;  %v1897_v40 = vpop.f32.mrf.mxu1 }
 0x61a   :  { %v1931_v46 = vrot.slane %v1897_v40, 6 }
 0x61c   :  { %v1934_v58 = vsel %vm312_vm0, %v1884_v28, %v1931_v46 }
 0x620   :  { %v1910_v59 = vpop.f32.mrf.mxu2  ;;  %v1923_v53 = vpop.f32.mrf.mxu3 }
 0x621   :  { %v1932_v36 = vrot.slane %v1910_v59, 4  ;;  %v1933_v35 = vrot.slane %v1923_v53, 2  ;;  %v1886_v56 = vpop.f32.mrf.mxu0  ;;  %v1899_v57 = vpop.f32.mrf.mxu1 }
 0x623   :  { %v1935_v34 = vsel %vm314_vm1, %v1932_v36, %v1933_v35 }
 0x624   :  { %v1936_v42 = vsel %vm316_vm2, %v1934_v58, %v1935_v34 }
 0x625   :  { %v1938_v5 = vadd.f32 %v1936_v42, %v1874_v44 }
 0x627   :  { %v2375_v8 = vmul.f32 -1.442695, %v1938_v5  ;;  %v1959_v12 = vrot.slane %v1938_v5, 2  ;;  %v1983_v16 = vrot.slane %v1938_v5, 6  ;;  %v1980_v43 = vrot.slane %v1938_v5, 4 }
 0x628   :  { %v1912_v62 = vpop.f32.mrf.mxu2  ;;  %v1925_v24 = vpop.f32.mrf.mxu3 }
 0x629   :  { %2556 = vpow2.f32 %v2375_v8  ;;  %v2376_v21 = vmul.f32 -1.442695, %v1959_v12  ;;  %v2377_v3 = vmul.f32 -1.442695, %v1983_v16 }
 0x62b   :  { %2558 = vpow2.f32 %v2376_v21 }
 0x62c   :  { %2560 = vpow2.f32 %v2377_v3 }
 0x62f   :  { %v2557_v41 = vpop.eup %2556 }
 0x630   :  { %v1942_v52 = vadd.f32 1.0, %v2557_v41 }
 0x631   :  { %v2559_v27 = vpop.eup %2558 }
 0x632   :  { %v2561_v26 = vpop.eup %2560  ;;  %2562 = vrcp.f32 %v1942_v52  ;;  %v1964_v23 = vadd.f32 1.0, %v2559_v27  ;;  %v1954_v10 = vand.u32 2147483648, %v1942_v52  ;;  %v1952_v17 = vand.u32 2147483647, %v1942_v52 }
 0x633   :  { %v1988_v29 = vadd.f32 1.0, %v2561_v26  ;;  %vm1948_vm2 = vweird.f32 %v1942_v52 }
 0x634   :  { %2564 = vrcp.f32 %v1964_v23  ;;  %v1976_v63 = vand.u32 2147483648, %v1964_v23  ;;  %v1974_v13 = vand.u32 2147483647, %v1964_v23  ;;  %v1955_v22 = vor.u32 1.1754944e-38, %v1954_v10 }
 0x635   :  { %2566 = vrcp.f32 %v1988_v29  ;;  %vm1953_vm12 = vcmp.eq.f32.partialorder %v1952_v17, 8.507059e+37  ;;  %vm1970_vm13 = vweird.f32 %v1964_v23  ;;  %v2000_v6 = vand.u32 2147483648, %v1988_v29 }
 0x636   :  { %2568 = vtanh.f32 %v1980_v43  ;;  %v1977_v51 = vor.u32 1.1754944e-38, %v1976_v63  ;;  %vm1975_vm4 = vcmp.eq.f32.partialorder %v1974_v13, 8.507059e+37  ;;  %vm1994_vm6 = vweird.f32 %v1988_v29 }
 0x637   :  { %v1998_v28 = vand.u32 2147483647, %v1988_v29  ;;  %v2001_v4 = vor.u32 1.1754944e-38, %v2000_v6 }
 0x638   :  { %v2563_v48 = vpop.eup %2562 }
 0x639   :  { %v1944_v60 = vmul.f32 %v2563_v48, %v1942_v52  ;;  %vm1949_vm1 = vweird.f32 %v2563_v48  ;;  %vm1999_vm8 = vcmp.eq.f32.partialorder %v1998_v28, 8.507059e+37 }
 0x63a   :  { %v2565_v33 = vpop.eup %2564  ;;  %vm1950_vm10 = vmor %vm1948_vm2, %vm1949_vm1 }
 0x63b   :  { %v1945_v15 = vsub.f32 1.0, %v1944_v60  ;;  %v2567_v50 = vpop.eup %2566  ;;  %v1966_v39 = vmul.f32 %v2565_v33, %v1964_v23  ;;  %vm1971_vm11 = vweird.f32 %v2565_v33 }
 0x63c   :  { %v1990_v25 = vmul.f32 %v2567_v50, %v1988_v29  ;;  %vm1972_vm14 = vmor %vm1970_vm13, %vm1971_vm11  ;;  %v2569_v1 = vpop.eup %2568  ;;  %vm1995_vm5 = vweird.f32 %v2567_v50 }
 0x63d   :  { %v1946_v45 = vmul.f32 %v2563_v48, %v1945_v15  ;;  %v1967_v54 = vsub.f32 1.0, %v1966_v39  ;;  %vm1996_vm7 = vmor %vm1994_vm6, %vm1995_vm5 }
 0x63e   :  { %v1991_v30 = vsub.f32 1.0, %v1990_v25 }
 0x63f   :  { %v1947_v61 = vadd.f32 %v2563_v48, %v1946_v45  ;;  %v1968_v2 = vmul.f32 %v2565_v33, %v1967_v54 }
 0x640   :  { %v1992_v18 = vmul.f32 %v2567_v50, %v1991_v30 }
 0x641   :  { %v1951_v20 = vsel %vm1950_vm10, %v2563_v48, %v1947_v61  ;;  %v1969_v37 = vadd.f32 %v2565_v33, %v1968_v2 }
 0x642   :  { %v1956_v49 = vsel %vm1953_vm12, %v1955_v22, %v1951_v20  ;;  %v1993_v31 = vadd.f32 %v2567_v50, %v1992_v18 }
 0x643   :  { %v1973_v55 = vsel %vm1972_vm14, %v2565_v33, %v1969_v37  ;;  %v2005_v0 = vmul.f32 %v2569_v1, %v1956_v49 }
 0x644   :  { %v1978_v14 = vsel %vm1975_vm4, %v1977_v51, %v1973_v55  ;;  %v1997_v40 = vsel %vm1996_vm7, %v2567_v50, %v1993_v31 }
 0x645   :  { %v2004_v11 = vmul.f32 %v1978_v14, %v3743_v9  ;;  %v2002_v59 = vsel %vm1999_vm8, %v2001_v4, %v1997_v40 }
 0x647   :  { %v2006_v19 = vadd.f32 %v2005_v0, %v2004_v11 }
 0x649   :  { %2570 = vtanh.f32 %v2006_v19  ;;  %2080 = vst [vmem:[#allocation3] sm:$0x3] %v2006_v19 }
 0x64f   :  { %v2571_v46 = vpop.eup %2570 }
 0x650   :  { %v2008_v53 = vmul.f32 %v2571_v46, %v2002_v59 }
 0x652   :  { %v2009_v36 = vpack.c.bf16 %v2008_v53, %v2008_v53  ;;  %2079 = vst [vmem:[#allocation2] sm:$0x3] %v2008_v53 }
 0x654   :  { %2018 = vmatmul.bf16.vlgmr.msrb.gmra.mxu0 %v2009_v36  ;;  %2031 = vmatmul.bf16.vlgmr.msrb.gmra.mxu1 %v2009_v36 }
 0x655   :  { %2044 = vmatmul.bf16.vlgmr.msrb.gmra.mxu2 %v2009_v36  ;;  %2057 = vmatmul.bf16.vlgmr.msrb.gmra.mxu3 %v2009_v36 }
 0x6d1   :  { %v2019_v9 = vpop.f32.mrf.mxu0  ;;  %v2032_v44 = vpop.f32.mrf.mxu1 }
 0x6d2   :  { %v2020_v35 = vadd.f32 %v2019_v9, %v4109_v47  ;;  %v2033_v56 = vadd.f32 %v2032_v44, %v4110_v38 }
 0x6d4   :  { %v2062_v57 = vpack.c.bf16 %v2033_v56, %v2020_v35 }
 0x6d6   :  { %v2066_v16 = vrot.slane %v2062_v57, 3 }
 0x6d8   :  { %v2045_v58 = vpop.f32.mrf.mxu2  ;;  %v2058_v34 = vpop.f32.mrf.mxu3  ;;  %v2071_v3 = vsel %vm619_vm15, %v2062_v57, %v2066_v16 }
 0x6d9   :  { %v2046_v42 = vadd.f32 %v2045_v58, %v4111_v32  ;;  %v2059_v5 = vadd.f32 %v2058_v34, %v4112_v7  ;;  %v2021_v8 = vpop.f32.mrf.mxu0  ;;  %v2034_v12 = vpop.f32.mrf.mxu1 }
 0x6db   :  { %v2063_v62 = vpack.c.bf16 %v2059_v5, %v2046_v42 }
 0x6dd   :  { %v2067_v24 = vrot.slane %v2063_v62, 6  ;;  %v2068_v21 = vrot.slane %v2063_v62, 1 }
 0x6df   :  { %v2074_v41 = vsel %vm623_vm3, %v2067_v24, %v2068_v21 }
 0x6e0   :  { %v2075_v47 = vsel %vm312_vm0, %v2071_v3, %v2074_v41  ;;  %v2047_v38 = vpop.f32.mrf.mxu2  ;;  %v2060_v52 = vpop.f32.mrf.mxu3 }
 0x6e1   :  { %2378 = vst [vmem:[%s3809_s4 + $0x1c] sm:$0xf] %v2075_v47 }

// kernel: cnn_lstm_forward.7
= control target key start
LH: loop header
LB: loop body
LE: loop exit
PB: predicated region body
PF: predicated region fallthrough
CT: control target
= control target key end

     0   :  { %vm296_vm0 = vcmask 1041408   ;;  %vm298_vm1 = vcmask 1045508   ;;  %vm300_vm2 = vcmask 1043456   ;;  %s2697_s1 = inlined_call_operand.vmem [shape: bf16[128,512], index: 1, kind: input, shape index: {}]   ;;  %s2698_s3 = inlined_call_operand.vmem [shape: f32[1,128], index: 3, kind: input, shape index: {}]   ;;  %s2699_s2 = inlined_call_operand.vmem [shape: bf16[128,128], index: 2, kind: input, shape index: {}]   ;;  %s2700_s0 = inlined_call_operand.vmem [shape: bf16[8,2,512], index: 0, kind: input, shape index: {}]   ;;  %s2701_s4 = inlined_call_operand.vmem [shape: f32[8,2,128], index: 4, kind: output, shape index: {}]  }
   0x1   :  { %v1631_v0 = vld [vmem:[%s2697_s1 + $0xe0] sm:$0xf]  ;;  %v1745_v1 = vld [vmem:[%s2697_s1 + $0xec] sm:$0xf0]  ;;  %v1743_v2 = vld [vmem:[%s2697_s1 + $0xe4] sm:$0xf] }
   0x2   :  { %v1929_v3 = vor.u32 %v1745_v1, %v1631_v0  ;;  %v1633_v4 = vld [vmem:[%s2697_s1 + $0xf0] sm:$0xf0]  ;;  %v1639_v5 = vld [vmem:[%s2697_s1 + $0xe8] sm:$0xf]  ;;  %v1746_v6 = vld [vmem:[%s2697_s1 + $0xf4] sm:$0xf0] }
   0x3   :  { %v1940_v7 = vor.u32 %v1743_v2, %v1633_v4  ;;  %v1942_v8 = vor.u32 %v1746_v6, %v1639_v5  ;;  %v1744_v9 = vld [vmem:[%s2697_s1 + $0xec] sm:$0xf]  ;;  %v1641_v10 = vld [vmem:[%s2697_s1 + $0xf8] sm:$0xf0]  ;;  %v1615_v11 = vld [vmem:[%s2697_s1 + $0xc0] sm:$0xf] }
   0x4   :  { %237 = vmatpush.bf16.msra.mxu0 %v1929_v3  ;;  %v1954_v12 = vor.u32 %v1744_v9, %v1641_v10  ;;  %v1741_v13 = vld [vmem:[%s2697_s1 + $0xcc] sm:$0xf0]  ;;  %v1739_v14 = vld [vmem:[%s2697_s1 + $0xc4] sm:$0xf]  ;;  %v1617_v15 = vld [vmem:[%s2697_s1 + $0xd0] sm:$0xf0] }
   0x5   :  { %250 = vmatpush.bf16.msra.mxu1 %v1940_v7  ;;  %263 = vmatpush.bf16.msra.mxu2 %v1942_v8  ;;  %v1967_v16 = vor.u32 %v1741_v13, %v1615_v11  ;;  %v1969_v17 = vor.u32 %v1739_v14, %v1617_v15  ;;  %v1623_v18 = vld [vmem:[%s2697_s1 + $0xc8] sm:$0xf]  ;;  %v1742_v19 = vld [vmem:[%s2697_s1 + $0xd4] sm:$0xf0]  ;;  %v1740_v20 = vld [vmem:[%s2697_s1 + $0xcc] sm:$0xf] }
   0x6   :  { %276 = vmatpush.bf16.msra.mxu3 %v1954_v12  ;;  %v1981_v21 = vor.u32 %v1742_v19, %v1623_v18  ;;  %v1625_v22 = vld [vmem:[%s2697_s1 + $0xd8] sm:$0xf0]  ;;  %v1599_v23 = vld [vmem:[%s2697_s1 + $0xa0] sm:$0xf]  ;;  %v1737_v24 = vld [vmem:[%s2697_s1 + $0xac] sm:$0xf0] }
   0x7   :  { %v1992_v25 = vor.u32 %v1740_v20, %v1625_v22  ;;  %v1735_v26 = vld [vmem:[%s2697_s1 + $0xa4] sm:$0xf]  ;;  %v1601_v27 = vld [vmem:[%s2697_s1 + $0xb0] sm:$0xf0]  ;;  %v1607_v28 = vld [vmem:[%s2697_s1 + $0xa8] sm:$0xf]  ;;  %v2004_v29 = vor.u32 %v1737_v24, %v1599_v23 }
   0x8   :  { %238 = vmatpush.bf16.msra.mxu0 %v1967_v16  ;;  %v1738_v30 = vld [vmem:[%s2697_s1 + $0xb4] sm:$0xf0]  ;;  %v1736_v31 = vld [vmem:[%s2697_s1 + $0xac] sm:$0xf]  ;;  %v1609_v32 = vld [vmem:[%s2697_s1 + $0xb8] sm:$0xf0]  ;;  %v2017_v33 = vor.u32 %v1735_v26, %v1601_v27 }
   0x9   :  { %251 = vmatpush.bf16.msra.mxu1 %v1969_v17  ;;  %264 = vmatpush.bf16.msra.mxu2 %v1981_v21  ;;  %v2019_v34 = vor.u32 %v1738_v30, %v1607_v28  ;;  %v1583_v35 = vld [vmem:[%s2697_s1 + $0x80] sm:$0xf]  ;;  %v1733_v36 = vld [vmem:[%s2697_s1 + $0x8c] sm:$0xf0]  ;;  %v1731_v37 = vld [vmem:[%s2697_s1 + $0x84] sm:$0xf]  ;;  %v2031_v38 = vor.u32 %v1736_v31, %v1609_v32 }
   0xa   :  { %277 = vmatpush.bf16.msra.mxu3 %v1992_v25  ;;  %v1585_v39 = vld [vmem:[%s2697_s1 + $0x90] sm:$0xf0]  ;;  %v1591_v40 = vld [vmem:[%s2697_s1 + $0x88] sm:$0xf]  ;;  %v1734_v41 = vld [vmem:[%s2697_s1 + $0x94] sm:$0xf0]  ;;  %v2049_v44 = vor.u32 %v1733_v36, %v1583_v35 }
   0xb   :  { %v1732_v42 = vld [vmem:[%s2697_s1 + $0x8c] sm:$0xf]  ;;  %v1593_v43 = vld [vmem:[%s2697_s1 + $0x98] sm:$0xf0]  ;;  %v2053_v45 = vor.u32 %v1731_v37, %v1585_v39  ;;  %v2055_v46 = vor.u32 %v1734_v41, %v1591_v40  ;;  %v1567_v47 = vld [vmem:[%s2697_s1 + $0x60] sm:$0xf] }
   0xc   :  { %239 = vmatpush.bf16.msra.mxu0 %v2004_v29  ;;  %v1729_v48 = vld [vmem:[%s2697_s1 + $0x6c] sm:$0xf0]  ;;  %v1727_v49 = vld [vmem:[%s2697_s1 + $0x64] sm:$0xf]  ;;  %v2067_v50 = vor.u32 %v1732_v42, %v1593_v43  ;;  %v1569_v51 = vld [vmem:[%s2697_s1 + $0x70] sm:$0xf0] }
   0xd   :  { %252 = vmatpush.bf16.msra.mxu1 %v2017_v33  ;;  %265 = vmatpush.bf16.msra.mxu2 %v2019_v34  ;;  %v1575_v52 = vld [vmem:[%s2697_s1 + $0x68] sm:$0xf]  ;;  %v1730_v53 = vld [vmem:[%s2697_s1 + $0x74] sm:$0xf0]  ;;  %v1728_v54 = vld [vmem:[%s2697_s1 + $0x6c] sm:$0xf]  ;;  %v2085_v56 = vor.u32 %v1729_v48, %v1567_v47  ;;  %v2089_v57 = vor.u32 %v1727_v49, %v1569_v51 }
   0xe   :  { %278 = vmatpush.bf16.msra.mxu3 %v2031_v38  ;;  %v1577_v55 = vld [vmem:[%s2697_s1 + $0x78] sm:$0xf0]  ;;  %v2091_v58 = vor.u32 %v1730_v53, %v1575_v52  ;;  %v1551_v59 = vld [vmem:[%s2697_s1 + $0x40] sm:$0xf]  ;;  %v1725_v60 = vld [vmem:[%s2697_s1 + $0x4c] sm:$0xf0] }
   0xf   :  { %v1723_v61 = vld [vmem:[%s2697_s1 + $0x44] sm:$0xf]  ;;  %v2103_v62 = vor.u32 %v1728_v54, %v1577_v55  ;;  %v1553_v63 = vld [vmem:[%s2697_s1 + $0x50] sm:$0xf0]  ;;  %v1559_v0 = vld [vmem:[%s2697_s1 + $0x48] sm:$0xf]  ;;  %v2121_v5 = vor.u32 %v1725_v60, %v1551_v59 }
  0x10   :  { %240 = vmatpush.bf16.msra.mxu0 %v2049_v44  ;;  %v1726_v1 = vld [vmem:[%s2697_s1 + $0x54] sm:$0xf0]  ;;  %v1724_v2 = vld [vmem:[%s2697_s1 + $0x4c] sm:$0xf]  ;;  %v1561_v4 = vld [vmem:[%s2697_s1 + $0x58] sm:$0xf0]  ;;  %v2128_v9 = vor.u32 %v1723_v61, %v1553_v63 }
  0x11   :  { %253 = vmatpush.bf16.msra.mxu1 %v2053_v45  ;;  %266 = vmatpush.bf16.msra.mxu2 %v2055_v46  ;;  %v1535_v6 = vld [vmem:[%s2697_s1 + $0x20] sm:$0xf]  ;;  %v2130_v10 = vor.u32 %v1726_v1, %v1559_v0  ;;  %v1721_v11 = vld [vmem:[%s2697_s1 + $0x2c] sm:$0xf0]  ;;  %v1719_v13 = vld [vmem:[%s2697_s1 + $0x24] sm:$0xf]  ;;  %v2142_v15 = vor.u32 %v1724_v2, %v1561_v4 }
  0x12   :  { %279 = vmatpush.bf16.msra.mxu3 %v2067_v50  ;;  %2714 = vst [vmem:[#allocation4_spill] sm:$0xff] %v2128_v9  ;;  %v1537_v14 = vld [vmem:[%s2697_s1 + $0x30] sm:$0xf0]  ;;  %v1543_v18 = vld [vmem:[%s2697_s1 + $0x28] sm:$0xf]  ;;  %v1894_v20 = vmov 0.0   ;;  %v2157_v24 = vor.u32 %v1721_v11, %v1535_v6 }
  0x13   :  { %v1722_v19 = vld [vmem:[%s2697_s1 + $0x34] sm:$0xf0]  ;;  %21 = vst [vmem:[#allocation2] sm:$0x3] %v1894_v20  ;;  %v1720_v22 = vld [vmem:[%s2697_s1 + $0x2c] sm:$0xf]  ;;  %v2161_v26 = vor.u32 %v1719_v13, %v1537_v14 }
  0x14   :  { %241 = vmatpush.bf16.msra.mxu0 %v2085_v56  ;;  %v1545_v23 = vld [vmem:[%s2697_s1 + $0x38] sm:$0xf0]  ;;  %22 = vst [vmem:[#allocation3] sm:$0x3] %v1894_v20  ;;  %v2163_v27 = vor.u32 %v1722_v19, %v1543_v18  ;;  %v1519_v28 = vld [vmem:[%s2697_s1] sm:$0xf] }
  0x15   :  { %254 = vmatpush.bf16.msra.mxu1 %v2089_v57  ;;  %267 = vmatpush.bf16.msra.mxu2 %v2091_v58  ;;  %2715 = vst [vmem:[#allocation5_spill] sm:$0xff] %v2161_v26  ;;  %v1717_v30 = vld [vmem:[%s2697_s1 + $0xc] sm:$0xf0]  ;;  %v1715_v31 = vld [vmem:[%s2697_s1 + $0x4] sm:$0xf]  ;;  %v2175_v32 = vor.u32 %v1720_v22, %v1545_v23  ;;  %v2251_v51 = vld [vmem:[%s2699_s2 + $0x38] sm:$0xff] }
  0x16   :  { %280 = vmatpush.bf16.msra.mxu3 %v2103_v62  ;;  %v1521_v35 = vld [vmem:[%s2697_s1 + $0x10] sm:$0xf0]  ;;  %v1527_v36 = vld [vmem:[%s2697_s1 + $0x8] sm:$0xf]  ;;  %v1718_v37 = vld [vmem:[%s2697_s1 + $0x14] sm:$0xf0]  ;;  %v2193_v41 = vor.u32 %v1717_v30, %v1519_v28 }
  0x17   :  { %v1716_v39 = vld [vmem:[%s2697_s1 + $0xc] sm:$0xf]  ;;  %v1529_v40 = vld [vmem:[%s2697_s1 + $0x18] sm:$0xf0]  ;;  %v2197_v42 = vor.u32 %v1715_v31, %v1521_v35  ;;  %v2199_v43 = vor.u32 %v1718_v37, %v1527_v36  ;;  %v2258_v52 = vld [vmem:[%s2699_s2 + $0x30] sm:$0xff] }
  0x18   :  { %242 = vmatpush.bf16.msra.mxu0 %v2121_v5  ;;  %v2202_v48 = vor.u32 %v1716_v39, %v1529_v40  ;;  %v2265_v53 = vld [vmem:[%s2699_s2 + $0x28] sm:$0xff]  ;;  %v2272_v54 = vld [vmem:[%s2699_s2 + $0x20] sm:$0xff]  ;;  %v2279_v55 = vld [vmem:[%s2699_s2 + $0x18] sm:$0xff] }
  0x19   :  { %255 = vmatpush.bf16.msra.mxu1 %v2128_v9  ;;  %268 = vmatpush.bf16.msra.mxu2 %v2130_v10  ;;  %2716 = vst [vmem:[#allocation6_spill] sm:$0xff] %v2197_v42  ;;  %v2286_v61 = vld [vmem:[%s2699_s2 + $0x10] sm:$0xff]  ;;  %v2292_v0 = vld [vmem:[%s2699_s2 + $0x8] sm:$0xff]  ;;  %v74_v1 = vld [vmem:[%s2700_s0] sm:$0xf] }
  0x1a   :  { %281 = vmatpush.bf16.msra.mxu3 %v2142_v15  ;;  %v72_v47 = vld [vmem:[#allocation2] sm:$0x3]  ;;  %v75_v14 = vunpack.c.l.bf16 %v74_v1 }
  0x1b   :  { %v76_v49 = vpack.c.bf16 %v72_v47, %v72_v47  ;;  %v2303_v20 = vld [vmem:[%s2699_s2] sm:$0xff] }
  0x1c   :  { %243 = vmatpush.bf16.msra.mxu0 %v2157_v24 }
  0x1d   :  { %256 = vmatpush.bf16.msra.mxu1 %v2161_v26  ;;  %269 = vmatpush.bf16.msra.mxu2 %v2163_v27 }
  0x1e   :  { %282 = vmatpush.bf16.msra.mxu3 %v2175_v32 }
  0x20   :  { %244 = vmatpush.bf16.msra.mxu0 %v2193_v41 }
  0x21   :  { %257 = vmatpush.bf16.msra.mxu1 %v2197_v42  ;;  %270 = vmatpush.bf16.msra.mxu2 %v2199_v43 }
  0x22   :  { %283 = vmatpush.bf16.msra.mxu3 %v2202_v48 }
  0x23   :  { %245 = vmatmul.bf16.vlgmr.msra.gmra.mxu0 %v76_v49 }
  0x24   :  { %258 = vmatmul.bf16.vlgmr.msra.gmra.mxu1 %v76_v49  ;;  %271 = vmatmul.bf16.vlgmr.msra.gmra.mxu2 %v76_v49 }
  0x25   :  { %443 = vmatpush.bf16.msrb.mxu1 %v1929_v3  ;;  %456 = vmatpush.bf16.msrb.mxu2 %v1940_v7 }
  0x26   :  { %284 = vmatmul.bf16.vlgmr.msra.gmra.mxu3 %v76_v49  ;;  %426 = vmatpush.bf16.msrb.mxu0 %v2251_v51 }
  0x27   :  { %469 = vmatpush.bf16.msrb.mxu3 %v1942_v8 }
  0x29   :  { %444 = vmatpush.bf16.msrb.mxu1 %v1967_v16  ;;  %457 = vmatpush.bf16.msrb.mxu2 %v1969_v17 }
  0x2a   :  { %427 = vmatpush.bf16.msrb.mxu0 %v2258_v52 }
  0x2b   :  { %470 = vmatpush.bf16.msrb.mxu3 %v1981_v21 }
  0x2d   :  { %445 = vmatpush.bf16.msrb.mxu1 %v2004_v29  ;;  %458 = vmatpush.bf16.msrb.mxu2 %v2017_v33 }
  0x2e   :  { %428 = vmatpush.bf16.msrb.mxu0 %v2265_v53 }
  0x2f   :  { %471 = vmatpush.bf16.msrb.mxu3 %v2019_v34 }
  0x31   :  { %446 = vmatpush.bf16.msrb.mxu1 %v2049_v44  ;;  %459 = vmatpush.bf16.msrb.mxu2 %v2053_v45 }
  0x32   :  { %429 = vmatpush.bf16.msrb.mxu0 %v2272_v54 }
  0x33   :  { %472 = vmatpush.bf16.msrb.mxu3 %v2055_v46 }
  0x35   :  { %447 = vmatpush.bf16.msrb.mxu1 %v2085_v56  ;;  %460 = vmatpush.bf16.msrb.mxu2 %v2089_v57 }
  0x36   :  { %430 = vmatpush.bf16.msrb.mxu0 %v2279_v55 }
  0x37   :  { %473 = vmatpush.bf16.msrb.mxu3 %v2091_v58 }
  0x39   :  { %448 = vmatpush.bf16.msrb.mxu1 %v2121_v5  ;;  %461 = vmatpush.bf16.msrb.mxu2 %v2128_v9 }
  0x3a   :  { %431 = vmatpush.bf16.msrb.mxu0 %v2286_v61 }
  0x3b   :  { %474 = vmatpush.bf16.msrb.mxu3 %v2130_v10 }
  0x3d   :  { %449 = vmatpush.bf16.msrb.mxu1 %v2157_v24  ;;  %462 = vmatpush.bf16.msrb.mxu2 %v2161_v26 }
  0x3e   :  { %432 = vmatpush.bf16.msrb.mxu0 %v2292_v0 }
  0x3f   :  { %475 = vmatpush.bf16.msrb.mxu3 %v2163_v27 }
  0x41   :  { %450 = vmatpush.bf16.msrb.mxu1 %v2193_v41  ;;  %463 = vmatpush.bf16.msrb.mxu2 %v2197_v42 }
  0x42   :  { %433 = vmatpush.bf16.msrb.mxu0 %v2303_v20 }
  0x43   :  { %476 = vmatpush.bf16.msrb.mxu3 %v2199_v43 }
  0x45   :  { %596 = vmatpush.bf16.msra.mxu2 %v1929_v3  ;;  %578 = vmatpush.bf16.msra.mxu1 %v2251_v51 }
  0x46   :  { %482 = vmatpush.bf16.msra.mxu0 %v1954_v12 }
  0x47   :  { %609 = vmatpush.bf16.msra.mxu3 %v1940_v7 }
  0x49   :  { %597 = vmatpush.bf16.msra.mxu2 %v1967_v16  ;;  %579 = vmatpush.bf16.msra.mxu1 %v2258_v52 }
  0x4a   :  { %483 = vmatpush.bf16.msra.mxu0 %v1992_v25 }
  0x4b   :  { %610 = vmatpush.bf16.msra.mxu3 %v1969_v17 }
  0x4d   :  { %598 = vmatpush.bf16.msra.mxu2 %v2004_v29  ;;  %580 = vmatpush.bf16.msra.mxu1 %v2265_v53 }
  0x4e   :  { %484 = vmatpush.bf16.msra.mxu0 %v2031_v38 }
  0x4f   :  { %611 = vmatpush.bf16.msra.mxu3 %v2017_v33 }
  0x51   :  { %599 = vmatpush.bf16.msra.mxu2 %v2049_v44  ;;  %581 = vmatpush.bf16.msra.mxu1 %v2272_v54 }
  0x52   :  { %485 = vmatpush.bf16.msra.mxu0 %v2067_v50 }
  0x53   :  { %612 = vmatpush.bf16.msra.mxu3 %v2053_v45 }
  0x55   :  { %600 = vmatpush.bf16.msra.mxu2 %v2085_v56  ;;  %582 = vmatpush.bf16.msra.mxu1 %v2279_v55 }
  0x56   :  { %486 = vmatpush.bf16.msra.mxu0 %v2103_v62 }
  0x57   :  { %613 = vmatpush.bf16.msra.mxu3 %v2089_v57 }
  0x59   :  { %601 = vmatpush.bf16.msra.mxu2 %v2121_v5  ;;  %583 = vmatpush.bf16.msra.mxu1 %v2286_v61 }
  0x5a   :  { %487 = vmatpush.bf16.msra.mxu0 %v2142_v15 }
  0x5b   :  { %614 = vmatpush.bf16.msra.mxu3 %v2128_v9 }
  0x5d   :  { %602 = vmatpush.bf16.msra.mxu2 %v2157_v24  ;;  %584 = vmatpush.bf16.msra.mxu1 %v2292_v0 }
  0x5e   :  { %488 = vmatpush.bf16.msra.mxu0 %v2175_v32 }
  0x5f   :  { %615 = vmatpush.bf16.msra.mxu3 %v2161_v26 }
  0x61   :  { %603 = vmatpush.bf16.msra.mxu2 %v2193_v41  ;;  %585 = vmatpush.bf16.msra.mxu1 %v2303_v20 }
  0x62   :  { %489 = vmatpush.bf16.msra.mxu0 %v2202_v48 }
  0x63   :  { %616 = vmatpush.bf16.msra.mxu3 %v2197_v42 }
  0xa0   :  { %v246_v59 = vpop.f32.mrf.mxu0 }
  0xa1   :  { %v259_v60 = vpop.f32.mrf.mxu1 }
  0xa2   :  { %v293_v63 = vrot.slane %v259_v60, 6 }
  0xa4   :  { %v297_v13 = vsel %vm296_vm0, %v246_v59, %v293_v63 }
  0xa7   :  { %v272_v2 = vpop.f32.mrf.mxu2 }
  0xa8   :  { %v294_v4 = vrot.slane %v272_v2, 4  ;;  %v248_v11 = vpop.f32.mrf.mxu0 }
  0xa9   :  { %v285_v6 = vpop.f32.mrf.mxu3  ;;  %v261_v19 = vpop.f32.mrf.mxu1 }
  0xaa   :  { %v295_v18 = vrot.slane %v285_v6, 2 }
  0xac   :  { %v299_v22 = vsel %vm298_vm1, %v294_v4, %v295_v18 }
  0xad   :  { %v301_v23 = vsel %vm300_vm2, %v297_v13, %v299_v22 }
  0xae   :  { %v303_v28 = vadd.f32 %v301_v23, %v75_v14 }
  0xaf   :  { %v274_v36 = vpop.f32.mrf.mxu2 }
  0xb0   :  { %v1645_v30 = vmul.f32 -1.442695, %v303_v28  ;;  %v324_v31 = vrot.slane %v303_v28, 2  ;;  %v348_v35 = vrot.slane %v303_v28, 6  ;;  %v345_v11 = vrot.slane %v303_v28, 4 }
  0xb1   :  { %v287_v37 = vpop.f32.mrf.mxu3 }
  0xb2   :  { %1757 = vpow2.f32 %v1645_v30  ;;  %v1646_v39 = vmul.f32 -1.442695, %v324_v31  ;;  %v1647_v40 = vmul.f32 -1.442695, %v348_v35 }
  0xb4   :  { %1759 = vpow2.f32 %v1646_v39 }
  0xb5   :  { %1761 = vpow2.f32 %v1647_v40 }
  0xb8   :  { %v1758_v47 = vpop.eup %1757 }
  0xb9   :  { %v307_v49 = vadd.f32 1.0, %v1758_v47 }
  0xba   :  { %v1760_v59 = vpop.eup %1759 }
  0xbb   :  { %v1762_v60 = vpop.eup %1761  ;;  %1763 = vrcp.f32 %v307_v49  ;;  %v329_v63 = vadd.f32 1.0, %v1760_v59  ;;  %v319_v19 = vand.u32 2147483648, %v307_v49  ;;  %v317_v31 = vand.u32 2147483647, %v307_v49 }
  0xbc   :  { %v353_v1 = vadd.f32 1.0, %v1762_v60  ;;  %vm313_vm4 = vweird.f32 %v307_v49  ;;  %v73_v60 = vld [vmem:[#allocation3] sm:$0x3] }
  0xbd   :  { %1765 = vrcp.f32 %v329_v63  ;;  %v341_v35 = vand.u32 2147483648, %v329_v63  ;;  %v339_v28 = vand.u32 2147483647, %v329_v63  ;;  %v320_v39 = vor.u32 1.1754944e-38, %v319_v19 }
  0xbe   :  { %1767 = vrcp.f32 %v353_v1  ;;  %vm318_vm7 = vcmp.eq.f32.partialorder %v317_v31, 8.507059e+37  ;;  %vm335_vm8 = vweird.f32 %v329_v63  ;;  %vm359_vm12 = vweird.f32 %v353_v1 }
  0xbf   :  { %1769 = vtanh.f32 %v345_v11  ;;  %vm340_vm10 = vcmp.eq.f32.partialorder %v339_v28, 8.507059e+37 }
  0xc1   :  { %v1764_v2 = vpop.eup %1763 }
  0xc2   :  { %v309_v4 = vmul.f32 %v1764_v2, %v307_v49  ;;  %vm314_vm3 = vweird.f32 %v1764_v2 }
  0xc3   :  { %v1766_v6 = vpop.eup %1765  ;;  %vm315_vm6 = vmor %vm313_vm4, %vm314_vm3 }
  0xc4   :  { %v1768_v13 = vpop.eup %1767  ;;  %v310_v14 = vsub.f32 1.0, %v309_v4  ;;  %v331_v18 = vmul.f32 %v1766_v6, %v329_v63  ;;  %vm336_vm5 = vweird.f32 %v1766_v6  ;;  %v363_v63 = vand.u32 2147483647, %v353_v1 }
  0xc5   :  { %v355_v22 = vmul.f32 %v1768_v13, %v353_v1  ;;  %vm337_vm9 = vmor %vm335_vm8, %vm336_vm5  ;;  %v1770_v11 = vpop.eup %1769  ;;  %vm360_vm11 = vweird.f32 %v1768_v13 }
  0xc6   :  { %v332_v23 = vsub.f32 1.0, %v331_v18  ;;  %v311_v30 = vmul.f32 %v1764_v2, %v310_v14  ;;  %v342_v14 = vor.u32 1.1754944e-38, %v341_v35  ;;  %vm361_vm13 = vmor %vm359_vm12, %vm360_vm11  ;;  %vm364_vm14 = vcmp.eq.f32.partialorder %v363_v63, 8.507059e+37 }
  0xc7   :  { %v356_v40 = vsub.f32 1.0, %v355_v22 }
  0xc8   :  { %v312_v36 = vadd.f32 %v1764_v2, %v311_v30  ;;  %v333_v37 = vmul.f32 %v1766_v6, %v332_v23 }
  0xc9   :  { %v357_v23 = vmul.f32 %v1768_v13, %v356_v40 }
  0xca   :  { %v316_v47 = vsel %vm315_vm6, %v1764_v2, %v312_v36  ;;  %v334_v59 = vadd.f32 %v1766_v6, %v333_v37  ;;  %v365_v2 = vand.u32 2147483648, %v353_v1  ;;  %v2718_v1 = vld [vmem:[#allocation6_spill] sm:$0xff] }
  0xcb   :  { %v321_v4 = vsel %vm318_vm7, %v320_v39, %v316_v47  ;;  %v358_v19 = vadd.f32 %v1768_v13, %v357_v23 }
  0xcc   :  { %v338_v49 = vsel %vm337_vm9, %v1766_v6, %v334_v59  ;;  %v370_v42 = vmul.f32 %v1770_v11, %v321_v4  ;;  %v366_v31 = vor.u32 1.1754944e-38, %v365_v2 }
  0xcd   :  { %v343_v18 = vsel %vm340_vm10, %v342_v14, %v338_v49  ;;  %v362_v22 = vsel %vm361_vm13, %v1768_v13, %v358_v19  ;;  %v2364_v13 = vld [vmem:[%s2698_s3] ss:$0 sm:$0xff]  ;;  %v2373_v14 = vld [vmem:[%s2700_s0 + $0x4] sm:$0xff]  }
  0xce   :  { %v369_v30 = vmul.f32 %v343_v18, %v73_v60  ;;  %v367_v35 = vsel %vm364_vm14, %v366_v31, %v362_v22  ;;  %2719 = vst [vmem:[#allocation7_spill] sm:$0xff] %v2364_v13  ;;  %v442_v19 = vunpack.c.l.bf16 %v2373_v14 }
  0xcf   :  { %2720 = vst [vmem:[#allocation8_spill] sm:$0xff] %v2373_v14 }
  0xd0   :  { %v2318_v26 = vadd.f32 %v370_v42, %v369_v30  ;;  %v2717_v42 = vld [vmem:[#allocation5_spill] sm:$0xff] }
  0xd2   :  { %1771 = vtanh.f32 %v2318_v26 }
  0xd8   :  { %v1772_v6 = vpop.eup %1771 }
  0xd9   :  { %v373_v36 = vmul.f32 %v1772_v6, %v367_v35 }
  0xdb   :  { %v374_v37 = vpack.c.bf16 %v373_v36, %v373_v36 }
  0xdd   :  { %434 = vmatmul.bf16.vlgmr.msrb.gmra.mxu0 %v374_v37  ;;  %451 = vmatmul.bf16.vlgmr.msrb.gmra.mxu1 %v374_v37 }
  0xde   :  { %464 = vmatmul.bf16.vlgmr.msrb.gmra.mxu2 %v374_v37  ;;  %477 = vmatmul.bf16.vlgmr.msrb.gmra.mxu3 %v374_v37 }
  0xdf   :  { %622 = vmatpush.bf16.msrb.mxu0 %v1942_v8  ;;  %635 = vmatpush.bf16.msrb.mxu1 %v1954_v12 }
  0xe0   :  { %731 = vmatpush.bf16.msrb.mxu2 %v2251_v51  ;;  %749 = vmatpush.bf16.msrb.mxu3 %v1929_v3 }
  0xe3   :  { %623 = vmatpush.bf16.msrb.mxu0 %v1981_v21  ;;  %636 = vmatpush.bf16.msrb.mxu1 %v1992_v25 }
  0xe4   :  { %732 = vmatpush.bf16.msrb.mxu2 %v2258_v52  ;;  %750 = vmatpush.bf16.msrb.mxu3 %v1967_v16 }
  0xe7   :  { %624 = vmatpush.bf16.msrb.mxu0 %v2019_v34  ;;  %637 = vmatpush.bf16.msrb.mxu1 %v2031_v38 }
  0xe8   :  { %733 = vmatpush.bf16.msrb.mxu2 %v2265_v53  ;;  %751 = vmatpush.bf16.msrb.mxu3 %v2004_v29 }
  0xeb   :  { %625 = vmatpush.bf16.msrb.mxu0 %v2055_v46  ;;  %638 = vmatpush.bf16.msrb.mxu1 %v2067_v50 }
  0xec   :  { %734 = vmatpush.bf16.msrb.mxu2 %v2272_v54  ;;  %752 = vmatpush.bf16.msrb.mxu3 %v2049_v44 }
  0xed   :  { %490 = vmatmul.bf16.vlgmr.msra.gmra.mxu0 %v374_v37 }
  0xef   :  { %626 = vmatpush.bf16.msrb.mxu0 %v2091_v58  ;;  %639 = vmatpush.bf16.msrb.mxu1 %v2103_v62 }
  0xf0   :  { %735 = vmatpush.bf16.msrb.mxu2 %v2279_v55  ;;  %753 = vmatpush.bf16.msrb.mxu3 %v2085_v56 }
  0xf3   :  { %627 = vmatpush.bf16.msrb.mxu0 %v2130_v10  ;;  %640 = vmatpush.bf16.msrb.mxu1 %v2142_v15 }
  0xf4   :  { %736 = vmatpush.bf16.msrb.mxu2 %v2286_v61  ;;  %754 = vmatpush.bf16.msrb.mxu3 %v2121_v5 }
  0xf7   :  { %628 = vmatpush.bf16.msrb.mxu0 %v2163_v27  ;;  %641 = vmatpush.bf16.msrb.mxu1 %v2175_v32 }
  0xf8   :  { %737 = vmatpush.bf16.msrb.mxu2 %v2292_v0  ;;  %755 = vmatpush.bf16.msrb.mxu3 %v2157_v24 }
  0xfb   :  { %629 = vmatpush.bf16.msrb.mxu0 %v2199_v43  ;;  %642 = vmatpush.bf16.msrb.mxu1 %v2202_v48 }
  0xfc   :  { %738 = vmatpush.bf16.msrb.mxu2 %v2303_v20  ;;  %756 = vmatpush.bf16.msrb.mxu3 %v2193_v41 }
  0xff   :  { %762 = vmatpush.bf16.msra.mxu0 %v1940_v7 }
 0x103   :  { %763 = vmatpush.bf16.msra.mxu0 %v1969_v17 }
 0x107   :  { %764 = vmatpush.bf16.msra.mxu0 %v2017_v33 }
 0x10b   :  { %765 = vmatpush.bf16.msra.mxu0 %v2053_v45 }
 0x10f   :  { %766 = vmatpush.bf16.msra.mxu0 %v2089_v57 }
 0x113   :  { %767 = vmatpush.bf16.msra.mxu0 %v2128_v9 }
 0x117   :  { %768 = vmatpush.bf16.msra.mxu0 %v2717_v42 }
 0x11b   :  { %769 = vmatpush.bf16.msra.mxu0 %v2718_v1 }
 0x15a   :  { %v435_v28 = vpop.f32.mrf.mxu0  ;;  %v452_v39 = vpop.f32.mrf.mxu1 }
 0x15b   :  { %v436_v40 = vadd.f32 %v2364_v13, %v435_v28 }
 0x15d   :  { %439 = vst [vmem:[%s2701_s4] sm:$0x3] %v436_v40 }
 0x161   :  { %v465_v47 = vpop.f32.mrf.mxu2  ;;  %v478_v59 = vpop.f32.mrf.mxu3 }
 0x162   :  { %v437_v60 = vpop.f32.mrf.mxu0  ;;  %v454_v4 = vpop.f32.mrf.mxu1  ;;  %v499_v49 = vrot.slane %v465_v47, 6  ;;  %v500_v30 = vrot.slane %v478_v59, 4 }
 0x164   :  { %v502_v63 = vsel %vm296_vm0, %v452_v39, %v499_v49 }
 0x169   :  { %v467_v11 = vpop.f32.mrf.mxu2  ;;  %v480_v18 = vpop.f32.mrf.mxu3 }
 0x16a   :  { %v491_v23 = vpop.f32.mrf.mxu0 }
 0x16b   :  { %v501_v2 = vrot.slane %v491_v23, 2 }
 0x16d   :  { %v503_v22 = vsel %vm298_vm1, %v500_v30, %v501_v2 }
 0x16e   :  { %v504_v31 = vsel %vm300_vm2, %v502_v63, %v503_v22 }
 0x16f   :  { %v506_v6 = vadd.f32 %v504_v31, %v442_v19 }
 0x171   :  { %v1681_v35 = vmul.f32 -1.442695, %v506_v6  ;;  %v527_v36 = vrot.slane %v506_v6, 2  ;;  %v551_v37 = vrot.slane %v506_v6, 6  ;;  %v548_v19 = vrot.slane %v506_v6, 4 }
 0x172   :  { %v493_v28 = vpop.f32.mrf.mxu0 }
 0x173   :  { %1773 = vpow2.f32 %v1681_v35  ;;  %v1682_v40 = vmul.f32 -1.442695, %v527_v36  ;;  %v1683_v47 = vmul.f32 -1.442695, %v551_v37 }
 0x175   :  { %1775 = vpow2.f32 %v1682_v40 }
 0x176   :  { %1777 = vpow2.f32 %v1683_v47 }
 0x179   :  { %v1774_v59 = vpop.eup %1773 }
 0x17a   :  { %v510_v60 = vadd.f32 1.0, %v1774_v59 }
 0x17b   :  { %v1776_v4 = vpop.eup %1775 }
 0x17c   :  { %v1778_v11 = vpop.eup %1777  ;;  %1779 = vrcp.f32 %v510_v60  ;;  %v532_v39 = vadd.f32 1.0, %v1776_v4  ;;  %v522_v31 = vand.u32 2147483648, %v510_v60  ;;  %v520_v28 = vand.u32 2147483647, %v510_v60 }
 0x17d   :  { %v556_v49 = vadd.f32 1.0, %v1778_v11  ;;  %vm516_vm3 = vweird.f32 %v510_v60 }
 0x17e   :  { %1781 = vrcp.f32 %v532_v39  ;;  %v544_v40 = vand.u32 2147483648, %v532_v39  ;;  %v542_v4 = vand.u32 2147483647, %v532_v39  ;;  %v523_v11 = vor.u32 1.1754944e-38, %v522_v31 }
 0x17f   :  { %1783 = vrcp.f32 %v556_v49  ;;  %vm521_vm6 = vcmp.eq.f32.partialorder %v520_v28, 8.507059e+37  ;;  %vm538_vm7 = vweird.f32 %v532_v39  ;;  %v568_v31 = vand.u32 2147483648, %v556_v49 }
 0x180   :  { %1785 = vtanh.f32 %v548_v19  ;;  %vm543_vm9 = vcmp.eq.f32.partialorder %v542_v4, 8.507059e+37  ;;  %vm562_vm11 = vweird.f32 %v556_v49 }
 0x182   :  { %v1780_v18 = vpop.eup %1779 }
 0x183   :  { %v512_v23 = vmul.f32 %v1780_v18, %v510_v60  ;;  %vm517_vm15 = vweird.f32 %v1780_v18 }
 0x184   :  { %v1782_v30 = vpop.eup %1781  ;;  %vm518_vm5 = vmor %vm516_vm3, %vm517_vm15 }
 0x185   :  { %v1784_v2 = vpop.eup %1783  ;;  %v513_v63 = vsub.f32 1.0, %v512_v23  ;;  %v534_v22 = vmul.f32 %v1782_v30, %v532_v39  ;;  %vm539_vm4 = vweird.f32 %v1782_v30  ;;  %v566_v39 = vand.u32 2147483647, %v556_v49 }
 0x186   :  { %v558_v35 = vmul.f32 %v1784_v2, %v556_v49  ;;  %vm540_vm8 = vmor %vm538_vm7, %vm539_vm4  ;;  %v1786_v1 = vpop.eup %1785  ;;  %vm563_vm10 = vweird.f32 %v1784_v2  ;;  %v2724_v49 = vld [vmem:[#allocation7_spill] sm:$0xff] }
 0x187   :  { %v535_v36 = vsub.f32 1.0, %v534_v22  ;;  %v514_v37 = vmul.f32 %v1780_v18, %v513_v63  ;;  %v545_v22 = vor.u32 1.1754944e-38, %v544_v40  ;;  %vm564_vm12 = vmor %vm562_vm11, %vm563_vm10  ;;  %vm567_vm13 = vcmp.eq.f32.partialorder %v566_v39, 8.507059e+37 }
 0x188   :  { %v559_v14 = vsub.f32 1.0, %v558_v35  ;;  %v569_v35 = vor.u32 1.1754944e-38, %v568_v31 }
 0x189   :  { %v515_v47 = vadd.f32 %v1780_v18, %v514_v37  ;;  %v536_v59 = vmul.f32 %v1782_v30, %v535_v36 }
 0x18a   :  { %v560_v60 = vmul.f32 %v1784_v2, %v559_v14 }
 0x18b   :  { %v519_v6 = vsel %vm518_vm5, %v1780_v18, %v515_v47  ;;  %v537_v23 = vadd.f32 %v1782_v30, %v536_v59 }
 0x18c   :  { %v524_v13 = vsel %vm521_vm6, %v523_v11, %v519_v6  ;;  %v561_v9 = vadd.f32 %v1784_v2, %v560_v60 }
 0x18d   :  { %v541_v63 = vsel %vm540_vm8, %v1782_v30, %v537_v23  ;;  %v573_v36 = vmul.f32 %v1786_v1, %v524_v13  ;;  %v2723_v1 = vld [vmem:[#allocation6_spill] sm:$0xff] }
 0x18e   :  { %v546_v19 = vsel %vm543_vm9, %v545_v22, %v541_v63  ;;  %v565_v18 = vsel %vm564_vm12, %v1784_v2, %v561_v9  ;;  %v2721_v9 = vld [vmem:[#allocation4_spill] sm:$0xff] }
 0x18f   :  { %v572_v37 = vmul.f32 %v546_v19, %v2318_v26  ;;  %v570_v28 = vsel %vm567_vm13, %v569_v35, %v565_v18  ;;  %v2722_v26 = vld [vmem:[#allocation5_spill] sm:$0xff] }
 0x191   :  { %v2380_v42 = vadd.f32 %v573_v36, %v572_v37  ;;  %v2725_v37 = vld [vmem:[#allocation8_spill] sm:$0xff] }
 0x192   :  { %v595_v36 = vunpack.c.h.bf16 %v2725_v37 }
 0x193   :  { %1787 = vtanh.f32 %v2380_v42 }
 0x199   :  { %v1788_v30 = vpop.eup %1787 }
 0x19a   :  { %v576_v40 = vmul.f32 %v1788_v30, %v570_v28 }
 0x19c   :  { %v577_v14 = vpack.c.bf16 %v576_v40, %v576_v40 }
 0x19e   :  { %586 = vmatmul.bf16.vlgmr.msra.gmra.mxu1 %v577_v14  ;;  %604 = vmatmul.bf16.vlgmr.msra.gmra.mxu2 %v577_v14 }
 0x19f   :  { %617 = vmatmul.bf16.vlgmr.msra.gmra.mxu3 %v577_v14  ;;  %630 = vmatmul.bf16.vlgmr.msrb.gmra.mxu0 %v577_v14 }
 0x1a0   :  { %775 = vmatpush.bf16.msra.mxu1 %v1942_v8  ;;  %788 = vmatpush.bf16.msra.mxu2 %v1954_v12 }
 0x1a1   :  { %884 = vmatpush.bf16.msra.mxu3 %v2251_v51  ;;  %902 = vmatpush.bf16.msrb.mxu0 %v1929_v3 }
 0x1a4   :  { %776 = vmatpush.bf16.msra.mxu1 %v1981_v21  ;;  %789 = vmatpush.bf16.msra.mxu2 %v1992_v25 }
 0x1a5   :  { %885 = vmatpush.bf16.msra.mxu3 %v2258_v52  ;;  %903 = vmatpush.bf16.msrb.mxu0 %v1967_v16 }
 0x1a8   :  { %777 = vmatpush.bf16.msra.mxu1 %v2019_v34  ;;  %790 = vmatpush.bf16.msra.mxu2 %v2031_v38 }
 0x1a9   :  { %886 = vmatpush.bf16.msra.mxu3 %v2265_v53  ;;  %904 = vmatpush.bf16.msrb.mxu0 %v2004_v29 }
 0x1ac   :  { %778 = vmatpush.bf16.msra.mxu1 %v2055_v46  ;;  %791 = vmatpush.bf16.msra.mxu2 %v2067_v50 }
 0x1ad   :  { %887 = vmatpush.bf16.msra.mxu3 %v2272_v54  ;;  %905 = vmatpush.bf16.msrb.mxu0 %v2049_v44 }
 0x1ae   :  { %643 = vmatmul.bf16.vlgmr.msrb.gmra.mxu1 %v577_v14 }
 0x1b0   :  { %779 = vmatpush.bf16.msra.mxu1 %v2091_v58  ;;  %792 = vmatpush.bf16.msra.mxu2 %v2103_v62 }
 0x1b1   :  { %888 = vmatpush.bf16.msra.mxu3 %v2279_v55  ;;  %906 = vmatpush.bf16.msrb.mxu0 %v2085_v56 }
 0x1b4   :  { %780 = vmatpush.bf16.msra.mxu1 %v2130_v10  ;;  %793 = vmatpush.bf16.msra.mxu2 %v2142_v15 }
 0x1b5   :  { %889 = vmatpush.bf16.msra.mxu3 %v2286_v61  ;;  %907 = vmatpush.bf16.msrb.mxu0 %v2121_v5 }
 0x1b8   :  { %781 = vmatpush.bf16.msra.mxu1 %v2163_v27  ;;  %794 = vmatpush.bf16.msra.mxu2 %v2175_v32 }
 0x1b9   :  { %890 = vmatpush.bf16.msra.mxu3 %v2292_v0  ;;  %908 = vmatpush.bf16.msrb.mxu0 %v2157_v24 }
 0x1bc   :  { %782 = vmatpush.bf16.msra.mxu1 %v2199_v43  ;;  %795 = vmatpush.bf16.msra.mxu2 %v2202_v48 }
 0x1bd   :  { %891 = vmatpush.bf16.msra.mxu3 %v2303_v20  ;;  %909 = vmatpush.bf16.msrb.mxu0 %v2193_v41 }
 0x1c0   :  { %915 = vmatpush.bf16.msrb.mxu1 %v1940_v7 }
 0x1c4   :  { %916 = vmatpush.bf16.msrb.mxu1 %v1969_v17 }
 0x1c8   :  { %917 = vmatpush.bf16.msrb.mxu1 %v2017_v33 }
 0x1cc   :  { %918 = vmatpush.bf16.msrb.mxu1 %v2053_v45 }
 0x1d0   :  { %919 = vmatpush.bf16.msrb.mxu1 %v2089_v57 }
 0x1d4   :  { %920 = vmatpush.bf16.msrb.mxu1 %v2721_v9 }
 0x1d8   :  { %921 = vmatpush.bf16.msrb.mxu1 %v2722_v26 }
 0x1dc   :  { %922 = vmatpush.bf16.msrb.mxu1 %v2723_v1 }
 0x21b   :  { %v587_v13 = vpop.f32.mrf.mxu1 }
 0x21c   :  { %v588_v2 = vadd.f32 %v2724_v49, %v587_v13  ;;  %v631_v47 = vpop.f32.mrf.mxu0 }
 0x21d   :  { %v653_v60 = vrot.slane %v631_v47, 4 }
 0x21e   :  { %1684 = vst [vmem:[%s2701_s4 + $0x2] sm:$0x3] %v588_v2 }
 0x221   :  { %v605_v59 = vpop.f32.mrf.mxu2 }
 0x222   :  { %v618_v4 = vpop.f32.mrf.mxu3 }
 0x223   :  { %v589_v11 = vpop.f32.mrf.mxu1  ;;  %v652_v22 = vrot.slane %v618_v4, 6 }
 0x224   :  { %v633_v6 = vpop.f32.mrf.mxu0 }
 0x225   :  { %v655_v39 = vsel %vm296_vm0, %v605_v59, %v652_v22 }
 0x229   :  { %v607_v23 = vpop.f32.mrf.mxu2 }
 0x22a   :  { %v620_v63 = vpop.f32.mrf.mxu3 }
 0x22b   :  { %v644_v19 = vpop.f32.mrf.mxu1 }
 0x22c   :  { %v654_v31 = vrot.slane %v644_v19, 2 }
 0x22e   :  { %v656_v18 = vsel %vm298_vm1, %v653_v60, %v654_v31 }
 0x22f   :  { %v657_v35 = vsel %vm300_vm2, %v655_v39, %v656_v18 }
 0x230   :  { %v659_v30 = vadd.f32 %v657_v35, %v595_v36 }
 0x232   :  { %v1686_v28 = vmul.f32 -1.442695, %v659_v30  ;;  %v680_v40 = vrot.slane %v659_v30, 2  ;;  %v704_v14 = vrot.slane %v659_v30, 6  ;;  %v701_v37 = vrot.slane %v659_v30, 4 }
 0x233   :  { %v646_v13 = vpop.f32.mrf.mxu1 }
 0x234   :  { %1789 = vpow2.f32 %v1686_v28  ;;  %v1687_v2 = vmul.f32 -1.442695, %v680_v40  ;;  %v1688_v4 = vmul.f32 -1.442695, %v704_v14 }
 0x236   :  { %1791 = vpow2.f32 %v1687_v2 }
 0x237   :  { %1793 = vpow2.f32 %v1688_v4 }
 0x23a   :  { %v1790_v47 = vpop.eup %1789 }
 0x23b   :  { %v663_v11 = vadd.f32 1.0, %v1790_v47 }
 0x23c   :  { %v1792_v6 = vpop.eup %1791 }
 0x23d   :  { %v1794_v23 = vpop.eup %1793  ;;  %1795 = vrcp.f32 %v663_v11  ;;  %v685_v59 = vadd.f32 1.0, %v1792_v6  ;;  %v675_v18 = vand.u32 2147483648, %v663_v11  ;;  %v673_v14 = vand.u32 2147483647, %v663_v11 }
 0x23e   :  { %v709_v22 = vadd.f32 1.0, %v1794_v23  ;;  %vm669_vm15 = vweird.f32 %v663_v11 }
 0x23f   :  { %1797 = vrcp.f32 %v685_v59  ;;  %v697_v13 = vand.u32 2147483648, %v685_v59  ;;  %v695_v47 = vand.u32 2147483647, %v685_v59  ;;  %v676_v6 = vor.u32 1.1754944e-38, %v675_v18 }
 0x240   :  { %1799 = vrcp.f32 %v709_v22  ;;  %vm674_vm5 = vcmp.eq.f32.partialorder %v673_v14, 8.507059e+37  ;;  %vm691_vm6 = vweird.f32 %v685_v59  ;;  %v721_v18 = vand.u32 2147483648, %v709_v22 }
 0x241   :  { %1801 = vtanh.f32 %v701_v37  ;;  %vm696_vm8 = vcmp.eq.f32.partialorder %v695_v47, 8.507059e+37  ;;  %vm715_vm10 = vweird.f32 %v709_v22 }
 0x243   :  { %v1796_v63 = vpop.eup %1795 }
 0x244   :  { %v665_v19 = vmul.f32 %v1796_v63, %v663_v11  ;;  %vm670_vm14 = vweird.f32 %v1796_v63 }
 0x245   :  { %v1798_v60 = vpop.eup %1797  ;;  %vm671_vm4 = vmor %vm669_vm15, %vm670_vm14 }
 0x246   :  { %v1800_v36 = vpop.eup %1799  ;;  %v666_v31 = vsub.f32 1.0, %v665_v19  ;;  %v687_v39 = vmul.f32 %v1798_v60, %v685_v59  ;;  %vm692_vm3 = vweird.f32 %v1798_v60  ;;  %v719_v59 = vand.u32 2147483647, %v709_v22 }
 0x247   :  { %v711_v35 = vmul.f32 %v1800_v36, %v709_v22  ;;  %vm693_vm7 = vmor %vm691_vm6, %vm692_vm3  ;;  %v1802_v1 = vpop.eup %1801  ;;  %vm716_vm9 = vweird.f32 %v1800_v36 }
 0x248   :  { %v688_v28 = vsub.f32 1.0, %v687_v39  ;;  %v667_v40 = vmul.f32 %v1796_v63, %v666_v31  ;;  %v698_v39 = vor.u32 1.1754944e-38, %v697_v13  ;;  %vm717_vm11 = vmor %vm715_vm10, %vm716_vm9  ;;  %vm720_vm12 = vcmp.eq.f32.partialorder %v719_v59, 8.507059e+37 }
 0x249   :  { %v712_v23 = vsub.f32 1.0, %v711_v35  ;;  %v722_v35 = vor.u32 1.1754944e-38, %v721_v18 }
 0x24a   :  { %v668_v2 = vadd.f32 %v1796_v63, %v667_v40  ;;  %v689_v4 = vmul.f32 %v1798_v60, %v688_v28 }
 0x24b   :  { %v713_v11 = vmul.f32 %v1800_v36, %v712_v23 }
 0x24c   :  { %v672_v30 = vsel %vm671_vm4, %v1796_v63, %v668_v2  ;;  %v690_v19 = vadd.f32 %v1798_v60, %v689_v4 }
 0x24d   :  { %v677_v49 = vsel %vm674_vm5, %v676_v6, %v672_v30  ;;  %v714_v9 = vadd.f32 %v1800_v36, %v713_v11 }
 0x24e   :  { %v694_v31 = vsel %vm693_vm7, %v1798_v60, %v690_v19  ;;  %v726_v28 = vmul.f32 %v1802_v1, %v677_v49 }
 0x24f   :  { %v699_v37 = vsel %vm696_vm8, %v698_v39, %v694_v31  ;;  %v718_v63 = vsel %vm717_vm11, %v1800_v36, %v714_v9  ;;  %v2482_v36 = vld [vmem:[%s2700_s0 + $0xc] sm:$0xff]  }
 0x250   :  { %v725_v40 = vmul.f32 %v699_v37, %v2380_v42  ;;  %v723_v14 = vsel %vm720_vm12, %v722_v35, %v718_v63  ;;  %v748_v23 = vunpack.c.l.bf16 %v2482_v36 }
 0x252   :  { %v2432_v26 = vadd.f32 %v726_v28, %v725_v40 }
 0x254   :  { %1803 = vtanh.f32 %v2432_v26 }
 0x25a   :  { %v1804_v60 = vpop.eup %1803 }
 0x25b   :  { %v729_v13 = vmul.f32 %v1804_v60, %v723_v14 }
 0x25d   :  { %v730_v2 = vpack.c.bf16 %v729_v13, %v729_v13 }
 0x25f   :  { %739 = vmatmul.bf16.vlgmr.msrb.gmra.mxu2 %v730_v2  ;;  %757 = vmatmul.bf16.vlgmr.msrb.gmra.mxu3 %v730_v2 }
 0x260   :  { %770 = vmatmul.bf16.vlgmr.msra.gmra.mxu0 %v730_v2  ;;  %783 = vmatmul.bf16.vlgmr.msra.gmra.mxu1 %v730_v2 }
 0x261   :  { %928 = vmatpush.bf16.msrb.mxu2 %v1942_v8  ;;  %941 = vmatpush.bf16.msrb.mxu3 %v1954_v12 }
 0x262   :  { %1037 = vmatpush.bf16.msra.mxu0 %v2251_v51  ;;  %1055 = vmatpush.bf16.msra.mxu1 %v1929_v3  ;;  %v2726_v51 = vld [vmem:[#allocation4_spill] sm:$0xff] }
 0x265   :  { %929 = vmatpush.bf16.msrb.mxu2 %v1981_v21  ;;  %942 = vmatpush.bf16.msrb.mxu3 %v1992_v25 }
 0x266   :  { %1038 = vmatpush.bf16.msra.mxu0 %v2258_v52  ;;  %1056 = vmatpush.bf16.msra.mxu1 %v1967_v16  ;;  %v2727_v52 = vld [vmem:[#allocation5_spill] sm:$0xff] }
 0x269   :  { %930 = vmatpush.bf16.msrb.mxu2 %v2019_v34  ;;  %943 = vmatpush.bf16.msrb.mxu3 %v2031_v38 }
 0x26a   :  { %1039 = vmatpush.bf16.msra.mxu0 %v2265_v53  ;;  %1057 = vmatpush.bf16.msra.mxu1 %v2004_v29  ;;  %v2728_v53 = vld [vmem:[#allocation6_spill] sm:$0xff] }
 0x26d   :  { %931 = vmatpush.bf16.msrb.mxu2 %v2055_v46  ;;  %944 = vmatpush.bf16.msrb.mxu3 %v2067_v50 }
 0x26e   :  { %1040 = vmatpush.bf16.msra.mxu0 %v2272_v54  ;;  %1058 = vmatpush.bf16.msra.mxu1 %v2049_v44 }
 0x26f   :  { %796 = vmatmul.bf16.vlgmr.msra.gmra.mxu2 %v730_v2 }
 0x271   :  { %932 = vmatpush.bf16.msrb.mxu2 %v2091_v58  ;;  %945 = vmatpush.bf16.msrb.mxu3 %v2103_v62 }
 0x272   :  { %1041 = vmatpush.bf16.msra.mxu0 %v2279_v55  ;;  %1059 = vmatpush.bf16.msra.mxu1 %v2085_v56 }
 0x275   :  { %933 = vmatpush.bf16.msrb.mxu2 %v2130_v10  ;;  %946 = vmatpush.bf16.msrb.mxu3 %v2142_v15 }
 0x276   :  { %1042 = vmatpush.bf16.msra.mxu0 %v2286_v61  ;;  %1060 = vmatpush.bf16.msra.mxu1 %v2121_v5 }
 0x279   :  { %934 = vmatpush.bf16.msrb.mxu2 %v2163_v27  ;;  %947 = vmatpush.bf16.msrb.mxu3 %v2175_v32 }
 0x27a   :  { %1043 = vmatpush.bf16.msra.mxu0 %v2292_v0  ;;  %1061 = vmatpush.bf16.msra.mxu1 %v2157_v24 }
 0x27d   :  { %935 = vmatpush.bf16.msrb.mxu2 %v2199_v43  ;;  %948 = vmatpush.bf16.msrb.mxu3 %v2202_v48 }
 0x27e   :  { %1044 = vmatpush.bf16.msra.mxu0 %v2303_v20  ;;  %1062 = vmatpush.bf16.msra.mxu1 %v2193_v41  ;;  %v2729_v20 = vld [vmem:[#allocation7_spill] sm:$0xff] }
 0x281   :  { %1068 = vmatpush.bf16.msra.mxu2 %v1940_v7 }
 0x285   :  { %1069 = vmatpush.bf16.msra.mxu2 %v1969_v17 }
 0x289   :  { %1070 = vmatpush.bf16.msra.mxu2 %v2017_v33 }
 0x28d   :  { %1071 = vmatpush.bf16.msra.mxu2 %v2053_v45 }
 0x291   :  { %1072 = vmatpush.bf16.msra.mxu2 %v2089_v57 }
 0x295   :  { %1073 = vmatpush.bf16.msra.mxu2 %v2726_v51 }
 0x299   :  { %1074 = vmatpush.bf16.msra.mxu2 %v2727_v52 }
 0x29d   :  { %1075 = vmatpush.bf16.msra.mxu2 %v2728_v53 }
 0x2dd   :  { %v771_v54 = vpop.f32.mrf.mxu0  ;;  %v784_v55 = vpop.f32.mrf.mxu1 }
 0x2de   :  { %v805_v47 = vrot.slane %v771_v54, 6  ;;  %v806_v6 = vrot.slane %v784_v55, 4 }
 0x2e2   :  { %v740_v61 = vpop.f32.mrf.mxu2  ;;  %v758_v0 = vpop.f32.mrf.mxu3 }
 0x2e3   :  { %v741_v42 = vadd.f32 %v2729_v20, %v740_v61  ;;  %v808_v19 = vsel %vm296_vm0, %v758_v0, %v805_v47 }
 0x2e5   :  { %1689 = vst [vmem:[%s2701_s4 + $0x4] sm:$0x3] %v741_v42  ;;  %v773_v9 = vpop.f32.mrf.mxu0  ;;  %v786_v1 = vpop.f32.mrf.mxu1 }
 0x2ea   :  { %v742_v49 = vpop.f32.mrf.mxu2  ;;  %v760_v22 = vpop.f32.mrf.mxu3 }
 0x2f2   :  { %v797_v4 = vpop.f32.mrf.mxu2 }
 0x2f3   :  { %v807_v30 = vrot.slane %v797_v4, 2 }
 0x2f5   :  { %v809_v39 = vsel %vm298_vm1, %v806_v6, %v807_v30 }
 0x2f6   :  { %v810_v31 = vsel %vm300_vm2, %v808_v19, %v809_v39 }
 0x2f7   :  { %v812_v37 = vadd.f32 %v810_v31, %v748_v23 }
 0x2f9   :  { %v1691_v11 = vmul.f32 -1.442695, %v812_v37  ;;  %v833_v40 = vrot.slane %v812_v37, 2  ;;  %v857_v28 = vrot.slane %v812_v37, 6  ;;  %v854_v42 = vrot.slane %v812_v37, 4 }
 0x2fa   :  { %v799_v18 = vpop.f32.mrf.mxu2 }
 0x2fb   :  { %1805 = vpow2.f32 %v1691_v11  ;;  %v1692_v59 = vmul.f32 -1.442695, %v833_v40  ;;  %v1693_v63 = vmul.f32 -1.442695, %v857_v28 }
 0x2fd   :  { %1807 = vpow2.f32 %v1692_v59 }
 0x2fe   :  { %1809 = vpow2.f32 %v1693_v63 }
 0x301   :  { %v1806_v35 = vpop.eup %1805 }
 0x302   :  { %v816_v60 = vadd.f32 1.0, %v1806_v35 }
 0x303   :  { %v1808_v14 = vpop.eup %1807 }
 0x304   :  { %v1810_v13 = vpop.eup %1809  ;;  %1811 = vrcp.f32 %v816_v60  ;;  %v838_v2 = vadd.f32 1.0, %v1808_v14  ;;  %v828_v22 = vand.u32 2147483648, %v816_v60  ;;  %v826_v23 = vand.u32 2147483647, %v816_v60 }
 0x305   :  { %v862_v54 = vadd.f32 1.0, %v1810_v13  ;;  %vm822_vm14 = vweird.f32 %v816_v60 }
 0x306   :  { %1813 = vrcp.f32 %v838_v2  ;;  %v850_v30 = vand.u32 2147483648, %v838_v2  ;;  %v848_v31 = vand.u32 2147483647, %v838_v2  ;;  %v829_v11 = vor.u32 1.1754944e-38, %v828_v22 }
 0x307   :  { %1815 = vrcp.f32 %v862_v54  ;;  %vm827_vm4 = vcmp.eq.f32.partialorder %v826_v23, 8.507059e+37  ;;  %vm844_vm5 = vweird.f32 %v838_v2  ;;  %vm868_vm9 = vweird.f32 %v862_v54  ;;  %v2524_v23 = vld [vmem:[%s2699_s2 + $0x20] sm:$0xff] }
 0x308   :  { %1817 = vtanh.f32 %v854_v42  ;;  %v851_v59 = vor.u32 1.1754944e-38, %v850_v30  ;;  %vm849_vm7 = vcmp.eq.f32.partialorder %v848_v31, 8.507059e+37  ;;  %v2533_v30 = vld [vmem:[%s2699_s2 + $0x18] sm:$0xff]  ;;  %v2561_v31 = vld [vmem:[%s2699_s2] sm:$0xff] }
 0x30a   :  { %v1812_v55 = vpop.eup %1811 }
 0x30b   :  { %v818_v61 = vmul.f32 %v1812_v55, %v816_v60  ;;  %vm823_vm13 = vweird.f32 %v1812_v55 }
 0x30c   :  { %v1814_v0 = vpop.eup %1813  ;;  %vm824_vm3 = vmor %vm822_vm14, %vm823_vm13 }
 0x30d   :  { %v1816_v9 = vpop.eup %1815  ;;  %v819_v1 = vsub.f32 1.0, %v818_v61  ;;  %v840_v49 = vmul.f32 %v1814_v0, %v838_v2  ;;  %vm845_vm15 = vweird.f32 %v1814_v0  ;;  %v872_v2 = vand.u32 2147483647, %v862_v54 }
 0x30e   :  { %v864_v4 = vmul.f32 %v1816_v9, %v862_v54  ;;  %vm846_vm6 = vmor %vm844_vm5, %vm845_vm15  ;;  %v1818_v35 = vpop.eup %1817  ;;  %vm869_vm8 = vweird.f32 %v1816_v9 }
 0x30f   :  { %v841_v47 = vsub.f32 1.0, %v840_v49  ;;  %v820_v6 = vmul.f32 %v1812_v55, %v819_v1  ;;  %v874_v49 = vand.u32 2147483648, %v862_v54  ;;  %vm870_vm10 = vmor %vm868_vm9, %vm869_vm8  ;;  %vm873_vm11 = vcmp.eq.f32.partialorder %v872_v2, 8.507059e+37  ;;  %v2506_v54 = vld [vmem:[%s2699_s2 + $0x30] sm:$0xff] }
 0x310   :  { %v865_v40 = vsub.f32 1.0, %v864_v4 }
 0x311   :  { %v821_v19 = vadd.f32 %v1812_v55, %v820_v6  ;;  %v842_v39 = vmul.f32 %v1814_v0, %v841_v47  ;;  %v875_v22 = vor.u32 1.1754944e-38, %v874_v49 }
 0x312   :  { %v866_v60 = vmul.f32 %v1816_v9, %v865_v40 }
 0x313   :  { %v825_v37 = vsel %vm824_vm3, %v1812_v55, %v821_v19  ;;  %v843_v28 = vadd.f32 %v1814_v0, %v842_v39  ;;  %v2542_v19 = vld [vmem:[%s2699_s2 + $0x10] sm:$0xff]  ;;  %v2551_v39 = vld [vmem:[%s2699_s2 + $0x8] sm:$0xff] }
 0x314   :  { %v830_v18 = vsel %vm827_vm4, %v829_v11, %v825_v37  ;;  %v867_v1 = vadd.f32 %v1816_v9, %v866_v60 }
 0x315   :  { %v847_v63 = vsel %vm846_vm6, %v1814_v0, %v843_v28  ;;  %v879_v61 = vmul.f32 %v1818_v35, %v830_v18 }
 0x316   :  { %v852_v14 = vsel %vm849_vm7, %v851_v59, %v847_v63  ;;  %v871_v55 = vsel %vm870_vm10, %v1816_v9, %v867_v1  ;;  %v2515_v9 = vld [vmem:[%s2699_s2 + $0x28] sm:$0xff]  ;;  %v901_v1 = vunpack.c.h.bf16 %v2482_v36 }
 0x317   :  { %v878_v13 = vmul.f32 %v852_v14, %v2432_v26  ;;  %v876_v4 = vsel %vm873_vm11, %v875_v22, %v871_v55  ;;  %v2497_v26 = vld [vmem:[%s2699_s2 + $0x38] sm:$0xff] }
 0x319   :  { %v2489_v42 = vadd.f32 %v879_v61, %v878_v13 }
 0x31b   :  { %1819 = vtanh.f32 %v2489_v42 }
 0x321   :  { %v1820_v0 = vpop.eup %1819 }
 0x322   :  { %v882_v47 = vmul.f32 %v1820_v0, %v876_v4 }
 0x324   :  { %v883_v6 = vpack.c.bf16 %v882_v47, %v882_v47 }
 0x326   :  { %892 = vmatmul.bf16.vlgmr.msra.gmra.mxu3 %v883_v6  ;;  %910 = vmatmul.bf16.vlgmr.msrb.gmra.mxu0 %v883_v6 }
 0x327   :  { %923 = vmatmul.bf16.vlgmr.msrb.gmra.mxu1 %v883_v6  ;;  %936 = vmatmul.bf16.vlgmr.msrb.gmra.mxu2 %v883_v6 }
 0x328   :  { %1081 = vmatpush.bf16.msra.mxu3 %v1942_v8  ;;  %1094 = vmatpush.bf16.msrb.mxu0 %v1954_v12 }
 0x329   :  { %1190 = vmatpush.bf16.msrb.mxu1 %v2497_v26  ;;  %1208 = vmatpush.bf16.msrb.mxu2 %v1929_v3 }
 0x32c   :  { %1082 = vmatpush.bf16.msra.mxu3 %v1981_v21  ;;  %1095 = vmatpush.bf16.msrb.mxu0 %v1992_v25 }
 0x32d   :  { %1191 = vmatpush.bf16.msrb.mxu1 %v2506_v54  ;;  %1209 = vmatpush.bf16.msrb.mxu2 %v1967_v16 }
 0x330   :  { %1083 = vmatpush.bf16.msra.mxu3 %v2019_v34  ;;  %1096 = vmatpush.bf16.msrb.mxu0 %v2031_v38 }
 0x331   :  { %1192 = vmatpush.bf16.msrb.mxu1 %v2515_v9  ;;  %1210 = vmatpush.bf16.msrb.mxu2 %v2004_v29 }
 0x334   :  { %1084 = vmatpush.bf16.msra.mxu3 %v2055_v46  ;;  %1097 = vmatpush.bf16.msrb.mxu0 %v2067_v50 }
 0x335   :  { %1193 = vmatpush.bf16.msrb.mxu1 %v2524_v23  ;;  %1211 = vmatpush.bf16.msrb.mxu2 %v2049_v44 }
 0x336   :  { %949 = vmatmul.bf16.vlgmr.msrb.gmra.mxu3 %v883_v6 }
 0x338   :  { %1085 = vmatpush.bf16.msra.mxu3 %v2091_v58  ;;  %1098 = vmatpush.bf16.msrb.mxu0 %v2103_v62 }
 0x339   :  { %1194 = vmatpush.bf16.msrb.mxu1 %v2533_v30  ;;  %1212 = vmatpush.bf16.msrb.mxu2 %v2085_v56 }
 0x33c   :  { %1086 = vmatpush.bf16.msra.mxu3 %v2130_v10  ;;  %1099 = vmatpush.bf16.msrb.mxu0 %v2142_v15 }
 0x33d   :  { %1195 = vmatpush.bf16.msrb.mxu1 %v2542_v19  ;;  %1213 = vmatpush.bf16.msrb.mxu2 %v2121_v5 }
 0x340   :  { %1087 = vmatpush.bf16.msra.mxu3 %v2163_v27  ;;  %1100 = vmatpush.bf16.msrb.mxu0 %v2175_v32 }
 0x341   :  { %1196 = vmatpush.bf16.msrb.mxu1 %v2551_v39  ;;  %1214 = vmatpush.bf16.msrb.mxu2 %v2157_v24 }
 0x344   :  { %1088 = vmatpush.bf16.msra.mxu3 %v2199_v43  ;;  %1101 = vmatpush.bf16.msrb.mxu0 %v2202_v48 }
 0x345   :  { %1197 = vmatpush.bf16.msrb.mxu1 %v2561_v31  ;;  %1215 = vmatpush.bf16.msrb.mxu2 %v2193_v41 }
 0x348   :  { %1221 = vmatpush.bf16.msrb.mxu3 %v1940_v7 }
 0x34c   :  { %1222 = vmatpush.bf16.msrb.mxu3 %v1969_v17 }
 0x350   :  { %1223 = vmatpush.bf16.msrb.mxu3 %v2017_v33 }
 0x354   :  { %1224 = vmatpush.bf16.msrb.mxu3 %v2053_v45 }
 0x358   :  { %1225 = vmatpush.bf16.msrb.mxu3 %v2089_v57 }
 0x35c   :  { %1226 = vmatpush.bf16.msrb.mxu3 %v2726_v51 }
 0x360   :  { %1227 = vmatpush.bf16.msrb.mxu3 %v2727_v52 }
 0x364   :  { %1228 = vmatpush.bf16.msrb.mxu3 %v2728_v53 }
 0x3a3   :  { %v911_v11 = vpop.f32.mrf.mxu0 }
 0x3a4   :  { %v924_v40 = vpop.f32.mrf.mxu1 }
 0x3a5   :  { %v958_v60 = vrot.slane %v924_v40, 6 }
 0x3a7   :  { %v961_v2 = vsel %vm296_vm0, %v911_v11, %v958_v60 }
 0x3a9   :  { %v893_v37 = vpop.f32.mrf.mxu3 }
 0x3aa   :  { %v894_v28 = vadd.f32 %v2729_v20, %v893_v37  ;;  %v937_v18 = vpop.f32.mrf.mxu2 }
 0x3ab   :  { %v913_v59 = vpop.f32.mrf.mxu0  ;;  %v959_v61 = vrot.slane %v937_v18, 4 }
 0x3ac   :  { %1694 = vst [vmem:[%s2701_s4 + $0x6] sm:$0x3] %v894_v28  ;;  %v926_v63 = vpop.f32.mrf.mxu1 }
 0x3b1   :  { %v895_v35 = vpop.f32.mrf.mxu3 }
 0x3b2   :  { %v939_v14 = vpop.f32.mrf.mxu2 }
 0x3b9   :  { %v950_v13 = vpop.f32.mrf.mxu3 }
 0x3ba   :  { %v960_v49 = vrot.slane %v950_v13, 2 }
 0x3bc   :  { %v962_v55 = vsel %vm298_vm1, %v959_v61, %v960_v49 }
 0x3bd   :  { %v963_v20 = vsel %vm300_vm2, %v961_v2, %v962_v55 }
 0x3be   :  { %v965_v22 = vadd.f32 %v963_v20, %v901_v1 }
 0x3c0   :  { %v1696_v0 = vmul.f32 -1.442695, %v965_v22  ;;  %v986_v4 = vrot.slane %v965_v22, 2  ;;  %v1010_v47 = vrot.slane %v965_v22, 6  ;;  %v1007_v13 = vrot.slane %v965_v22, 4 }
 0x3c1   :  { %v952_v6 = vpop.f32.mrf.mxu3 }
 0x3c2   :  { %1821 = vpow2.f32 %v1696_v0  ;;  %v1697_v37 = vmul.f32 -1.442695, %v986_v4  ;;  %v1698_v28 = vmul.f32 -1.442695, %v1010_v47 }
 0x3c4   :  { %1823 = vpow2.f32 %v1697_v37 }
 0x3c5   :  { %1825 = vpow2.f32 %v1698_v28 }
 0x3c8   :  { %v1822_v40 = vpop.eup %1821 }
 0x3c9   :  { %v969_v18 = vadd.f32 1.0, %v1822_v40 }
 0x3ca   :  { %v1824_v36 = vpop.eup %1823 }
 0x3cb   :  { %v1826_v59 = vpop.eup %1825  ;;  %1827 = vrcp.f32 %v969_v18  ;;  %v991_v11 = vadd.f32 1.0, %v1824_v36  ;;  %v981_v2 = vand.u32 2147483648, %v969_v18  ;;  %v979_v4 = vand.u32 2147483647, %v969_v18 }
 0x3cc   :  { %v1015_v63 = vadd.f32 1.0, %v1826_v59  ;;  %vm975_vm13 = vweird.f32 %v969_v18 }
 0x3cd   :  { %1829 = vrcp.f32 %v991_v11  ;;  %v1003_v47 = vand.u32 2147483648, %v991_v11  ;;  %v1001_v28 = vand.u32 2147483647, %v991_v11  ;;  %v982_v40 = vor.u32 1.1754944e-38, %v981_v2 }
 0x3ce   :  { %1831 = vrcp.f32 %v1015_v63  ;;  %vm980_vm3 = vcmp.eq.f32.partialorder %v979_v4, 8.507059e+37  ;;  %vm997_vm4 = vweird.f32 %v991_v11  ;;  %v1027_v2 = vand.u32 2147483648, %v1015_v63 }
 0x3cf   :  { %1833 = vtanh.f32 %v1007_v13  ;;  %vm1002_vm6 = vcmp.eq.f32.partialorder %v1001_v28, 8.507059e+37  ;;  %vm1021_vm8 = vweird.f32 %v1015_v63 }
 0x3d1   :  { %v1828_v35 = vpop.eup %1827 }
 0x3d2   :  { %v971_v14 = vmul.f32 %v1828_v35, %v969_v18  ;;  %vm976_vm12 = vweird.f32 %v1828_v35 }
 0x3d3   :  { %v1830_v60 = vpop.eup %1829  ;;  %vm977_vm15 = vmor %vm975_vm13, %vm976_vm12 }
 0x3d4   :  { %v1832_v61 = vpop.eup %1831  ;;  %v972_v1 = vsub.f32 1.0, %v971_v14  ;;  %v993_v49 = vmul.f32 %v1830_v60, %v991_v11  ;;  %vm998_vm14 = vweird.f32 %v1830_v60  ;;  %v1025_v11 = vand.u32 2147483647, %v1015_v63 }
 0x3d5   :  { %v1017_v55 = vmul.f32 %v1832_v61, %v1015_v63  ;;  %vm999_vm5 = vmor %vm997_vm4, %vm998_vm14  ;;  %v1834_v53 = vpop.eup %1833  ;;  %vm1022_vm7 = vweird.f32 %v1832_v61 }
 0x3d6   :  { %v994_v20 = vsub.f32 1.0, %v993_v49  ;;  %v973_v0 = vmul.f32 %v1828_v35, %v972_v1  ;;  %v1004_v49 = vor.u32 1.1754944e-38, %v1003_v47  ;;  %vm1023_vm9 = vmor %vm1021_vm8, %vm1022_vm7  ;;  %vm1026_vm10 = vcmp.eq.f32.partialorder %v1025_v11, 8.507059e+37 }
 0x3d7   :  { %v1018_v36 = vsub.f32 1.0, %v1017_v55  ;;  %v1028_v55 = vor.u32 1.1754944e-38, %v1027_v2 }
 0x3d8   :  { %v974_v6 = vadd.f32 %v1828_v35, %v973_v0  ;;  %v995_v37 = vmul.f32 %v1830_v60, %v994_v20 }
 0x3d9   :  { %v1019_v18 = vmul.f32 %v1832_v61, %v1018_v36 }
 0x3da   :  { %v978_v22 = vsel %vm977_vm15, %v1828_v35, %v974_v6  ;;  %v996_v59 = vadd.f32 %v1830_v60, %v995_v37 }
 0x3db   :  { %v983_v14 = vsel %vm980_vm3, %v982_v40, %v978_v22  ;;  %v1020_v51 = vadd.f32 %v1832_v61, %v1019_v18 }
 0x3dc   :  { %v1000_v1 = vsel %vm999_vm5, %v1830_v60, %v996_v59  ;;  %v1032_v20 = vmul.f32 %v1834_v53, %v983_v14 }
 0x3dd   :  { %v1005_v13 = vsel %vm1002_vm6, %v1004_v49, %v1000_v1  ;;  %v1024_v35 = vsel %vm1023_vm9, %v1832_v61, %v1020_v51 }
 0x3de   :  { %v1031_v0 = vmul.f32 %v1005_v13, %v2489_v42  ;;  %v1029_v4 = vsel %vm1026_vm10, %v1028_v55, %v1024_v35 }
 0x3e0   :  { %v2581_v52 = vadd.f32 %v1032_v20, %v1031_v0 }
 0x3e2   :  { %1835 = vtanh.f32 %v2581_v52 }
 0x3e8   :  { %v1836_v60 = vpop.eup %1835 }
 0x3e9   :  { %v1035_v47 = vmul.f32 %v1836_v60, %v1029_v4 }
 0x3eb   :  { %v1036_v6 = vpack.c.bf16 %v1035_v47, %v1035_v47 }
 0x3ed   :  { %1045 = vmatmul.bf16.vlgmr.msra.gmra.mxu0 %v1036_v6  ;;  %1063 = vmatmul.bf16.vlgmr.msra.gmra.mxu1 %v1036_v6 }
 0x3ee   :  { %1076 = vmatmul.bf16.vlgmr.msra.gmra.mxu2 %v1036_v6  ;;  %1089 = vmatmul.bf16.vlgmr.msra.gmra.mxu3 %v1036_v6 }
 0x3ef   :  { %1234 = vmatpush.bf16.msra.mxu0 %v1942_v8  ;;  %1247 = vmatpush.bf16.msra.mxu1 %v1954_v12 }
 0x3f0   :  { %1343 = vmatpush.bf16.msra.mxu2 %v2497_v26  ;;  %1361 = vmatpush.bf16.msra.mxu3 %v1929_v3  ;;  %v2730_v3 = vld [vmem:[#allocation4_spill] sm:$0xff] }
 0x3f3   :  { %1235 = vmatpush.bf16.msra.mxu0 %v1981_v21  ;;  %1248 = vmatpush.bf16.msra.mxu1 %v1992_v25 }
 0x3f4   :  { %1344 = vmatpush.bf16.msra.mxu2 %v2506_v54  ;;  %1362 = vmatpush.bf16.msra.mxu3 %v1967_v16  ;;  %v2731_v16 = vld [vmem:[#allocation5_spill] sm:$0xff] }
 0x3f7   :  { %1236 = vmatpush.bf16.msra.mxu0 %v2019_v34  ;;  %1249 = vmatpush.bf16.msra.mxu1 %v2031_v38 }
 0x3f8   :  { %1345 = vmatpush.bf16.msra.mxu2 %v2515_v9  ;;  %1363 = vmatpush.bf16.msra.mxu3 %v2004_v29  ;;  %v2732_v29 = vld [vmem:[#allocation6_spill] sm:$0xff] }
 0x3fb   :  { %1237 = vmatpush.bf16.msra.mxu0 %v2055_v46  ;;  %1250 = vmatpush.bf16.msra.mxu1 %v2067_v50 }
 0x3fc   :  { %1346 = vmatpush.bf16.msra.mxu2 %v2524_v23  ;;  %1364 = vmatpush.bf16.msra.mxu3 %v2049_v44 }
 0x3fd   :  { %1102 = vmatmul.bf16.vlgmr.msrb.gmra.mxu0 %v1036_v6 }
 0x3ff   :  { %1238 = vmatpush.bf16.msra.mxu0 %v2091_v58  ;;  %1251 = vmatpush.bf16.msra.mxu1 %v2103_v62 }
 0x400   :  { %1347 = vmatpush.bf16.msra.mxu2 %v2533_v30  ;;  %1365 = vmatpush.bf16.msra.mxu3 %v2085_v56  ;;  %v2627_v56 = vld [vmem:[%s2698_s3] ss:$0 sm:$0xff] }
 0x403   :  { %1239 = vmatpush.bf16.msra.mxu0 %v2130_v10  ;;  %1252 = vmatpush.bf16.msra.mxu1 %v2142_v15 }
 0x404   :  { %1348 = vmatpush.bf16.msra.mxu2 %v2542_v19  ;;  %1366 = vmatpush.bf16.msra.mxu3 %v2121_v5 }
 0x407   :  { %1240 = vmatpush.bf16.msra.mxu0 %v2163_v27  ;;  %1253 = vmatpush.bf16.msra.mxu1 %v2175_v32 }
 0x408   :  { %1349 = vmatpush.bf16.msra.mxu2 %v2551_v39  ;;  %1367 = vmatpush.bf16.msra.mxu3 %v2157_v24  ;;  %v2636_v24 = vld [vmem:[%s2700_s0 + $0x14] sm:$0xff]  }
 0x409   :  { %v1054_v61 = vunpack.c.l.bf16 %v2636_v24 }
 0x40b   :  { %1241 = vmatpush.bf16.msra.mxu0 %v2199_v43  ;;  %1254 = vmatpush.bf16.msra.mxu1 %v2202_v48 }
 0x40c   :  { %1350 = vmatpush.bf16.msra.mxu2 %v2561_v31  ;;  %1368 = vmatpush.bf16.msra.mxu3 %v2193_v41 }
 0x40f   :  { %1374 = vmatpush.bf16.msrb.mxu0 %v1940_v7 }
 0x413   :  { %1375 = vmatpush.bf16.msrb.mxu0 %v1969_v17 }
 0x417   :  { %1376 = vmatpush.bf16.msrb.mxu0 %v2017_v33 }
 0x41b   :  { %1377 = vmatpush.bf16.msrb.mxu0 %v2053_v45 }
 0x41f   :  { %1378 = vmatpush.bf16.msrb.mxu0 %v2089_v57 }
 0x423   :  { %1379 = vmatpush.bf16.msrb.mxu0 %v2730_v3 }
 0x427   :  { %1380 = vmatpush.bf16.msrb.mxu0 %v2731_v16 }
 0x42b   :  { %1381 = vmatpush.bf16.msrb.mxu0 %v2732_v29 }
 0x46a   :  { %v1046_v44 = vpop.f32.mrf.mxu0  ;;  %v1064_v7 = vpop.f32.mrf.mxu1 }
 0x46b   :  { %v1047_v17 = vadd.f32 %v2627_v56, %v1046_v44 }
 0x46d   :  { %1699 = vst [vmem:[%s2701_s4 + $0x8] sm:$0x3] %v1047_v17 }
 0x471   :  { %v1077_v33 = vpop.f32.mrf.mxu2  ;;  %v1090_v45 = vpop.f32.mrf.mxu3 }
 0x472   :  { %v1048_v57 = vpop.f32.mrf.mxu0  ;;  %v1066_v5 = vpop.f32.mrf.mxu1  ;;  %v1111_v41 = vrot.slane %v1077_v33, 6  ;;  %v1112_v63 = vrot.slane %v1090_v45, 4 }
 0x474   :  { %v1114_v28 = vsel %vm296_vm0, %v1064_v7, %v1111_v41 }
 0x479   :  { %v1079_v51 = vpop.f32.mrf.mxu2  ;;  %v1092_v53 = vpop.f32.mrf.mxu3 }
 0x47a   :  { %v1103_v42 = vpop.f32.mrf.mxu0 }
 0x47b   :  { %v1113_v37 = vrot.slane %v1103_v42, 2 }
 0x47d   :  { %v1115_v40 = vsel %vm298_vm1, %v1112_v63, %v1113_v37 }
 0x47e   :  { %v1116_v36 = vsel %vm300_vm2, %v1114_v28, %v1115_v40 }
 0x47f   :  { %v1118_v22 = vadd.f32 %v1116_v36, %v1054_v61 }
 0x481   :  { %v1701_v59 = vmul.f32 -1.442695, %v1118_v22  ;;  %v1139_v14 = vrot.slane %v1118_v22, 2  ;;  %v1163_v49 = vrot.slane %v1118_v22, 6  ;;  %v1160_v6 = vrot.slane %v1118_v22, 4 }
 0x482   :  { %v1105_v1 = vpop.f32.mrf.mxu0 }
 0x483   :  { %1837 = vpow2.f32 %v1701_v59  ;;  %v1702_v13 = vmul.f32 -1.442695, %v1139_v14  ;;  %v1703_v18 = vmul.f32 -1.442695, %v1163_v49 }
 0x485   :  { %1839 = vpow2.f32 %v1702_v13 }
 0x486   :  { %1841 = vpow2.f32 %v1703_v18 }
 0x489   :  { %v1838_v0 = vpop.eup %1837 }
 0x48a   :  { %v1122_v20 = vadd.f32 1.0, %v1838_v0 }
 0x48b   :  { %v1840_v2 = vpop.eup %1839 }
 0x48c   :  { %v1842_v11 = vpop.eup %1841  ;;  %1843 = vrcp.f32 %v1122_v20  ;;  %v1144_v35 = vadd.f32 1.0, %v1840_v2  ;;  %v1134_v44 = vand.u32 2147483648, %v1122_v20  ;;  %v1132_v45 = vand.u32 2147483647, %v1122_v20 }
 0x48d   :  { %v1168_v55 = vadd.f32 1.0, %v1842_v11  ;;  %vm1128_vm12 = vweird.f32 %v1122_v20 }
 0x48e   :  { %1845 = vrcp.f32 %v1144_v35  ;;  %v1156_v57 = vand.u32 2147483648, %v1144_v35  ;;  %v1154_v51 = vand.u32 2147483647, %v1144_v35  ;;  %v1135_v53 = vor.u32 1.1754944e-38, %v1134_v44 }
 0x48f   :  { %1847 = vrcp.f32 %v1168_v55  ;;  %vm1133_vm15 = vcmp.eq.f32.partialorder %v1132_v45, 8.507059e+37  ;;  %vm1150_vm3 = vweird.f32 %v1144_v35  ;;  %v1180_v18 = vand.u32 2147483648, %v1168_v55 }
 0x490   :  { %1849 = vtanh.f32 %v1160_v6  ;;  %v1157_v28 = vor.u32 1.1754944e-38, %v1156_v57  ;;  %vm1155_vm5 = vcmp.eq.f32.partialorder %v1154_v51, 8.507059e+37  ;;  %vm1174_vm7 = vweird.f32 %v1168_v55 }
 0x491   :  { %v1178_v0 = vand.u32 2147483647, %v1168_v55  ;;  %v1181_v2 = vor.u32 1.1754944e-38, %v1180_v18 }
 0x492   :  { %v1844_v60 = vpop.eup %1843 }
 0x493   :  { %v1124_v4 = vmul.f32 %v1844_v60, %v1122_v20  ;;  %vm1129_vm11 = vweird.f32 %v1844_v60  ;;  %vm1179_vm9 = vcmp.eq.f32.partialorder %v1178_v0, 8.507059e+37 }
 0x494   :  { %v1846_v47 = vpop.eup %1845  ;;  %vm1130_vm14 = vmor %vm1128_vm12, %vm1129_vm11 }
 0x495   :  { %v1848_v3 = vpop.eup %1847  ;;  %v1125_v16 = vsub.f32 1.0, %v1124_v4  ;;  %v1146_v29 = vmul.f32 %v1846_v47, %v1144_v35  ;;  %vm1151_vm13 = vweird.f32 %v1846_v47 }
 0x496   :  { %v1170_v7 = vmul.f32 %v1848_v3, %v1168_v55  ;;  %vm1152_vm4 = vmor %vm1150_vm3, %vm1151_vm13  ;;  %v1850_v36 = vpop.eup %1849  ;;  %vm1175_vm6 = vweird.f32 %v1848_v3 }
 0x497   :  { %v1147_v17 = vsub.f32 1.0, %v1146_v29  ;;  %v1126_v33 = vmul.f32 %v1844_v60, %v1125_v16  ;;  %vm1176_vm8 = vmor %vm1174_vm7, %vm1175_vm6 }
 0x498   :  { %v1171_v42 = vsub.f32 1.0, %v1170_v7 }
 0x499   :  { %v1127_v5 = vadd.f32 %v1844_v60, %v1126_v33  ;;  %v1148_v41 = vmul.f32 %v1846_v47, %v1147_v17 }
 0x49a   :  { %v1172_v59 = vmul.f32 %v1848_v3, %v1171_v42 }
 0x49b   :  { %v1131_v63 = vsel %vm1130_vm14, %v1844_v60, %v1127_v5  ;;  %v1149_v61 = vadd.f32 %v1846_v47, %v1148_v41 }
 0x49c   :  { %v1136_v37 = vsel %vm1133_vm15, %v1135_v53, %v1131_v63  ;;  %v1173_v13 = vadd.f32 %v1848_v3, %v1172_v59 }
 0x49d   :  { %v1153_v40 = vsel %vm1152_vm4, %v1846_v47, %v1149_v61  ;;  %v1185_v49 = vmul.f32 %v1850_v36, %v1136_v37 }
 0x49e   :  { %v1158_v22 = vsel %vm1155_vm5, %v1157_v28, %v1153_v40  ;;  %v1177_v20 = vsel %vm1176_vm8, %v1848_v3, %v1173_v13 }
 0x49f   :  { %v1184_v14 = vmul.f32 %v1158_v22, %v2581_v52  ;;  %v1182_v35 = vsel %vm1179_vm9, %v1181_v2, %v1177_v20 }
 0x4a1   :  { %v2643_v1 = vadd.f32 %v1185_v49, %v1184_v14 }
 0x4a3   :  { %1851 = vtanh.f32 %v2643_v1 }
 0x4a9   :  { %v1852_v11 = vpop.eup %1851 }
 0x4aa   :  { %v1188_v60 = vmul.f32 %v1852_v11, %v1182_v35 }
 0x4ac   :  { %v1189_v4 = vpack.c.bf16 %v1188_v60, %v1188_v60 }
 0x4ae   :  { %1198 = vmatmul.bf16.vlgmr.msrb.gmra.mxu1 %v1189_v4  ;;  %1216 = vmatmul.bf16.vlgmr.msrb.gmra.mxu2 %v1189_v4 }
 0x4af   :  { %1229 = vmatmul.bf16.vlgmr.msrb.gmra.mxu3 %v1189_v4  ;;  %1242 = vmatmul.bf16.vlgmr.msra.gmra.mxu0 %v1189_v4 }
 0x4b0   :  { %1387 = vmatpush.bf16.msrb.mxu1 %v1942_v8  ;;  %1400 = vmatpush.bf16.msrb.mxu2 %v1954_v12 }
 0x4b1   :  { %1496 = vmatpush.bf16.msrb.mxu3 %v2497_v26 }
 0x4b4   :  { %1388 = vmatpush.bf16.msrb.mxu1 %v1981_v21  ;;  %1401 = vmatpush.bf16.msrb.mxu2 %v1992_v25 }
 0x4b5   :  { %1497 = vmatpush.bf16.msrb.mxu3 %v2506_v54 }
 0x4b8   :  { %1389 = vmatpush.bf16.msrb.mxu1 %v2019_v34  ;;  %1402 = vmatpush.bf16.msrb.mxu2 %v2031_v38 }
 0x4b9   :  { %1498 = vmatpush.bf16.msrb.mxu3 %v2515_v9 }
 0x4bc   :  { %1390 = vmatpush.bf16.msrb.mxu1 %v2055_v46  ;;  %1403 = vmatpush.bf16.msrb.mxu2 %v2067_v50 }
 0x4bd   :  { %1499 = vmatpush.bf16.msrb.mxu3 %v2524_v23 }
 0x4be   :  { %1255 = vmatmul.bf16.vlgmr.msra.gmra.mxu1 %v1189_v4 }
 0x4c0   :  { %1391 = vmatpush.bf16.msrb.mxu1 %v2091_v58  ;;  %1404 = vmatpush.bf16.msrb.mxu2 %v2103_v62 }
 0x4c1   :  { %1500 = vmatpush.bf16.msrb.mxu3 %v2533_v30 }
 0x4c4   :  { %1392 = vmatpush.bf16.msrb.mxu1 %v2130_v10  ;;  %1405 = vmatpush.bf16.msrb.mxu2 %v2142_v15 }
 0x4c5   :  { %1501 = vmatpush.bf16.msrb.mxu3 %v2542_v19 }
 0x4c8   :  { %1393 = vmatpush.bf16.msrb.mxu1 %v2163_v27  ;;  %1406 = vmatpush.bf16.msrb.mxu2 %v2175_v32  ;;  %v1207_v27 = vunpack.c.h.bf16 %v2636_v24 }
 0x4c9   :  { %1502 = vmatpush.bf16.msrb.mxu3 %v2551_v39 }
 0x4cc   :  { %1394 = vmatpush.bf16.msrb.mxu1 %v2199_v43  ;;  %1407 = vmatpush.bf16.msrb.mxu2 %v2202_v48 }
 0x4cd   :  { %1503 = vmatpush.bf16.msrb.mxu3 %v2561_v31 }
 0x52b   :  { %v1199_v8 = vpop.f32.mrf.mxu1 }
 0x52c   :  { %v1200_v12 = vadd.f32 %v2627_v56, %v1199_v8  ;;  %v1243_v21 = vpop.f32.mrf.mxu0 }
 0x52d   :  { %v1265_v15 = vrot.slane %v1243_v21, 4 }
 0x52e   :  { %1704 = vst [vmem:[%s2701_s4 + $0xa] sm:$0x3] %v1200_v12 }
 0x531   :  { %v1217_v25 = vpop.f32.mrf.mxu2 }
 0x532   :  { %v1230_v34 = vpop.f32.mrf.mxu3 }
 0x533   :  { %v1201_v38 = vpop.f32.mrf.mxu1  ;;  %v1264_v58 = vrot.slane %v1230_v34, 6 }
 0x534   :  { %v1245_v46 = vpop.f32.mrf.mxu0 }
 0x535   :  { %v1267_v43 = vsel %vm296_vm0, %v1217_v25, %v1264_v58 }
 0x539   :  { %v1219_v50 = vpop.f32.mrf.mxu2 }
 0x53a   :  { %v1232_v62 = vpop.f32.mrf.mxu3 }
 0x53b   :  { %v1256_v10 = vpop.f32.mrf.mxu1 }
 0x53c   :  { %v1266_v32 = vrot.slane %v1256_v10, 2 }
 0x53e   :  { %v1268_v48 = vsel %vm298_vm1, %v1265_v15, %v1266_v32 }
 0x53f   :  { %v1269_v52 = vsel %vm300_vm2, %v1267_v43, %v1268_v48  ;;  %v1710_v43 = vld [vmem:[%s2700_s0 + $0x1c] sm:$0xf] }
 0x540   :  { %v1271_v26 = vadd.f32 %v1269_v52, %v1207_v27 }
 0x542   :  { %v1706_v54 = vmul.f32 -1.442695, %v1271_v26  ;;  %v1292_v9 = vrot.slane %v1271_v26, 2  ;;  %v1316_v23 = vrot.slane %v1271_v26, 6  ;;  %v1313_v7 = vrot.slane %v1271_v26, 4 }
 0x543   :  { %v1258_v30 = vpop.f32.mrf.mxu1 }
 0x544   :  { %1853 = vpow2.f32 %v1706_v54  ;;  %v1707_v19 = vmul.f32 -1.442695, %v1292_v9  ;;  %v1708_v39 = vmul.f32 -1.442695, %v1316_v23  ;;  %v1360_v54 = vunpack.c.l.bf16 %v1710_v43 }
 0x546   :  { %1855 = vpow2.f32 %v1707_v19 }
 0x547   :  { %1857 = vpow2.f32 %v1708_v39 }
 0x54a   :  { %v1854_v31 = vpop.eup %1853 }
 0x54b   :  { %v1275_v55 = vadd.f32 1.0, %v1854_v31 }
 0x54c   :  { %v1856_v24 = vpop.eup %1855 }
 0x54d   :  { %v1858_v47 = vpop.eup %1857  ;;  %1859 = vrcp.f32 %v1275_v55  ;;  %v1297_v6 = vadd.f32 1.0, %v1856_v24  ;;  %v1287_v57 = vand.u32 2147483648, %v1275_v55  ;;  %v1285_v53 = vand.u32 2147483647, %v1275_v55 }
 0x54e   :  { %v1321_v3 = vadd.f32 1.0, %v1858_v47  ;;  %vm1281_vm11 = vweird.f32 %v1275_v55 }
 0x54f   :  { %1861 = vrcp.f32 %v1297_v6  ;;  %v1309_v42 = vand.u32 2147483648, %v1297_v6  ;;  %v1307_v37 = vand.u32 2147483647, %v1297_v6  ;;  %v1288_v28 = vor.u32 1.1754944e-38, %v1287_v57 }
 0x550   :  { %1863 = vrcp.f32 %v1321_v3  ;;  %vm1286_vm14 = vcmp.eq.f32.partialorder %v1285_v53, 8.507059e+37  ;;  %vm1303_vm15 = vweird.f32 %v1297_v6  ;;  %v1333_v60 = vand.u32 2147483648, %v1321_v3 }
 0x551   :  { %1865 = vtanh.f32 %v1313_v7  ;;  %v1310_v14 = vor.u32 1.1754944e-38, %v1309_v42  ;;  %vm1308_vm4 = vcmp.eq.f32.partialorder %v1307_v37, 8.507059e+37  ;;  %vm1327_vm6 = vweird.f32 %v1321_v3 }
 0x552   :  { %v1331_v4 = vand.u32 2147483647, %v1321_v3  ;;  %v1334_v12 = vor.u32 1.1754944e-38, %v1333_v60 }
 0x553   :  { %v1860_v16 = vpop.eup %1859 }
 0x554   :  { %v1277_v29 = vmul.f32 %v1860_v16, %v1275_v55  ;;  %vm1282_vm10 = vweird.f32 %v1860_v16  ;;  %vm1332_vm8 = vcmp.eq.f32.partialorder %v1331_v4, 8.507059e+37 }
 0x555   :  { %v1862_v44 = vpop.eup %1861  ;;  %vm1283_vm13 = vmor %vm1281_vm11, %vm1282_vm10 }
 0x556   :  { %v1864_v17 = vpop.eup %1863  ;;  %v1278_v33 = vsub.f32 1.0, %v1277_v29  ;;  %v1299_v45 = vmul.f32 %v1862_v44, %v1297_v6  ;;  %vm1304_vm12 = vweird.f32 %v1862_v44 }
 0x557   :  { %v1323_v5 = vmul.f32 %v1864_v17, %v1321_v3  ;;  %vm1305_vm3 = vmor %vm1303_vm15, %vm1304_vm12  ;;  %v1866_v13 = vpop.eup %1865  ;;  %vm1328_vm5 = vweird.f32 %v1864_v17 }
 0x558   :  { %v1300_v41 = vsub.f32 1.0, %v1299_v45  ;;  %v1279_v51 = vmul.f32 %v1860_v16, %v1278_v33  ;;  %vm1329_vm7 = vmor %vm1327_vm6, %vm1328_vm5 }
 0x559   :  { %v1324_v40 = vsub.f32 1.0, %v1323_v5 }
 0x55a   :  { %v1280_v63 = vadd.f32 %v1860_v16, %v1279_v51  ;;  %v1301_v61 = vmul.f32 %v1862_v44, %v1300_v41 }
 0x55b   :  { %v1325_v0 = vmul.f32 %v1864_v17, %v1324_v40 }
 0x55c   :  { %v1284_v36 = vsel %vm1283_vm13, %v1860_v16, %v1280_v63  ;;  %v1302_v22 = vadd.f32 %v1862_v44, %v1301_v61 }
 0x55d   :  { %v1289_v59 = vsel %vm1286_vm14, %v1288_v28, %v1284_v36  ;;  %v1326_v35 = vadd.f32 %v1864_v17, %v1325_v0 }
 0x55e   :  { %v1306_v49 = vsel %vm1305_vm3, %v1862_v44, %v1302_v22  ;;  %v1338_v2 = vmul.f32 %v1866_v13, %v1289_v59 }
 0x55f   :  { %v1311_v18 = vsel %vm1308_vm4, %v1310_v14, %v1306_v49  ;;  %v1330_v8 = vsel %vm1329_vm7, %v1864_v17, %v1326_v35 }
 0x560   :  { %v1337_v20 = vmul.f32 %v1311_v18, %v2643_v1  ;;  %v1335_v25 = vsel %vm1332_vm8, %v1334_v12, %v1330_v8 }
 0x562   :  { %v2679_v11 = vadd.f32 %v1338_v2, %v1337_v20 }
 0x564   :  { %1867 = vtanh.f32 %v2679_v11 }
 0x56a   :  { %v1868_v21 = vpop.eup %1867 }
 0x56b   :  { %v1341_v34 = vmul.f32 %v1868_v21, %v1335_v25 }
 0x56d   :  { %v1342_v38 = vpack.c.bf16 %v1341_v34, %v1341_v34 }
 0x56f   :  { %1351 = vmatmul.bf16.vlgmr.msra.gmra.mxu2 %v1342_v38  ;;  %1369 = vmatmul.bf16.vlgmr.msra.gmra.mxu3 %v1342_v38 }
 0x570   :  { %1382 = vmatmul.bf16.vlgmr.msrb.gmra.mxu0 %v1342_v38  ;;  %1395 = vmatmul.bf16.vlgmr.msrb.gmra.mxu1 %v1342_v38 }
 0x57f   :  { %1408 = vmatmul.bf16.vlgmr.msrb.gmra.mxu2 %v1342_v38 }
 0x5ed   :  { %v1383_v1 = vpop.f32.mrf.mxu0  ;;  %v1396_v46 = vpop.f32.mrf.mxu1 }
 0x5ee   :  { %v1417_v52 = vrot.slane %v1383_v1, 6  ;;  %v1418_v26 = vrot.slane %v1396_v46, 4 }
 0x5f2   :  { %v1352_v50 = vpop.f32.mrf.mxu2  ;;  %v1370_v58 = vpop.f32.mrf.mxu3 }
 0x5f3   :  { %v1353_v62 = vadd.f32 %v2627_v56, %v1352_v50  ;;  %v1420_v23 = vsel %vm296_vm0, %v1370_v58, %v1417_v52 }
 0x5f5   :  { %1709 = vst [vmem:[%s2701_s4 + $0xc] sm:$0x3] %v1353_v62  ;;  %v1385_v10 = vpop.f32.mrf.mxu0  ;;  %v1398_v15 = vpop.f32.mrf.mxu1 }
 0x5fa   :  { %v1354_v27 = vpop.f32.mrf.mxu2  ;;  %v1372_v32 = vpop.f32.mrf.mxu3 }
 0x602   :  { %v1409_v48 = vpop.f32.mrf.mxu2 }
 0x603   :  { %v1419_v9 = vrot.slane %v1409_v48, 2 }
 0x605   :  { %v1421_v30 = vsel %vm298_vm1, %v1418_v26, %v1419_v9 }
 0x606   :  { %v1422_v19 = vsel %vm300_vm2, %v1420_v23, %v1421_v30 }
 0x607   :  { %v1424_v39 = vadd.f32 %v1422_v19, %v1360_v54 }
 0x609   :  { %v1711_v31 = vmul.f32 -1.442695, %v1424_v39  ;;  %v1445_v55 = vrot.slane %v1424_v39, 2  ;;  %v1469_v24 = vrot.slane %v1424_v39, 6  ;;  %v1466_v41 = vrot.slane %v1424_v39, 4 }
 0x60a   :  { %v1411_v47 = vpop.f32.mrf.mxu2 }
 0x60b   :  { %1869 = vpow2.f32 %v1711_v31  ;;  %v1712_v6 = vmul.f32 -1.442695, %v1445_v55  ;;  %v1713_v3 = vmul.f32 -1.442695, %v1469_v24 }
 0x60d   :  { %1871 = vpow2.f32 %v1712_v6 }
 0x60e   :  { %1873 = vpow2.f32 %v1713_v3 }
 0x611   :  { %v1870_v16 = vpop.eup %1869 }
 0x612   :  { %v1428_v29 = vadd.f32 1.0, %v1870_v16 }
 0x613   :  { %v1872_v44 = vpop.eup %1871 }
 0x614   :  { %v1874_v7 = vpop.eup %1873  ;;  %1875 = vrcp.f32 %v1428_v29  ;;  %v1450_v17 = vadd.f32 1.0, %v1872_v44  ;;  %v1440_v63 = vand.u32 2147483648, %v1428_v29  ;;  %v1438_v40 = vand.u32 2147483647, %v1428_v29 }
 0x615   :  { %v1474_v33 = vadd.f32 1.0, %v1874_v7  ;;  %vm1434_vm1 = vweird.f32 %v1428_v29 }
 0x616   :  { %1877 = vrcp.f32 %v1450_v17  ;;  %v1462_v36 = vand.u32 2147483648, %v1450_v17  ;;  %v1460_v14 = vand.u32 2147483647, %v1450_v17  ;;  %v1441_v49 = vor.u32 1.1754944e-38, %v1440_v63 }
 0x617   :  { %1879 = vrcp.f32 %v1474_v33  ;;  %vm1439_vm10 = vcmp.eq.f32.partialorder %v1438_v40, 8.507059e+37  ;;  %vm1456_vm11 = vweird.f32 %v1450_v17  ;;  %v1486_v38 = vand.u32 2147483648, %v1474_v33 }
 0x618   :  { %1881 = vtanh.f32 %v1466_v41  ;;  %v1463_v2 = vor.u32 1.1754944e-38, %v1462_v36  ;;  %vm1461_vm13 = vcmp.eq.f32.partialorder %v1460_v14, 8.507059e+37  ;;  %vm1480_vm15 = vweird.f32 %v1474_v33 }
 0x619   :  { %v1484_v1 = vand.u32 2147483647, %v1474_v33  ;;  %v1487_v50 = vor.u32 1.1754944e-38, %v1486_v38 }
 0x61a   :  { %v1876_v45 = vpop.eup %1875 }
 0x61b   :  { %v1430_v57 = vmul.f32 %v1876_v45, %v1428_v29  ;;  %vm1435_vm0 = vweird.f32 %v1876_v45  ;;  %vm1485_vm4 = vcmp.eq.f32.partialorder %v1484_v1, 8.507059e+37 }
 0x61c   :  { %v1878_v5 = vpop.eup %1877  ;;  %vm1436_vm9 = vmor %vm1434_vm1, %vm1435_vm0 }
 0x61d   :  { %v1880_v51 = vpop.eup %1879  ;;  %v1431_v53 = vsub.f32 1.0, %v1430_v57  ;;  %v1452_v42 = vmul.f32 %v1878_v5, %v1450_v17  ;;  %vm1457_vm2 = vweird.f32 %v1878_v5 }
 0x61e   :  { %v1476_v61 = vmul.f32 %v1880_v51, %v1474_v33  ;;  %vm1458_vm12 = vmor %vm1456_vm11, %vm1457_vm2  ;;  %v1882_v60 = vpop.eup %1881  ;;  %vm1481_vm14 = vweird.f32 %v1880_v51 }
 0x61f   :  { %v1453_v37 = vsub.f32 1.0, %v1452_v42  ;;  %v1432_v28 = vmul.f32 %v1876_v45, %v1431_v53  ;;  %vm1482_vm3 = vmor %vm1480_vm15, %vm1481_vm14 }
 0x620   :  { %v1477_v13 = vsub.f32 1.0, %v1476_v61 }
 0x621   :  { %v1433_v22 = vadd.f32 %v1876_v45, %v1432_v28  ;;  %v1454_v59 = vmul.f32 %v1878_v5, %v1453_v37 }
 0x622   :  { %v1478_v8 = vmul.f32 %v1880_v51, %v1477_v13 }
 0x623   :  { %v1437_v18 = vsel %vm1436_vm9, %v1876_v45, %v1433_v22  ;;  %v1455_v0 = vadd.f32 %v1878_v5, %v1454_v59 }
 0x624   :  { %v1442_v20 = vsel %vm1439_vm10, %v1441_v49, %v1437_v18  ;;  %v1479_v34 = vadd.f32 %v1880_v51, %v1478_v8 }
 0x625   :  { %v1459_v35 = vsel %vm1458_vm12, %v1878_v5, %v1455_v0  ;;  %v1491_v21 = vmul.f32 %v1882_v60, %v1442_v20 }
 0x626   :  { %v1464_v4 = vsel %vm1461_vm13, %v1463_v2, %v1459_v35  ;;  %v1483_v46 = vsel %vm1482_vm3, %v1880_v51, %v1479_v34 }
 0x627   :  { %v1490_v12 = vmul.f32 %v1464_v4, %v2679_v11  ;;  %v1488_v62 = vsel %vm1485_vm4, %v1487_v50, %v1483_v46 }
 0x629   :  { %v1492_v25 = vadd.f32 %v1491_v21, %v1490_v12 }
 0x62b   :  { %1883 = vtanh.f32 %v1492_v25  ;;  %1512 = vst [vmem:[#allocation3] sm:$0x3] %v1492_v25 }
 0x631   :  { %v1884_v58 = vpop.eup %1883 }
 0x632   :  { %v1494_v10 = vmul.f32 %v1884_v58, %v1488_v62 }
 0x634   :  { %v1495_v15 = vpack.c.bf16 %v1494_v10, %v1494_v10  ;;  %1511 = vst [vmem:[#allocation2] sm:$0x3] %v1494_v10 }
 0x636   :  { %1504 = vmatmul.bf16.vlgmr.msrb.gmra.mxu3 %v1495_v15 }
 0x6b9   :  { %v1505_v11 = vpop.f32.mrf.mxu3 }
 0x6ba   :  { %v1506_v27 = vadd.f32 %v2627_v56, %v1505_v11 }
 0x6bc   :  { %1714 = vst [vmem:[%s2701_s4 + $0xe] sm:$0x3] %v1506_v27 }
 0x6c1   :  { %v1507_v32 = vpop.f32.mrf.mxu3 }

</bundles_post_ra>
